<compile_context>
chip_gen: v7x
topology: tpu7x:2x2x1
jax: 0.10.0
libtpu: 0.0.40
codegen_flags: <defaults>
</compile_context>

<pallas_src>
import functools

import jax
import jax.numpy as jnp
from jax.experimental import pallas as pl
from jax.experimental.pallas import tpu as pltpu


# ------------------------------ fused kernel --------------------------------

def _rdn_kernel(*refs, N, H, W, channel, growth, conv_number, rdb_count):
    x_ref = refs[0]
    o_ref = refs[-2]
    pad_ref = refs[-1]                       # (N, H+2, W+2, channel) f32 scratch
    HW = H * W
    M = N * HW
    f32 = jnp.float32
    bf16 = jnp.bfloat16

    # ---- unpack weight/bias refs (same order the host wrapper emits them) --
    idx = 1

    def take(n):
        nonlocal idx
        chunk = refs[idx:idx + n]
        idx += n
        return chunk

    rdb_params = []
    for _ in range(rdb_count):
        convs = []
        for j in range(conv_number):
            wparts = take(j + 1)              # part-major (9*Cp, growth) blocks
            (b,) = take(1)
            convs.append((wparts, b))
        w1parts = take(conv_number + 1)       # (Cp, channel) blocks for the 1x1
        (b1,) = take(1)
        rdb_params.append((convs, w1parts, b1))
    g1parts = take(rdb_count)                 # (channel, channel) GFF1 blocks
    (bg1,) = take(1)
    wg2, bg2 = take(2)                        # GFF2: (9*channel, channel), bias

    # ---- persistent zero-bordered padding scratch (border stays zero) ------
    pad_ref[...] = jnp.zeros((N, H + 2, W + 2, channel), f32)

    def im2col(feat_flat, Cp):
        """Write feat (M, Cp) into the scratch interior, return its 9-tap
        im2col slab (M, 9*Cp) in bf16 with columns ordered (ky, kx, c)."""
        pad_ref[:, 1:H + 1, 1:W + 1, :Cp] = feat_flat.reshape(N, H, W, Cp)
        taps = []
        for ky in range(3):
            for kx in range(3):
                taps.append(pad_ref[:, ky:ky + H, kx:kx + W, :Cp]
                            .reshape(M, Cp).astype(bf16))
        return jnp.concatenate(taps, axis=-1)

    # ---- network ------------------------------------------------------------
    x_flat = x_ref[...].reshape(M, channel)                        # f32 (M, 60)
    f1 = jnp.broadcast_to(bg1[...], (M, channel)).astype(f32)      # GFF1 acc

    for r in range(rdb_count):
        convs, w1parts, b1 = rdb_params[r]
        inp_flat = x_flat
        slabs = [im2col(inp_flat, channel)]          # cached per-part slabs (bf16)
        parts_flat = [inp_flat.astype(bf16)]         # per-part flats for the 1x1
        for j in range(conv_number):                 # DenoiseBasicBlock: conv->relu->cat
            wparts, b = convs[j]
            acc = jnp.broadcast_to(b[...], (M, growth)).astype(f32)
            for slab, w in zip(slabs, wparts):
                acc = acc + jnp.dot(slab, w[...], preferred_element_type=f32)
            out = jnp.maximum(acc, 0.0)
            parts_flat.append(out.astype(bf16))
            if j + 1 < conv_number:                  # last block feeds only the 1x1
                slabs.append(im2col(out, growth))
        acc = jnp.broadcast_to(b1[...], (M, channel)).astype(f32)
        for pf, w in zip(parts_flat, w1parts):       # weight-split 1x1 (no concat)
            acc = acc + jnp.dot(pf, w[...], preferred_element_type=f32)
        x_flat = acc + inp_flat                      # local 1x1 + skip
        # incremental GFF1: f_1x1 = sum_r rdb_out_r @ Wg1[r*C:(r+1)*C] + bg1
        f1 = f1 + jnp.dot(x_flat.astype(bf16), g1parts[r][...],
                          preferred_element_type=f32)

    slab = im2col(f1, channel)                       # GFF2 (3x3, no relu)
    fgf = jnp.broadcast_to(bg2[...], (M, channel)).astype(f32)
    fgf = fgf + jnp.dot(slab, wg2[...], preferred_element_type=f32)
    # NOTE: DenoiseRDN_Custom.forward returns GFF2's output directly
    # (no global residual), matching the PyTorch reference.
    o_ref[...] = fgf.reshape(N, HW, channel).astype(o_ref.dtype)


# ------------------------------ host wrapper ---------------------------------

def denoise_rdn_pallas(x, params, *, channel, growth, conv_number, rdb_count):
    N, H, W, C = x.shape
    assert C == channel
    bf16 = jnp.bfloat16

    flat_args = [x]
    in_specs = [pl.BlockSpec((N, H, W, C), lambda i: (0, 0, 0, 0))]

    def add(arr):                               # grid-invariant 2-D block
        flat_args.append(arr)
        in_specs.append(pl.BlockSpec(arr.shape, lambda i: (0, 0)))

    def add_conv3x3(w, part_sizes):
        # part-major: per concat-part, a (9*Cp, Cout) row block in (ky,kx,c) order
        cout = w.shape[-1]
        off = 0
        for cp in part_sizes:
            add(w[:, :, off:off + cp, :].reshape(9 * cp, cout).astype(bf16))
            off += cp

    def add_conv1x1(w, part_sizes):
        w2 = w.reshape(w.shape[2], w.shape[3]).astype(bf16)
        off = 0
        for cp in part_sizes:
            add(w2[off:off + cp, :])
            off += cp

    def add_bias(b):
        add(b.reshape(1, b.shape[0]).astype(jnp.float32))

    for rdb in params["rdbs"]:
        for j, (w, b) in enumerate(rdb["blocks"]):
            add_conv3x3(w, [channel] + [growth] * j)
            add_bias(b)
        add_conv1x1(rdb["w1x1"], [channel] + [growth] * conv_number)
        add_bias(rdb["b1x1"])
    wg1, bg1 = params["gff1"]
    add_conv1x1(wg1, [channel] * rdb_count)
    add_bias(bg1)
    wg2, bg2 = params["gff2"]
    add_conv3x3(wg2, [channel])
    add_bias(bg2)

    kernel = functools.partial(_rdn_kernel, N=N, H=H, W=W, channel=channel,
                               growth=growth, conv_number=conv_number,
                               rdb_count=rdb_count)
    out = pl.pallas_call(
        kernel,
        grid_spec=pltpu.PrefetchScalarGridSpec(
            num_scalar_prefetch=0,
            grid=(1,),                        # batch is folded into matmul M
            in_specs=in_specs,
            out_specs=pl.BlockSpec((N, H * W, channel), lambda i: (0, 0, 0)),
            scratch_shapes=[pltpu.VMEM((N, H + 2, W + 2, channel), jnp.float32)]),
        out_shape=jax.ShapeDtypeStruct((N, H * W, channel), jnp.float32),
        compiler_params=pltpu.CompilerParams(
            dimension_semantics=("arbitrary",)),
    )(*flat_args)
    return out.reshape(N, H, W, channel)


# ----------------------- parameters (deterministic) -------------------------

def _init_conv(key, kh, kw, cin, cout):
    kw_key, kb_key = jax.random.split(key)
    fan_in = cin * kh * kw
    bound = 1.0 / (fan_in ** 0.5)        # matches PyTorch default init bounds
    w = jax.random.uniform(kw_key, (kh, kw, cin, cout), jnp.float32, -bound, bound)
    b = jax.random.uniform(kb_key, (cout,), jnp.float32, -bound, bound)
    return w, b


def init_params(key, channel, growth_rate, conv_number, rdb_count):
    params = {"rdbs": []}
    for _ in range(rdb_count):
        blocks = []
        for j in range(conv_number):
            key, sub = jax.random.split(key)
            blocks.append(_init_conv(sub, 3, 3, channel + j * growth_rate,
                                     growth_rate))
        key, sub = jax.random.split(key)
        w1, b1 = _init_conv(sub, 1, 1, channel + conv_number * growth_rate,
                            channel)
        params["rdbs"].append({"blocks": blocks, "w1x1": w1, "b1x1": b1})
    key, s1 = jax.random.split(key)
    params["gff1"] = _init_conv(s1, 1, 1, channel * rdb_count, channel)
    key, s2 = jax.random.split(key)
    params["gff2"] = _init_conv(s2, 3, 3, channel, channel)
    return params


# ------------------------------ pure-JAX ref ---------------------------------

def conv2d_ref(x, w, b, *, relu=False):
    out = jax.lax.conv_general_dilated(
        x, w, window_strides=(1, 1), padding="SAME",
        dimension_numbers=("NHWC", "HWIO", "NHWC"))
    out = out + b
    if relu:
        out = jnp.maximum(out, 0.0)
    return out


def denoise_rdn_ref(x, params):
    rdb_outs = []
    for rdb in params["rdbs"]:
        inp = x
        cur = x
        for (w, b) in rdb["blocks"]:        # DenoiseBasicBlock: conv -> relu -> cat
            out = conv2d_ref(cur, w, b, relu=True)
            cur = jnp.concatenate([cur, out], axis=-1)
        x = conv2d_ref(cur, rdb["w1x1"], rdb["b1x1"]) + inp     # 1x1 + skip
        rdb_outs.append(x)
    f_D = jnp.concatenate(rdb_outs, axis=-1)
    f_1x1 = conv2d_ref(f_D, *params["gff1"])
    return conv2d_ref(f_1x1, *params["gff2"])       # no global residual (per spec)


if __name__ == "__main__":
    # channel is fixed to 60 by the module (DenoiseRDB is built with input_dim=60).
    channel, growth_rate, conv_number, rdb_count = 60, 8, 2, 2
    N, H, W = 2, 8, 8

    key = jax.random.PRNGKey(0)
    key, kx = jax.random.split(key)
    x = jax.random.normal(kx, (N, H, W, channel), jnp.float32)
    params = init_params(key, channel, growth_rate, conv_number, rdb_count)

    fwd = jax.jit(functools.partial(denoise_rdn_pallas, channel=channel,
                                    growth=growth_rate, conv_number=conv_number,
                                    rdb_count=rdb_count))
    out = jax.block_until_ready(fwd(x, params))

    ref = denoise_rdn_ref(x, params)
    assert out.shape == (N, H, W, channel)
    # Tolerance sized for bf16 MXU inputs with f32 accumulation: expected error
    # is O(1e-2); a tap-ordering / weight-layout bug would be O(1).
    assert bool(jnp.allclose(out, ref, rtol=5e-2, atol=1e-1))
    print("KERNEL_OK")
</pallas_src>

<mosaic_0001>
module attributes {stable_mosaic.version = 11 : i64} {
  func.func @_rdn_kernel(%arg0: i32, %arg1: memref<2x8x8x60xf32, #tpu.memory_space<vmem>>, %arg2: memref<540x8xbf16, #tpu.memory_space<vmem>>, %arg3: memref<1x8xf32, #tpu.memory_space<vmem>>, %arg4: memref<540x8xbf16, #tpu.memory_space<vmem>>, %arg5: memref<72x8xbf16, #tpu.memory_space<vmem>>, %arg6: memref<1x8xf32, #tpu.memory_space<vmem>>, %arg7: memref<60x60xbf16, #tpu.memory_space<vmem>>, %arg8: memref<8x60xbf16, #tpu.memory_space<vmem>>, %arg9: memref<8x60xbf16, #tpu.memory_space<vmem>>, %arg10: memref<1x60xf32, #tpu.memory_space<vmem>>, %arg11: memref<540x8xbf16, #tpu.memory_space<vmem>>, %arg12: memref<1x8xf32, #tpu.memory_space<vmem>>, %arg13: memref<540x8xbf16, #tpu.memory_space<vmem>>, %arg14: memref<72x8xbf16, #tpu.memory_space<vmem>>, %arg15: memref<1x8xf32, #tpu.memory_space<vmem>>, %arg16: memref<60x60xbf16, #tpu.memory_space<vmem>>, %arg17: memref<8x60xbf16, #tpu.memory_space<vmem>>, %arg18: memref<8x60xbf16, #tpu.memory_space<vmem>>, %arg19: memref<1x60xf32, #tpu.memory_space<vmem>>, %arg20: memref<60x60xbf16, #tpu.memory_space<vmem>>, %arg21: memref<60x60xbf16, #tpu.memory_space<vmem>>, %arg22: memref<1x60xf32, #tpu.memory_space<vmem>>, %arg23: memref<540x60xbf16, #tpu.memory_space<vmem>>, %arg24: memref<1x60xf32, #tpu.memory_space<vmem>>, %arg25: memref<2x64x60xf32, #tpu.memory_space<vmem>>, %arg26: memref<2x10x10x60xf32, #tpu.memory_space<vmem>>) attributes {dimension_semantics = [#tpu.dimension_semantics<arbitrary>], iteration_bounds = array<i64: 1>, scalar_prefetch = 0 : i64, scratch_operands = 1 : i64, tpu.core_type = #tpu.core_type<tc>, window_params = [{pipeline_mode = #tpu.pipeline_mode<synchronous>, transform_indices = @transform_0, window_bounds = array<i64: 2, 8, 8, 60>}, {pipeline_mode = #tpu.pipeline_mode<synchronous>, transform_indices = @transform_1, window_bounds = array<i64: 540, 8>}, {pipeline_mode = #tpu.pipeline_mode<synchronous>, transform_indices = @transform_2, window_bounds = array<i64: 1, 8>}, {pipeline_mode = #tpu.pipeline_mode<synchronous>, transform_indices = @transform_3, window_bounds = array<i64: 540, 8>}, {pipeline_mode = #tpu.pipeline_mode<synchronous>, transform_indices = @transform_4, window_bounds = array<i64: 72, 8>}, {pipeline_mode = #tpu.pipeline_mode<synchronous>, transform_indices = @transform_5, window_bounds = array<i64: 1, 8>}, {pipeline_mode = #tpu.pipeline_mode<synchronous>, transform_indices = @transform_6, window_bounds = array<i64: 60, 60>}, {pipeline_mode = #tpu.pipeline_mode<synchronous>, transform_indices = @transform_7, window_bounds = array<i64: 8, 60>}, {pipeline_mode = #tpu.pipeline_mode<synchronous>, transform_indices = @transform_8, window_bounds = array<i64: 8, 60>}, {pipeline_mode = #tpu.pipeline_mode<synchronous>, transform_indices = @transform_9, window_bounds = array<i64: 1, 60>}, {pipeline_mode = #tpu.pipeline_mode<synchronous>, transform_indices = @transform_10, window_bounds = array<i64: 540, 8>}, {pipeline_mode = #tpu.pipeline_mode<synchronous>, transform_indices = @transform_11, window_bounds = array<i64: 1, 8>}, {pipeline_mode = #tpu.pipeline_mode<synchronous>, transform_indices = @transform_12, window_bounds = array<i64: 540, 8>}, {pipeline_mode = #tpu.pipeline_mode<synchronous>, transform_indices = @transform_13, window_bounds = array<i64: 72, 8>}, {pipeline_mode = #tpu.pipeline_mode<synchronous>, transform_indices = @transform_14, window_bounds = array<i64: 1, 8>}, {pipeline_mode = #tpu.pipeline_mode<synchronous>, transform_indices = @transform_15, window_bounds = array<i64: 60, 60>}, {pipeline_mode = #tpu.pipeline_mode<synchronous>, transform_indices = @transform_16, window_bounds = array<i64: 8, 60>}, {pipeline_mode = #tpu.pipeline_mode<synchronous>, transform_indices = @transform_17, window_bounds = array<i64: 8, 60>}, {pipeline_mode = #tpu.pipeline_mode<synchronous>, transform_indices = @transform_18, window_bounds = array<i64: 1, 60>}, {pipeline_mode = #tpu.pipeline_mode<synchronous>, transform_indices = @transform_19, window_bounds = array<i64: 60, 60>}, {pipeline_mode = #tpu.pipeline_mode<synchronous>, transform_indices = @transform_20, window_bounds = array<i64: 60, 60>}, {pipeline_mode = #tpu.pipeline_mode<synchronous>, transform_indices = @transform_21, window_bounds = array<i64: 1, 60>}, {pipeline_mode = #tpu.pipeline_mode<synchronous>, transform_indices = @transform_22, window_bounds = array<i64: 540, 60>}, {pipeline_mode = #tpu.pipeline_mode<synchronous>, transform_indices = @transform_23, window_bounds = array<i64: 1, 60>}, {pipeline_mode = #tpu.pipeline_mode<synchronous>, transform_indices = @transform_24, window_bounds = array<i64: 2, 64, 60>}]} {
    %cst = arith.constant 0.000000e+00 : f32
    %0 = vector.broadcast %cst : f32 to vector<2x10x10x60xf32>
    %c0 = arith.constant 0 : index
    %c0_0 = arith.constant 0 : index
    %c0_1 = arith.constant 0 : index
    %c0_2 = arith.constant 0 : index
    %1 = vector.load %arg26[%c0, %c0_0, %c0_1, %c0_2] : memref<2x10x10x60xf32, #tpu.memory_space<vmem>>, vector<2x10x10x60xf32>
    tpu.vector_store %arg26[%c0, %c0_0, %c0_1, %c0_2], %0 {strides = array<i32>} : memref<2x10x10x60xf32, #tpu.memory_space<vmem>>, vector<2x10x10x60xf32>,
    %c0_3 = arith.constant 0 : index
    %c0_4 = arith.constant 0 : index
    %c0_5 = arith.constant 0 : index
    %c0_6 = arith.constant 0 : index
    %2 = vector.load %arg1[%c0_3, %c0_4, %c0_5, %c0_6] : memref<2x8x8x60xf32, #tpu.memory_space<vmem>>, vector<2x8x8x60xf32>
    %3 = vector.shape_cast %2 : vector<2x8x8x60xf32> to vector<128x60xf32>
    %c0_7 = arith.constant 0 : index
    %c0_8 = arith.constant 0 : index
    %4 = vector.load %arg22[%c0_7, %c0_8] : memref<1x60xf32, #tpu.memory_space<vmem>>, vector<1x60xf32>
    %5 = vector.shape_cast %4 : vector<1x60xf32> to vector<1x60xf32>
    %6 = vector.broadcast %5 : vector<1x60xf32> to vector<128x60xf32>
    %7 = vector.shape_cast %3 : vector<128x60xf32> to vector<2x8x8x60xf32>
    %c0_9 = arith.constant 0 : index
    %c1 = arith.constant 1 : index
    %c1_10 = arith.constant 1 : index
    %c0_11 = arith.constant 0 : index
    %8 = vector.load %arg26[%c0_9, %c1, %c1_10, %c0_11] : memref<2x10x10x60xf32, #tpu.memory_space<vmem>>, vector<2x8x8x60xf32>
    tpu.vector_store %arg26[%c0_9, %c1, %c1_10, %c0_11], %7 {strides = array<i32>} : memref<2x10x10x60xf32, #tpu.memory_space<vmem>>, vector<2x8x8x60xf32>,
    %c0_12 = arith.constant 0 : index
    %c0_13 = arith.constant 0 : index
    %c0_14 = arith.constant 0 : index
    %c0_15 = arith.constant 0 : index
    %9 = vector.load %arg26[%c0_12, %c0_13, %c0_14, %c0_15] : memref<2x10x10x60xf32, #tpu.memory_space<vmem>>, vector<2x8x8x60xf32>
    %10 = vector.shape_cast %9 : vector<2x8x8x60xf32> to vector<128x60xf32>
    %11 = arith.truncf %10 : vector<128x60xf32> to vector<128x60xbf16>
    %c0_16 = arith.constant 0 : index
    %c0_17 = arith.constant 0 : index
    %c1_18 = arith.constant 1 : index
    %c0_19 = arith.constant 0 : index
    %12 = vector.load %arg26[%c0_16, %c0_17, %c1_18, %c0_19] : memref<2x10x10x60xf32, #tpu.memory_space<vmem>>, vector<2x8x8x60xf32>
    %13 = vector.shape_cast %12 : vector<2x8x8x60xf32> to vector<128x60xf32>
    %14 = arith.truncf %13 : vector<128x60xf32> to vector<128x60xbf16>
    %c0_20 = arith.constant 0 : index
    %c0_21 = arith.constant 0 : index
    %c2 = arith.constant 2 : index
    %c0_22 = arith.constant 0 : index
    %15 = vector.load %arg26[%c0_20, %c0_21, %c2, %c0_22] : memref<2x10x10x60xf32, #tpu.memory_space<vmem>>, vector<2x8x8x60xf32>
    %16 = vector.shape_cast %15 : vector<2x8x8x60xf32> to vector<128x60xf32>
    %17 = arith.truncf %16 : vector<128x60xf32> to vector<128x60xbf16>
    %c0_23 = arith.constant 0 : index
    %c1_24 = arith.constant 1 : index
    %c0_25 = arith.constant 0 : index
    %c0_26 = arith.constant 0 : index
    %18 = vector.load %arg26[%c0_23, %c1_24, %c0_25, %c0_26] : memref<2x10x10x60xf32, #tpu.memory_space<vmem>>, vector<2x8x8x60xf32>
    %19 = vector.shape_cast %18 : vector<2x8x8x60xf32> to vector<128x60xf32>
    %20 = arith.truncf %19 : vector<128x60xf32> to vector<128x60xbf16>
    %c0_27 = arith.constant 0 : index
    %c1_28 = arith.constant 1 : index
    %c1_29 = arith.constant 1 : index
    %c0_30 = arith.constant 0 : index
    %21 = vector.load %arg26[%c0_27, %c1_28, %c1_29, %c0_30] : memref<2x10x10x60xf32, #tpu.memory_space<vmem>>, vector<2x8x8x60xf32>
    %22 = vector.shape_cast %21 : vector<2x8x8x60xf32> to vector<128x60xf32>
    %23 = arith.truncf %22 : vector<128x60xf32> to vector<128x60xbf16>
    %c0_31 = arith.constant 0 : index
    %c1_32 = arith.constant 1 : index
    %c2_33 = arith.constant 2 : index
    %c0_34 = arith.constant 0 : index
    %24 = vector.load %arg26[%c0_31, %c1_32, %c2_33, %c0_34] : memref<2x10x10x60xf32, #tpu.memory_space<vmem>>, vector<2x8x8x60xf32>
    %25 = vector.shape_cast %24 : vector<2x8x8x60xf32> to vector<128x60xf32>
    %26 = arith.truncf %25 : vector<128x60xf32> to vector<128x60xbf16>
    %c0_35 = arith.constant 0 : index
    %c2_36 = arith.constant 2 : index
    %c0_37 = arith.constant 0 : index
    %c0_38 = arith.constant 0 : index
    %27 = vector.load %arg26[%c0_35, %c2_36, %c0_37, %c0_38] : memref<2x10x10x60xf32, #tpu.memory_space<vmem>>, vector<2x8x8x60xf32>
    %28 = vector.shape_cast %27 : vector<2x8x8x60xf32> to vector<128x60xf32>
    %29 = arith.truncf %28 : vector<128x60xf32> to vector<128x60xbf16>
    %c0_39 = arith.constant 0 : index
    %c2_40 = arith.constant 2 : index
    %c1_41 = arith.constant 1 : index
    %c0_42 = arith.constant 0 : index
    %30 = vector.load %arg26[%c0_39, %c2_40, %c1_41, %c0_42] : memref<2x10x10x60xf32, #tpu.memory_space<vmem>>, vector<2x8x8x60xf32>
    %31 = vector.shape_cast %30 : vector<2x8x8x60xf32> to vector<128x60xf32>
    %32 = arith.truncf %31 : vector<128x60xf32> to vector<128x60xbf16>
    %c0_43 = arith.constant 0 : index
    %c2_44 = arith.constant 2 : index
    %c2_45 = arith.constant 2 : index
    %c0_46 = arith.constant 0 : index
    %33 = vector.load %arg26[%c0_43, %c2_44, %c2_45, %c0_46] : memref<2x10x10x60xf32, #tpu.memory_space<vmem>>, vector<2x8x8x60xf32>
    %34 = vector.shape_cast %33 : vector<2x8x8x60xf32> to vector<128x60xf32>
    %35 = arith.truncf %34 : vector<128x60xf32> to vector<128x60xbf16>
    %36 = tpu.concatenate %11, %14, %17, %20, %23, %26, %29, %32, %35 in 1 : vector<128x60xbf16>, vector<128x60xbf16>, vector<128x60xbf16>, vector<128x60xbf16>, vector<128x60xbf16>, vector<128x60xbf16>, vector<128x60xbf16>, vector<128x60xbf16>, vector<128x60xbf16> -> vector<128x540xbf16>
    %37 = arith.truncf %3 : vector<128x60xf32> to vector<128x60xbf16>
    %c0_47 = arith.constant 0 : index
    %c0_48 = arith.constant 0 : index
    %38 = vector.load %arg3[%c0_47, %c0_48] : memref<1x8xf32, #tpu.memory_space<vmem>>, vector<1x8xf32>
    %39 = vector.shape_cast %38 : vector<1x8xf32> to vector<1x8xf32>
    %40 = vector.broadcast %39 : vector<1x8xf32> to vector<128x8xf32>
    %c0_49 = arith.constant 0 : index
    %c0_50 = arith.constant 0 : index
    %41 = vector.load %arg2[%c0_49, %c0_50] : memref<540x8xbf16, #tpu.memory_space<vmem>>, vector<540x8xbf16>
    %cst_51 = arith.constant dense<0.000000e+00> : vector<128x8xf32>
    %42 = tpu.matmul %36, %41, %cst_51 {dimension_numbers = #tpu.dot_dimension_numbers<[1], [0], [0], [1], [0, 0, 1, 1], [], []>} : vector<128x540xbf16>, vector<540x8xbf16>, vector<128x8xf32> -> vector<128x8xf32>
    %43 = arith.addf %40, %42 : vector<128x8xf32>
    %cst_52 = arith.constant 0.000000e+00 : f32
    %44 = vector.broadcast %cst_52 : f32 to vector<128x8xf32>
    %45 = arith.maximumf %43, %44 : vector<128x8xf32>
    %46 = arith.truncf %45 : vector<128x8xf32> to vector<128x8xbf16>
    %47 = vector.shape_cast %45 : vector<128x8xf32> to vector<2x8x8x8xf32>
    %c0_53 = arith.constant 0 : index
    %c1_54 = arith.constant 1 : index
    %c1_55 = arith.constant 1 : index
    %c0_56 = arith.constant 0 : index
    %48 = vector.load %arg26[%c0_53, %c1_54, %c1_55, %c0_56] : memref<2x10x10x60xf32, #tpu.memory_space<vmem>>, vector<2x8x8x8xf32>
    tpu.vector_store %arg26[%c0_53, %c1_54, %c1_55, %c0_56], %47 {strides = array<i32>} : memref<2x10x10x60xf32, #tpu.memory_space<vmem>>, vector<2x8x8x8xf32>,
    %c0_57 = arith.constant 0 : index
    %c0_58 = arith.constant 0 : index
    %c0_59 = arith.constant 0 : index
    %c0_60 = arith.constant 0 : index
    %49 = vector.load %arg26[%c0_57, %c0_58, %c0_59, %c0_60] : memref<2x10x10x60xf32, #tpu.memory_space<vmem>>, vector<2x8x8x8xf32>
    %50 = vector.shape_cast %49 : vector<2x8x8x8xf32> to vector<128x8xf32>
    %51 = arith.truncf %50 : vector<128x8xf32> to vector<128x8xbf16>
    %c0_61 = arith.constant 0 : index
    %c0_62 = arith.constant 0 : index
    %c1_63 = arith.constant 1 : index
    %c0_64 = arith.constant 0 : index
    %52 = vector.load %arg26[%c0_61, %c0_62, %c1_63, %c0_64] : memref<2x10x10x60xf32, #tpu.memory_space<vmem>>, vector<2x8x8x8xf32>
    %53 = vector.shape_cast %52 : vector<2x8x8x8xf32> to vector<128x8xf32>
    %54 = arith.truncf %53 : vector<128x8xf32> to vector<128x8xbf16>
    %c0_65 = arith.constant 0 : index
    %c0_66 = arith.constant 0 : index
    %c2_67 = arith.constant 2 : index
    %c0_68 = arith.constant 0 : index
    %55 = vector.load %arg26[%c0_65, %c0_66, %c2_67, %c0_68] : memref<2x10x10x60xf32, #tpu.memory_space<vmem>>, vector<2x8x8x8xf32>
    %56 = vector.shape_cast %55 : vector<2x8x8x8xf32> to vector<128x8xf32>
    %57 = arith.truncf %56 : vector<128x8xf32> to vector<128x8xbf16>
    %c0_69 = arith.constant 0 : index
    %c1_70 = arith.constant 1 : index
    %c0_71 = arith.constant 0 : index
    %c0_72 = arith.constant 0 : index
    %58 = vector.load %arg26[%c0_69, %c1_70, %c0_71, %c0_72] : memref<2x10x10x60xf32, #tpu.memory_space<vmem>>, vector<2x8x8x8xf32>
    %59 = vector.shape_cast %58 : vector<2x8x8x8xf32> to vector<128x8xf32>
    %60 = arith.truncf %59 : vector<128x8xf32> to vector<128x8xbf16>
    %c0_73 = arith.constant 0 : index
    %c1_74 = arith.constant 1 : index
    %c1_75 = arith.constant 1 : index
    %c0_76 = arith.constant 0 : index
    %61 = vector.load %arg26[%c0_73, %c1_74, %c1_75, %c0_76] : memref<2x10x10x60xf32, #tpu.memory_space<vmem>>, vector<2x8x8x8xf32>
    %62 = vector.shape_cast %61 : vector<2x8x8x8xf32> to vector<128x8xf32>
    %63 = arith.truncf %62 : vector<128x8xf32> to vector<128x8xbf16>
    %c0_77 = arith.constant 0 : index
    %c1_78 = arith.constant 1 : index
    %c2_79 = arith.constant 2 : index
    %c0_80 = arith.constant 0 : index
    %64 = vector.load %arg26[%c0_77, %c1_78, %c2_79, %c0_80] : memref<2x10x10x60xf32, #tpu.memory_space<vmem>>, vector<2x8x8x8xf32>
    %65 = vector.shape_cast %64 : vector<2x8x8x8xf32> to vector<128x8xf32>
    %66 = arith.truncf %65 : vector<128x8xf32> to vector<128x8xbf16>
    %c0_81 = arith.constant 0 : index
    %c2_82 = arith.constant 2 : index
    %c0_83 = arith.constant 0 : index
    %c0_84 = arith.constant 0 : index
    %67 = vector.load %arg26[%c0_81, %c2_82, %c0_83, %c0_84] : memref<2x10x10x60xf32, #tpu.memory_space<vmem>>, vector<2x8x8x8xf32>
    %68 = vector.shape_cast %67 : vector<2x8x8x8xf32> to vector<128x8xf32>
    %69 = arith.truncf %68 : vector<128x8xf32> to vector<128x8xbf16>
    %c0_85 = arith.constant 0 : index
    %c2_86 = arith.constant 2 : index
    %c1_87 = arith.constant 1 : index
    %c0_88 = arith.constant 0 : index
    %70 = vector.load %arg26[%c0_85, %c2_86, %c1_87, %c0_88] : memref<2x10x10x60xf32, #tpu.memory_space<vmem>>, vector<2x8x8x8xf32>
    %71 = vector.shape_cast %70 : vector<2x8x8x8xf32> to vector<128x8xf32>
    %72 = arith.truncf %71 : vector<128x8xf32> to vector<128x8xbf16>
    %c0_89 = arith.constant 0 : index
    %c2_90 = arith.constant 2 : index
    %c2_91 = arith.constant 2 : index
    %c0_92 = arith.constant 0 : index
    %73 = vector.load %arg26[%c0_89, %c2_90, %c2_91, %c0_92] : memref<2x10x10x60xf32, #tpu.memory_space<vmem>>, vector<2x8x8x8xf32>
    %74 = vector.shape_cast %73 : vector<2x8x8x8xf32> to vector<128x8xf32>
    %75 = arith.truncf %74 : vector<128x8xf32> to vector<128x8xbf16>
    %76 = tpu.concatenate %51, %54, %57, %60, %63, %66, %69, %72, %75 in 1 : vector<128x8xbf16>, vector<128x8xbf16>, vector<128x8xbf16>, vector<128x8xbf16>, vector<128x8xbf16>, vector<128x8xbf16>, vector<128x8xbf16>, vector<128x8xbf16>, vector<128x8xbf16> -> vector<128x72xbf16>
    %c0_93 = arith.constant 0 : index
    %c0_94 = arith.constant 0 : index
    %77 = vector.load %arg6[%c0_93, %c0_94] : memref<1x8xf32, #tpu.memory_space<vmem>>, vector<1x8xf32>
    %78 = vector.shape_cast %77 : vector<1x8xf32> to vector<1x8xf32>
    %79 = vector.broadcast %78 : vector<1x8xf32> to vector<128x8xf32>
    %c0_95 = arith.constant 0 : index
    %c0_96 = arith.constant 0 : index
    %80 = vector.load %arg4[%c0_95, %c0_96] : memref<540x8xbf16, #tpu.memory_space<vmem>>, vector<540x8xbf16>
    %cst_97 = arith.constant dense<0.000000e+00> : vector<128x8xf32>
    %81 = tpu.matmul %36, %80, %cst_97 {dimension_numbers = #tpu.dot_dimension_numbers<[1], [0], [0], [1], [0, 0, 1, 1], [], []>} : vector<128x540xbf16>, vector<540x8xbf16>, vector<128x8xf32> -> vector<128x8xf32>
    %82 = arith.addf %79, %81 : vector<128x8xf32>
    %c0_98 = arith.constant 0 : index
    %c0_99 = arith.constant 0 : index
    %83 = vector.load %arg5[%c0_98, %c0_99] : memref<72x8xbf16, #tpu.memory_space<vmem>>, vector<72x8xbf16>
    %cst_100 = arith.constant dense<0.000000e+00> : vector<128x8xf32>
    %84 = tpu.matmul %76, %83, %cst_100 {dimension_numbers = #tpu.dot_dimension_numbers<[1], [0], [0], [1], [0, 0, 1, 1], [], []>} : vector<128x72xbf16>, vector<72x8xbf16>, vector<128x8xf32> -> vector<128x8xf32>
    %85 = arith.addf %82, %84 : vector<128x8xf32>
    %cst_101 = arith.constant 0.000000e+00 : f32
    %86 = vector.broadcast %cst_101 : f32 to vector<128x8xf32>
    %87 = arith.maximumf %85, %86 : vector<128x8xf32>
    %88 = arith.truncf %87 : vector<128x8xf32> to vector<128x8xbf16>
    %c0_102 = arith.constant 0 : index
    %c0_103 = arith.constant 0 : index
    %89 = vector.load %arg10[%c0_102, %c0_103] : memref<1x60xf32, #tpu.memory_space<vmem>>, vector<1x60xf32>
    %90 = vector.shape_cast %89 : vector<1x60xf32> to vector<1x60xf32>
    %91 = vector.broadcast %90 : vector<1x60xf32> to vector<128x60xf32>
    %c0_104 = arith.constant 0 : index
    %c0_105 = arith.constant 0 : index
    %92 = vector.load %arg7[%c0_104, %c0_105] : memref<60x60xbf16, #tpu.memory_space<vmem>>, vector<60x60xbf16>
    %cst_106 = arith.constant dense<0.000000e+00> : vector<128x60xf32>
    %93 = tpu.matmul %37, %92, %cst_106 {dimension_numbers = #tpu.dot_dimension_numbers<[1], [0], [0], [1], [0, 0, 1, 1], [], []>} : vector<128x60xbf16>, vector<60x60xbf16>, vector<128x60xf32> -> vector<128x60xf32>
    %94 = arith.addf %91, %93 : vector<128x60xf32>
    %c0_107 = arith.constant 0 : index
    %c0_108 = arith.constant 0 : index
    %95 = vector.load %arg8[%c0_107, %c0_108] : memref<8x60xbf16, #tpu.memory_space<vmem>>, vector<8x60xbf16>
    %cst_109 = arith.constant dense<0.000000e+00> : vector<128x60xf32>
    %96 = tpu.matmul %46, %95, %cst_109 {dimension_numbers = #tpu.dot_dimension_numbers<[1], [0], [0], [1], [0, 0, 1, 1], [], []>} : vector<128x8xbf16>, vector<8x60xbf16>, vector<128x60xf32> -> vector<128x60xf32>
    %97 = arith.addf %94, %96 : vector<128x60xf32>
    %c0_110 = arith.constant 0 : index
    %c0_111 = arith.constant 0 : index
    %98 = vector.load %arg9[%c0_110, %c0_111] : memref<8x60xbf16, #tpu.memory_space<vmem>>, vector<8x60xbf16>
    %cst_112 = arith.constant dense<0.000000e+00> : vector<128x60xf32>
    %99 = tpu.matmul %88, %98, %cst_112 {dimension_numbers = #tpu.dot_dimension_numbers<[1], [0], [0], [1], [0, 0, 1, 1], [], []>} : vector<128x8xbf16>, vector<8x60xbf16>, vector<128x60xf32> -> vector<128x60xf32>
    %100 = arith.addf %97, %99 : vector<128x60xf32>
    %101 = arith.addf %100, %3 : vector<128x60xf32>
    %102 = arith.truncf %101 : vector<128x60xf32> to vector<128x60xbf16>
    %c0_113 = arith.constant 0 : index
    %c0_114 = arith.constant 0 : index
    %103 = vector.load %arg20[%c0_113, %c0_114] : memref<60x60xbf16, #tpu.memory_space<vmem>>, vector<60x60xbf16>
    %cst_115 = arith.constant dense<0.000000e+00> : vector<128x60xf32>
    %104 = tpu.matmul %102, %103, %cst_115 {dimension_numbers = #tpu.dot_dimension_numbers<[1], [0], [0], [1], [0, 0, 1, 1], [], []>} : vector<128x60xbf16>, vector<60x60xbf16>, vector<128x60xf32> -> vector<128x60xf32>
    %105 = arith.addf %6, %104 : vector<128x60xf32>
    %106 = vector.shape_cast %101 : vector<128x60xf32> to vector<2x8x8x60xf32>
    %c0_116 = arith.constant 0 : index
    %c1_117 = arith.constant 1 : index
    %c1_118 = arith.constant 1 : index
    %c0_119 = arith.constant 0 : index
    %107 = vector.load %arg26[%c0_116, %c1_117, %c1_118, %c0_119] : memref<2x10x10x60xf32, #tpu.memory_space<vmem>>, vector<2x8x8x60xf32>
    tpu.vector_store %arg26[%c0_116, %c1_117, %c1_118, %c0_119], %106 {strides = array<i32>} : memref<2x10x10x60xf32, #tpu.memory_space<vmem>>, vector<2x8x8x60xf32>,
    %c0_120 = arith.constant 0 : index
    %c0_121 = arith.constant 0 : index
    %c0_122 = arith.constant 0 : index
    %c0_123 = arith.constant 0 : index
    %108 = vector.load %arg26[%c0_120, %c0_121, %c0_122, %c0_123] : memref<2x10x10x60xf32, #tpu.memory_space<vmem>>, vector<2x8x8x60xf32>
    %109 = vector.shape_cast %108 : vector<2x8x8x60xf32> to vector<128x60xf32>
    %110 = arith.truncf %109 : vector<128x60xf32> to vector<128x60xbf16>
    %c0_124 = arith.constant 0 : index
    %c0_125 = arith.constant 0 : index
    %c1_126 = arith.constant 1 : index
    %c0_127 = arith.constant 0 : index
    %111 = vector.load %arg26[%c0_124, %c0_125, %c1_126, %c0_127] : memref<2x10x10x60xf32, #tpu.memory_space<vmem>>, vector<2x8x8x60xf32>
    %112 = vector.shape_cast %111 : vector<2x8x8x60xf32> to vector<128x60xf32>
    %113 = arith.truncf %112 : vector<128x60xf32> to vector<128x60xbf16>
    %c0_128 = arith.constant 0 : index
    %c0_129 = arith.constant 0 : index
    %c2_130 = arith.constant 2 : index
    %c0_131 = arith.constant 0 : index
    %114 = vector.load %arg26[%c0_128, %c0_129, %c2_130, %c0_131] : memref<2x10x10x60xf32, #tpu.memory_space<vmem>>, vector<2x8x8x60xf32>
    %115 = vector.shape_cast %114 : vector<2x8x8x60xf32> to vector<128x60xf32>
    %116 = arith.truncf %115 : vector<128x60xf32> to vector<128x60xbf16>
    %c0_132 = arith.constant 0 : index
    %c1_133 = arith.constant 1 : index
    %c0_134 = arith.constant 0 : index
    %c0_135 = arith.constant 0 : index
    %117 = vector.load %arg26[%c0_132, %c1_133, %c0_134, %c0_135] : memref<2x10x10x60xf32, #tpu.memory_space<vmem>>, vector<2x8x8x60xf32>
    %118 = vector.shape_cast %117 : vector<2x8x8x60xf32> to vector<128x60xf32>
    %119 = arith.truncf %118 : vector<128x60xf32> to vector<128x60xbf16>
    %c0_136 = arith.constant 0 : index
    %c1_137 = arith.constant 1 : index
    %c1_138 = arith.constant 1 : index
    %c0_139 = arith.constant 0 : index
    %120 = vector.load %arg26[%c0_136, %c1_137, %c1_138, %c0_139] : memref<2x10x10x60xf32, #tpu.memory_space<vmem>>, vector<2x8x8x60xf32>
    %121 = vector.shape_cast %120 : vector<2x8x8x60xf32> to vector<128x60xf32>
    %122 = arith.truncf %121 : vector<128x60xf32> to vector<128x60xbf16>
    %c0_140 = arith.constant 0 : index
    %c1_141 = arith.constant 1 : index
    %c2_142 = arith.constant 2 : index
    %c0_143 = arith.constant 0 : index
    %123 = vector.load %arg26[%c0_140, %c1_141, %c2_142, %c0_143] : memref<2x10x10x60xf32, #tpu.memory_space<vmem>>, vector<2x8x8x60xf32>
    %124 = vector.shape_cast %123 : vector<2x8x8x60xf32> to vector<128x60xf32>
    %125 = arith.truncf %124 : vector<128x60xf32> to vector<128x60xbf16>
    %c0_144 = arith.constant 0 : index
    %c2_145 = arith.constant 2 : index
    %c0_146 = arith.constant 0 : index
    %c0_147 = arith.constant 0 : index
    %126 = vector.load %arg26[%c0_144, %c2_145, %c0_146, %c0_147] : memref<2x10x10x60xf32, #tpu.memory_space<vmem>>, vector<2x8x8x60xf32>
    %127 = vector.shape_cast %126 : vector<2x8x8x60xf32> to vector<128x60xf32>
    %128 = arith.truncf %127 : vector<128x60xf32> to vector<128x60xbf16>
    %c0_148 = arith.constant 0 : index
    %c2_149 = arith.constant 2 : index
    %c1_150 = arith.constant 1 : index
    %c0_151 = arith.constant 0 : index
    %129 = vector.load %arg26[%c0_148, %c2_149, %c1_150, %c0_151] : memref<2x10x10x60xf32, #tpu.memory_space<vmem>>, vector<2x8x8x60xf32>
    %130 = vector.shape_cast %129 : vector<2x8x8x60xf32> to vector<128x60xf32>
    %131 = arith.truncf %130 : vector<128x60xf32> to vector<128x60xbf16>
    %c0_152 = arith.constant 0 : index
    %c2_153 = arith.constant 2 : index
    %c2_154 = arith.constant 2 : index
    %c0_155 = arith.constant 0 : index
    %132 = vector.load %arg26[%c0_152, %c2_153, %c2_154, %c0_155] : memref<2x10x10x60xf32, #tpu.memory_space<vmem>>, vector<2x8x8x60xf32>
    %133 = vector.shape_cast %132 : vector<2x8x8x60xf32> to vector<128x60xf32>
    %134 = arith.truncf %133 : vector<128x60xf32> to vector<128x60xbf16>
    %135 = tpu.concatenate %110, %113, %116, %119, %122, %125, %128, %131, %134 in 1 : vector<128x60xbf16>, vector<128x60xbf16>, vector<128x60xbf16>, vector<128x60xbf16>, vector<128x60xbf16>, vector<128x60xbf16>, vector<128x60xbf16>, vector<128x60xbf16>, vector<128x60xbf16> -> vector<128x540xbf16>
    %136 = arith.truncf %101 : vector<128x60xf32> to vector<128x60xbf16>
    %c0_156 = arith.constant 0 : index
    %c0_157 = arith.constant 0 : index
    %137 = vector.load %arg12[%c0_156, %c0_157] : memref<1x8xf32, #tpu.memory_space<vmem>>, vector<1x8xf32>
    %138 = vector.shape_cast %137 : vector<1x8xf32> to vector<1x8xf32>
    %139 = vector.broadcast %138 : vector<1x8xf32> to vector<128x8xf32>
    %c0_158 = arith.constant 0 : index
    %c0_159 = arith.constant 0 : index
    %140 = vector.load %arg11[%c0_158, %c0_159] : memref<540x8xbf16, #tpu.memory_space<vmem>>, vector<540x8xbf16>
    %cst_160 = arith.constant dense<0.000000e+00> : vector<128x8xf32>
    %141 = tpu.matmul %135, %140, %cst_160 {dimension_numbers = #tpu.dot_dimension_numbers<[1], [0], [0], [1], [0, 0, 1, 1], [], []>} : vector<128x540xbf16>, vector<540x8xbf16>, vector<128x8xf32> -> vector<128x8xf32>
    %142 = arith.addf %139, %141 : vector<128x8xf32>
    %cst_161 = arith.constant 0.000000e+00 : f32
    %143 = vector.broadcast %cst_161 : f32 to vector<128x8xf32>
    %144 = arith.maximumf %142, %143 : vector<128x8xf32>
    %145 = arith.truncf %144 : vector<128x8xf32> to vector<128x8xbf16>
    %146 = vector.shape_cast %144 : vector<128x8xf32> to vector<2x8x8x8xf32>
    %c0_162 = arith.constant 0 : index
    %c1_163 = arith.constant 1 : index
    %c1_164 = arith.constant 1 : index
    %c0_165 = arith.constant 0 : index
    %147 = vector.load %arg26[%c0_162, %c1_163, %c1_164, %c0_165] : memref<2x10x10x60xf32, #tpu.memory_space<vmem>>, vector<2x8x8x8xf32>
    tpu.vector_store %arg26[%c0_162, %c1_163, %c1_164, %c0_165], %146 {strides = array<i32>} : memref<2x10x10x60xf32, #tpu.memory_space<vmem>>, vector<2x8x8x8xf32>,
    %c0_166 = arith.constant 0 : index
    %c0_167 = arith.constant 0 : index
    %c0_168 = arith.constant 0 : index
    %c0_169 = arith.constant 0 : index
    %148 = vector.load %arg26[%c0_166, %c0_167, %c0_168, %c0_169] : memref<2x10x10x60xf32, #tpu.memory_space<vmem>>, vector<2x8x8x8xf32>
    %149 = vector.shape_cast %148 : vector<2x8x8x8xf32> to vector<128x8xf32>
    %150 = arith.truncf %149 : vector<128x8xf32> to vector<128x8xbf16>
    %c0_170 = arith.constant 0 : index
    %c0_171 = arith.constant 0 : index
    %c1_172 = arith.constant 1 : index
    %c0_173 = arith.constant 0 : index
    %151 = vector.load %arg26[%c0_170, %c0_171, %c1_172, %c0_173] : memref<2x10x10x60xf32, #tpu.memory_space<vmem>>, vector<2x8x8x8xf32>
    %152 = vector.shape_cast %151 : vector<2x8x8x8xf32> to vector<128x8xf32>
    %153 = arith.truncf %152 : vector<128x8xf32> to vector<128x8xbf16>
    %c0_174 = arith.constant 0 : index
    %c0_175 = arith.constant 0 : index
    %c2_176 = arith.constant 2 : index
    %c0_177 = arith.constant 0 : index
    %154 = vector.load %arg26[%c0_174, %c0_175, %c2_176, %c0_177] : memref<2x10x10x60xf32, #tpu.memory_space<vmem>>, vector<2x8x8x8xf32>
    %155 = vector.shape_cast %154 : vector<2x8x8x8xf32> to vector<128x8xf32>
    %156 = arith.truncf %155 : vector<128x8xf32> to vector<128x8xbf16>
    %c0_178 = arith.constant 0 : index
    %c1_179 = arith.constant 1 : index
    %c0_180 = arith.constant 0 : index
    %c0_181 = arith.constant 0 : index
    %157 = vector.load %arg26[%c0_178, %c1_179, %c0_180, %c0_181] : memref<2x10x10x60xf32, #tpu.memory_space<vmem>>, vector<2x8x8x8xf32>
    %158 = vector.shape_cast %157 : vector<2x8x8x8xf32> to vector<128x8xf32>
    %159 = arith.truncf %158 : vector<128x8xf32> to vector<128x8xbf16>
    %c0_182 = arith.constant 0 : index
    %c1_183 = arith.constant 1 : index
    %c1_184 = arith.constant 1 : index
    %c0_185 = arith.constant 0 : index
    %160 = vector.load %arg26[%c0_182, %c1_183, %c1_184, %c0_185] : memref<2x10x10x60xf32, #tpu.memory_space<vmem>>, vector<2x8x8x8xf32>
    %161 = vector.shape_cast %160 : vector<2x8x8x8xf32> to vector<128x8xf32>
    %162 = arith.truncf %161 : vector<128x8xf32> to vector<128x8xbf16>
    %c0_186 = arith.constant 0 : index
    %c1_187 = arith.constant 1 : index
    %c2_188 = arith.constant 2 : index
    %c0_189 = arith.constant 0 : index
    %163 = vector.load %arg26[%c0_186, %c1_187, %c2_188, %c0_189] : memref<2x10x10x60xf32, #tpu.memory_space<vmem>>, vector<2x8x8x8xf32>
    %164 = vector.shape_cast %163 : vector<2x8x8x8xf32> to vector<128x8xf32>
    %165 = arith.truncf %164 : vector<128x8xf32> to vector<128x8xbf16>
    %c0_190 = arith.constant 0 : index
    %c2_191 = arith.constant 2 : index
    %c0_192 = arith.constant 0 : index
    %c0_193 = arith.constant 0 : index
    %166 = vector.load %arg26[%c0_190, %c2_191, %c0_192, %c0_193] : memref<2x10x10x60xf32, #tpu.memory_space<vmem>>, vector<2x8x8x8xf32>
    %167 = vector.shape_cast %166 : vector<2x8x8x8xf32> to vector<128x8xf32>
    %168 = arith.truncf %167 : vector<128x8xf32> to vector<128x8xbf16>
    %c0_194 = arith.constant 0 : index
    %c2_195 = arith.constant 2 : index
    %c1_196 = arith.constant 1 : index
    %c0_197 = arith.constant 0 : index
    %169 = vector.load %arg26[%c0_194, %c2_195, %c1_196, %c0_197] : memref<2x10x10x60xf32, #tpu.memory_space<vmem>>, vector<2x8x8x8xf32>
    %170 = vector.shape_cast %169 : vector<2x8x8x8xf32> to vector<128x8xf32>
    %171 = arith.truncf %170 : vector<128x8xf32> to vector<128x8xbf16>
    %c0_198 = arith.constant 0 : index
    %c2_199 = arith.constant 2 : index
    %c2_200 = arith.constant 2 : index
    %c0_201 = arith.constant 0 : index
    %172 = vector.load %arg26[%c0_198, %c2_199, %c2_200, %c0_201] : memref<2x10x10x60xf32, #tpu.memory_space<vmem>>, vector<2x8x8x8xf32>
    %173 = vector.shape_cast %172 : vector<2x8x8x8xf32> to vector<128x8xf32>
    %174 = arith.truncf %173 : vector<128x8xf32> to vector<128x8xbf16>
    %175 = tpu.concatenate %150, %153, %156, %159, %162, %165, %168, %171, %174 in 1 : vector<128x8xbf16>, vector<128x8xbf16>, vector<128x8xbf16>, vector<128x8xbf16>, vector<128x8xbf16>, vector<128x8xbf16>, vector<128x8xbf16>, vector<128x8xbf16>, vector<128x8xbf16> -> vector<128x72xbf16>
    %c0_202 = arith.constant 0 : index
    %c0_203 = arith.constant 0 : index
    %176 = vector.load %arg15[%c0_202, %c0_203] : memref<1x8xf32, #tpu.memory_space<vmem>>, vector<1x8xf32>
    %177 = vector.shape_cast %176 : vector<1x8xf32> to vector<1x8xf32>
    %178 = vector.broadcast %177 : vector<1x8xf32> to vector<128x8xf32>
    %c0_204 = arith.constant 0 : index
    %c0_205 = arith.constant 0 : index
    %179 = vector.load %arg13[%c0_204, %c0_205] : memref<540x8xbf16, #tpu.memory_space<vmem>>, vector<540x8xbf16>
    %cst_206 = arith.constant dense<0.000000e+00> : vector<128x8xf32>
    %180 = tpu.matmul %135, %179, %cst_206 {dimension_numbers = #tpu.dot_dimension_numbers<[1], [0], [0], [1], [0, 0, 1, 1], [], []>} : vector<128x540xbf16>, vector<540x8xbf16>, vector<128x8xf32> -> vector<128x8xf32>
    %181 = arith.addf %178, %180 : vector<128x8xf32>
    %c0_207 = arith.constant 0 : index
    %c0_208 = arith.constant 0 : index
    %182 = vector.load %arg14[%c0_207, %c0_208] : memref<72x8xbf16, #tpu.memory_space<vmem>>, vector<72x8xbf16>
    %cst_209 = arith.constant dense<0.000000e+00> : vector<128x8xf32>
    %183 = tpu.matmul %175, %182, %cst_209 {dimension_numbers = #tpu.dot_dimension_numbers<[1], [0], [0], [1], [0, 0, 1, 1], [], []>} : vector<128x72xbf16>, vector<72x8xbf16>, vector<128x8xf32> -> vector<128x8xf32>
    %184 = arith.addf %181, %183 : vector<128x8xf32>
    %cst_210 = arith.constant 0.000000e+00 : f32
    %185 = vector.broadcast %cst_210 : f32 to vector<128x8xf32>
    %186 = arith.maximumf %184, %185 : vector<128x8xf32>
    %187 = arith.truncf %186 : vector<128x8xf32> to vector<128x8xbf16>
    %c0_211 = arith.constant 0 : index
    %c0_212 = arith.constant 0 : index
    %188 = vector.load %arg19[%c0_211, %c0_212] : memref<1x60xf32, #tpu.memory_space<vmem>>, vector<1x60xf32>
    %189 = vector.shape_cast %188 : vector<1x60xf32> to vector<1x60xf32>
    %190 = vector.broadcast %189 : vector<1x60xf32> to vector<128x60xf32>
    %c0_213 = arith.constant 0 : index
    %c0_214 = arith.constant 0 : index
    %191 = vector.load %arg16[%c0_213, %c0_214] : memref<60x60xbf16, #tpu.memory_space<vmem>>, vector<60x60xbf16>
    %cst_215 = arith.constant dense<0.000000e+00> : vector<128x60xf32>
    %192 = tpu.matmul %136, %191, %cst_215 {dimension_numbers = #tpu.dot_dimension_numbers<[1], [0], [0], [1], [0, 0, 1, 1], [], []>} : vector<128x60xbf16>, vector<60x60xbf16>, vector<128x60xf32> -> vector<128x60xf32>
    %193 = arith.addf %190, %192 : vector<128x60xf32>
    %c0_216 = arith.constant 0 : index
    %c0_217 = arith.constant 0 : index
    %194 = vector.load %arg17[%c0_216, %c0_217] : memref<8x60xbf16, #tpu.memory_space<vmem>>, vector<8x60xbf16>
    %cst_218 = arith.constant dense<0.000000e+00> : vector<128x60xf32>
    %195 = tpu.matmul %145, %194, %cst_218 {dimension_numbers = #tpu.dot_dimension_numbers<[1], [0], [0], [1], [0, 0, 1, 1], [], []>} : vector<128x8xbf16>, vector<8x60xbf16>, vector<128x60xf32> -> vector<128x60xf32>
    %196 = arith.addf %193, %195 : vector<128x60xf32>
    %c0_219 = arith.constant 0 : index
    %c0_220 = arith.constant 0 : index
    %197 = vector.load %arg18[%c0_219, %c0_220] : memref<8x60xbf16, #tpu.memory_space<vmem>>, vector<8x60xbf16>
    %cst_221 = arith.constant dense<0.000000e+00> : vector<128x60xf32>
    %198 = tpu.matmul %187, %197, %cst_221 {dimension_numbers = #tpu.dot_dimension_numbers<[1], [0], [0], [1], [0, 0, 1, 1], [], []>} : vector<128x8xbf16>, vector<8x60xbf16>, vector<128x60xf32> -> vector<128x60xf32>
    %199 = arith.addf %196, %198 : vector<128x60xf32>
    %200 = arith.addf %199, %101 : vector<128x60xf32>
    %201 = arith.truncf %200 : vector<128x60xf32> to vector<128x60xbf16>
    %c0_222 = arith.constant 0 : index
    %c0_223 = arith.constant 0 : index
    %202 = vector.load %arg21[%c0_222, %c0_223] : memref<60x60xbf16, #tpu.memory_space<vmem>>, vector<60x60xbf16>
    %cst_224 = arith.constant dense<0.000000e+00> : vector<128x60xf32>
    %203 = tpu.matmul %201, %202, %cst_224 {dimension_numbers = #tpu.dot_dimension_numbers<[1], [0], [0], [1], [0, 0, 1, 1], [], []>} : vector<128x60xbf16>, vector<60x60xbf16>, vector<128x60xf32> -> vector<128x60xf32>
    %204 = arith.addf %105, %203 : vector<128x60xf32>
    %205 = vector.shape_cast %204 : vector<128x60xf32> to vector<2x8x8x60xf32>
    %c0_225 = arith.constant 0 : index
    %c1_226 = arith.constant 1 : index
    %c1_227 = arith.constant 1 : index
    %c0_228 = arith.constant 0 : index
    %206 = vector.load %arg26[%c0_225, %c1_226, %c1_227, %c0_228] : memref<2x10x10x60xf32, #tpu.memory_space<vmem>>, vector<2x8x8x60xf32>
    tpu.vector_store %arg26[%c0_225, %c1_226, %c1_227, %c0_228], %205 {strides = array<i32>} : memref<2x10x10x60xf32, #tpu.memory_space<vmem>>, vector<2x8x8x60xf32>,
    %c0_229 = arith.constant 0 : index
    %c0_230 = arith.constant 0 : index
    %c0_231 = arith.constant 0 : index
    %c0_232 = arith.constant 0 : index
    %207 = vector.load %arg26[%c0_229, %c0_230, %c0_231, %c0_232] : memref<2x10x10x60xf32, #tpu.memory_space<vmem>>, vector<2x8x8x60xf32>
    %208 = vector.shape_cast %207 : vector<2x8x8x60xf32> to vector<128x60xf32>
    %209 = arith.truncf %208 : vector<128x60xf32> to vector<128x60xbf16>
    %c0_233 = arith.constant 0 : index
    %c0_234 = arith.constant 0 : index
    %c1_235 = arith.constant 1 : index
    %c0_236 = arith.constant 0 : index
    %210 = vector.load %arg26[%c0_233, %c0_234, %c1_235, %c0_236] : memref<2x10x10x60xf32, #tpu.memory_space<vmem>>, vector<2x8x8x60xf32>
    %211 = vector.shape_cast %210 : vector<2x8x8x60xf32> to vector<128x60xf32>
    %212 = arith.truncf %211 : vector<128x60xf32> to vector<128x60xbf16>
    %c0_237 = arith.constant 0 : index
    %c0_238 = arith.constant 0 : index
    %c2_239 = arith.constant 2 : index
    %c0_240 = arith.constant 0 : index
    %213 = vector.load %arg26[%c0_237, %c0_238, %c2_239, %c0_240] : memref<2x10x10x60xf32, #tpu.memory_space<vmem>>, vector<2x8x8x60xf32>
    %214 = vector.shape_cast %213 : vector<2x8x8x60xf32> to vector<128x60xf32>
    %215 = arith.truncf %214 : vector<128x60xf32> to vector<128x60xbf16>
    %c0_241 = arith.constant 0 : index
    %c1_242 = arith.constant 1 : index
    %c0_243 = arith.constant 0 : index
    %c0_244 = arith.constant 0 : index
    %216 = vector.load %arg26[%c0_241, %c1_242, %c0_243, %c0_244] : memref<2x10x10x60xf32, #tpu.memory_space<vmem>>, vector<2x8x8x60xf32>
    %217 = vector.shape_cast %216 : vector<2x8x8x60xf32> to vector<128x60xf32>
    %218 = arith.truncf %217 : vector<128x60xf32> to vector<128x60xbf16>
    %c0_245 = arith.constant 0 : index
    %c1_246 = arith.constant 1 : index
    %c1_247 = arith.constant 1 : index
    %c0_248 = arith.constant 0 : index
    %219 = vector.load %arg26[%c0_245, %c1_246, %c1_247, %c0_248] : memref<2x10x10x60xf32, #tpu.memory_space<vmem>>, vector<2x8x8x60xf32>
    %220 = vector.shape_cast %219 : vector<2x8x8x60xf32> to vector<128x60xf32>
    %221 = arith.truncf %220 : vector<128x60xf32> to vector<128x60xbf16>
    %c0_249 = arith.constant 0 : index
    %c1_250 = arith.constant 1 : index
    %c2_251 = arith.constant 2 : index
    %c0_252 = arith.constant 0 : index
    %222 = vector.load %arg26[%c0_249, %c1_250, %c2_251, %c0_252] : memref<2x10x10x60xf32, #tpu.memory_space<vmem>>, vector<2x8x8x60xf32>
    %223 = vector.shape_cast %222 : vector<2x8x8x60xf32> to vector<128x60xf32>
    %224 = arith.truncf %223 : vector<128x60xf32> to vector<128x60xbf16>
    %c0_253 = arith.constant 0 : index
    %c2_254 = arith.constant 2 : index
    %c0_255 = arith.constant 0 : index
    %c0_256 = arith.constant 0 : index
    %225 = vector.load %arg26[%c0_253, %c2_254, %c0_255, %c0_256] : memref<2x10x10x60xf32, #tpu.memory_space<vmem>>, vector<2x8x8x60xf32>
    %226 = vector.shape_cast %225 : vector<2x8x8x60xf32> to vector<128x60xf32>
    %227 = arith.truncf %226 : vector<128x60xf32> to vector<128x60xbf16>
    %c0_257 = arith.constant 0 : index
    %c2_258 = arith.constant 2 : index
    %c1_259 = arith.constant 1 : index
    %c0_260 = arith.constant 0 : index
    %228 = vector.load %arg26[%c0_257, %c2_258, %c1_259, %c0_260] : memref<2x10x10x60xf32, #tpu.memory_space<vmem>>, vector<2x8x8x60xf32>
    %229 = vector.shape_cast %228 : vector<2x8x8x60xf32> to vector<128x60xf32>
    %230 = arith.truncf %229 : vector<128x60xf32> to vector<128x60xbf16>
    %c0_261 = arith.constant 0 : index
    %c2_262 = arith.constant 2 : index
    %c2_263 = arith.constant 2 : index
    %c0_264 = arith.constant 0 : index
    %231 = vector.load %arg26[%c0_261, %c2_262, %c2_263, %c0_264] : memref<2x10x10x60xf32, #tpu.memory_space<vmem>>, vector<2x8x8x60xf32>
    %232 = vector.shape_cast %231 : vector<2x8x8x60xf32> to vector<128x60xf32>
    %233 = arith.truncf %232 : vector<128x60xf32> to vector<128x60xbf16>
    %234 = tpu.concatenate %209, %212, %215, %218, %221, %224, %227, %230, %233 in 1 : vector<128x60xbf16>, vector<128x60xbf16>, vector<128x60xbf16>, vector<128x60xbf16>, vector<128x60xbf16>, vector<128x60xbf16>, vector<128x60xbf16>, vector<128x60xbf16>, vector<128x60xbf16> -> vector<128x540xbf16>
    %c0_265 = arith.constant 0 : index
    %c0_266 = arith.constant 0 : index
    %235 = vector.load %arg24[%c0_265, %c0_266] : memref<1x60xf32, #tpu.memory_space<vmem>>, vector<1x60xf32>
    %236 = vector.shape_cast %235 : vector<1x60xf32> to vector<1x60xf32>
    %237 = vector.broadcast %236 : vector<1x60xf32> to vector<128x60xf32>
    %c0_267 = arith.constant 0 : index
    %c0_268 = arith.constant 0 : index
    %238 = vector.load %arg23[%c0_267, %c0_268] : memref<540x60xbf16, #tpu.memory_space<vmem>>, vector<540x60xbf16>
    %cst_269 = arith.constant dense<0.000000e+00> : vector<128x60xf32>
    %239 = tpu.matmul %234, %238, %cst_269 {dimension_numbers = #tpu.dot_dimension_numbers<[1], [0], [0], [1], [0, 0, 1, 1], [], []>} : vector<128x540xbf16>, vector<540x60xbf16>, vector<128x60xf32> -> vector<128x60xf32>
    %240 = arith.addf %237, %239 : vector<128x60xf32>
    %241 = vector.shape_cast %240 : vector<128x60xf32> to vector<2x64x60xf32>
    %c0_270 = arith.constant 0 : index
    %c0_271 = arith.constant 0 : index
    %c0_272 = arith.constant 0 : index
    %242 = vector.load %arg25[%c0_270, %c0_271, %c0_272] : memref<2x64x60xf32, #tpu.memory_space<vmem>>, vector<2x64x60xf32>
    tpu.vector_store %arg25[%c0_270, %c0_271, %c0_272], %241 {strides = array<i32>} : memref<2x64x60xf32, #tpu.memory_space<vmem>>, vector<2x64x60xf32>,
    return
  }
  func.func @transform_0(%arg0: i32) -> (i32, i32, i32, i32) {
    %c0_i32 = arith.constant 0 : i32
    %c0_i32_0 = arith.constant 0 : i32
    %c0_i32_1 = arith.constant 0 : i32
    %c0_i32_2 = arith.constant 0 : i32
    %c0_i32_3 = arith.constant 0 : i32
    return %c0_i32, %c0_i32_0, %c0_i32_1, %c0_i32_2 : i32, i32, i32, i32
  }
  func.func @transform_1(%arg0: i32) -> (i32, i32) {
    %c0_i32 = arith.constant 0 : i32
    %c0_i32_0 = arith.constant 0 : i32
    %c0_i32_1 = arith.constant 0 : i32
    return %c0_i32, %c0_i32_0 : i32, i32
  }
  func.func @transform_2(%arg0: i32) -> (i32, i32) {
    %c0_i32 = arith.constant 0 : i32
    %c0_i32_0 = arith.constant 0 : i32
    %c0_i32_1 = arith.constant 0 : i32
    return %c0_i32, %c0_i32_0 : i32, i32
  }
  func.func @transform_3(%arg0: i32) -> (i32, i32) {
    %c0_i32 = arith.constant 0 : i32
    %c0_i32_0 = arith.constant 0 : i32
    %c0_i32_1 = arith.constant 0 : i32
    return %c0_i32, %c0_i32_0 : i32, i32
  }
  func.func @transform_4(%arg0: i32) -> (i32, i32) {
    %c0_i32 = arith.constant 0 : i32
    %c0_i32_0 = arith.constant 0 : i32
    %c0_i32_1 = arith.constant 0 : i32
    return %c0_i32, %c0_i32_0 : i32, i32
  }
  func.func @transform_5(%arg0: i32) -> (i32, i32) {
    %c0_i32 = arith.constant 0 : i32
    %c0_i32_0 = arith.constant 0 : i32
    %c0_i32_1 = arith.constant 0 : i32
    return %c0_i32, %c0_i32_0 : i32, i32
  }
  func.func @transform_6(%arg0: i32) -> (i32, i32) {
    %c0_i32 = arith.constant 0 : i32
    %c0_i32_0 = arith.constant 0 : i32
    %c0_i32_1 = arith.constant 0 : i32
    return %c0_i32, %c0_i32_0 : i32, i32
  }
  func.func @transform_7(%arg0: i32) -> (i32, i32) {
    %c0_i32 = arith.constant 0 : i32
    %c0_i32_0 = arith.constant 0 : i32
    %c0_i32_1 = arith.constant 0 : i32
    return %c0_i32, %c0_i32_0 : i32, i32
  }
  func.func @transform_8(%arg0: i32) -> (i32, i32) {
    %c0_i32 = arith.constant 0 : i32
    %c0_i32_0 = arith.constant 0 : i32
    %c0_i32_1 = arith.constant 0 : i32
    return %c0_i32, %c0_i32_0 : i32, i32
  }
  func.func @transform_9(%arg0: i32) -> (i32, i32) {
    %c0_i32 = arith.constant 0 : i32
    %c0_i32_0 = arith.constant 0 : i32
    %c0_i32_1 = arith.constant 0 : i32
    return %c0_i32, %c0_i32_0 : i32, i32
  }
  func.func @transform_10(%arg0: i32) -> (i32, i32) {
    %c0_i32 = arith.constant 0 : i32
    %c0_i32_0 = arith.constant 0 : i32
    %c0_i32_1 = arith.constant 0 : i32
    return %c0_i32, %c0_i32_0 : i32, i32
  }
  func.func @transform_11(%arg0: i32) -> (i32, i32) {
    %c0_i32 = arith.constant 0 : i32
    %c0_i32_0 = arith.constant 0 : i32
    %c0_i32_1 = arith.constant 0 : i32
    return %c0_i32, %c0_i32_0 : i32, i32
  }
  func.func @transform_12(%arg0: i32) -> (i32, i32) {
    %c0_i32 = arith.constant 0 : i32
    %c0_i32_0 = arith.constant 0 : i32
    %c0_i32_1 = arith.constant 0 : i32
    return %c0_i32, %c0_i32_0 : i32, i32
  }
  func.func @transform_13(%arg0: i32) -> (i32, i32) {
    %c0_i32 = arith.constant 0 : i32
    %c0_i32_0 = arith.constant 0 : i32
    %c0_i32_1 = arith.constant 0 : i32
    return %c0_i32, %c0_i32_0 : i32, i32
  }
  func.func @transform_14(%arg0: i32) -> (i32, i32) {
    %c0_i32 = arith.constant 0 : i32
    %c0_i32_0 = arith.constant 0 : i32
    %c0_i32_1 = arith.constant 0 : i32
    return %c0_i32, %c0_i32_0 : i32, i32
  }
  func.func @transform_15(%arg0: i32) -> (i32, i32) {
    %c0_i32 = arith.constant 0 : i32
    %c0_i32_0 = arith.constant 0 : i32
    %c0_i32_1 = arith.constant 0 : i32
    return %c0_i32, %c0_i32_0 : i32, i32
  }
  func.func @transform_16(%arg0: i32) -> (i32, i32) {
    %c0_i32 = arith.constant 0 : i32
    %c0_i32_0 = arith.constant 0 : i32
    %c0_i32_1 = arith.constant 0 : i32
    return %c0_i32, %c0_i32_0 : i32, i32
  }
  func.func @transform_17(%arg0: i32) -> (i32, i32) {
    %c0_i32 = arith.constant 0 : i32
    %c0_i32_0 = arith.constant 0 : i32
    %c0_i32_1 = arith.constant 0 : i32
    return %c0_i32, %c0_i32_0 : i32, i32
  }
  func.func @transform_18(%arg0: i32) -> (i32, i32) {
    %c0_i32 = arith.constant 0 : i32
    %c0_i32_0 = arith.constant 0 : i32
    %c0_i32_1 = arith.constant 0 : i32
    return %c0_i32, %c0_i32_0 : i32, i32
  }
  func.func @transform_19(%arg0: i32) -> (i32, i32) {
    %c0_i32 = arith.constant 0 : i32
    %c0_i32_0 = arith.constant 0 : i32
    %c0_i32_1 = arith.constant 0 : i32
    return %c0_i32, %c0_i32_0 : i32, i32
  }
  func.func @transform_20(%arg0: i32) -> (i32, i32) {
    %c0_i32 = arith.constant 0 : i32
    %c0_i32_0 = arith.constant 0 : i32
    %c0_i32_1 = arith.constant 0 : i32
    return %c0_i32, %c0_i32_0 : i32, i32
  }
  func.func @transform_21(%arg0: i32) -> (i32, i32) {
    %c0_i32 = arith.constant 0 : i32
    %c0_i32_0 = arith.constant 0 : i32
    %c0_i32_1 = arith.constant 0 : i32
    return %c0_i32, %c0_i32_0 : i32, i32
  }
  func.func @transform_22(%arg0: i32) -> (i32, i32) {
    %c0_i32 = arith.constant 0 : i32
    %c0_i32_0 = arith.constant 0 : i32
    %c0_i32_1 = arith.constant 0 : i32
    return %c0_i32, %c0_i32_0 : i32, i32
  }
  func.func @transform_23(%arg0: i32) -> (i32, i32) {
    %c0_i32 = arith.constant 0 : i32
    %c0_i32_0 = arith.constant 0 : i32
    %c0_i32_1 = arith.constant 0 : i32
    return %c0_i32, %c0_i32_0 : i32, i32
  }
  func.func @transform_24(%arg0: i32) -> (i32, i32, i32) {
    %c0_i32 = arith.constant 0 : i32
    %c0_i32_0 = arith.constant 0 : i32
    %c0_i32_1 = arith.constant 0 : i32
    %c0_i32_2 = arith.constant 0 : i32
    return %c0_i32, %c0_i32_0, %c0_i32_1 : i32, i32, i32
  }
}

</mosaic_0001>

<bundles_post_ra>
// kernel: denoise_rdn_pallas.1
= control target key start
LH: loop header
LB: loop body
LE: loop exit
PB: predicated region body
PF: predicated region fallthrough
CT: control target
= control target key end

     0   :  { %s13272_s0 = inlined_call_operand.vmem [shape: f32[2,8,8,60], index: 0, kind: input, shape index: {}]   ;;  %s13273_s1 = inlined_call_operand.vmem [shape: bf16[540,8], index: 1, kind: input, shape index: {}]   ;;  %s13274_s2 = inlined_call_operand.vmem [shape: f32[1,8], index: 2, kind: input, shape index: {}]   ;;  %s13275_s3 = inlined_call_operand.vmem [shape: bf16[540,8], index: 3, kind: input, shape index: {}]   ;;  %s13276_s4 = inlined_call_operand.vmem [shape: bf16[72,8], index: 4, kind: input, shape index: {}]   ;;  %s13277_s5 = inlined_call_operand.vmem [shape: f32[1,8], index: 5, kind: input, shape index: {}]   ;;  %s13278_s6 = inlined_call_operand.vmem [shape: bf16[60,60], index: 6, kind: input, shape index: {}]   ;;  %s13279_s7 = inlined_call_operand.vmem [shape: bf16[8,60], index: 7, kind: input, shape index: {}]   ;;  %s13280_s8 = inlined_call_operand.vmem [shape: bf16[8,60], index: 8, kind: input, shape index: {}]   ;;  %s13281_s9 = inlined_call_operand.vmem [shape: f32[1,60], index: 9, kind: input, shape index: {}]   ;;  %s13282_s10 = inlined_call_operand.vmem [shape: bf16[540,8], index: 10, kind: input, shape index: {}]   ;;  %s13283_s11 = inlined_call_operand.vmem [shape: f32[1,8], index: 11, kind: input, shape index: {}]   ;;  %s13284_s12 = inlined_call_operand.vmem [shape: bf16[540,8], index: 12, kind: input, shape index: {}]   ;;  %s13285_s13 = inlined_call_operand.vmem [shape: bf16[72,8], index: 13, kind: input, shape index: {}]   ;;  %s13286_s14 = inlined_call_operand.vmem [shape: f32[1,8], index: 14, kind: input, shape index: {}]   ;;  %s13287_s15 = inlined_call_operand.vmem [shape: bf16[60,60], index: 15, kind: input, shape index: {}]   ;;  %s13288_s16 = inlined_call_operand.vmem [shape: bf16[8,60], index: 16, kind: input, shape index: {}]   ;;  %s13289_s17 = inlined_call_operand.vmem [shape: bf16[8,60], index: 17, kind: input, shape index: {}]   ;;  %s13290_s18 = inlined_call_operand.vmem [shape: f32[1,60], index: 18, kind: input, shape index: {}]   ;;  %s13291_s19 = inlined_call_operand.vmem [shape: bf16[60,60], index: 19, kind: input, shape index: {}]   ;;  %s13292_s20 = inlined_call_operand.vmem [shape: bf16[60,60], index: 20, kind: input, shape index: {}]   ;;  %s13293_s21 = inlined_call_operand.vmem [shape: f32[1,60], index: 21, kind: input, shape index: {}]   ;;  %s13294_s22 = inlined_call_operand.vmem [shape: bf16[540,60], index: 22, kind: input, shape index: {}]   ;;  %s13295_s23 = inlined_call_operand.vmem [shape: f32[1,60], index: 23, kind: input, shape index: {}]   ;;  %s13296_s24 = inlined_call_operand.hbm [shape: f32[2,64,60], index: 24, kind: output, shape index: {}]  }
   0x1   :  { %13357 = sst [smem:[#allocation19_spill]] %s13272_s0 }
   0x2   :  { %13358 = sst [smem:[#allocation20_spill]] %s13273_s1 }
   0x3   :  { %13359 = sst [smem:[#allocation21_spill]] %s13274_s2 }
   0x4   :  { %13360 = sst [smem:[#allocation22_spill]] %s13275_s3 }
   0x5   :  { %13361 = sst [smem:[#allocation23_spill]] %s13276_s4 }
   0x6   :  { %13362 = sst [smem:[#allocation24_spill]] %s13277_s5 }
   0x7   :  { %13363 = sst [smem:[#allocation25_spill]] %s13278_s6 }
   0x8   :  { %13364 = sst [smem:[#allocation26_spill]] %s13279_s7 }
   0x9   :  { %13365 = sst [smem:[#allocation27_spill]] %s13280_s8 }
   0xa   :  { %vm79_vm0 = vcmask 490496   ;;  %vm81_vm1 = vcmask 484352   ;;  %s13366_s27 = sld [smem:[#allocation19_spill]]  ;;  %v9746_v1 = vmov 0.0   ;;  %s13373_s0 = sld [smem:[#allocation20_spill]]  ;;  %vm619_vm2 = vcmask 424960  }
   0xb   :  { %80 = vst.msk [vmem:[#allocation2] sm:$0xff] %vm79_vm0, %v9746_v1  ;;  %83 = vst.msk [vmem:[#allocation2 + $0x10] sm:$0xff] %vm79_vm0, %v9746_v1  ;;  %s9748_s3 = smov 60   ;;  %s9749_s25 = smov 52   ;;  %vm13355_vm3 = vcmask 916480   ;;  %vm13354_vm4 = vcmask 982016  }
   0xc   :  { %82 = vst.msk [vmem:[#allocation2 + $0x8] sm:$0x3] %vm81_vm1, %v9746_v1  ;;  %84 = vst.msk [vmem:[#allocation2 + $0x18] sm:$0x3] %vm81_vm1, %v9746_v1  ;;  %s9750_s8 = smov 112   ;;  %s9751_s4 = smov 104  }
   0xd   :  { %85 = vst.msk [vmem:[#allocation2 + $0x20] sm:$0xff] %vm79_vm0, %v9746_v1  ;;  %87 = vst.msk [vmem:[#allocation2 + $0x30] sm:$0xff] %vm79_vm0, %v9746_v1  ;;  %s9752_s1 = smov 36   ;;  %s13304_s28 = smov 44   ;;  %vm1048_vm5 = vcmask 1045504   ;;  %vm13328_vm6 = vcmask 293888  }
   0xe   :  { %86 = vst.msk [vmem:[#allocation2 + $0x28] sm:$0x3] %vm81_vm1, %v9746_v1  ;;  %88 = vst.msk [vmem:[#allocation2 + $0x38] sm:$0x3] %vm81_vm1, %v9746_v1  ;;  %s13302_s6 = smov 96   ;;  %s13374_s7 = sld [smem:[#allocation22_spill]] }
   0xf   :  { %89 = vst.msk [vmem:[#allocation2 + $0x40] sm:$0xff] %vm79_vm0, %v9746_v1  ;;  %91 = vst.msk [vmem:[#allocation2 + $0x50] sm:$0xff] %vm79_vm0, %v9746_v1  ;;  %vm13356_vm7 = vcmask 359424   ;;  %vm13327_vm8 = vcmask 785408   ;;  %vm13326_vm9 = vcmask 850944  }
  0x10   :  { %v9893_v0 = vld [vmem:[%s13366_s27] sm:$0xff]  ;;  %90 = vst.msk [vmem:[#allocation2 + $0x48] sm:$0x3] %vm81_vm1, %v9746_v1  ;;  %92 = vst.msk [vmem:[#allocation2 + $0x58] sm:$0x3] %vm81_vm1, %v9746_v1  ;;  %v9938_v2 = vld [vmem:[%s13366_s27 + $0x8] sm:$0xff] }
  0x11   :  { %93 = vst.msk [vmem:[#allocation2 + $0x60] sm:$0xff] %vm79_vm0, %v9746_v1  ;;  %95 = vst.msk [vmem:[#allocation2 + $0x70] sm:$0xff] %vm79_vm0, %v9746_v1  ;;  %v9943_v3 = vld [vmem:[%s13366_s27 + $0x10] sm:$0xff]  ;;  %v9948_v4 = vld [vmem:[%s13366_s27 + $0x18] sm:$0xff] }
  0x12   :  { %94 = vst.msk [vmem:[#allocation2 + $0x68] sm:$0x3] %vm81_vm1, %v9746_v1  ;;  %96 = vst.msk [vmem:[#allocation2 + $0x78] sm:$0x3] %vm81_vm1, %v9746_v1  ;;  %v9961_v5 = vld [vmem:[%s13366_s27 + $0x20] sm:$0xff]  ;;  %v9966_v6 = vld [vmem:[%s13366_s27 + $0x28] sm:$0xff] }
  0x13   :  { %97 = vst.msk [vmem:[#allocation2 + $0x80] sm:$0xff] %vm79_vm0, %v9746_v1  ;;  %99 = vst.msk [vmem:[#allocation2 + $0x90] sm:$0xff] %vm79_vm0, %v9746_v1  ;;  %v9971_v7 = vld [vmem:[%s13366_s27 + $0x30] sm:$0xff]  ;;  %v9982_v8 = vld [vmem:[%s13366_s27 + $0x38] sm:$0xff] }
  0x14   :  { %98 = vst.msk [vmem:[#allocation2 + $0x88] sm:$0x3] %vm81_vm1, %v9746_v1  ;;  %100 = vst.msk [vmem:[#allocation2 + $0x98] sm:$0x3] %vm81_vm1, %v9746_v1  ;;  %v9987_v9 = vld [vmem:[%s13366_s27 + $0x40] sm:$0xff]  ;;  %v9992_v10 = vld [vmem:[%s13366_s27 + $0x48] sm:$0xff] }
  0x15   :  { %101 = vst.msk [vmem:[#allocation2 + $0xa0] sm:$0xff] %vm79_vm0, %v9746_v1  ;;  %103 = vst.msk [vmem:[#allocation2 + $0xb0] sm:$0xff] %vm79_vm0, %v9746_v1  ;;  %v10003_v11 = vld [vmem:[%s13366_s27 + $0x50] sm:$0xff]  ;;  %v10008_v12 = vld [vmem:[%s13366_s27 + $0x58] sm:$0xff] }
  0x16   :  { %102 = vst.msk [vmem:[#allocation2 + $0xa8] sm:$0x3] %vm81_vm1, %v9746_v1  ;;  %104 = vst.msk [vmem:[#allocation2 + $0xb8] sm:$0x3] %vm81_vm1, %v9746_v1  ;;  %v10013_v13 = vld [vmem:[%s13366_s27 + $0x60] sm:$0xff]  ;;  %v10024_v14 = vld [vmem:[%s13366_s27 + $0x68] sm:$0xff] }
  0x17   :  { %105 = vst.msk [vmem:[#allocation2 + $0xc0] sm:$0xff] %vm79_vm0, %v9746_v1  ;;  %107 = vst.msk [vmem:[#allocation2 + $0xd0] sm:$0xff] %vm79_vm0, %v9746_v1  ;;  %v10029_v15 = vld [vmem:[%s13366_s27 + $0x70] sm:$0xff]  ;;  %v10034_v16 = vld [vmem:[%s13366_s27 + $0x78] sm:$0xff]  ;;  %s9747_s27 = smov 120  }
  0x18   :  { %106 = vst.msk [vmem:[#allocation2 + $0xc8] sm:$0x3] %vm81_vm1, %v9746_v1  ;;  %108 = vst.msk [vmem:[#allocation2 + $0xd8] sm:$0x3] %vm81_vm1, %v9746_v1  ;;  %v9525_v17 = vld [vmem:[%s13373_s0 + $0x40] sm:$0xff]   ;;  %v9527_v48 = vld [vmem:[%s13373_s0 + $0x48] sm:$0xff]  }
  0x19   :  { %109 = vst.msk [vmem:[#allocation2 + $0xe0] sm:$0xff] %vm79_vm0, %v9746_v1  ;;  %111 = vst.msk [vmem:[#allocation2 + $0xf0] sm:$0xff] %vm79_vm0, %v9746_v1  ;;  %v9526_v18 = vld [vmem:[%s13373_s0] sm:$0xff]   ;;  %8131 = vmatprep.subr.bf16.mxu0 %v9525_v17  ;;  %v9528_v52 = vld [vmem:[%s13373_s0 + $0x8] sm:$0xff]  }
  0x1a   :  { %110 = vst.msk [vmem:[#allocation2 + $0xe8] sm:$0x3] %vm81_vm1, %v9746_v1  ;;  %112 = vst.msk [vmem:[#allocation2 + $0xf8] sm:$0x3] %vm81_vm1, %v9746_v1  ;;  %v209_v19 = vld [vmem:[#allocation2 + $0x2] sm:$0xff]  ;;  %8132 = vmatpush3.bf16.msra.mxu0 %v9526_v18  ;;  %v9529_v56 = vld [vmem:[%s13373_s0 + $0x50] sm:$0xff]  }
  0x1b   :  { %113 = vst.msk [vmem:[#allocation2 + $0x100] sm:$0xff] %vm79_vm0, %v9746_v1  ;;  %115 = vst.msk [vmem:[#allocation2 + $0x110] sm:$0xff] %vm79_vm0, %v9746_v1  ;;  %v185_v20 = vld [vmem:[#allocation2 + $0x1] sm:$0xff]  ;;  %8133 = vmatprep.subr.bf16.mxu0 %v9527_v48  ;;  %v9530_v57 = vld [vmem:[%s13373_s0 + $0x10] sm:$0xff]  }
  0x1c   :  { %114 = vst.msk [vmem:[#allocation2 + $0x108] sm:$0x3] %vm81_vm1, %v9746_v1  ;;  %116 = vst.msk [vmem:[#allocation2 + $0x118] sm:$0x3] %vm81_vm1, %v9746_v1  ;;  %v9531_v58 = vld [vmem:[%s13373_s0 + $0x58] sm:$0xff]   ;;  %v9533_v17 = vld [vmem:[%s13373_s0 + $0x60] sm:$0xff]  }
  0x1d   :  { %117 = vst.msk [vmem:[#allocation2 + $0x120] sm:$0xff] %vm79_vm0, %v9746_v1  ;;  %119 = vst.msk [vmem:[#allocation2 + $0x130] sm:$0xff] %vm79_vm0, %v9746_v1  ;;  %v9532_v63 = vld [vmem:[%s13373_s0 + $0x18] sm:$0xff]  }
  0x1e   :  { %118 = vst.msk [vmem:[#allocation2 + $0x128] sm:$0x3] %vm81_vm1, %v9746_v1  ;;  %120 = vst.msk [vmem:[#allocation2 + $0x138] sm:$0x3] %vm81_vm1, %v9746_v1  ;;  %8134 = vmatpush3.bf16.msra.mxu0 %v9528_v52  ;;  %v217_v1 = vld [vmem:[#allocation2 + $0xa2] sm:$0xff] }
  0x1f   :  { %145 = vst.msk [vmem:[#allocation2 + $0x11] sm:$0xff] %vm79_vm0, %v9893_v0  ;;  %146 = vst.msk [vmem:[#allocation2 + $0x21] sm:$0xff] %vm79_vm0, %v9938_v2  ;;  %8135 = vmatprep.subr.bf16.mxu0 %v9529_v56  ;;  %v9542_v52 = vld [vmem:[%s13373_s0 + $0xc0] sm:$0xff]  }
  0x20   :  { %147 = vst.msk [vmem:[#allocation2 + $0x31] sm:$0xff] %vm79_vm0, %v9943_v3  ;;  %148 = vst.msk [vmem:[#allocation2 + $0x41] sm:$0xff] %vm79_vm0, %v9948_v4  ;;  %8195 = vmatprep.subr.bf16.mxu1 %v9542_v52 }
  0x21   :  { %149 = vst.msk [vmem:[#allocation2 + $0x51] sm:$0xff] %vm79_vm0, %v9961_v5  ;;  %150 = vst.msk [vmem:[#allocation2 + $0x61] sm:$0xff] %vm79_vm0, %v9966_v6 }
  0x22   :  { %151 = vst.msk [vmem:[#allocation2 + $0x71] sm:$0xff] %vm79_vm0, %v9971_v7  ;;  %152 = vst.msk [vmem:[#allocation2 + $0x81] sm:$0xff] %vm79_vm0, %v9982_v8  ;;  %8136 = vmatpush3.bf16.msra.mxu0 %v9530_v57 }
  0x23   :  { %153 = vst.msk [vmem:[#allocation2 + $0xb1] sm:$0xff] %vm79_vm0, %v9987_v9  ;;  %154 = vst.msk [vmem:[#allocation2 + $0xc1] sm:$0xff] %vm79_vm0, %v9992_v10  ;;  %8137 = vmatprep.subr.bf16.mxu0 %v9531_v58  ;;  %v9538_v58 = vld [vmem:[%s13373_s0 + $0x30] sm:$0xff]  }
  0x24   :  { %13367 = vst [vmem:[#allocation6_spill] sm:$0xff] %v10003_v11  ;;  %13368 = vst [vmem:[#allocation7_spill] sm:$0xff] %v10008_v12 }
  0x25   :  { %13369 = vst [vmem:[#allocation8_spill] sm:$0xff] %v10013_v13  ;;  %155 = vst.msk [vmem:[#allocation2 + $0xd1] sm:$0xff] %vm79_vm0, %v10003_v11 }
  0x26   :  { %156 = vst.msk [vmem:[#allocation2 + $0xe1] sm:$0xff] %vm79_vm0, %v10008_v12  ;;  %157 = vst.msk [vmem:[#allocation2 + $0xf1] sm:$0xff] %vm79_vm0, %v10013_v13  ;;  %v10048_v21 = vld [vmem:[#allocation2 + $0x12] sm:$0xff]  ;;  %v10053_v26 = vld [vmem:[#allocation2 + $0x20] sm:$0xff]  ;;  %8138 = vmatpush3.bf16.msra.mxu0 %v9532_v63 }
  0x27   :  { %13370 = vst [vmem:[#allocation9_spill] sm:$0xff] %v10024_v14  ;;  %13371 = vst [vmem:[#allocation10_spill] sm:$0xff] %v10029_v15  ;;  %v186_v22 = vld [vmem:[#allocation2 + $0x11] sm:$0xff]  ;;  %v225_v24 = vpack.c.bf16 %v10048_v21, %v209_v19  ;;  %v258_v27 = vld [vmem:[#allocation2 + $0x21] sm:$0xff]  ;;  %8139 = vmatprep.subr.bf16.mxu0 %v9533_v17 }
  0x28   :  { %13372 = vst [vmem:[#allocation11_spill] sm:$0xff] %v10034_v16  ;;  %158 = vst.msk [vmem:[#allocation2 + $0x101] sm:$0xff] %vm79_vm0, %v10024_v14  ;;  %v10050_v23 = vld [vmem:[#allocation2 + $0x10] sm:$0xff]  ;;  %v201_v25 = vpack.c.bf16 %v186_v22, %v185_v20  ;;  %v273_v29 = vpack.c.bf16 %v258_v27, %v186_v22  ;;  %v10059_v30 = vld [vmem:[#allocation2 + $0x22] sm:$0xff] }
  0x29   :  { %159 = vst.msk [vmem:[#allocation2 + $0x111] sm:$0xff] %vm79_vm0, %v10029_v15  ;;  %160 = vst.msk [vmem:[#allocation2 + $0x121] sm:$0xff] %vm79_vm0, %v10034_v16  ;;  %410 = vrot.lane.b32.xlu0 %v225_v24, %s9747_s27  ;;  %v249_v28 = vpack.c.bf16 %v10053_v26, %v10050_v23  ;;  %v10061_v31 = vld [vmem:[#allocation2 + $0x32] sm:$0xff]  ;;  %v10065_v33 = vld [vmem:[#allocation2 + $0x40] sm:$0xff] }
  0x2a   :  { %386 = vrot.lane.b32.xlu1 %v201_v25, %s9748_s3  ;;  %v10063_v32 = vld [vmem:[#allocation2 + $0x30] sm:$0xff]  ;;  %v10071_v34 = vpack.c.bf16 %v10061_v31, %v10059_v30  ;;  %v260_v37 = vld [vmem:[#allocation2 + $0x41] sm:$0xff] }
  0x2b   :  { %v250_v35 = vpack.c.bf16 %v10065_v33, %v10063_v32  ;;  %v188_v36 = vld [vmem:[#allocation2 + $0x31] sm:$0xff]  ;;  %v10080_v40 = vld [vmem:[#allocation2 + $0x42] sm:$0xff] }
  0x2c   :  { %v10078_v38 = vpack.c.bf16 %v188_v36, %v258_v27  ;;  %v274_v39 = vpack.c.bf16 %v260_v37, %v188_v36  ;;  %v10082_v41 = vld [vmem:[#allocation2 + $0x52] sm:$0xff]  ;;  %v10086_v43 = vld [vmem:[#allocation2 + $0x60] sm:$0xff]  ;;  %v9544_v63 = vld [vmem:[%s13373_s0 + $0xc8] sm:$0xff]  }
  0x2d   :  { %434 = vrot.lane.b32.xlu0 %v249_v28, %s9749_s25  ;;  %v10084_v42 = vld [vmem:[#allocation2 + $0x50] sm:$0xff]  ;;  %v10093_v44 = vpack.c.bf16 %v10082_v41, %v10080_v40  ;;  %v262_v47 = vld [vmem:[#allocation2 + $0x61] sm:$0xff] }
  0x2e   :  { %458 = vrot.lane.b32.xlu1 %v273_v29, %s9750_s8  ;;  %v251_v45 = vpack.c.bf16 %v10086_v43, %v10084_v42  ;;  %v190_v46 = vld [vmem:[#allocation2 + $0x51] sm:$0xff]  ;;  %v10100_v49 = vld [vmem:[#allocation2 + $0x62] sm:$0xff] }
  0x2f   :  { %v10102_v50 = vld [vmem:[#allocation2 + $0x72] sm:$0xff]  ;;  %v10112_v53 = vpack.c.bf16 %v190_v46, %v260_v37  ;;  %v275_v54 = vpack.c.bf16 %v262_v47, %v190_v46  ;;  %v10114_v55 = vld [vmem:[#allocation2 + $0x80] sm:$0xff]  ;;  %v9535_v28 = vld [vmem:[%s13373_s0 + $0x68] sm:$0xff]  }
  0x30   :  { %v10104_v51 = vld [vmem:[#allocation2 + $0x70] sm:$0xff]  ;;  %v10130_v59 = vpack.c.bf16 %v10102_v50, %v10100_v49  ;;  %v10134_v62 = vld [vmem:[#allocation2 + $0x81] sm:$0xff] }
  0x31   :  { %412 = vrot.lane.b32.xlu0 %v10071_v34, %s9747_s27  ;;  %v252_v60 = vpack.c.bf16 %v10114_v55, %v10104_v51  ;;  %v192_v61 = vld [vmem:[#allocation2 + $0x71] sm:$0xff]  ;;  %v10150_v24 = vld [vmem:[#allocation2 + $0xc0] sm:$0xff] }
  0x32   :  { %436 = vrot.lane.b32.xlu1 %v250_v35, %s9749_s25  ;;  %v10145_v18 = vpack.c.bf16 %v192_v61, %v262_v47  ;;  %v276_v19 = vpack.c.bf16 %v10134_v62, %v192_v61  ;;  %v10148_v20 = vld [vmem:[#allocation2 + $0xb2] sm:$0xff]  ;;  %v9534_v25 = vld [vmem:[%s13373_s0 + $0x20] sm:$0xff]  }
  0x33   :  { %v241_v22 = vld [vmem:[#allocation2 + $0xb0] sm:$0xff]  ;;  %v193_v27 = vld [vmem:[#allocation2 + $0xa1] sm:$0xff]  ;;  %v229_v29 = vpack.c.bf16 %v10148_v20, %v217_v1  ;;  %8140 = vmatpush3.bf16.msra.mxu0 %v9534_v25  ;;  %v9539_v61 = vld [vmem:[%s13373_s0 + $0x78] sm:$0xff]  }
  0x34   :  { %v253_v35 = vpack.c.bf16 %v10150_v24, %v241_v22  ;;  %v194_v36 = vld [vmem:[#allocation2 + $0xb1] sm:$0xff]  ;;  %v266_v37 = vld [vmem:[#allocation2 + $0xc1] sm:$0xff]  ;;  %8141 = vmatprep.subr.bf16.mxu0 %v9535_v28 }
  0x35   :  { %388 = vrot.lane.b32.xlu0 %v10078_v38, %s9748_s3  ;;  %v10169_v46 = vld [vmem:[#allocation2 + $0xc2] sm:$0xff]  ;;  %v10171_v47 = vld [vmem:[#allocation2 + $0xd2] sm:$0xff]  ;;  %v277_v56 = vpack.c.bf16 %v266_v37, %v194_v36 }
  0x36   :  { %460 = vrot.lane.b32.xlu1 %v274_v39, %s9750_s8  ;;  %v9536_v39 = vld [vmem:[%s13373_s0 + $0x28] sm:$0xff]   ;;  %v10173_v48 = vld [vmem:[#allocation2 + $0xd0] sm:$0xff]  ;;  %v10180_v57 = vld [vmem:[#allocation2 + $0xe0] sm:$0xff]  ;;  %v10204_v22 = vpack.c.bf16 %v10171_v47, %v10169_v46 }
  0x37   :  { %8142 = vmatpush3.bf16.msra.mxu0 %v9536_v39  ;;  %v9545_v1 = vld [vmem:[%s13373_s0 + $0x88] sm:$0xff]   ;;  %v196_v17 = vld [vmem:[#allocation2 + $0xd1] sm:$0xff]  ;;  %v254_v25 = vpack.c.bf16 %v10180_v57, %v10173_v48 }
  0x38   :  { %v9540_v28 = vld [vmem:[%s13373_s0 + $0x38] sm:$0xff]  }
  0x39   :  { %414 = vrot.lane.b32.xlu0 %v10093_v44, %s9747_s27  ;;  %v9548_v39 = vld [vmem:[%s13373_s0 + $0xd8] sm:$0xff]  }
  0x3a   :  { %438 = vrot.lane.b32.xlu1 %v251_v45, %s9749_s25  ;;  %v9537_v45 = vld [vmem:[%s13373_s0 + $0x70] sm:$0xff]  }
  0x3b   :  { %8143 = vmatprep.subr.bf16.mxu0 %v9537_v45  ;;  %v10227_v45 = vpack.c.bf16 %v196_v17, %v266_v37  ;;  %v9550_v37 = vld [vmem:[%s13373_s0 + $0xe0] sm:$0xff]  }
  0x3c   :  { %8144 = vmatpush3.bf16.msra.mxu0 %v9538_v58  ;;  %v10233_v58 = vld [vmem:[#allocation2 + $0x100] sm:$0xff] }
  0x3d   :  { %390 = vrot.lane.b32.xlu0 %v10112_v53, %s9748_s3  ;;  %8145 = vmatprep.subr.bf16.mxu0 %v9539_v61 }
  0x3e   :  { %462 = vrot.lane.b32.xlu1 %v275_v54, %s9750_s8  ;;  %v205_v54 = vpack.c.bf16 %v194_v36, %v193_v27  ;;  %v268_v27 = vld [vmem:[#allocation2 + $0xe1] sm:$0xff] }
  0x3f   :  { %v10219_v36 = vld [vmem:[#allocation2 + $0xe2] sm:$0xff]  ;;  %v278_v52 = vpack.c.bf16 %v268_v27, %v196_v17 }
  0x40   :  { %8146 = vmatpush3.bf16.msra.mxu0 %v9540_v28  ;;  %v270_v17 = vld [vmem:[#allocation2 + $0x101] sm:$0xff] }
  0x41   :  { %416 = vrot.lane.b32.xlu0 %v10130_v59, %s9747_s27 }
  0x42   :  { %440 = vrot.lane.b32.xlu1 %v252_v60, %s9749_s25  ;;  %v9543_v60 = vld [vmem:[%s13373_s0 + $0x80] sm:$0xff]  }
  0x43   :  { %8196 = vmatpush3.bf16.msra.mxu1 %v9543_v60  ;;  %v9549_v60 = vld [vmem:[%s13373_s0 + $0x98] sm:$0xff]  }
  0x44   :  { %8197 = vmatprep.subr.bf16.mxu1 %v9544_v63 }
  0x45   :  { %392 = vrot.lane.b32.xlu0 %v10145_v18, %s9748_s3 }
  0x46   :  { %464 = vrot.lane.b32.xlu1 %v276_v19, %s9750_s8  ;;  %v9546_v19 = vld [vmem:[%s13373_s0 + $0xd0] sm:$0xff]  }
  0x47   :  { %8198 = vmatpush3.bf16.msra.mxu1 %v9545_v1  ;;  %v198_v1 = vld [vmem:[#allocation2 + $0xf1] sm:$0xff] }
  0x48   :  { %8199 = vmatprep.subr.bf16.mxu1 %v9546_v19  ;;  %v9551_v19 = vld [vmem:[%s13373_s0 + $0xa0] sm:$0xff]   ;;  %v10260_v28 = vpack.c.bf16 %v198_v1, %v268_v27  ;;  %v10273_v27 = vpack.c.bf16 %v10063_v32, %v10053_v26  ;;  %v297_v26 = vpack.c.bf16 %v10059_v30, %v10048_v21 }
  0x49   :  { %418 = vrot.lane.b32.xlu0 %v229_v29, %s9747_s27  ;;  %v10214_v29 = vld [vmem:[%s13373_s0 + $0x100] sm:$0xff]  }
  0x4a   :  { %442 = vrot.lane.b32.xlu1 %v253_v35, %s9749_s25  ;;  %v9547_v35 = vld [vmem:[%s13373_s0 + $0x90] sm:$0xff]   ;;  %8931 = vmatprep.subr.bf16.mxu0 %v10214_v29  ;;  %v10293_v32 = vld [vmem:[#allocation2 + $0x120] sm:$0xff] }
  0x4b   :  { %8200 = vmatpush3.bf16.msra.mxu1 %v9547_v35  ;;  %v279_v35 = vpack.c.bf16 %v270_v17, %v198_v1  ;;  %v10283_v1 = vld [vmem:[#allocation2 + $0x112] sm:$0xff]  ;;  %v10305_v30 = vld [vmem:[#allocation2 + $0x121] sm:$0xff] }
  0x4c   :  { %8201 = vmatprep.subr.bf16.mxu1 %v9548_v39  ;;  %v9554_v39 = vld [vmem:[%s13373_s0 + $0xa8] sm:$0xff]  }
  0x4d   :  { %394 = vrot.lane.b32.xlu0 %v205_v54, %s9748_s3  ;;  %v10229_v54 = vld [vmem:[#allocation2 + $0xf2] sm:$0xff] }
  0x4e   :  { %466 = vrot.lane.b32.xlu1 %v277_v56, %s9750_s8  ;;  %v10231_v56 = vld [vmem:[#allocation2 + $0xf0] sm:$0xff]  ;;  %v10247_v61 = vpack.c.bf16 %v10229_v54, %v10219_v36 }
  0x4f   :  { %v255_v63 = vpack.c.bf16 %v10233_v58, %v10231_v56  ;;  %8202 = vmatpush3.bf16.msra.mxu1 %v9549_v60  ;;  %v9556_v60 = vld [vmem:[%s13373_s0 + $0xb0] sm:$0xff]  }
  0x50   :  { %8203 = vmatprep.subr.bf16.mxu1 %v9550_v37  ;;  %v9557_v37 = vld [vmem:[%s13373_s0 + $0xf8] sm:$0xff]  }
  0x51   :  { %420 = vrot.lane.b32.xlu0 %v10204_v22, %s9747_s27 }
  0x52   :  { %444 = vrot.lane.b32.xlu1 %v254_v25, %s9749_s25  ;;  %v9552_v25 = vld [vmem:[%s13373_s0 + $0xe8] sm:$0xff]  }
  0x53   :  { %8204 = vmatpush3.bf16.msra.mxu1 %v9551_v19  ;;  %v10285_v19 = vld [vmem:[#allocation2 + $0x110] sm:$0xff] }
  0x54   :  { %8205 = vmatprep.subr.bf16.mxu1 %v9552_v25  ;;  %v9558_v25 = vld [vmem:[%s13373_s0 + $0xb8] sm:$0xff]   ;;  %v256_v21 = vpack.c.bf16 %v10293_v32, %v10285_v19 }
  0x55   :  { %396 = vrot.lane.b32.xlu0 %v10227_v45, %s9748_s3 }
  0x56   :  { %468 = vrot.lane.b32.xlu1 %v278_v52, %s9750_s8  ;;  %v9555_v52 = vld [vmem:[%s13373_s0 + $0xf0] sm:$0xff]  }
  0x57   :  { %8206 = vmatpush3.bf16.msra.mxu1 %v9554_v39 }
  0x58   :  { %8207 = vmatprep.subr.bf16.mxu1 %v9555_v52 }
  0x59   :  { %422 = vrot.lane.b32.xlu0 %v10247_v61, %s9747_s27 }
  0x5a   :  { %446 = vrot.lane.b32.xlu1 %v255_v63, %s9749_s25  ;;  %v10281_v63 = vld [vmem:[#allocation2 + $0x102] sm:$0xff] }
  0x5b   :  { %8208 = vmatpush3.bf16.msra.mxu1 %v9556_v60  ;;  %v298_v60 = vpack.c.bf16 %v10080_v40, %v10061_v31  ;;  %v361_v31 = vld [vmem:[#allocation2 + $0x92] sm:$0xff] }
  0x5c   :  { %8209 = vmatprep.subr.bf16.mxu1 %v9557_v37  ;;  %v313_v40 = vld [vmem:[#allocation2 + $0x90] sm:$0xff]  ;;  %v9553_v37 = vld [vmem:[%s13373_s0 + $0x108] sm:$0x3f]  }
  0x5d   :  { %398 = vrot.lane.b32.xlu0 %v10260_v28, %s9748_s3 }
  0x5e   :  { %470 = vrot.lane.b32.xlu1 %v279_v35, %s9750_s8  ;;  %v200_v35 = vld [vmem:[#allocation2 + $0x111] sm:$0xff] }
  0x5f   :  { %8210 = vmatpush3.bf16.msra.mxu1 %v9558_v25  ;;  %v208_v39 = vpack.c.bf16 %v200_v35, %v270_v17  ;;  %v280_v52 = vpack.c.bf16 %v10305_v30, %v200_v35  ;;  %v10327_v17 = vpack.c.bf16 %v10104_v51, %v10086_v43  ;;  %v325_v43 = vpack.c.bf16 %v313_v40, %v10114_v55  ;;  %v337_v51 = vld [vmem:[#allocation2 + $0x91] sm:$0xff] }
  0x60   :  { %v10363_v55 = vpack.c.bf16 %v10231_v56, %v10180_v57 }
  0x61   :  { %506 = vrot.lane.b32.xlu0 %v10273_v27, %s9751_s4 }
  0x62   :  { %530 = vrot.lane.b32.xlu1 %v10078_v38, %s9752_s1  ;;  %v232_v38 = vpack.c.bf16 %v10283_v1, %v10281_v63 }
  0x65   :  { %482 = vrot.lane.b32.xlu0 %v297_v26, %s13304_s28 }
  0x66   :  { %554 = vrot.lane.b32.xlu1 %v10071_v34, %s13302_s6  ;;  %v10314_v34 = vpack.c.bf16 %v10084_v42, %v10065_v33  ;;  %v360_v33 = vld [vmem:[#allocation2 + $0x82] sm:$0xff]  ;;  %v299_v42 = vpack.c.bf16 %v10100_v49, %v10082_v41  ;;  %v10350_v49 = vpack.c.bf16 %v10173_v48, %v10150_v24  ;;  %v303_v24 = vpack.c.bf16 %v10281_v63, %v10229_v54  ;;  %v321_v48 = vld [vmem:[#allocation2 + $0x130] sm:$0xff] }
  0x67   :  { %v9563_v41 = vld [vmem:[%s13374_s7 + $0x40] sm:$0xff]   ;;  %v329_v56 = vpack.c.bf16 %v321_v48, %v10293_v32 }
  0x68   :  { %8269 = vmatprep.subr.bf16.mxu1 %v9563_v41 }
  0x69   :  { %424 = vrot.lane.b32.xlu0 %v232_v38, %s9747_s27 }
  0x6a   :  { %448 = vrot.lane.b32.xlu1 %v256_v21, %s9749_s25 }
  0x6d   :  { %400 = vrot.lane.b32.xlu0 %v208_v39, %s9748_s3 }
  0x6e   :  { %472 = vrot.lane.b32.xlu1 %v280_v52, %s9750_s8 }
  0x71   :  { %508 = vrot.lane.b32.xlu0 %v10314_v34, %s9751_s4 }
  0x72   :  { %532 = vrot.lane.b32.xlu1 %v10112_v53, %s9752_s1  ;;  %v349_v53 = vpack.c.bf16 %v337_v51, %v10134_v62  ;;  %v10376_v62 = vpack.c.bf16 %v10285_v19, %v10233_v58  ;;  %v345_v58 = vld [vmem:[#allocation2 + $0x131] sm:$0xff] }
  0x73   :  { %v353_v19 = vpack.c.bf16 %v345_v58, %v10305_v30 }
  0x75   :  { %484 = vrot.lane.b32.xlu0 %v298_v60, %s13304_s28 }
  0x76   :  { %556 = vrot.lane.b32.xlu1 %v10093_v44, %s13302_s6  ;;  %v373_v44 = vpack.c.bf16 %v361_v31, %v360_v33 }
  0x79   :  { %510 = vrot.lane.b32.xlu0 %v10327_v17, %s9751_s4 }
  0x7a   :  { %534 = vrot.lane.b32.xlu1 %v10145_v18, %s9752_s1  ;;  %v300_v18 = vpack.c.bf16 %v360_v33, %v10102_v50  ;;  %v301_v50 = vpack.c.bf16 %v10169_v46, %v10148_v20  ;;  %v161_v20 = vld [vmem:[#allocation2] sm:$0xff] }
  0x7b   :  { %v368_v46 = vld [vmem:[#allocation2 + $0x122] sm:$0xff] }
  0x7c   :  { %v304_v26 = vpack.c.bf16 %v368_v46, %v10283_v1  ;;  %v1050_v1 = vsel %vm1048_vm5, %v9553_v37, 0 }
  0x7d   :  { %486 = vrot.lane.b32.xlu0 %v299_v42, %s13304_s28 }
  0x7e   :  { %558 = vrot.lane.b32.xlu1 %v10130_v59, %s13302_s6  ;;  %v302_v59 = vpack.c.bf16 %v10219_v36, %v10171_v47  ;;  %v369_v47 = vld [vmem:[#allocation2 + $0x132] sm:$0xff]  ;;  %v177_v36 = vpack.c.bf16 %v10050_v23, %v161_v20  ;;  %v169_v20 = vld [vmem:[#allocation2 + $0xa0] sm:$0xff] }
  0x81   :  { %560 = vrot.lane.b32.xlu0 %v373_v44, %s13302_s6 }
  0x82   :  { %512 = vrot.lane.b32.xlu1 %v325_v43, %s9751_s4 }
  0x85   :  { %536 = vrot.lane.b32.xlu0 %v349_v53, %s9752_s1 }
  0x86   :  { %488 = vrot.lane.b32.xlu1 %v300_v18, %s13304_s28 }
  0x89   :  { %514 = vrot.lane.b32.xlu0 %v10350_v49, %s9751_s4 }
  0x8a   :  { %538 = vrot.lane.b32.xlu1 %v10227_v45, %s9752_s1  ;;  %v377_v45 = vpack.c.bf16 %v369_v47, %v368_v46 }
  0x8d   :  { %490 = vrot.lane.b32.xlu0 %v301_v50, %s13304_s28 }
  0x8e   :  { %562 = vrot.lane.b32.xlu1 %v10204_v22, %s13302_s6 }
  0x91   :  { %516 = vrot.lane.b32.xlu0 %v10363_v55, %s9751_s4 }
  0x92   :  { %540 = vrot.lane.b32.xlu1 %v10260_v28, %s9752_s1 }
  0x95   :  { %492 = vrot.lane.b32.xlu0 %v302_v59, %s13304_s28 }
  0x96   :  { %564 = vrot.lane.b32.xlu1 %v10247_v61, %s13302_s6 }
  0x99   :  { %518 = vrot.lane.b32.xlu0 %v10376_v62, %s9751_s4 }
  0x9a   :  { %542 = vrot.lane.b32.xlu1 %v208_v39, %s9752_s1 }
  0x9b   :  { %v411_v57 = vpop.permute.xlu0 %410 }
  0x9c   :  { %v387_v22 = vpop.permute.xlu1 %386 }
  0x9d   :  { %494 = vrot.lane.b32.xlu0 %v303_v24, %s13304_s28  ;;  %v572_v54 = vsel %vm79_vm0, %v177_v36, %v387_v22 }
  0x9e   :  { %566 = vrot.lane.b32.xlu1 %v232_v38, %s13302_s6  ;;  %v10404_v32 = vsel %vm13354_vm4, %v572_v54, %v411_v57  ;;  %v10410_v38 = vld [vmem:[%s13374_s7 + $0xc0] sm:$0xff]  }
  0x9f   :  { %v435_v61 = vpop.permute.xlu0 %434 }
  0xa0   :  { %v10388_v28 = vpop.permute.xlu1 %458  ;;  %v621_v23 = vsel %vm619_vm2, %v411_v57, %v435_v61  ;;  %v9721_v57 = vld [vmem:[#allocation2 + $0xb0] sm:$0xff] }
  0xa1   :  { %568 = vrot.lane.b32.xlu0 %v377_v45, %s13302_s6  ;;  %v10398_v63 = vsel %vm13355_vm3, %v621_v23, %v10388_v28  ;;  %v181_v22 = vpack.c.bf16 %v9721_v57, %v169_v20 }
  0xa2   :  { %520 = vrot.lane.b32.xlu1 %v329_v56, %s9751_s4  ;;  %1084 = vmatprep.mubr.bf16.mxu0 %v10398_v63 }
  0xa3   :  { %v413_v25 = vpop.permute.xlu0 %412  ;;  %1085 = vmatmul.mubr.bf16.vlgmr.msra.gmra.mrb[0].mxu0 %v10404_v32 }
  0xa4   :  { %v437_v35 = vpop.permute.xlu1 %436  ;;  %8932 = vmatpush3.bf16.msra.mxu0 %v10214_v29 }
  0xa5   :  { %544 = vrot.lane.b32.xlu0 %v353_v19, %s9752_s1  ;;  %9491 = vmatprep.subr.msk.bf16.mxu0 %vm1048_vm5, %v9553_v37  ;;  %v623_v21 = vsel %vm619_vm2, %v413_v25, %v437_v35 }
  0xa6   :  { %496 = vrot.lane.b32.xlu1 %v304_v26, %s13304_s28 }
  0xa7   :  { %v389_v30 = vpop.permute.xlu0 %388 }
  0xa8   :  { %v10418_v39 = vpop.permute.xlu1 %460  ;;  %v575_v52 = vsel %vm79_vm0, %v10273_v27, %v389_v30  ;;  %8934 = vmatpush3.bf16.msra.mxu0 %v1050_v1 }
  0xa9   :  { %v10424_v60 = vsel %vm13355_vm3, %v623_v21, %v10418_v39  ;;  %v10428_v29 = vsel %vm13354_vm4, %v575_v52, %v413_v25  ;;  %8333 = vmatprep.subr.bf16.mxu0 %v10410_v38 }
  0xaa   :  { %1092 = vmatprep.mubr.bf16.mxu0 %v10424_v60 }
  0xab   :  { %v415_v33 = vpop.permute.xlu0 %414  ;;  %1093 = vmatmul.mubr.bf16.gmra.mrb[4].mxu0 %v10428_v29 }
  0xac   :  { %v439_v42 = vpop.permute.xlu1 %438 }
  0xad   :  { %v625_v31 = vsel %vm619_vm2, %v415_v33, %v439_v42 }
  0xaf   :  { %v391_v40 = vpop.permute.xlu0 %390 }
  0xb0   :  { %v10433_v27 = vpop.permute.xlu1 %462  ;;  %v578_v44 = vsel %vm79_vm0, %v10314_v34, %v391_v40 }
  0xb1   :  { %v10439_v43 = vsel %vm13355_vm3, %v625_v31, %v10433_v27  ;;  %v10443_v51 = vsel %vm13354_vm4, %v578_v44, %v415_v33 }
  0xb2   :  { %1100 = vmatprep.mubr.bf16.mxu0 %v10439_v43 }
  0xb3   :  { %v417_v53 = vpop.permute.xlu0 %416  ;;  %1101 = vmatmul.mubr.bf16.gmra.mrb[8].mxu0 %v10443_v51 }
  0xb4   :  { %v441_v18 = vpop.permute.xlu1 %440 }
  0xb5   :  { %v627_v41 = vsel %vm619_vm2, %v417_v53, %v441_v18 }
  0xb7   :  { %v393_v50 = vpop.permute.xlu0 %392 }
  0xb8   :  { %v10447_v59 = vpop.permute.xlu1 %464  ;;  %v581_v34 = vsel %vm79_vm0, %v10327_v17, %v393_v50 }
  0xb9   :  { %v10453_v24 = vsel %vm13355_vm3, %v627_v41, %v10447_v59  ;;  %v10457_v46 = vsel %vm13354_vm4, %v581_v34, %v417_v53 }
  0xba   :  { %1108 = vmatprep.mubr.bf16.mxu0 %v10453_v24 }
  0xbb   :  { %v419_v47 = vpop.permute.xlu0 %418  ;;  %1109 = vmatmul.mubr.bf16.gmra.mrb[12].mxu0 %v10457_v46 }
  0xbc   :  { %v443_v48 = vpop.permute.xlu1 %442 }
  0xbd   :  { %v629_v36 = vsel %vm619_vm2, %v419_v47, %v443_v48 }
  0xbf   :  { %v395_v45 = vpop.permute.xlu0 %394 }
  0xc0   :  { %v10461_v56 = vpop.permute.xlu1 %466  ;;  %v584_v17 = vsel %vm79_vm0, %v181_v22, %v395_v45 }
  0xc1   :  { %v10466_v58 = vsel %vm13355_vm3, %v629_v36, %v10461_v56  ;;  %v10470_v54 = vsel %vm13354_vm4, %v584_v17, %v419_v47 }
  0xc2   :  { %1116 = vmatprep.mubr.bf16.mxu0 %v10466_v58 }
  0xc3   :  { %v421_v61 = vpop.permute.xlu0 %420  ;;  %1117 = vmatmul.mubr.bf16.gmra.mrb[16].mxu0 %v10470_v54 }
  0xc4   :  { %v445_v37 = vpop.permute.xlu1 %444 }
  0xc5   :  { %v631_v23 = vsel %vm619_vm2, %v421_v61, %v445_v37 }
  0xc7   :  { %v397_v19 = vpop.permute.xlu0 %396 }
  0xc8   :  { %v10474_v26 = vpop.permute.xlu1 %468  ;;  %v587_v25 = vsel %vm79_vm0, %v10350_v49, %v397_v19 }
  0xc9   :  { %v10480_v35 = vsel %vm13355_vm3, %v631_v23, %v10474_v26  ;;  %v10484_v1 = vsel %vm13354_vm4, %v587_v25, %v421_v61 }
  0xca   :  { %1124 = vmatprep.mubr.bf16.mxu0 %v10480_v35 }
  0xcb   :  { %v423_v21 = vpop.permute.xlu0 %422  ;;  %1125 = vmatmul.mubr.bf16.gmra.mrb[20].mxu0 %v10484_v1 }
  0xcc   :  { %v447_v30 = vpop.permute.xlu1 %446 }
  0xcd   :  { %v633_v52 = vsel %vm619_vm2, %v423_v21, %v447_v30 }
  0xcf   :  { %v399_v49 = vpop.permute.xlu0 %398 }
  0xd0   :  { %v10488_v33 = vpop.permute.xlu1 %470  ;;  %v590_v42 = vsel %vm79_vm0, %v10363_v55, %v399_v49  ;;  %v9564_v55 = vld [vmem:[%s13374_s7] sm:$0xff]  }
  0xd1   :  { %v10494_v31 = vsel %vm13355_vm3, %v633_v52, %v10488_v33  ;;  %v10498_v40 = vsel %vm13354_vm4, %v590_v42, %v423_v21 }
  0xd2   :  { %1132 = vmatprep.mubr.bf16.mxu0 %v10494_v31 }
  0xd3   :  { %v507_v44 = vpop.permute.xlu0 %506  ;;  %1133 = vmatmul.mubr.bf16.gmra.mrb[24].mxu0 %v10498_v40 }
  0xd4   :  { %v531_v53 = vpop.permute.xlu1 %530 }
  0xd5   :  { %v705_v18 = vsel %vm13328_vm6, %v507_v44, %v531_v53 }
  0xd7   :  { %v483_v41 = vpop.permute.xlu0 %482 }
  0xd8   :  { %v10502_v50 = vpop.permute.xlu1 %554 }
  0xd9   :  { %13375 = vst [vmem:[#allocation12_spill] sm:$0xff] %v10502_v50 }
  0xda   :  { %29 = vsyncpa [#allocation4], 0  ;;  %v663_v20 = vsel %vm13356_vm7, %v10388_v28, %v483_v41  ;;  %v10511_v34 = vsel %vm13327_vm8, %v705_v18, %v10502_v50  ;;  %v9567_v47 = vld [vmem:[%s13374_s7 + $0x48] sm:$0xff]   ;;  %v9571_v36 = vld [vmem:[%s13374_s7 + $0x50] sm:$0xff]   ;;  %vm13325_vm10 = vcmask 228352   ;;  %s13382_s30 = sld [smem:[#allocation25_spill]] }
  0xdb   :  { %1181 = vmatprep.mubr.bf16.mxu1 %v10511_v34  ;;  %v10518_v48 = vsel %vm13326_vm9, %v663_v20, %v507_v44  ;;  %v425_v57 = vpop.permute.xlu0 %424  ;;  %v9568_v28 = vld [vmem:[%s13374_s7 + $0x8] sm:$0xff]   ;;  %v9572_v37 = vld [vmem:[%s13374_s7 + $0x10] sm:$0xff]   ;;  %v9575_v25 = vld [vmem:[%s13374_s7 + $0x58] sm:$0xff]   ;;  %vm2592_vm11 = vcmask 1043456   ;;  %s13383_s6 = sld [smem:[#allocation26_spill]]  ;;  %s13397_s29 = sld [smem:[#allocation21_spill]] }
  0xdc   :  { %1182 = vmatmul.mubr.bf16.vlgmr.msra.gmra.mrb[0].mxu1 %v10518_v48  ;;  %v449_v22 = vpop.permute.xlu1 %448  ;;  %v9579_v49 = vld [vmem:[%s13374_s7 + $0x60] sm:$0xff]   ;;  %vm1383_vm12 = vcmask 64512   ;;  %s13339_s0 = smov 16   ;;  %s9757_s2 = smov 24   ;;  %vm1832_vm13 = vcmask 130048   ;;  %vm1849_vm14 = vcmask 195584  }
  0xdd   :  { %8270 = vmatpush3.bf16.msra.mxu1 %v9564_v55  ;;  %v635_v45 = vsel %vm619_vm2, %v425_v57, %v449_v22  ;;  %v10561_v18 = vld [vmem:[%s13374_s7 + $0x80] sm:$0xff]   ;;  %s13335_s5 = smov 40   ;;  %s13329_s28 = smov 64   ;;  %vm1866_vm15 = vcmask 261120   ;;  %vm1883_vm1 = vcmask 326656  }
  0xde   :  { %8271 = vmatprep.subr.bf16.mxu1 %v9567_v47  ;;  %v9580_v41 = vld [vmem:[%s13374_s7 + $0x20] sm:$0xff]   ;;  %v10575_v47 = vld [vmem:[%s13374_s7 + $0xc8] sm:$0xff]   ;;  %s13400_s26 = sld [smem:[#allocation24_spill]] }
  0xdf   :  { %v401_v17 = vpop.permute.xlu0 %400 }
  0xe0   :  { %v10528_v61 = vpop.permute.xlu1 %472  ;;  %v593_v23 = vsel %vm79_vm0, %v10376_v62, %v401_v17  ;;  %v9576_v62 = vld [vmem:[%s13374_s7 + $0x18] sm:$0xff]   ;;  %v10600_v17 = vld [vmem:[%s13374_s7 + $0xd0] sm:$0xff]  }
  0xe1   :  { %8272 = vmatpush3.bf16.msra.mxu1 %v9568_v28  ;;  %v10537_v19 = vsel %vm13355_vm3, %v635_v45, %v10528_v61  ;;  %v10544_v21 = vsel %vm13354_vm4, %v593_v23, %v425_v57  ;;  %v9583_v57 = vld [vmem:[%s13374_s7 + $0x68] sm:$0xff]   ;;  %v9587_v23 = vld [vmem:[%s13374_s7 + $0x70] sm:$0xff]  }
  0xe2   :  { %8273 = vmatprep.subr.bf16.mxu1 %v9571_v36  ;;  %1140 = vmatprep.mubr.bf16.mxu0 %v10537_v19  ;;  %13376 = vst [vmem:[#allocation13_spill] sm:$0xff] %v10544_v21  ;;  %v10591_v36 = vld [vmem:[%s13374_s7 + $0x88] sm:$0xff]  }
  0xe3   :  { %1141 = vmatmul.mubr.bf16.gmra.mrb[28].mxu0 %v10544_v21  ;;  %v509_v30 = vpop.permute.xlu0 %508  ;;  %v9584_v45 = vld [vmem:[%s13374_s7 + $0x28] sm:$0xff]  }
  0xe4   :  { %v533_v52 = vpop.permute.xlu1 %532  ;;  %8935 = vmatprep.mubr.msk.bf16.mxu0 %vm13325_vm10, %v10502_v50 }
  0xe5   :  { %8274 = vmatpush3.bf16.msra.mxu1 %v9572_v37  ;;  %v707_v42 = vsel %vm13328_vm6, %v509_v30, %v533_v52  ;;  %v10612_v52 = vld [vmem:[%s13374_s7 + $0x90] sm:$0xff]  }
  0xe6   :  { %8275 = vmatprep.subr.bf16.mxu1 %v9575_v25 }
  0xe7   :  { %v485_v44 = vpop.permute.xlu0 %484 }
  0xe8   :  { %v10556_v53 = vpop.permute.xlu1 %556  ;;  %v665_v55 = vsel %vm13356_vm7, %v10418_v39, %v485_v44  ;;  %v10629_v44 = vld [vmem:[%s13374_s7 + $0xd8] sm:$0xff]  }
  0xe9   :  { %13377 = vst [vmem:[#allocation14_spill] sm:$0xff] %v10556_v53  ;;  %8276 = vmatpush3.bf16.msra.mxu1 %v9576_v62  ;;  %v10570_v20 = vsel %vm13327_vm8, %v707_v42, %v10556_v53  ;;  %v10582_v22 = vsel %vm13326_vm9, %v665_v55, %v509_v30  ;;  %v9588_v62 = vld [vmem:[%s13374_s7 + $0x30] sm:$0xff]  }
  0xea   :  { %8277 = vmatprep.subr.bf16.mxu1 %v9579_v49  ;;  %1189 = vmatprep.mubr.bf16.mxu1 %v10570_v20 }
  0xeb   :  { %1190 = vmatmul.mubr.bf16.gmra.mrb[4].mxu1 %v10582_v22  ;;  %8936 = vmatmul.mubr.msk.bf16.vlgmr.msra.gmra.mrb[32].mxu0 %vm13325_vm10, %v10556_v53  ;;  %v511_v39 = vpop.permute.xlu0 %510 }
  0xec   :  { %v535_v28 = vpop.permute.xlu1 %534  ;;  %8334 = vmatpush3.bf16.msra.mxu0 %v10561_v18 }
  0xed   :  { %8278 = vmatpush3.bf16.msra.mxu1 %v9580_v41  ;;  %8335 = vmatprep.subr.bf16.mxu0 %v10575_v47  ;;  %v709_v37 = vsel %vm13328_vm6, %v511_v39, %v535_v28  ;;  %v10645_v28 = vld [vmem:[%s13374_s7 + $0x98] sm:$0xff]  }
  0xee   :  { %8279 = vmatprep.subr.bf16.mxu1 %v9583_v57 }
  0xef   :  { %v487_v25 = vpop.permute.xlu0 %486 }
  0xf0   :  { %v10606_v30 = vpop.permute.xlu1 %558  ;;  %8336 = vmatpush3.bf16.msra.mxu0 %v10591_v36  ;;  %v667_v49 = vsel %vm13356_vm7, %v10433_v27, %v487_v25  ;;  %v9589_v27 = vld [vmem:[%s13374_s7 + $0x78] sm:$0xff]   ;;  %v10662_v25 = vld [vmem:[%s13374_s7 + $0xa0] sm:$0xff]  }
  0xf1   :  { %13378 = vst [vmem:[#allocation15_spill] sm:$0xff] %v10606_v30  ;;  %8280 = vmatpush3.bf16.msra.mxu1 %v9584_v45  ;;  %v10621_v42 = vsel %vm13327_vm8, %v709_v37, %v10606_v30  ;;  %8939 = vmatprep.mubr.msk.bf16.mxu0 %vm13325_vm10, %v10606_v30  ;;  %v10633_v41 = vsel %vm13326_vm9, %v667_v49, %v511_v39  ;;  %v9590_v39 = vld [vmem:[%s13374_s7 + $0x38] sm:$0xff]   ;;  %v10656_v45 = vld [vmem:[%s13374_s7 + $0xe0] sm:$0xff]  }
  0xf2   :  { %8337 = vmatprep.subr.bf16.mxu0 %v10600_v17  ;;  %1197 = vmatprep.mubr.bf16.mxu1 %v10621_v42 }
  0xf3   :  { %8281 = vmatprep.subr.bf16.mxu1 %v9587_v23  ;;  %1198 = vmatmul.mubr.bf16.gmra.mrb[8].mxu1 %v10633_v41  ;;  %v10639_v55 = vpop.permute.xlu0 %560 }
  0xf4   :  { %13379 = vst [vmem:[#allocation16_spill] sm:$0xff] %v10639_v55  ;;  %v513_v57 = vpop.permute.xlu1 %512  ;;  %8338 = vmatpush3.bf16.msra.mxu0 %v10612_v52 }
  0xf5   :  { %8282 = vmatpush3.bf16.msra.mxu1 %v9588_v62  ;;  %8940 = vmatmul.mubr.msk.bf16.gmra.mrb[36].mxu0 %vm13325_vm10, %v10639_v55 }
  0xf6   :  { %8339 = vmatprep.subr.bf16.mxu0 %v10629_v44  ;;  %8283 = vmatprep.subr.bf16.mxu1 %v9589_v27  ;;  %v10671_v27 = vld [vmem:[%s13374_s7 + $0xe8] sm:$0xff]  }
  0xf7   :  { %v537_v37 = vpop.permute.xlu0 %536 }
  0xf8   :  { %v489_v23 = vpop.permute.xlu1 %488  ;;  %8340 = vmatpush3.bf16.msra.mxu0 %v10645_v28  ;;  %v711_v62 = vsel %vm13328_vm6, %v513_v57, %v537_v37 }
  0xf9   :  { %8284 = vmatpush3.bf16.msra.mxu1 %v9590_v39  ;;  %v669_v49 = vsel %vm13356_vm7, %v10447_v59, %v489_v23  ;;  %8341 = vmatprep.subr.bf16.mxu0 %v10656_v45  ;;  %v10676_v30 = vsel %vm13327_vm8, %v711_v62, %v10639_v55  ;;  %v10687_v23 = vld [vmem:[%s13374_s7 + $0xa8] sm:$0xff]   ;;  %v10702_v55 = vld [vmem:[%s13374_s7 + $0xb0] sm:$0xff]  }
  0xfa   :  { %9251 = vmatprep.subr.bf16.mxu1 %v10410_v38  ;;  %v10679_v39 = vsel %vm13326_vm9, %v669_v49, %v513_v57  ;;  %1205 = vmatprep.mubr.bf16.mxu1 %v10676_v30  ;;  %v10693_v38 = vld [vmem:[%s13374_s7 + $0xf0] sm:$0xff]  }
  0xfb   :  { %v515_v37 = vpop.permute.xlu0 %514  ;;  %1206 = vmatmul.mubr.bf16.gmra.mrb[12].mxu1 %v10679_v39 }
  0xfc   :  { %v539_v59 = vpop.permute.xlu1 %538  ;;  %8342 = vmatpush3.bf16.msra.mxu0 %v10662_v25 }
  0xfd   :  { %8343 = vmatprep.subr.bf16.mxu0 %v10671_v27  ;;  %v713_v57 = vsel %vm13328_vm6, %v515_v37, %v539_v59  ;;  %v10716_v59 = vld [vmem:[%s13374_s7 + $0xf8] sm:$0xff]  }
  0xff   :  { %v491_v62 = vpop.permute.xlu0 %490 }
 0x100   :  { %v10696_v49 = vpop.permute.xlu1 %562  ;;  %8344 = vmatpush3.bf16.msra.mxu0 %v10687_v23  ;;  %v671_v53 = vsel %vm13356_vm7, %v10461_v56, %v491_v62  ;;  %v10727_v62 = vld [vmem:[%s13374_s7 + $0xb8] sm:$0xff]  }
 0x101   :  { %13380 = vst [vmem:[#allocation17_spill] sm:$0xff] %v10696_v49  ;;  %v10708_v50 = vsel %vm13327_vm8, %v713_v57, %v10696_v49  ;;  %8943 = vmatprep.mubr.msk.bf16.mxu0 %vm13325_vm10, %v10696_v49  ;;  %8345 = vmatprep.subr.bf16.mxu0 %v10693_v38  ;;  %v10720_v16 = vsel %vm13326_vm9, %v671_v53, %v515_v37 }
 0x102   :  { %1213 = vmatprep.mubr.bf16.mxu1 %v10708_v50 }
 0x103   :  { %v517_v56 = vpop.permute.xlu0 %516  ;;  %1214 = vmatmul.mubr.bf16.gmra.mrb[16].mxu1 %v10720_v16 }
 0x104   :  { %v541_v57 = vpop.permute.xlu1 %540  ;;  %8346 = vmatpush3.bf16.msra.mxu0 %v10702_v55 }
 0x105   :  { %8347 = vmatprep.subr.bf16.mxu0 %v10716_v59  ;;  %v715_v49 = vsel %vm13328_vm6, %v517_v56, %v541_v57 }
 0x107   :  { %v493_v15 = vpop.permute.xlu0 %492 }
 0x108   :  { %v10731_v21 = vpop.permute.xlu1 %564  ;;  %8348 = vmatpush3.bf16.msra.mxu0 %v10727_v62  ;;  %v673_v53 = vsel %vm13356_vm7, %v10474_v26, %v493_v15 }
 0x109   :  { %8944 = vmatmul.mubr.msk.bf16.gmra.mrb[40].mxu0 %vm13325_vm10, %v10731_v21  ;;  %v10740_v37 = vsel %vm13327_vm8, %v715_v49, %v10731_v21  ;;  %v10744_v14 = vsel %vm13326_vm9, %v673_v53, %v517_v56 }
 0x10a   :  { %1221 = vmatprep.mubr.bf16.mxu1 %v10740_v37 }
 0x10b   :  { %v519_v57 = vpop.permute.xlu0 %518  ;;  %1222 = vmatmul.mubr.bf16.gmra.mrb[20].mxu1 %v10744_v14 }
 0x10c   :  { %v543_v13 = vpop.permute.xlu1 %542 }
 0x10d   :  { %v717_v12 = vsel %vm13328_vm6, %v519_v57, %v543_v13 }
 0x10f   :  { %v495_v11 = vpop.permute.xlu0 %494 }
 0x110   :  { %v10748_v15 = vpop.permute.xlu1 %566  ;;  %v675_v26 = vsel %vm13356_vm7, %v10488_v33, %v495_v11 }
 0x111   :  { %13381 = vst [vmem:[#allocation18_spill] sm:$0xff] %v10748_v15  ;;  %v10754_v49 = vsel %vm13327_vm8, %v717_v12, %v10748_v15  ;;  %8947 = vmatprep.mubr.msk.bf16.mxu0 %vm13325_vm10, %v10748_v15  ;;  %v10760_v56 = vsel %vm13326_vm9, %v675_v26, %v519_v57 }
 0x112   :  { %1229 = vmatprep.mubr.bf16.mxu1 %v10754_v49 }
 0x113   :  { %v10762_v53 = vpop.permute.xlu0 %568  ;;  %1230 = vmatmul.mubr.bf16.gmra.mrb[24].mxu1 %v10760_v56 }
 0x114   :  { %v521_v13 = vpop.permute.xlu1 %520  ;;  %8948 = vmatmul.mubr.msk.bf16.gmra.mrb[44].mxu0 %vm13325_vm10, %v10762_v53 }
 0x115   :  { %2361 = vmatprep.mubr.bf16.mxu0 %v10511_v34  ;;  %v9593_v34 = vld [vmem:[%s13382_s30] sm:$0xff]  }
 0x116   :  { %8997 = vmatprep.subr.bf16.mxu0 %v9593_v34 }
 0x117   :  { %v545_v11 = vpop.permute.xlu0 %544 }
 0x118   :  { %v497_v12 = vpop.permute.xlu1 %496  ;;  %v719_v33 = vsel %vm13328_vm6, %v521_v13, %v545_v11  ;;  %vm13351_vm6 = vcmask 588800  }
 0x119   :  { %v677_v15 = vsel %vm13356_vm7, %v10528_v61, %v497_v12  ;;  %v10773_v57 = vsel %vm13327_vm8, %v719_v33, %v10762_v53  ;;  %v9594_v61 = vld [vmem:[%s13382_s30 + $0x8] sm:$0xff]   ;;  %vm13352_vm8 = vcmask 523264  }
 0x11a   :  { %v10776_v26 = vsel %vm13326_vm9, %v677_v15, %v521_v13  ;;  %1237 = vmatprep.mubr.bf16.mxu1 %v10773_v57  ;;  %v9595_v15 = vld [vmem:[%s13382_s30 + $0x10] sm:$0xff]   ;;  %vm13353_vm9 = vcmask 457728  }
 0x11b   :  { %1238 = vmatmul.mubr.bf16.gmra.mrb[28].mxu1 %v10776_v26 }
 0x11c   :  { %2264 = vmatprep.mubr.bf16.mxu1 %v10398_v63  ;;  %2362 = vmatmul.mubr.bf16.vlgmr.msra.gmra.mrb[48].mxu0 %v10518_v48  ;;  %v9596_v63 = vld [vmem:[%s13382_s30 + $0x18] sm:$0x3f]   ;;  %s9755_s30 = smov 8  }
 0x11d   :  { %2369 = vmatprep.mubr.bf16.mxu0 %v10570_v20  ;;  %8998 = vmatpush3.bf16.msra.mxu0 %v9593_v34  ;;  %v13388_v48 = vld [vmem:[#allocation13_spill] sm:$0xff] }
 0x11e   :  { %8999 = vmatprep.subr.bf16.mxu0 %v9594_v61 }
 0x121   :  { %9000 = vmatpush3.bf16.msra.mxu0 %v9594_v61 }
 0x122   :  { %9001 = vmatprep.subr.bf16.mxu0 %v9595_v15 }
 0x123   :  { %2265 = vmatmul.mubr.bf16.vlgmr.msra.gmra.mrb[32].mxu1 %v10404_v32  ;;  %v2796_v32 = vsel %vm1048_vm5, %v9596_v63, 0 }
 0x124   :  { %2272 = vmatprep.mubr.bf16.mxu1 %v10424_v60  ;;  %2370 = vmatmul.mubr.bf16.gmra.mrb[52].mxu0 %v10582_v22  ;;  %v9591_v60 = vld [vmem:[%s13374_s7 + $0x100] sm:$0xff]   ;;  %v13391_v22 = vld [vmem:[#allocation12_spill] sm:$0xff] }
 0x125   :  { %2377 = vmatprep.mubr.bf16.mxu0 %v10621_v42  ;;  %9259 = vmatpush3.bf16.msra.mxu1 %v10561_v18  ;;  %v13390_v18 = vld [vmem:[#allocation11_spill] sm:$0xff] }
 0x126   :  { %9252 = vmatprep.subr.bf16.mxu1 %v10575_v47  ;;  %9002 = vmatpush3.bf16.msra.mxu0 %v9595_v15 }
 0x127   :  { %9494 = vmatprep.subr.msk.bf16.mxu0 %vm1048_vm5, %v9596_v63 }
 0x129   :  { %9260 = vmatpush3.bf16.msra.mxu1 %v10591_v36  ;;  %v13392_v36 = vld [vmem:[#allocation14_spill] sm:$0xff] }
 0x12a   :  { %9253 = vmatprep.subr.bf16.mxu1 %v10600_v17  ;;  %9004 = vmatpush3.bf16.msra.mxu0 %v2796_v32  ;;  %v13393_v17 = vld [vmem:[#allocation15_spill] sm:$0xff] }
 0x12b   :  { %2273 = vmatmul.mubr.bf16.gmra.mrb[36].mxu1 %v10428_v29  ;;  %v745_v29 = vpack.c.bf16 %v9938_v2, %v9893_v0 }
 0x12c   :  { %2280 = vmatprep.mubr.bf16.mxu1 %v10439_v43  ;;  %2378 = vmatmul.mubr.bf16.gmra.mrb[56].mxu0 %v10633_v41  ;;  %v2911_v43 = vld [vmem:[%s13383_s6] sm:$0xf]  ;;  %s13398_s6 = sld [smem:[#allocation23_spill]] }
 0x12d   :  { %2385 = vmatprep.mubr.bf16.mxu0 %v10676_v30  ;;  %9261 = vmatpush3.bf16.msra.mxu1 %v10612_v52 }
 0x12e   :  { %9254 = vmatprep.subr.bf16.mxu1 %v10629_v44  ;;  %9495 = vmatprep.subr.msk.bf16.mxu0 %vm2592_vm11, %v2911_v43 }
 0x131   :  { %9262 = vmatpush3.bf16.msra.mxu1 %v10645_v28  ;;  %v13394_v28 = vld [vmem:[#allocation16_spill] sm:$0xff] }
 0x132   :  { %9255 = vmatprep.subr.bf16.mxu1 %v10656_v45  ;;  %v13395_v45 = vld [vmem:[#allocation17_spill] sm:$0xff] }
 0x133   :  { %2281 = vmatmul.mubr.bf16.gmra.mrb[40].mxu1 %v10443_v51  ;;  %v747_v51 = vpack.c.bf16 %v9966_v6, %v9961_v5 }
 0x134   :  { %2288 = vmatprep.mubr.bf16.mxu1 %v10453_v24  ;;  %2386 = vmatmul.mubr.bf16.gmra.mrb[60].mxu0 %v10679_v39  ;;  %v2937_v24 = vsel %vm2592_vm11, %v2911_v43, 0 }
 0x135   :  { %2393 = vmatprep.mubr.bf16.mxu0 %v10708_v50  ;;  %9263 = vmatpush3.bf16.msra.mxu1 %v10662_v25 }
 0x136   :  { %9256 = vmatprep.subr.bf16.mxu1 %v10671_v27 }
 0x139   :  { %9264 = vmatpush3.bf16.msra.mxu1 %v10687_v23 }
 0x13a   :  { %9257 = vmatprep.subr.bf16.mxu1 %v10693_v38 }
 0x13b   :  { %2289 = vmatmul.mubr.bf16.gmra.mrb[44].mxu1 %v10457_v46  ;;  %v749_v46 = vpack.c.bf16 %v9992_v10, %v9987_v9 }
 0x13c   :  { %2296 = vmatprep.mubr.bf16.mxu1 %v10466_v58  ;;  %2394 = vmatmul.mubr.bf16.gmra.mrb[64].mxu0 %v10720_v16  ;;  %v746_v16 = vpack.c.bf16 %v9948_v4, %v9943_v3  ;;  %v13384_v58 = vld [vmem:[#allocation6_spill] sm:$0xff] }
 0x13d   :  { %2401 = vmatprep.mubr.bf16.mxu0 %v10740_v37  ;;  %9265 = vmatpush3.bf16.msra.mxu1 %v10702_v55 }
 0x13e   :  { %9258 = vmatprep.subr.bf16.mxu1 %v10716_v59 }
 0x141   :  { %9266 = vmatpush3.bf16.msra.mxu1 %v10727_v62  ;;  %v13396_v62 = vld [vmem:[#allocation18_spill] sm:$0xff] }
 0x142   :  { %8951 = vmatprep.subr.bf16.mxu1 %v9591_v60 }
 0x143   :  { %2297 = vmatmul.mubr.bf16.gmra.mrb[48].mxu1 %v10470_v54  ;;  %v13385_v54 = vld [vmem:[#allocation7_spill] sm:$0xff] }
 0x144   :  { %2304 = vmatprep.mubr.bf16.mxu1 %v10480_v35  ;;  %2402 = vmatmul.mubr.bf16.gmra.mrb[68].mxu0 %v10744_v14  ;;  %v748_v14 = vpack.c.bf16 %v9982_v8, %v9971_v7  ;;  %v750_v35 = vpack.c.bf16 %v13385_v54, %v13384_v58 }
 0x145   :  { %9005 = vmatprep.mubr.msk.bf16.mxu0 %vm79_vm0, %v745_v29 }
 0x14b   :  { %2305 = vmatmul.mubr.bf16.gmra.mrb[52].mxu1 %v10484_v1  ;;  %v13386_v1 = vld [vmem:[#allocation8_spill] sm:$0xff] }
 0x14c   :  { %2312 = vmatprep.mubr.bf16.mxu1 %v10494_v31  ;;  %9006 = vmatmul.mubr.msk.bf16.vlgmr.msra.gmra.mrb[72].mxu0 %vm79_vm0, %v746_v16  ;;  %v13387_v31 = vld [vmem:[#allocation9_spill] sm:$0xff] }
 0x14d   :  { %9009 = vmatprep.mubr.msk.bf16.mxu0 %vm79_vm0, %v747_v51  ;;  %9022 = vmatpush3.bf16.msra.mxu0 %v2937_v24  ;;  %v751_v50 = vpack.c.bf16 %v13387_v31, %v13386_v1 }
 0x153   :  { %2313 = vmatmul.mubr.bf16.gmra.mrb[56].mxu1 %v10498_v40  ;;  %v9592_v40 = vld [vmem:[%s13374_s7 + $0x108] sm:$0x3f]   ;;  %s13333_s7 = smov 48  }
 0x154   :  { %2320 = vmatprep.mubr.bf16.mxu1 %v10537_v19  ;;  %9010 = vmatmul.mubr.msk.bf16.gmra.mrb[76].mxu0 %vm79_vm0, %v748_v14  ;;  %v13389_v19 = vld [vmem:[#allocation10_spill] sm:$0xff]  ;;  %v2230_v47 = vsel %vm1048_vm5, %v9592_v40, 0 }
 0x155   :  { %9013 = vmatprep.mubr.msk.bf16.mxu0 %vm79_vm0, %v749_v46  ;;  %v752_v20 = vpack.c.bf16 %v13390_v18, %v13389_v19 }
 0x15b   :  { %2321 = vmatmul.mubr.bf16.gmra.mrb[60].mxu1 %v13388_v48 }
 0x15c   :  { %2409 = vmatprep.mubr.bf16.mxu1 %v10754_v49  ;;  %9014 = vmatmul.mubr.msk.bf16.gmra.mrb[80].mxu0 %vm79_vm0, %v750_v35 }
 0x15d   :  { %9017 = vmatprep.mubr.msk.bf16.mxu0 %vm79_vm0, %v751_v50 }
 0x163   :  { %2410 = vmatmul.mubr.bf16.vlgmr.msra.gmra.mrb[64].mxu1 %v10760_v56 }
 0x164   :  { %2417 = vmatprep.mubr.bf16.mxu1 %v10773_v57  ;;  %8952 = vmatpush3.bf16.msra.mxu1 %v9591_v60 }
 0x165   :  { %9492 = vmatprep.subr.msk.bf16.mxu1 %vm1048_vm5, %v9592_v40  ;;  %9018 = vmatmul.mubr.msk.bf16.gmra.mrb[84].mxu0 %vm79_vm0, %v752_v20 }
 0x168   :  { %8954 = vmatpush3.bf16.msra.mxu1 %v2230_v47 }
 0x16b   :  { %2418 = vmatmul.mubr.bf16.gmra.mrb[68].mxu1 %v10776_v26 }
 0x16c   :  { %8955 = vmatprep.mubr.msk.bf16.mxu1 %vm13325_vm10, %v13391_v22 }
 0x173   :  { %8956 = vmatmul.mubr.msk.bf16.vlgmr.msra.gmra.mrb[72].mxu1 %vm13325_vm10, %v13392_v36 }
 0x174   :  { %8959 = vmatprep.mubr.msk.bf16.mxu1 %vm13325_vm10, %v13393_v17 }
 0x176   :  { %v8147_v30 = vpop.f32.mrb[0].mxu0 }
 0x177   :  { %v8148_v52 = vpop.f32.mrb[1].mxu0 }
 0x178   :  { %v8149_v42 = vadd.f32 %v8148_v52, %v8147_v30  ;;  %v8150_v44 = vpop.f32.mrb[2].mxu0 }
 0x179   :  { %v8151_v41 = vpop.f32.mrb[3].mxu0 }
 0x17a   :  { %v8152_v55 = vadd.f32 %v8151_v41, %v8150_v44 }
 0x17b   :  { %8960 = vmatmul.mubr.msk.bf16.gmra.mrb[76].mxu1 %vm13325_vm10, %v13394_v28 }
 0x17c   :  { %8963 = vmatprep.mubr.msk.bf16.mxu1 %vm13325_vm10, %v13395_v45 }
 0x17e   :  { %v8153_v25 = vpop.f32.mrb[4].mxu0 }
 0x17f   :  { %v8154_v27 = vpop.f32.mrb[5].mxu0 }
 0x180   :  { %v8155_v39 = vadd.f32 %v8154_v27, %v8153_v25  ;;  %v8156_v23 = vpop.f32.mrb[6].mxu0 }
 0x181   :  { %v8157_v38 = vpop.f32.mrb[7].mxu0 }
 0x182   :  { %v10887_v59 = vadd.f32 %v8157_v38, %v8156_v23 }
 0x183   :  { %8964 = vmatmul.mubr.msk.bf16.gmra.mrb[80].mxu1 %vm13325_vm10, %v10731_v21 }
 0x184   :  { %8967 = vmatprep.mubr.msk.bf16.mxu1 %vm13325_vm10, %v13396_v62 }
 0x186   :  { %v8159_v37 = vpop.f32.mrb[8].mxu0 }
 0x187   :  { %v8160_v49 = vpop.f32.mrb[9].mxu0 }
 0x188   :  { %v10893_v56 = vadd.f32 %v8160_v49, %v8159_v37  ;;  %v8162_v13 = vpop.f32.mrb[10].mxu0 }
 0x189   :  { %v8163_v11 = vpop.f32.mrb[11].mxu0 }
 0x18a   :  { %v10895_v12 = vadd.f32 %v8163_v11, %v8162_v13  ;;  %v10922_v13 = vld [vmem:[%s13397_s29] ss:$0 sm:$0xff]  ;;  %s13337_s29 = smov 32  }
 0x18b   :  { %8968 = vmatmul.mubr.msk.bf16.gmra.mrb[84].mxu1 %vm13325_vm10, %v10762_v53  ;;  %vm1900_vm10 = vcmask 392192  }
 0x18e   :  { %v8165_v33 = vpop.f32.mrb[12].mxu0 }
 0x18f   :  { %v8166_v57 = vpop.f32.mrb[13].mxu0 }
 0x190   :  { %v10899_v26 = vadd.f32 %v8166_v57, %v8165_v33  ;;  %v8168_v34 = vpop.f32.mrb[14].mxu0 }
 0x191   :  { %v8169_v21 = vpop.f32.mrb[15].mxu0 }
 0x192   :  { %v10901_v61 = vadd.f32 %v8169_v21, %v8168_v34 }
 0x196   :  { %v8171_v15 = vpop.f32.mrb[16].mxu0 }
 0x197   :  { %v8172_v63 = vpop.f32.mrb[17].mxu0 }
 0x198   :  { %v10903_v32 = vadd.f32 %v8172_v63, %v8171_v15  ;;  %v8174_v60 = vpop.f32.mrb[18].mxu0 }
 0x199   :  { %v8175_v29 = vpop.f32.mrb[19].mxu0 }
 0x19a   :  { %v10905_v16 = vadd.f32 %v8175_v29, %v8174_v60 }
 0x19e   :  { %v8177_v43 = vpop.f32.mrb[20].mxu0 }
 0x19f   :  { %v8178_v51 = vpop.f32.mrb[21].mxu0 }
 0x1a0   :  { %v10907_v24 = vadd.f32 %v8178_v51, %v8177_v43  ;;  %v8180_v53 = vpop.f32.mrb[22].mxu0 }
 0x1a1   :  { %v8181_v14 = vpop.f32.mrb[23].mxu0 }
 0x1a2   :  { %v10909_v46 = vadd.f32 %v8181_v14, %v8180_v53 }
 0x1a6   :  { %v8183_v35 = vpop.f32.mrb[24].mxu0 }
 0x1a7   :  { %v8184_v50 = vpop.f32.mrb[25].mxu0 }
 0x1a8   :  { %v10911_v48 = vadd.f32 %v8184_v50, %v8183_v35  ;;  %v8186_v40 = vpop.f32.mrb[26].mxu0 }
 0x1a9   :  { %v8187_v20 = vpop.f32.mrb[27].mxu0 }
 0x1aa   :  { %v10913_v47 = vadd.f32 %v8187_v20, %v8186_v40 }
 0x1af   :  { %v8211_v22 = vpop.f32.mrb[0].mxu1 }
 0x1b0   :  { %v8212_v36 = vpop.f32.mrb[1].mxu1 }
 0x1b1   :  { %v8213_v17 = vadd.f32 %v8212_v36, %v8211_v22  ;;  %v8214_v30 = vpop.f32.mrb[2].mxu1 }
 0x1b2   :  { %v8215_v52 = vpop.f32.mrb[3].mxu1 }
 0x1b3   :  { %v8216_v44 = vadd.f32 %v8215_v52, %v8214_v30  ;;  %v1184_v41 = vadd.f32 %v8213_v17, %v8149_v42 }
 0x1b5   :  { %v1187_v28 = vadd.f32 %v8216_v44, %v8152_v55 }
 0x1b6   :  { %v8189_v45 = vpop.f32.mrb[28].mxu0 }
 0x1b7   :  { %v8190_v25 = vpop.f32.mrb[29].mxu0 }
 0x1b8   :  { %v10915_v27 = vadd.f32 %v8190_v25, %v8189_v45  ;;  %v8192_v23 = vpop.f32.mrb[30].mxu0 }
 0x1b9   :  { %v8193_v38 = vpop.f32.mrb[31].mxu0 }
 0x1ba   :  { %v10917_v62 = vadd.f32 %v8193_v38, %v8192_v23 }
 0x1be   :  { %v8217_v37 = vpop.f32.mrb[4].mxu1  ;;  %v8937_v49 = vpop.f32.mrb[32].mxu0 }
 0x1bf   :  { %v8218_v11 = vpop.f32.mrb[5].mxu1  ;;  %v1280_v33 = vpop.f32.mrb[33].mxu0 }
 0x1c0   :  { %v8219_v57 = vadd.f32 %v8218_v11, %v8217_v37  ;;  %v1281_v42 = vadd.f32 %v1280_v33, %v1184_v41  ;;  %v8220_v55 = vpop.f32.mrb[6].mxu1  ;;  %v8938_v34 = vpop.f32.mrb[34].mxu0 }
 0x1c1   :  { %v8221_v21 = vpop.f32.mrb[7].mxu1  ;;  %v1283_v15 = vpop.f32.mrb[35].mxu0 }
 0x1c2   :  { %v1192_v63 = vadd.f32 %v8219_v57, %v8155_v39  ;;  %v1343_v60 = vadd.f32 %v10922_v13, %v1281_v42  ;;  %v8222_v29 = vadd.f32 %v8221_v21, %v8220_v55  ;;  %v1284_v43 = vadd.f32 %v1283_v15, %v1187_v28 }
 0x1c4   :  { %v1289_v51 = vadd.f32 %v8937_v49, %v1192_v63  ;;  %v1359_v53 = vmax.f32 %v1343_v60, 0.0  ;;  %v1195_v14 = vadd.f32 %v8222_v29, %v10887_v59  ;;  %v1344_v35 = vadd.f32 %v10922_v13, %v1284_v43  ;;  %v1424_v49 = vld [vmem:[#allocation2 + $0x1] sm:$0xff] }
 0x1c6   :  { %v1345_v50 = vadd.f32 %v10922_v13, %v1289_v51  ;;  %v1292_v40 = vadd.f32 %v8938_v34, %v1195_v14  ;;  %v1360_v20 = vmax.f32 %v1344_v35, 0.0  ;;  %v8223_v22 = vpop.f32.mrb[8].mxu1  ;;  %1384 = vst.msk [vmem:[#allocation2 + $0x11] sm:$0xff] %vm1383_vm12, %v1359_v53 }
 0x1c7   :  { %v8224_v36 = vpop.f32.mrb[9].mxu1 }
 0x1c8   :  { %v1361_v39 = vmax.f32 %v1345_v50, 0.0  ;;  %v1346_v17 = vadd.f32 %v10922_v13, %v1292_v40  ;;  %v1375_v30 = vpack.c.bf16 %v1360_v20, %v1359_v53  ;;  %v8225_v52 = vadd.f32 %v8224_v36, %v8223_v22  ;;  %v8226_v44 = vpop.f32.mrb[10].mxu1  ;;  %v8941_v41 = vpop.f32.mrb[36].mxu0  ;;  %1385 = vst.msk [vmem:[#allocation2 + $0x21] sm:$0xff] %vm1383_vm12, %v1360_v20 }
 0x1c9   :  { %v8227_v59 = vpop.f32.mrb[11].mxu1  ;;  %v1296_v28 = vpop.f32.mrb[37].mxu0 }
 0x1ca   :  { %v1362_v45 = vmax.f32 %v1346_v17, 0.0  ;;  %v8228_v25 = vadd.f32 %v8227_v59, %v8226_v44  ;;  %9023 = vmatprep.mubr.msk.bf16.mxu0 %vm1383_vm12, %v1375_v30  ;;  %1386 = vst.msk [vmem:[#allocation2 + $0x31] sm:$0xff] %vm1383_vm12, %v1361_v39  ;;  %v1200_v23 = vadd.f32 %v8225_v52, %v10893_v56  ;;  %v8942_v38 = vpop.f32.mrb[38].mxu0  ;;  %v1448_v56 = vld [vmem:[#allocation2 + $0x2] sm:$0xff] }
 0x1cb   :  { %v1299_v37 = vpop.f32.mrb[39].mxu0 }
 0x1cc   :  { %v1376_v11 = vpack.c.bf16 %v1362_v45, %v1361_v39  ;;  %1387 = vst.msk [vmem:[#allocation2 + $0x41] sm:$0xff] %vm1383_vm12, %v1362_v45  ;;  %v1297_v33 = vadd.f32 %v1296_v28, %v1200_v23  ;;  %v1203_v57 = vadd.f32 %v8228_v25, %v10895_v12  ;;  %v9597_v12 = vld [vmem:[%s13398_s6] sm:$0xff]   ;;  %v9598_v28 = vld [vmem:[%s13398_s6 + $0x8] sm:$0xff]  }
 0x1cd   :  { %v10936_v42 = vld [vmem:[#allocation2 + $0x11] sm:$0xff]  ;;  %8971 = vmatprep.subr.bf16.mxu1 %v9597_v12 }
 0x1ce   :  { %v1347_v55 = vadd.f32 %v10922_v13, %v1297_v33  ;;  %v1300_v34 = vadd.f32 %v1299_v37, %v1203_v57  ;;  %9024 = vmatmul.mubr.msk.bf16.vlgmr.msra.gmra.mrb[72].mxu0 %vm1383_vm12, %v1376_v11  ;;  %v1440_v21 = vpack.c.bf16 %v10936_v42, %v1424_v49  ;;  %v8229_v15 = vpop.f32.mrb[12].mxu1  ;;  %v10941_v63 = vld [vmem:[#allocation2 + $0x12] sm:$0xff]  ;;  %8972 = vmatpush3.bf16.msra.mxu1 %v9597_v12 }
 0x1cf   :  { %v8230_v43 = vpop.f32.mrb[13].mxu1  ;;  %v1464_v50 = vpack.c.bf16 %v10941_v63, %v1448_v56  ;;  %v10955_v39 = vld [vmem:[#allocation2 + $0x20] sm:$0xff]  ;;  %v10962_v44 = vld [vmem:[#allocation2 + $0x10] sm:$0xff]  ;;  %8973 = vmatprep.subr.bf16.mxu1 %v9598_v28 }
 0x1d0   :  { %v1363_v60 = vmax.f32 %v1347_v55, 0.0  ;;  %v1348_v29 = vadd.f32 %v10922_v13, %v1300_v34  ;;  %1624 = vrot.lane.b32.xlu0 %v1440_v21, %s9755_s30  ;;  %v8231_v51 = vadd.f32 %v8230_v43, %v8229_v15  ;;  %v8232_v53 = vpop.f32.mrb[14].mxu1  ;;  %v1488_v45 = vpack.c.bf16 %v10955_v39, %v10962_v44  ;;  %v1497_v37 = vld [vmem:[#allocation2 + $0x21] sm:$0xff]  ;;  %v9599_v56 = vld [vmem:[%s13398_s6 + $0x10] sm:$0xff]  }
 0x1d1   :  { %v8233_v35 = vpop.f32.mrb[15].mxu1  ;;  %v10951_v22 = vld [vmem:[#allocation2 + $0x30] sm:$0xff] }
 0x1d2   :  { %1388 = vst.msk [vmem:[#allocation2 + $0x51] sm:$0xff] %vm1383_vm12, %v1363_v60  ;;  %v1364_v14 = vmax.f32 %v1348_v29, 0.0  ;;  %v1208_v40 = vadd.f32 %v8231_v51, %v10899_v26  ;;  %v8234_v20 = vadd.f32 %v8233_v35, %v8232_v53  ;;  %v1498_v23 = vld [vmem:[#allocation2 + $0x31] sm:$0xff]  ;;  %8974 = vmatpush3.bf16.msra.mxu1 %v9598_v28  ;;  %v1521_v51 = vld [vmem:[#allocation2 + $0x22] sm:$0xff] }
 0x1d3   :  { %v10953_v36 = vld [vmem:[#allocation2 + $0x40] sm:$0xff]  ;;  %v1522_v12 = vld [vmem:[#allocation2 + $0x32] sm:$0xff]  ;;  %8975 = vmatprep.subr.bf16.mxu1 %v9599_v56 }
 0x1d4   :  { %v1377_v17 = vpack.c.bf16 %v1364_v14, %v1363_v60  ;;  %1389 = vst.msk [vmem:[#allocation2 + $0x61] sm:$0xff] %vm1383_vm12, %v1364_v14  ;;  %1648 = vrot.lane.b32.xlu0 %v1464_v50, %s13339_s0  ;;  %v1489_v30 = vpack.c.bf16 %v10953_v36, %v10951_v22  ;;  %v1305_v52 = vadd.f32 %v8941_v41, %v1208_v40  ;;  %v10964_v59 = vld [vmem:[#allocation2 + $0x41] sm:$0xff]  ;;  %v9600_v40 = vld [vmem:[%s13398_s6 + $0x18] sm:$0xff]  }
 0x1d5   :  { %v1211_v26 = vadd.f32 %v8234_v20, %v10901_v61  ;;  %v1513_v11 = vpack.c.bf16 %v10964_v59, %v1498_v23  ;;  %v10977_v21 = vld [vmem:[#allocation2 + $0x42] sm:$0xff] }
 0x1d6   :  { %1674 = vrot.lane.b32.xlu1 %v1489_v30, %s9757_s2  ;;  %9027 = vmatprep.mubr.msk.bf16.mxu0 %vm1383_vm12, %v1377_v17  ;;  %v1349_v41 = vadd.f32 %v10922_v13, %v1305_v52  ;;  %v8235_v61 = vpop.f32.mrb[16].mxu1  ;;  %v1537_v14 = vpack.c.bf16 %v10977_v21, %v1522_v12  ;;  %v1536_v17 = vpack.c.bf16 %v1521_v51, %v10941_v63 }
 0x1d7   :  { %v1308_v25 = vadd.f32 %v8942_v38, %v1211_v26  ;;  %v8236_v49 = vpop.f32.mrb[17].mxu1  ;;  %v1512_v38 = vpack.c.bf16 %v1497_v37, %v10936_v42  ;;  %8976 = vmatpush3.bf16.msra.mxu1 %v9599_v56 }
 0x1d8   :  { %1672 = vrot.lane.b32.xlu0 %v1488_v45, %s9757_s2  ;;  %v1365_v33 = vmax.f32 %v1349_v41, 0.0  ;;  %v8237_v55 = vadd.f32 %v8236_v49, %v8235_v61  ;;  %v8238_v34 = vpop.f32.mrb[18].mxu1  ;;  %8977 = vmatprep.subr.bf16.mxu1 %v9600_v40  ;;  %v1441_v45 = vpack.c.bf16 %v1498_v23, %v1497_v37  ;;  %v9601_v61 = vld [vmem:[%s13398_s6 + $0x20] ss:$0 sps:$4 sm:$0xff]   ;;  %s13331_s6 = smov 56  }
 0x1d9   :  { %v1350_v57 = vadd.f32 %v10922_v13, %v1308_v25  ;;  %v8239_v15 = vpop.f32.mrb[19].mxu1 }
 0x1da   :  { %1698 = vrot.lane.b32.xlu1 %v1513_v11, %s13337_s29  ;;  %1390 = vst.msk [vmem:[#allocation2 + $0x71] sm:$0xff] %vm1383_vm12, %v1365_v33  ;;  %v8240_v29 = vadd.f32 %v8239_v15, %v8238_v34  ;;  %v1216_v43 = vadd.f32 %v8237_v55, %v10903_v32  ;;  %v1465_v55 = vpack.c.bf16 %v1522_v12, %v1521_v51  ;;  %v2594_v34 = vsel %vm2592_vm11, %v9601_v61, 0 }
 0x1db   :  { %v1366_v60 = vmax.f32 %v1350_v57, 0.0  ;;  %8978 = vmatpush3.bf16.msra.mxu1 %v9600_v40 }
 0x1dc   :  { %v8945_v53 = vpop.f32.mrb[40].mxu0  ;;  %1696 = vrot.lane.b32.xlu0 %v1512_v38, %s13337_s29  ;;  %v1219_v35 = vadd.f32 %v8240_v29, %v10905_v16  ;;  %9493 = vmatprep.subr.msk.bf16.mxu1 %vm2592_vm11, %v9601_v61 }
 0x1dd   :  { %1391 = vst.msk [vmem:[#allocation2 + $0x81] sm:$0xff] %vm1383_vm12, %v1366_v60  ;;  %v1312_v42 = vpop.f32.mrb[41].mxu0  ;;  %v1378_v50 = vpack.c.bf16 %v1366_v60, %v1365_v33  ;;  %v11005_v33 = vpack.c.bf16 %v10951_v22, %v10955_v39  ;;  %v11014_v22 = vld [vmem:[#allocation2 + $0x50] sm:$0xff] }
 0x1de   :  { %v1313_v32 = vadd.f32 %v1312_v42, %v1216_v43  ;;  %v8946_v20 = vpop.f32.mrb[42].mxu0  ;;  %1722 = vrot.lane.b32.xlu1 %v1537_v14, %s13335_s5  ;;  %v8241_v30 = vpop.f32.mrb[20].mxu1 }
 0x1df   :  { %v1315_v52 = vpop.f32.mrb[43].mxu0  ;;  %9028 = vmatmul.mubr.msk.bf16.gmra.mrb[76].mxu0 %vm1383_vm12, %v1378_v50  ;;  %v8242_v28 = vpop.f32.mrb[21].mxu1  ;;  %8980 = vmatpush3.bf16.msra.mxu1 %v2594_v34 }
 0x1e0   :  { %v1351_v16 = vadd.f32 %v10922_v13, %v1313_v32  ;;  %v1316_v26 = vadd.f32 %v1315_v52, %v1219_v35  ;;  %1720 = vrot.lane.b32.xlu0 %v1536_v17, %s13335_s5  ;;  %v8243_v41 = vadd.f32 %v8242_v28, %v8241_v30  ;;  %v8244_v25 = vpop.f32.mrb[22].mxu1  ;;  %v11024_v35 = vld [vmem:[#allocation2 + $0x51] sm:$0xff] }
 0x1e1   :  { %v8245_v11 = vpop.f32.mrb[23].mxu1  ;;  %v1585_v30 = vpack.c.bf16 %v11024_v35, %v10964_v59  ;;  %v11034_v28 = vld [vmem:[#allocation2 + $0x52] sm:$0xff] }
 0x1e2   :  { %v1367_v63 = vmax.f32 %v1351_v16, 0.0  ;;  %v1352_v49 = vadd.f32 %v10922_v13, %v1316_v26  ;;  %1626 = vrot.lane.b32.xlu1 %v1441_v45, %s9755_s30  ;;  %v1224_v57 = vadd.f32 %v8243_v41, %v10907_v24  ;;  %v8246_v23 = vadd.f32 %v8245_v11, %v8244_v25 }
 0x1e3   :  { %v1609_v59 = vpack.c.bf16 %v11034_v28, %v10977_v21 }
 0x1e4   :  { %1392 = vst.msk [vmem:[#allocation2 + $0xb1] sm:$0xff] %vm1383_vm12, %v1367_v63  ;;  %v1368_v37 = vmax.f32 %v1352_v49, 0.0  ;;  %1744 = vrot.lane.b32.xlu0 %v11005_v33, %s13333_s7  ;;  %v1321_v15 = vadd.f32 %v8945_v53, %v1224_v57  ;;  %v1227_v38 = vadd.f32 %v8246_v23, %v10909_v46  ;;  %v1561_v46 = vpack.c.bf16 %v11014_v22, %v10953_v36  ;;  %v11043_v23 = vld [vmem:[#allocation2 + $0x80] sm:$0xff] }
 0x1e6   :  { %v1379_v24 = vpack.c.bf16 %v1368_v37, %v1367_v63  ;;  %1393 = vst.msk [vmem:[#allocation2 + $0xc1] sm:$0xff] %vm1383_vm12, %v1368_v37  ;;  %1650 = vrot.lane.b32.xlu1 %v1465_v55, %s13339_s0  ;;  %v1353_v39 = vadd.f32 %v10922_v13, %v1321_v15  ;;  %v1324_v56 = vadd.f32 %v8946_v20, %v1227_v38  ;;  %v8247_v60 = vpop.f32.mrb[24].mxu1 }
 0x1e7   :  { %v8248_v29 = vpop.f32.mrb[25].mxu1  ;;  %v8949_v43 = vpop.f32.mrb[44].mxu0 }
 0x1e8   :  { %1768 = vrot.lane.b32.xlu0 %v1441_v45, %s13331_s6  ;;  %9031 = vmatprep.mubr.msk.bf16.mxu0 %vm1383_vm12, %v1379_v24  ;;  %v1369_v12 = vmax.f32 %v1353_v39, 0.0  ;;  %v1354_v51 = vadd.f32 %v10922_v13, %v1324_v56  ;;  %v8249_v53 = vadd.f32 %v8248_v29, %v8247_v60  ;;  %v8250_v14 = vpop.f32.mrb[26].mxu1  ;;  %v1328_v42 = vpop.f32.mrb[45].mxu0  ;;  %v11048_v39 = vld [vmem:[#allocation2 + $0x70] sm:$0xff]  ;;  %v1477_v56 = vld [vmem:[#allocation2 + $0x60] sm:$0xff] }
 0x1e9   :  { %v8251_v50 = vpop.f32.mrb[27].mxu1  ;;  %v8950_v40 = vpop.f32.mrb[46].mxu0  ;;  %v1491_v29 = vpack.c.bf16 %v11043_v23, %v11048_v39 }
 0x1ea   :  { %1746 = vrot.lane.b32.xlu1 %v1561_v46, %s13333_s7  ;;  %1394 = vst.msk [vmem:[#allocation2 + $0xd1] sm:$0xff] %vm1383_vm12, %v1369_v12  ;;  %v1370_v32 = vmax.f32 %v1354_v51, 0.0  ;;  %v8252_v20 = vadd.f32 %v8251_v50, %v8250_v14  ;;  %v1232_v17 = vadd.f32 %v8249_v53, %v10911_v48  ;;  %v1331_v36 = vpop.f32.mrb[47].mxu0  ;;  %v11055_v53 = vld [vmem:[#allocation2 + $0x81] sm:$0xff] }
 0x1ec   :  { %1792 = vrot.lane.b32.xlu0 %v1465_v55, %s13329_s28  ;;  %1395 = vst.msk [vmem:[#allocation2 + $0xe1] sm:$0xff] %vm1383_vm12, %v1370_v32  ;;  %v1329_v52 = vadd.f32 %v1328_v42, %v1232_v17  ;;  %v1235_v16 = vadd.f32 %v8252_v20, %v10913_v47  ;;  %v1380_v26 = vpack.c.bf16 %v1370_v32, %v1369_v12  ;;  %v1502_v32 = vld [vmem:[#allocation2 + $0x71] sm:$0xff]  ;;  %v1501_v20 = vld [vmem:[#allocation2 + $0x61] sm:$0xff] }
 0x1ee   :  { %1770 = vrot.lane.b32.xlu1 %v1585_v30, %s13331_s6  ;;  %v1355_v45 = vadd.f32 %v10922_v13, %v1329_v52  ;;  %v1332_v48 = vadd.f32 %v1331_v36, %v1235_v16  ;;  %v8253_v41 = vpop.f32.mrb[28].mxu1  ;;  %9032 = vmatmul.mubr.msk.bf16.gmra.mrb[80].mxu0 %vm1383_vm12, %v1380_v26 }
 0x1ef   :  { %v8254_v25 = vpop.f32.mrb[29].mxu1  ;;  %v8349_v61 = vpop.f32.mrb[48].mxu0 }
 0x1f0   :  { %1628 = vrot.lane.b32.xlu0 %v1585_v30, %s9755_s30  ;;  %v1371_v63 = vmax.f32 %v1355_v45, 0.0  ;;  %v1356_v47 = vadd.f32 %v10922_v13, %v1332_v48  ;;  %v8255_v49 = vadd.f32 %v8254_v25, %v8253_v41  ;;  %v8256_v11 = vpop.f32.mrb[30].mxu1  ;;  %v8350_v57 = vpop.f32.mrb[49].mxu0  ;;  %v1527_v45 = vld [vmem:[#allocation2 + $0x82] sm:$0xff]  ;;  %v1514_v25 = vpack.c.bf16 %v1501_v20, %v11024_v35 }
 0x1f1   :  { %v8351_v37 = vadd.f32 %v8350_v57, %v8349_v61  ;;  %v8257_v55 = vpop.f32.mrb[31].mxu1  ;;  %v8352_v34 = vpop.f32.mrb[50].mxu0 }
 0x1f2   :  { %1794 = vrot.lane.b32.xlu1 %v1609_v59, %s13329_s28  ;;  %1396 = vst.msk [vmem:[#allocation2 + $0xf1] sm:$0xff] %vm1383_vm12, %v1371_v63  ;;  %v1372_v15 = vmax.f32 %v1356_v47, 0.0  ;;  %v1240_v38 = vadd.f32 %v8255_v49, %v10915_v27  ;;  %v8258_v24 = vadd.f32 %v8257_v55, %v8256_v11  ;;  %v8353_v21 = vpop.f32.mrb[51].mxu0  ;;  %v1490_v27 = vpack.c.bf16 %v1477_v56, %v11014_v22  ;;  %v1526_v49 = vld [vmem:[#allocation2 + $0x72] sm:$0xff] }
 0x1f3   :  { %v8354_v60 = vadd.f32 %v8353_v21, %v8352_v34  ;;  %v1539_v57 = vpack.c.bf16 %v1527_v45, %v1526_v49 }
 0x1f4   :  { %1652 = vrot.lane.b32.xlu0 %v1609_v59, %s13339_s0  ;;  %v1381_v46 = vpack.c.bf16 %v1372_v15, %v1371_v63  ;;  %1397 = vst.msk [vmem:[#allocation2 + $0x101] sm:$0xff] %vm1383_vm12, %v1372_v15  ;;  %v1337_v12 = vadd.f32 %v8949_v43, %v1240_v38  ;;  %v1243_v51 = vadd.f32 %v8258_v24, %v10917_v62  ;;  %v1551_v15 = vld [vmem:[#allocation2 + $0x90] sm:$0xff] }
 0x1f5   :  { %v1515_v62 = vpack.c.bf16 %v11055_v53, %v1502_v32  ;;  %v1563_v21 = vpack.c.bf16 %v1551_v15, %v11043_v23 }
 0x1f6   :  { %1678 = vrot.lane.b32.xlu1 %v1491_v29, %s9757_s2  ;;  %v1357_v14 = vadd.f32 %v10922_v13, %v1337_v12  ;;  %v1340_v42 = vadd.f32 %v8950_v40, %v1243_v51  ;;  %v8285_v50 = vpop.f32.mrb[32].mxu1  ;;  %9035 = vmatprep.mubr.msk.bf16.mxu0 %vm1383_vm12, %v1381_v46 }
 0x1f7   :  { %v8286_v17 = vpop.f32.mrb[33].mxu1  ;;  %v8355_v36 = vpop.f32.mrb[52].mxu0 }
 0x1f8   :  { %1676 = vrot.lane.b32.xlu0 %v1490_v27, %s9757_s2  ;;  %v1373_v43 = vmax.f32 %v1357_v14, 0.0  ;;  %v1358_v30 = vadd.f32 %v10922_v13, %v1340_v42  ;;  %v8287_v52 = vadd.f32 %v8286_v17, %v8285_v50  ;;  %v8288_v16 = vpop.f32.mrb[34].mxu1  ;;  %v8356_v26 = vpop.f32.mrb[53].mxu0  ;;  %v1525_v13 = vld [vmem:[#allocation2 + $0x62] sm:$0xff] }
 0x1f9   :  { %v8357_v48 = vadd.f32 %v8356_v26, %v8355_v36  ;;  %v8289_v40 = vpop.f32.mrb[35].mxu1  ;;  %v8358_v41 = vpop.f32.mrb[54].mxu0  ;;  %v1538_v35 = vpack.c.bf16 %v1525_v13, %v11034_v28  ;;  %v11080_v28 = vpack.c.bf16 %v11048_v39, %v1477_v56 }
 0x1fa   :  { %1702 = vrot.lane.b32.xlu1 %v1515_v62, %s13337_s29  ;;  %1398 = vst.msk [vmem:[#allocation2 + $0x111] sm:$0xff] %vm1383_vm12, %v1373_v43  ;;  %v1374_v61 = vmax.f32 %v1358_v30, 0.0  ;;  %v11067_v59 = vadd.f32 %v8351_v37, %v8287_v52  ;;  %v8290_v63 = vadd.f32 %v8289_v40, %v8288_v16  ;;  %v8359_v47 = vpop.f32.mrb[55].mxu0  ;;  %v1586_v30 = vpack.c.bf16 %v1502_v32, %v1501_v20  ;;  %v1432_v32 = vld [vmem:[#allocation2 + $0xa1] sm:$0xff]  ;;  %v1433_v20 = vld [vmem:[#allocation2 + $0xb1] sm:$0xff] }
 0x1fb   :  { %v8360_v11 = vadd.f32 %v8359_v47, %v8358_v41 }
 0x1fc   :  { %1700 = vrot.lane.b32.xlu0 %v1514_v25, %s13337_s29  ;;  %1399 = vst.msk [vmem:[#allocation2 + $0x121] sm:$0xff] %vm1383_vm12, %v1374_v61  ;;  %v11071_v55 = vadd.f32 %v8354_v60, %v8290_v63  ;;  %v1382_v34 = vpack.c.bf16 %v1374_v61, %v1373_v43  ;;  %v1575_v60 = vld [vmem:[#allocation2 + $0x91] sm:$0xff] }
 0x1fd   :  { %v1587_v23 = vpack.c.bf16 %v1575_v60, %v11055_v53  ;;  %v1599_v43 = vld [vmem:[#allocation2 + $0x92] sm:$0xff]  ;;  %v1610_v53 = vpack.c.bf16 %v1526_v49, %v1525_v13 }
 0x1fe   :  { %1726 = vrot.lane.b32.xlu1 %v1539_v57, %s13335_s5  ;;  %v8291_v37 = vpop.f32.mrb[36].mxu1  ;;  %9036 = vmatmul.mubr.msk.bf16.gmra.mrb[84].mxu0 %vm1383_vm12, %v1382_v34  ;;  %v1611_v56 = vpack.c.bf16 %v1599_v43, %v1527_v45  ;;  %v1444_v45 = vpack.c.bf16 %v1433_v20, %v1432_v32 }
 0x1ff   :  { %v8292_v38 = vpop.f32.mrb[37].mxu1  ;;  %v8361_v24 = vpop.f32.mrb[56].mxu0 }
 0x200   :  { %1724 = vrot.lane.b32.xlu0 %v1538_v35, %s13335_s5  ;;  %v8293_v29 = vadd.f32 %v8292_v38, %v8291_v37  ;;  %v8294_v46 = vpop.f32.mrb[38].mxu1  ;;  %v8362_v12 = vpop.f32.mrb[57].mxu0  ;;  %v1456_v35 = vld [vmem:[#allocation2 + $0xa2] sm:$0xff]  ;;  %v1457_v37 = vld [vmem:[#allocation2 + $0xb2] sm:$0xff] }
 0x201   :  { %v8363_v51 = vadd.f32 %v8362_v12, %v8361_v24  ;;  %v8295_v27 = vpop.f32.mrb[39].mxu1  ;;  %v8364_v14 = vpop.f32.mrb[58].mxu0 }
 0x202   :  { %1750 = vrot.lane.b32.xlu1 %v1563_v21, %s13333_s7  ;;  %v11082_v42 = vadd.f32 %v8357_v48, %v8293_v29  ;;  %v8296_v50 = vadd.f32 %v8295_v27, %v8294_v46  ;;  %v8365_v17 = vpop.f32.mrb[59].mxu0  ;;  %v11099_v29 = vld [vmem:[#allocation2 + $0xe0] sm:$0xff] }
 0x203   :  { %v8366_v36 = vadd.f32 %v8365_v17, %v8364_v14  ;;  %v1482_v17 = vld [vmem:[#allocation2 + $0xd0] sm:$0xff] }
 0x204   :  { %1748 = vrot.lane.b32.xlu0 %v11080_v28, %s13333_s7  ;;  %v11087_v62 = vadd.f32 %v8360_v11, %v8296_v50  ;;  %v1493_v43 = vpack.c.bf16 %v11099_v29, %v1482_v17 }
 0x206   :  { %1774 = vrot.lane.b32.xlu1 %v1587_v23, %s13331_s6  ;;  %v8297_v52 = vpop.f32.mrb[40].mxu1 }
 0x207   :  { %v8298_v16 = vpop.f32.mrb[41].mxu1  ;;  %v8367_v39 = vpop.f32.mrb[60].mxu0 }
 0x208   :  { %1772 = vrot.lane.b32.xlu0 %v1586_v30, %s13331_s6  ;;  %v8299_v26 = vadd.f32 %v8298_v16, %v8297_v52  ;;  %v8300_v48 = vpop.f32.mrb[42].mxu1  ;;  %v8368_v40 = vpop.f32.mrb[61].mxu0  ;;  %v11108_v52 = vld [vmem:[#allocation2 + $0xb0] sm:$0xff]  ;;  %v1507_v16 = vld [vmem:[#allocation2 + $0xe1] sm:$0xff] }
 0x209   :  { %v8369_v41 = vadd.f32 %v8368_v40, %v8367_v39  ;;  %v8301_v25 = vpop.f32.mrb[43].mxu1  ;;  %v8370_v61 = vpop.f32.mrb[62].mxu0 }
 0x20a   :  { %1798 = vrot.lane.b32.xlu1 %v1611_v56, %s13329_s28  ;;  %v11092_v63 = vadd.f32 %v8363_v51, %v8299_v26  ;;  %v8302_v47 = vadd.f32 %v8301_v25, %v8300_v48  ;;  %v8371_v11 = vpop.f32.mrb[63].mxu0  ;;  %v1468_v51 = vpack.c.bf16 %v1457_v37, %v1456_v35  ;;  %v1506_v26 = vld [vmem:[#allocation2 + $0xd1] sm:$0xff]  ;;  %v1505_v48 = vld [vmem:[#allocation2 + $0xc1] sm:$0xff] }
 0x20b   :  { %v8372_v57 = vadd.f32 %v8371_v11, %v8370_v61  ;;  %v1517_v25 = vpack.c.bf16 %v1507_v16, %v1506_v26  ;;  %v1531_v11 = vld [vmem:[#allocation2 + $0xe2] sm:$0xff] }
 0x20c   :  { %1796 = vrot.lane.b32.xlu0 %v1610_v53, %s13329_s28  ;;  %v11095_v34 = vadd.f32 %v8366_v36, %v8302_v47  ;;  %v1481_v36 = vld [vmem:[#allocation2 + $0xc0] sm:$0xff] }
 0x20d   :  { %v1492_v39 = vpack.c.bf16 %v1481_v36, %v11108_v52 }
 0x20e   :  { %1630 = vrot.lane.b32.xlu1 %v1586_v30, %s9755_s30  ;;  %v8303_v15 = vpop.f32.mrb[44].mxu1 }
 0x20f   :  { %v8304_v38 = vpop.f32.mrb[45].mxu1  ;;  %v8373_v24 = vpop.f32.mrb[64].mxu0 }
 0x210   :  { %1632 = vrot.lane.b32.xlu0 %v1444_v45, %s9755_s30  ;;  %v8305_v49 = vadd.f32 %v8304_v38, %v8303_v15  ;;  %v8306_v13 = vpop.f32.mrb[46].mxu1  ;;  %v8374_v21 = vpop.f32.mrb[65].mxu0  ;;  %v1516_v15 = vpack.c.bf16 %v1505_v48, %v1433_v20  ;;  %v1445_v20 = vpack.c.bf16 %v1506_v26, %v1505_v48 }
 0x211   :  { %v8375_v46 = vadd.f32 %v8374_v21, %v8373_v24  ;;  %v8307_v12 = vpop.f32.mrb[47].mxu1  ;;  %v8376_v60 = vpop.f32.mrb[66].mxu0 }
 0x212   :  { %1654 = vrot.lane.b32.xlu1 %v1610_v53, %s13339_s0  ;;  %v11102_v27 = vadd.f32 %v8369_v41, %v8305_v49  ;;  %v8308_v14 = vadd.f32 %v8307_v12, %v8306_v13  ;;  %v8377_v50 = vpop.f32.mrb[67].mxu0  ;;  %v1530_v49 = vld [vmem:[#allocation2 + $0xd2] sm:$0xff]  ;;  %v1529_v13 = vld [vmem:[#allocation2 + $0xc2] sm:$0xff] }
 0x213   :  { %v8378_v23 = vadd.f32 %v8377_v50, %v8376_v60  ;;  %v1541_v12 = vpack.c.bf16 %v1531_v11, %v1530_v49 }
 0x214   :  { %1656 = vrot.lane.b32.xlu0 %v1468_v51, %s13339_s0  ;;  %v11106_v30 = vadd.f32 %v8372_v57, %v8308_v14  ;;  %v1540_v51 = vpack.c.bf16 %v1529_v13, %v1457_v37 }
 0x216   :  { %1682 = vrot.lane.b32.xlu1 %v1493_v43, %s9757_s2  ;;  %v8309_v56 = vpop.f32.mrb[48].mxu1 }
 0x217   :  { %v8310_v40 = vpop.f32.mrb[49].mxu1  ;;  %v8379_v41 = vpop.f32.mrb[68].mxu0 }
 0x218   :  { %1680 = vrot.lane.b32.xlu0 %v1492_v39, %s9757_s2  ;;  %v8311_v61 = vadd.f32 %v8310_v40, %v8309_v56  ;;  %v8312_v53 = vpop.f32.mrb[50].mxu1  ;;  %v8380_v47 = vpop.f32.mrb[69].mxu0  ;;  %v11122_v56 = vpack.c.bf16 %v1482_v17, %v1481_v36 }
 0x219   :  { %v8381_v32 = vadd.f32 %v8380_v47, %v8379_v41  ;;  %v8313_v57 = vpop.f32.mrb[51].mxu1  ;;  %v8382_v45 = vpop.f32.mrb[70].mxu0 }
 0x21a   :  { %1706 = vrot.lane.b32.xlu1 %v1517_v25, %s13337_s29  ;;  %v11114_v35 = vadd.f32 %v8375_v46, %v8311_v61  ;;  %v8314_v38 = vadd.f32 %v8313_v57, %v8312_v53  ;;  %v8383_v24 = vpop.f32.mrb[71].mxu0  ;;  %v1555_v25 = vld [vmem:[#allocation2 + $0xf0] sm:$0xff] }
 0x21b   :  { %v8384_v21 = vadd.f32 %v8383_v24, %v8382_v45  ;;  %v11133_v61 = vpack.c.bf16 %v1555_v25, %v11099_v29  ;;  %v1579_v53 = vld [vmem:[#allocation2 + $0xf1] sm:$0xff] }
 0x21c   :  { %1704 = vrot.lane.b32.xlu0 %v1516_v15, %s13337_s29  ;;  %v11117_v60 = vadd.f32 %v8378_v23, %v8314_v38  ;;  %v1469_v23 = vpack.c.bf16 %v1530_v49, %v1529_v13  ;;  %v1589_v57 = vpack.c.bf16 %v1579_v53, %v1507_v16  ;;  %v1603_v45 = vld [vmem:[#allocation2 + $0xf2] sm:$0xff]  ;;  %v1487_v13 = vld [vmem:[#allocation2 + $0x120] sm:$0xff] }
 0x21d   :  { %v1613_v29 = vpack.c.bf16 %v1603_v45, %v1531_v11 }
 0x21e   :  { %1730 = vrot.lane.b32.xlu1 %v1541_v12, %s13335_s5  ;;  %v8315_v14 = vpop.f32.mrb[52].mxu1 }
 0x21f   :  { %v8316_v50 = vpop.f32.mrb[53].mxu1 }
 0x220   :  { %1728 = vrot.lane.b32.xlu0 %v1540_v51, %s13335_s5  ;;  %v8317_v46 = vadd.f32 %v8316_v50, %v8315_v14  ;;  %v8318_v43 = vpop.f32.mrb[54].mxu1  ;;  %v1486_v51 = vld [vmem:[#allocation2 + $0x110] sm:$0xff]  ;;  %v1485_v14 = vld [vmem:[#allocation2 + $0x100] sm:$0xff] }
 0x221   :  { %v8319_v39 = vpop.f32.mrb[55].mxu1  ;;  %v1495_v16 = vpack.c.bf16 %v1487_v13, %v1486_v51  ;;  %v1511_v50 = vld [vmem:[#allocation2 + $0x121] sm:$0xff] }
 0x222   :  { %1634 = vrot.lane.b32.xlu1 %v1445_v20, %s9755_s30  ;;  %v11124_v40 = vadd.f32 %v8381_v32, %v8317_v46  ;;  %v8320_v41 = vadd.f32 %v8319_v39, %v8318_v43  ;;  %v1510_v43 = vld [vmem:[#allocation2 + $0x111] sm:$0xff]  ;;  %v1509_v39 = vld [vmem:[#allocation2 + $0x101] sm:$0xff] }
 0x224   :  { %1752 = vrot.lane.b32.xlu0 %v11122_v56, %s13333_s7  ;;  %v11128_v37 = vadd.f32 %v8384_v21, %v8320_v41  ;;  %v1519_v41 = vpack.c.bf16 %v1511_v50, %v1510_v43 }
 0x226   :  { %1658 = vrot.lane.b32.xlu1 %v1469_v23, %s13339_s0  ;;  %v8321_v26 = vpop.f32.mrb[56].mxu1 }
 0x227   :  { %v8322_v48 = vpop.f32.mrb[57].mxu1 }
 0x228   :  { %1776 = vrot.lane.b32.xlu0 %v1445_v20, %s13331_s6  ;;  %v8323_v17 = vadd.f32 %v8322_v48, %v8321_v26  ;;  %v8324_v36 = vpop.f32.mrb[58].mxu1  ;;  %v1494_v20 = vpack.c.bf16 %v1485_v14, %v1555_v25  ;;  %v1535_v48 = vld [vmem:[#allocation2 + $0x122] sm:$0xff] }
 0x229   :  { %v8325_v47 = vpop.f32.mrb[59].mxu1 }
 0x22a   :  { %1754 = vrot.lane.b32.xlu1 %v11133_v61, %s13333_s7  ;;  %v8326_v32 = vadd.f32 %v8325_v47, %v8324_v36  ;;  %v1518_v47 = vpack.c.bf16 %v1509_v39, %v1579_v53 }
 0x22c   :  { %1800 = vrot.lane.b32.xlu0 %v1469_v23, %s13329_s28 }
 0x22e   :  { %1778 = vrot.lane.b32.xlu1 %v1589_v57, %s13331_s6  ;;  %v8327_v15 = vpop.f32.mrb[60].mxu1 }
 0x22f   :  { %v8328_v38 = vpop.f32.mrb[61].mxu1 }
 0x230   :  { %1636 = vrot.lane.b32.xlu0 %v1589_v57, %s9755_s30  ;;  %v8329_v24 = vadd.f32 %v8328_v38, %v8327_v15  ;;  %v8330_v49 = vpop.f32.mrb[62].mxu1  ;;  %v1534_v38 = vld [vmem:[#allocation2 + $0x112] sm:$0xff] }
 0x231   :  { %v8331_v21 = vpop.f32.mrb[63].mxu1  ;;  %v1543_v25 = vpack.c.bf16 %v1535_v48, %v1534_v38 }
 0x232   :  { %1802 = vrot.lane.b32.xlu1 %v1613_v29, %s13329_s28  ;;  %v8332_v12 = vadd.f32 %v8331_v21, %v8330_v49  ;;  %v1559_v21 = vld [vmem:[#allocation2 + $0x130] sm:$0xff] }
 0x234   :  { %1660 = vrot.lane.b32.xlu0 %v1613_v29, %s13339_s0  ;;  %v1533_v29 = vld [vmem:[#allocation2 + $0x102] sm:$0xff] }
 0x236   :  { %1686 = vrot.lane.b32.xlu1 %v1495_v16, %s9757_s2  ;;  %v8385_v46 = vpop.f32.mrb[64].mxu1  ;;  %v1542_v16 = vpack.c.bf16 %v1533_v29, %v1603_v45  ;;  %v1447_v45 = vpack.c.bf16 %v1510_v43, %v1509_v39 }
 0x237   :  { %v8386_v11 = vpop.f32.mrb[65].mxu1 }
 0x238   :  { %1684 = vrot.lane.b32.xlu0 %v1494_v20, %s9757_s2  ;;  %v8387_v23 = vadd.f32 %v8386_v11, %v8385_v46  ;;  %v8388_v26 = vpop.f32.mrb[66].mxu1  ;;  %v1567_v11 = vpack.c.bf16 %v1559_v21, %v1487_v13  ;;  %v1583_v21 = vld [vmem:[#allocation2 + $0x131] sm:$0xff] }
 0x239   :  { %v8389_v36 = vpop.f32.mrb[67].mxu1 }
 0x23a   :  { %1710 = vrot.lane.b32.xlu1 %v1519_v41, %s13337_s29  ;;  %v11145_v57 = vadd.f32 %v8387_v23, %v8323_v17  ;;  %v8390_v15 = vadd.f32 %v8389_v36, %v8388_v26  ;;  %v11153_v26 = vpack.c.bf16 %v1486_v51, %v1485_v14  ;;  %v1591_v14 = vpack.c.bf16 %v1583_v21, %v1511_v50 }
 0x23c   :  { %1708 = vrot.lane.b32.xlu0 %v1518_v47, %s13337_s29  ;;  %v11148_v49 = vadd.f32 %v8390_v15, %v8326_v32  ;;  %s13439_s29 = smov 32  }
 0x23e   :  { %1734 = vrot.lane.b32.xlu1 %v1543_v25, %s13335_s5  ;;  %v8391_v20 = vpop.f32.mrb[68].mxu1  ;;  %v1471_v25 = vpack.c.bf16 %v1534_v38, %v1533_v29 }
 0x23f   :  { %v8392_v46 = vpop.f32.mrb[69].mxu1 }
 0x240   :  { %1732 = vrot.lane.b32.xlu0 %v1542_v16, %s13335_s5  ;;  %v8393_v53 = vadd.f32 %v8392_v46, %v8391_v20  ;;  %v8394_v17 = vpop.f32.mrb[70].mxu1  ;;  %v1607_v16 = vld [vmem:[#allocation2 + $0x132] sm:$0xff]  ;;  %v1400_v46 = vld [vmem:[#allocation2] sm:$0xff] }
 0x241   :  { %v8395_v41 = vpop.f32.mrb[71].mxu1  ;;  %v1615_v39 = vpack.c.bf16 %v1607_v16, %v1535_v48  ;;  %v1416_v38 = vpack.c.bf16 %v10962_v44, %v1400_v46 }
 0x242   :  { %1758 = vrot.lane.b32.xlu1 %v1567_v11, %s13333_s7  ;;  %v1625_v23 = vpop.permute.xlu0 %1624  ;;  %v11155_v36 = vadd.f32 %v8393_v53, %v8329_v24  ;;  %v8396_v32 = vadd.f32 %v8395_v41, %v8394_v17 }
 0x243   :  { %v1810_v53 = vsel %vm1383_vm12, %v1416_v38, %v1625_v23 }
 0x244   :  { %1756 = vrot.lane.b32.xlu0 %v11153_v26, %s13333_s7  ;;  %v11159_v47 = vadd.f32 %v8396_v32, %v8332_v12 }
 0x246   :  { %1638 = vrot.lane.b32.xlu1 %v1447_v45, %s9755_s30  ;;  %v1649_v13 = vpop.permute.xlu0 %1648 }
 0x247   :  { %v1834_v41 = vsel %vm1832_vm13, %v1810_v53, %v1649_v13 }
 0x248   :  { %v1675_v15 = vpop.permute.xlu1 %1674  ;;  %1780 = vrot.lane.b32.xlu0 %v1447_v45, %s13331_s6 }
 0x24a   :  { %1662 = vrot.lane.b32.xlu1 %v1471_v25, %s13339_s0  ;;  %v1673_v51 = vpop.permute.xlu0 %1672  ;;  %s13401_s0 = smov 44  }
 0x24b   :  { %v1851_v32 = vsel %vm1849_vm14, %v1834_v41, %v1673_v51 }
 0x24c   :  { %v1699_v24 = vpop.permute.xlu1 %1698  ;;  %1804 = vrot.lane.b32.xlu0 %v1471_v25, %s13329_s28 }
 0x24e   :  { %1782 = vrot.lane.b32.xlu1 %v1591_v14, %s13331_s6  ;;  %v1697_v12 = vpop.permute.xlu0 %1696  ;;  %s13399_s6 = sld [smem:[#allocation27_spill]] }
 0x24f   :  { %v1868_v25 = vsel %vm1866_vm15, %v1851_v32, %v1697_v12  ;;  %v1404_v32 = vld [vmem:[#allocation2 + $0x40] sm:$0xff] }
 0x250   :  { %v1723_v43 = vpop.permute.xlu1 %1722 }
 0x252   :  { %1806 = vrot.lane.b32.xlu1 %v1615_v39, %s13329_s28  ;;  %v1721_v20 = vpop.permute.xlu0 %1720  ;;  %s13408_s28 = smov 96  }
 0x253   :  { %v1885_v23 = vsel %vm1883_vm1, %v1868_v25, %v1721_v20 }
 0x254   :  { %v1627_v11 = vpop.permute.xlu1 %1626 }
 0x255   :  { %v1813_v50 = vsel %vm1383_vm12, %v11005_v33, %v1627_v11 }
 0x256   :  { %v1745_v29 = vpop.permute.xlu0 %1744 }
 0x257   :  { %v1902_v33 = vsel %vm1900_vm10, %v1885_v23, %v1745_v29 }
 0x258   :  { %v1651_v17 = vpop.permute.xlu1 %1650 }
 0x259   :  { %v1836_v48 = vsel %vm1832_vm13, %v1813_v50, %v1651_v17 }
 0x25a   :  { %v1853_v44 = vsel %vm1849_vm14, %v1836_v48, %v1675_v15  ;;  %v1769_v45 = vpop.permute.xlu0 %1768 }
 0x25b   :  { %v1870_v13 = vsel %vm1866_vm15, %v1853_v44, %v1699_v24  ;;  %v1919_v14 = vsel %vm13353_vm9, %v1902_v33, %v1769_v45  ;;  %v1418_v44 = vpack.c.bf16 %v11014_v22, %v1404_v32 }
 0x25c   :  { %v1747_v21 = vpop.permute.xlu1 %1746  ;;  %v1887_v15 = vsel %vm1883_vm1, %v1870_v13, %v1723_v43 }
 0x25d   :  { %v1904_v20 = vsel %vm1900_vm10, %v1887_v15, %v1747_v21 }
 0x25e   :  { %v1793_v16 = vpop.permute.xlu0 %1792 }
 0x25f   :  { %v1936_v51 = vsel %vm13352_vm8, %v1919_v14, %v1793_v16 }
 0x260   :  { %v1771_v39 = vpop.permute.xlu1 %1770  ;;  %8981 = vmatprep.mubr.msk.bf16.mxu1 %vm13351_vm6, %v1936_v51 }
 0x261   :  { %v1921_v46 = vsel %vm13353_vm9, %v1904_v20, %v1771_v39 }
 0x262   :  { %v1629_v12 = vpop.permute.xlu0 %1628 }
 0x263   :  { %v1816_v25 = vsel %vm1383_vm12, %v1418_v44, %v1629_v12 }
 0x264   :  { %v1795_v11 = vpop.permute.xlu1 %1794 }
 0x265   :  { %v1938_v38 = vsel %vm13352_vm8, %v1921_v46, %v1795_v11 }
 0x266   :  { %v1653_v24 = vpop.permute.xlu0 %1652  ;;  %8982 = vmatmul.mubr.msk.bf16.vlgmr.msra.gmra.mrb[72].mxu1 %vm13351_vm6, %v1938_v38 }
 0x267   :  { %v1838_v21 = vsel %vm1832_vm13, %v1816_v25, %v1653_v24 }
 0x268   :  { %v1679_v29 = vpop.permute.xlu1 %1678 }
 0x26a   :  { %v1677_v53 = vpop.permute.xlu0 %1676 }
 0x26b   :  { %v1855_v33 = vsel %vm1849_vm14, %v1838_v21, %v1677_v53 }
 0x26c   :  { %v1703_v50 = vpop.permute.xlu1 %1702 }
 0x26e   :  { %v1701_v17 = vpop.permute.xlu0 %1700 }
 0x26f   :  { %v1872_v14 = vsel %vm1866_vm15, %v1855_v33, %v1701_v17 }
 0x270   :  { %v1727_v41 = vpop.permute.xlu1 %1726 }
 0x272   :  { %v1725_v43 = vpop.permute.xlu0 %1724 }
 0x273   :  { %v1889_v16 = vsel %vm1883_vm1, %v1872_v14, %v1725_v43 }
 0x274   :  { %v1751_v48 = vpop.permute.xlu1 %1750 }
 0x276   :  { %v1749_v45 = vpop.permute.xlu0 %1748 }
 0x277   :  { %v1906_v15 = vsel %vm1900_vm10, %v1889_v16, %v1749_v45 }
 0x278   :  { %v1775_v23 = vpop.permute.xlu1 %1774 }
 0x27a   :  { %v1773_v13 = vpop.permute.xlu0 %1772 }
 0x27b   :  { %v1923_v39 = vsel %vm13353_vm9, %v1906_v15, %v1773_v13 }
 0x27c   :  { %v1799_v51 = vpop.permute.xlu1 %1798 }
 0x27e   :  { %v1797_v20 = vpop.permute.xlu0 %1796 }
 0x27f   :  { %v1940_v22 = vsel %vm13352_vm8, %v1923_v39, %v1797_v20 }
 0x280   :  { %v1631_v46 = vpop.permute.xlu1 %1630  ;;  %8985 = vmatprep.mubr.msk.bf16.mxu1 %vm13351_vm6, %v1940_v22 }
 0x281   :  { %v1819_v11 = vsel %vm1383_vm12, %v11080_v28, %v1631_v46 }
 0x282   :  { %v1633_v12 = vpop.permute.xlu0 %1632 }
 0x284   :  { %v1655_v38 = vpop.permute.xlu1 %1654 }
 0x285   :  { %v1840_v24 = vsel %vm1832_vm13, %v1819_v11, %v1655_v38 }
 0x286   :  { %v1857_v53 = vsel %vm1849_vm14, %v1840_v24, %v1679_v29  ;;  %v1657_v17 = vpop.permute.xlu0 %1656  ;;  %v1408_v29 = vld [vmem:[#allocation2 + $0xa0] sm:$0xff] }
 0x287   :  { %v1874_v43 = vsel %vm1866_vm15, %v1857_v53, %v1703_v50  ;;  %v1420_v50 = vpack.c.bf16 %v11108_v52, %v1408_v29 }
 0x288   :  { %v1891_v32 = vsel %vm1883_vm1, %v1874_v43, %v1727_v41  ;;  %v1683_v44 = vpop.permute.xlu1 %1682 }
 0x289   :  { %v1908_v45 = vsel %vm1900_vm10, %v1891_v32, %v1751_v48  ;;  %v1822_v41 = vsel %vm1383_vm12, %v1420_v50, %v1633_v12 }
 0x28a   :  { %v1681_v25 = vpop.permute.xlu0 %1680  ;;  %v1925_v21 = vsel %vm13353_vm9, %v1908_v45, %v1775_v23  ;;  %v1842_v23 = vsel %vm1832_vm13, %v1822_v41, %v1657_v17 }
 0x28b   :  { %v1942_v33 = vsel %vm13352_vm8, %v1925_v21, %v1799_v51  ;;  %v1859_v22 = vsel %vm1849_vm14, %v1842_v23, %v1681_v25 }
 0x28c   :  { %v1707_v13 = vpop.permute.xlu1 %1706  ;;  %8986 = vmatmul.mubr.msk.bf16.gmra.mrb[76].mxu1 %vm13351_vm6, %v1942_v33 }
 0x28e   :  { %v1705_v28 = vpop.permute.xlu0 %1704 }
 0x28f   :  { %v1876_v38 = vsel %vm1866_vm15, %v1859_v22, %v1705_v28 }
 0x290   :  { %v1731_v14 = vpop.permute.xlu1 %1730 }
 0x292   :  { %v1729_v16 = vpop.permute.xlu0 %1728 }
 0x293   :  { %v1893_v52 = vsel %vm1883_vm1, %v1876_v38, %v1729_v16 }
 0x294   :  { %v1635_v15 = vpop.permute.xlu1 %1634 }
 0x295   :  { %v1825_v48 = vsel %vm1383_vm12, %v11122_v56, %v1635_v15 }
 0x296   :  { %v1753_v39 = vpop.permute.xlu0 %1752 }
 0x297   :  { %v1910_v12 = vsel %vm1900_vm10, %v1893_v52, %v1753_v39 }
 0x298   :  { %v1659_v20 = vpop.permute.xlu1 %1658 }
 0x299   :  { %v1844_v51 = vsel %vm1832_vm13, %v1825_v48, %v1659_v20 }
 0x29a   :  { %v1861_v46 = vsel %vm1849_vm14, %v1844_v51, %v1683_v44  ;;  %v1777_v11 = vpop.permute.xlu0 %1776 }
 0x29b   :  { %v1878_v53 = vsel %vm1866_vm15, %v1861_v46, %v1707_v13  ;;  %v1927_v56 = vsel %vm13353_vm9, %v1910_v12, %v1777_v11 }
 0x29c   :  { %v1755_v24 = vpop.permute.xlu1 %1754  ;;  %v1895_v32 = vsel %vm1883_vm1, %v1878_v53, %v1731_v14 }
 0x29d   :  { %v1912_v25 = vsel %vm1900_vm10, %v1895_v32, %v1755_v24 }
 0x29e   :  { %v1801_v43 = vpop.permute.xlu0 %1800 }
 0x29f   :  { %v1944_v17 = vsel %vm13352_vm8, %v1927_v56, %v1801_v43 }
 0x2a0   :  { %v1779_v45 = vpop.permute.xlu1 %1778  ;;  %8989 = vmatprep.mubr.msk.bf16.mxu1 %vm13351_vm6, %v1944_v17 }
 0x2a1   :  { %v1929_v21 = vsel %vm13353_vm9, %v1912_v25, %v1779_v45  ;;  %v3052_v25 = vld [vmem:[%s13399_s6] sm:$0xf]  ;;  %s13442_s6 = smov 56  }
 0x2a2   :  { %v1637_v44 = vpop.permute.xlu0 %1636  ;;  %9496 = vmatprep.subr.msk.bf16.mxu0 %vm2592_vm11, %v3052_v25 }
 0x2a3   :  { %v1828_v20 = vsel %vm1383_vm12, %v11133_v61, %v1637_v44 }
 0x2a4   :  { %v1803_v33 = vpop.permute.xlu1 %1802 }
 0x2a5   :  { %v1946_v28 = vsel %vm13352_vm8, %v1929_v21, %v1803_v33  ;;  %v3078_v21 = vsel %vm2592_vm11, %v3052_v25, 0 }
 0x2a6   :  { %v1661_v16 = vpop.permute.xlu0 %1660  ;;  %8990 = vmatmul.mubr.msk.bf16.gmra.mrb[80].mxu1 %vm13351_vm6, %v1946_v28  ;;  %9040 = vmatpush3.bf16.msra.mxu0 %v3078_v21 }
 0x2a7   :  { %v1846_v51 = vsel %vm1832_vm13, %v1828_v20, %v1661_v16 }
 0x2a8   :  { %v1687_v13 = vpop.permute.xlu1 %1686 }
 0x2aa   :  { %v1685_v29 = vpop.permute.xlu0 %1684 }
 0x2ab   :  { %v1863_v22 = vsel %vm1849_vm14, %v1846_v51, %v1685_v29  ;;  %v9603_v29 = vld [vmem:[%s13291_s19 + $0x8] sm:$0xff]  }
 0x2ac   :  { %v1711_v15 = vpop.permute.xlu1 %1710 }
 0x2ae   :  { %v1709_v50 = vpop.permute.xlu0 %1708 }
 0x2af   :  { %v1880_v11 = vsel %vm1866_vm15, %v1863_v22, %v1709_v50 }
 0x2b0   :  { %v1735_v39 = vpop.permute.xlu1 %1734 }
 0x2b2   :  { %v1733_v14 = vpop.permute.xlu0 %1732 }
 0x2b3   :  { %v1897_v38 = vsel %vm1883_vm1, %v1880_v11, %v1733_v14 }
 0x2b4   :  { %v1759_v41 = vpop.permute.xlu1 %1758 }
 0x2b6   :  { %v1757_v48 = vpop.permute.xlu0 %1756 }
 0x2b7   :  { %v1914_v12 = vsel %vm1900_vm10, %v1897_v38, %v1757_v48 }
 0x2b8   :  { %v1639_v23 = vpop.permute.xlu1 %1638 }
 0x2b9   :  { %v1831_v52 = vsel %vm1383_vm12, %v11153_v26, %v1639_v23 }
 0x2ba   :  { %v1781_v46 = vpop.permute.xlu0 %1780 }
 0x2bb   :  { %v1931_v61 = vsel %vm13353_vm9, %v1914_v12, %v1781_v46 }
 0x2bc   :  { %v1663_v24 = vpop.permute.xlu1 %1662 }
 0x2bd   :  { %v1848_v53 = vsel %vm1832_vm13, %v1831_v52, %v1663_v24 }
 0x2be   :  { %v1865_v56 = vsel %vm1849_vm14, %v1848_v53, %v1687_v13  ;;  %v1805_v43 = vpop.permute.xlu0 %1804  ;;  %v9602_v13 = vld [vmem:[%s13291_s19] sm:$0xff]  }
 0x2bf   :  { %v1882_v17 = vsel %vm1866_vm15, %v1865_v56, %v1711_v15  ;;  %v1948_v32 = vsel %vm13352_vm8, %v1931_v61, %v1805_v43  ;;  %9057 = vmatprep.subr.bf16.mxu1 %v9602_v13  ;;  %v11261_v15 = vld [vmem:[%s13400_s26] ss:$0 sm:$0xff]  ;;  %s13443_s26 = smov 64  }
 0x2c0   :  { %v1899_v45 = vsel %vm1883_vm1, %v1882_v17, %v1735_v39  ;;  %v1783_v44 = vpop.permute.xlu1 %1782  ;;  %8993 = vmatprep.mubr.msk.bf16.mxu1 %vm13351_vm6, %v1948_v32  ;;  %9058 = vmatpush3.bf16.msra.mxu1 %v9602_v13  ;;  %v9267_v50 = vadd.f32 %v11261_v15, %v11082_v42  ;;  %v9269_v14 = vadd.f32 %v11261_v15, %v11067_v59 }
 0x2c1   :  { %v1916_v26 = vsel %vm1900_vm10, %v1899_v45, %v1759_v41  ;;  %9059 = vmatprep.subr.bf16.mxu1 %v9603_v29  ;;  %v9271_v20 = vadd.f32 %v11261_v15, %v11087_v62  ;;  %v9273_v22 = vadd.f32 %v11261_v15, %v11071_v55  ;;  %v9275_v59 = vadd.f32 %v11261_v15, %v11102_v27 }
 0x2c2   :  { %v1933_v33 = vsel %vm13353_vm9, %v1916_v26, %v1783_v44  ;;  %v9277_v55 = vadd.f32 %v11261_v15, %v11092_v63  ;;  %v9279_v17 = vadd.f32 %v11261_v15, %v11106_v30  ;;  %v9281_v44 = vadd.f32 %v11261_v15, %v11095_v34 }
 0x2c3   :  { %v9283_v63 = vadd.f32 %v11261_v15, %v11124_v40  ;;  %v9285_v34 = vadd.f32 %v11261_v15, %v11114_v35  ;;  %v9291_v35 = vadd.f32 %v11261_v15, %v11155_v36  ;;  %vm13415_vm9 = vcmask 850944  }
 0x2c4   :  { %v1807_v28 = vpop.permute.xlu1 %1806  ;;  %9060 = vmatpush3.bf16.msra.mxu1 %v9603_v29 }
 0x2c5   :  { %v1950_v16 = vsel %vm13352_vm8, %v1933_v33, %v1807_v28  ;;  %vm13414_vm8 = vcmask 785408  }
 0x2c6   :  { %8994 = vmatmul.mubr.msk.bf16.gmra.mrb[84].mxu1 %vm13351_vm6, %v1950_v16  ;;  %vm13413_vm6 = vcmask 293888  }
 0x339   :  { %v8983_v39 = vpop.f32.mrb[72].mxu1 }
 0x33a   :  { %v9268_v41 = vadd.f32 %v9267_v50, %v8983_v39  ;;  %v2630_v48 = vpop.f32.mrb[73].mxu1 }
 0x33b   :  { %v9270_v23 = vadd.f32 %v9269_v14, %v2630_v48  ;;  %v8984_v51 = vpop.f32.mrb[74].mxu1  ;;  %v9287_v14 = vadd.f32 %v11261_v15, %v11128_v37 }
 0x33c   :  { %v9272_v46 = vadd.f32 %v9271_v20, %v8984_v51  ;;  %v2633_v11 = vpop.f32.mrb[75].mxu1  ;;  %v2711_v52 = vmax.f32 %v9268_v41, 0.0  ;;  %v9289_v20 = vadd.f32 %v11261_v15, %v11117_v60  ;;  %v9293_v60 = vadd.f32 %v11261_v15, %v11145_v57 }
 0x33d   :  { %v9274_v38 = vadd.f32 %v9273_v22, %v2633_v11  ;;  %v2709_v42 = vmax.f32 %v9270_v23, 0.0 }
 0x33e   :  { %v2712_v24 = vmax.f32 %v9272_v46, 0.0 }
 0x33f   :  { %v2710_v12 = vmax.f32 %v9274_v38, 0.0 }
 0x340   :  { %v2726_v53 = vpack.c.bf16 %v2712_v24, %v2711_v52 }
 0x341   :  { %v2725_v61 = vpack.c.bf16 %v2710_v12, %v2709_v42 }
 0x343   :  { %9041 = vmatprep.mubr.msk.bf16.mxu0 %vm1383_vm12, %v2725_v61  ;;  %v9604_v61 = vld [vmem:[%s13291_s19 + $0x10] sm:$0xff]  }
 0x344   :  { %9042 = vmatmul.mubr.msk.bf16.vlgmr.msra.gmra.mrb[72].mxu0 %vm1383_vm12, %v2726_v53  ;;  %v9295_v53 = vadd.f32 %v11261_v15, %v11159_v47  ;;  %9061 = vmatprep.subr.bf16.mxu1 %v9604_v61  ;;  %v9605_v47 = vld [vmem:[%s13291_s19 + $0x18] sm:$0x3f]  }
 0x345   :  { %9062 = vmatpush3.bf16.msra.mxu1 %v9604_v61  ;;  %v9613_v61 = vld [vmem:[%s13282_s10 + $0x18] sm:$0xff]  }
 0x346   :  { %9497 = vmatprep.subr.msk.bf16.mxu1 %vm1048_vm5, %v9605_v47 }
 0x35f   :  { %v8987_v62 = vpop.f32.mrb[76].mxu1 }
 0x360   :  { %v9276_v56 = vadd.f32 %v9275_v59, %v8987_v62  ;;  %v2646_v43 = vpop.f32.mrb[77].mxu1 }
 0x361   :  { %v9278_v32 = vadd.f32 %v9277_v55, %v2646_v43  ;;  %v8988_v45 = vpop.f32.mrb[78].mxu1  ;;  %v9297_v55 = vadd.f32 %v11261_v15, %v11148_v49  ;;  %v9606_v49 = vld [vmem:[%s13282_s10 + $0x40] sm:$0xff]  }
 0x362   :  { %v9280_v26 = vadd.f32 %v9279_v17, %v8988_v45  ;;  %v2649_v25 = vpop.f32.mrb[79].mxu1  ;;  %v2715_v33 = vmax.f32 %v9276_v56, 0.0  ;;  %v11317_v15 = vld [vmem:[%s13281_s9] ss:$0 sm:$0xff]  ;;  %s13438_s9 = smov 16  }
 0x363   :  { %v9282_v21 = vadd.f32 %v9281_v44, %v2649_v25  ;;  %v2713_v27 = vmax.f32 %v9278_v32, 0.0 }
 0x364   :  { %v2716_v28 = vmax.f32 %v9280_v26, 0.0  ;;  %v3273_v26 = vsel %vm1048_vm5, %v9605_v47, 0 }
 0x365   :  { %v2714_v16 = vmax.f32 %v9282_v21, 0.0  ;;  %9064 = vmatpush3.bf16.msra.mxu1 %v3273_v26  ;;  %v9619_v26 = vld [vmem:[%s13282_s10 + $0x30] sm:$0xff]  }
 0x366   :  { %v2728_v13 = vpack.c.bf16 %v2716_v28, %v2715_v33  ;;  %8462 = vmatprep.subr.bf16.mxu1 %v9606_v49  ;;  %v9620_v49 = vld [vmem:[%s13282_s10 + $0x78] sm:$0xff]  }
 0x367   :  { %v2727_v29 = vpack.c.bf16 %v2714_v16, %v2713_v27 }
 0x369   :  { %9045 = vmatprep.mubr.msk.bf16.mxu0 %vm1383_vm12, %v2727_v29 }
 0x36a   :  { %9046 = vmatmul.mubr.msk.bf16.gmra.mrb[76].mxu0 %vm1383_vm12, %v2728_v13 }
 0x379   :  { %v8991_v30 = vpop.f32.mrb[80].mxu1 }
 0x37a   :  { %v9284_v50 = vadd.f32 %v9283_v63, %v8991_v30  ;;  %v2662_v39 = vpop.f32.mrb[81].mxu1 }
 0x37b   :  { %v9286_v41 = vadd.f32 %v9285_v34, %v2662_v39  ;;  %v8992_v48 = vpop.f32.mrb[82].mxu1 }
 0x37c   :  { %v9288_v23 = vadd.f32 %v9287_v14, %v8992_v48  ;;  %v2665_v51 = vpop.f32.mrb[83].mxu1  ;;  %v2719_v46 = vmax.f32 %v9284_v50, 0.0  ;;  %v3452_v14 = vld [vmem:[#allocation2 + $0x2] sm:$0xff] }
 0x37d   :  { %v9290_v22 = vadd.f32 %v9289_v20, %v2665_v51  ;;  %v2717_v40 = vmax.f32 %v9286_v41, 0.0  ;;  %v9609_v48 = vld [vmem:[%s13282_s10 + $0x8] sm:$0xff]  }
 0x37e   :  { %v2720_v11 = vmax.f32 %v9288_v23, 0.0 }
 0x37f   :  { %v2718_v38 = vmax.f32 %v9290_v22, 0.0  ;;  %v9610_v22 = vld [vmem:[%s13282_s10 + $0x50] sm:$0xff]  }
 0x380   :  { %v2730_v52 = vpack.c.bf16 %v2720_v11, %v2719_v46  ;;  %v3428_v11 = vld [vmem:[#allocation2 + $0x1] sm:$0xff] }
 0x381   :  { %v2729_v24 = vpack.c.bf16 %v2718_v38, %v2717_v40 }
 0x383   :  { %9049 = vmatprep.mubr.msk.bf16.mxu0 %vm1383_vm12, %v2729_v24 }
 0x384   :  { %9050 = vmatmul.mubr.msk.bf16.gmra.mrb[80].mxu0 %vm1383_vm12, %v2730_v52  ;;  %v9611_v52 = vld [vmem:[%s13282_s10 + $0x10] sm:$0xff]  }
 0x399   :  { %v8995_v37 = vpop.f32.mrb[84].mxu1 }
 0x39a   :  { %v9292_v42 = vadd.f32 %v9291_v35, %v8995_v37  ;;  %v2678_v12 = vpop.f32.mrb[85].mxu1  ;;  %v9612_v37 = vld [vmem:[%s13282_s10 + $0x58] sm:$0xff]  }
 0x39b   :  { %v9294_v59 = vadd.f32 %v9293_v60, %v2678_v12  ;;  %v8996_v62 = vpop.f32.mrb[86].mxu1 }
 0x39c   :  { %v9296_v56 = vadd.f32 %v9295_v53, %v8996_v62  ;;  %v2681_v36 = vpop.f32.mrb[87].mxu1  ;;  %v2723_v57 = vmax.f32 %v9292_v42, 0.0 }
 0x39d   :  { %v9298_v43 = vadd.f32 %v9297_v55, %v2681_v36  ;;  %v2721_v32 = vmax.f32 %v9294_v59, 0.0  ;;  %v9614_v55 = vld [vmem:[%s13282_s10 + $0x60] sm:$0xff]  }
 0x39e   :  { %v2724_v17 = vmax.f32 %v9296_v56, 0.0 }
 0x39f   :  { %v2722_v45 = vmax.f32 %v9298_v43, 0.0  ;;  %v9615_v43 = vld [vmem:[%s13282_s10 + $0x20] sm:$0xff]  }
 0x3a0   :  { %v2732_v44 = vpack.c.bf16 %v2724_v17, %v2723_v57  ;;  %v9616_v17 = vld [vmem:[%s13282_s10 + $0x68] sm:$0xff]  }
 0x3a1   :  { %v2731_v25 = vpack.c.bf16 %v2722_v45, %v2721_v32  ;;  %v9617_v32 = vld [vmem:[%s13282_s10 + $0x28] sm:$0xff]  }
 0x3a3   :  { %9053 = vmatprep.mubr.msk.bf16.mxu0 %vm1383_vm12, %v2731_v25 }
 0x3a4   :  { %9054 = vmatmul.mubr.msk.bf16.gmra.mrb[84].mxu0 %vm1383_vm12, %v2732_v44  ;;  %v9618_v44 = vld [vmem:[%s13282_s10 + $0x70] sm:$0xff]  }
 0x417   :  { %v9043_v21 = vpop.f32.mrb[72].mxu0 }
 0x418   :  { %v9299_v33 = vadd.f32 %v9043_v21, %v11317_v15  ;;  %v3114_v28 = vpop.f32.mrb[73].mxu0  ;;  %v9621_v21 = vld [vmem:[%s13282_s10 + $0x38] sm:$0xff]  }
 0x419   :  { %v9300_v27 = vadd.f32 %v11317_v15, %v3114_v28  ;;  %v9044_v16 = vpop.f32.mrb[74].mxu0 }
 0x41a   :  { %v11322_v13 = vadd.f32 %v9299_v33, %v9943_v3  ;;  %v9301_v29 = vadd.f32 %v9044_v16, %v11317_v15  ;;  %v3117_v63 = vpop.f32.mrb[75].mxu0 }
 0x41b   :  { %v11326_v30 = vadd.f32 %v9300_v27, %v9893_v0  ;;  %v9302_v34 = vadd.f32 %v11317_v15, %v3117_v63 }
 0x41c   :  { %3390 = vst.msk [vmem:[#allocation2 + $0x31] sm:$0xff] %vm79_vm0, %v11322_v13  ;;  %v11332_v50 = vadd.f32 %v9301_v29, %v9948_v4  ;;  %v9607_v4 = vld [vmem:[%s13282_s10] sm:$0xff]  }
 0x41d   :  { %3388 = vst.msk [vmem:[#allocation2 + $0x11] sm:$0xff] %vm79_vm0, %v11326_v30  ;;  %v11337_v3 = vadd.f32 %v9302_v34, %v9938_v2  ;;  %v9608_v2 = vld [vmem:[%s13282_s10 + $0x48] sm:$0xff]  }
 0x41e   :  { %3391 = vst.msk [vmem:[#allocation2 + $0x41] sm:$0xff] %vm79_vm0, %v11332_v50  ;;  %v11352_v39 = vpack.c.bf16 %v11332_v50, %v11322_v13 }
 0x41f   :  { %v11343_v0 = vpack.c.bf16 %v11337_v3, %v11326_v30  ;;  %3389 = vst.msk [vmem:[#allocation2 + $0x21] sm:$0xff] %vm79_vm0, %v11337_v3 }
 0x421   :  { %9065 = vmatprep.mubr.msk.bf16.mxu1 %vm79_vm0, %v11343_v0 }
 0x422   :  { %9066 = vmatmul.mubr.msk.bf16.vlgmr.msra.gmra.mrb[88].mxu1 %vm79_vm0, %v11352_v39 }
 0x423   :  { %8463 = vmatpush3.bf16.msra.mxu1 %v9607_v4  ;;  %v3478_v23 = vld [vmem:[#allocation2 + $0x30] sm:$0xff] }
 0x424   :  { %v3453_v41 = vld [vmem:[#allocation2 + $0x12] sm:$0xff]  ;;  %8464 = vmatprep.subr.bf16.mxu1 %v9608_v2 }
 0x425   :  { %v3468_v20 = vpack.c.bf16 %v3453_v41, %v3452_v14  ;;  %v11364_v51 = vld [vmem:[#allocation2 + $0x40] sm:$0xff]  ;;  %v3429_v40 = vld [vmem:[#allocation2 + $0x11] sm:$0xff] }
 0x426   :  { %v3493_v46 = vpack.c.bf16 %v11364_v51, %v3478_v23  ;;  %v11371_v38 = vld [vmem:[#allocation2 + $0x41] sm:$0xff]  ;;  %v3444_v24 = vpack.c.bf16 %v3429_v40, %v3428_v11  ;;  %v3502_v35 = vld [vmem:[#allocation2 + $0x31] sm:$0xff] }
 0x427   :  { %3652 = vrot.lane.b32.xlu0 %v3468_v20, %s9747_s27  ;;  %8465 = vmatpush3.bf16.msra.mxu1 %v9609_v48  ;;  %v3517_v60 = vpack.c.bf16 %v11371_v38, %v3502_v35  ;;  %v3454_v42 = vld [vmem:[#allocation2 + $0x22] sm:$0xff]  ;;  %v11383_v53 = vld [vmem:[#allocation2 + $0x32] sm:$0xff] }
 0x428   :  { %3678 = vrot.lane.b32.xlu1 %v3493_v46, %s9749_s25  ;;  %8466 = vmatprep.subr.bf16.mxu1 %v9610_v22  ;;  %v3477_v12 = vld [vmem:[#allocation2 + $0x20] sm:$0xff]  ;;  %v11389_v59 = vpack.c.bf16 %v11383_v53, %v3454_v42  ;;  %v11391_v62 = vld [vmem:[#allocation2 + $0x10] sm:$0xff]  ;;  %v3540_v25 = vpack.c.bf16 %v3454_v42, %v3453_v41 }
 0x429   :  { %v3492_v56 = vpack.c.bf16 %v3477_v12, %v11391_v62  ;;  %v3430_v36 = vld [vmem:[#allocation2 + $0x21] sm:$0xff]  ;;  %v11411_v45 = vpack.c.bf16 %v3478_v23, %v3477_v12 }
 0x42a   :  { %v3445_v57 = vpack.c.bf16 %v3502_v35, %v3430_v36  ;;  %v3516_v47 = vpack.c.bf16 %v3430_v36, %v3429_v40  ;;  %v9624_v12 = vld [vmem:[%s13282_s10 + $0xc8] sm:$0xff]  }
 0x42b   :  { %3628 = vrot.lane.b32.xlu0 %v3444_v24, %s9748_s3  ;;  %8467 = vmatpush3.bf16.msra.mxu1 %v9611_v52  ;;  %v9622_v52 = vld [vmem:[%s13282_s10 + $0xc0] sm:$0xff]  }
 0x42c   :  { %3702 = vrot.lane.b32.xlu1 %v3517_v60, %s9750_s8  ;;  %8468 = vmatprep.subr.bf16.mxu1 %v9612_v37  ;;  %v9623_v24 = vld [vmem:[%s13282_s10 + $0x80] sm:$0xff]  }
 0x42d   :  { %8526 = vmatprep.subr.bf16.mxu0 %v9622_v52 }
 0x42e   :  { %8527 = vmatpush3.bf16.msra.mxu0 %v9623_v24 }
 0x42f   :  { %3654 = vrot.lane.b32.xlu0 %v11389_v59, %s9747_s27  ;;  %8469 = vmatpush3.bf16.msra.mxu1 %v9613_v61  ;;  %v9625_v61 = vld [vmem:[%s13282_s10 + $0x88] sm:$0xff]  }
 0x430   :  { %3676 = vrot.lane.b32.xlu1 %v3492_v56, %s9749_s25  ;;  %8470 = vmatprep.subr.bf16.mxu1 %v9614_v55  ;;  %v9626_v55 = vld [vmem:[%s13282_s10 + $0xd0] sm:$0xff]   ;;  %v11512_v56 = vld [vmem:[%s13282_s10 + $0x100] sm:$0xff]  }
 0x431   :  { %8528 = vmatprep.subr.bf16.mxu0 %v9624_v12 }
 0x432   :  { %8529 = vmatpush3.bf16.msra.mxu0 %v9625_v61 }
 0x433   :  { %3630 = vrot.lane.b32.xlu0 %v3445_v57, %s9748_s3  ;;  %8471 = vmatpush3.bf16.msra.mxu1 %v9615_v43 }
 0x434   :  { %3700 = vrot.lane.b32.xlu1 %v3516_v47, %s9750_s8  ;;  %8472 = vmatprep.subr.bf16.mxu1 %v9616_v17 }
 0x435   :  { %8530 = vmatprep.subr.bf16.mxu0 %v9626_v55 }
 0x437   :  { %3748 = vrot.lane.b32.xlu0 %v11411_v45, %s9751_s4  ;;  %8473 = vmatpush3.bf16.msra.mxu1 %v9617_v32  ;;  %v9628_v32 = vld [vmem:[%s13282_s10 + $0x90] sm:$0xff]  }
 0x438   :  { %3772 = vrot.lane.b32.xlu1 %v3445_v57, %s9752_s1  ;;  %8474 = vmatprep.subr.bf16.mxu1 %v9618_v44 }
 0x439   :  { %8531 = vmatpush3.bf16.msra.mxu0 %v9628_v32  ;;  %v3436_v32 = vld [vmem:[#allocation2 + $0xa1] sm:$0xff] }
 0x43b   :  { %3724 = vrot.lane.b32.xlu0 %v3540_v25, %s13401_s0  ;;  %8475 = vmatpush3.bf16.msra.mxu1 %v9619_v26  ;;  %v9629_v25 = vld [vmem:[%s13282_s10 + $0xd8] sm:$0xff]  }
 0x43c   :  { %8476 = vmatprep.subr.bf16.mxu1 %v9620_v49  ;;  %8532 = vmatprep.subr.bf16.mxu0 %v9629_v25 }
 0x43d   :  { %v9047_v33 = vpop.f32.mrb[76].mxu0 }
 0x43e   :  { %v9303_v28 = vadd.f32 %v9047_v33, %v11317_v15  ;;  %v3130_v27 = vpop.f32.mrb[77].mxu0 }
 0x43f   :  { %v9304_v16 = vadd.f32 %v11317_v15, %v3130_v27  ;;  %v9048_v29 = vpop.f32.mrb[78].mxu0  ;;  %8477 = vmatpush3.bf16.msra.mxu1 %v9621_v21 }
 0x440   :  { %v11432_v63 = vadd.f32 %v9303_v28, %v9971_v7  ;;  %v9305_v34 = vadd.f32 %v9048_v29, %v11317_v15  ;;  %v3133_v4 = vpop.f32.mrb[79].mxu0  ;;  %9081 = vmatprep.subr.bf16.mxu1 %v11512_v56 }
 0x441   :  { %v11436_v2 = vadd.f32 %v9304_v16, %v9961_v5  ;;  %v9306_v14 = vadd.f32 %v11317_v15, %v3133_v4  ;;  %v9630_v16 = vld [vmem:[%s13282_s10 + $0x98] sm:$0xff]  }
 0x442   :  { %3394 = vst.msk [vmem:[#allocation2 + $0x71] sm:$0xff] %vm79_vm0, %v11432_v63  ;;  %v11442_v41 = vadd.f32 %v9305_v34, %v9982_v8  ;;  %8533 = vmatpush3.bf16.msra.mxu0 %v9630_v16 }
 0x443   :  { %13402 = vst [vmem:[#allocation6_spill] sm:$0xff] %v11436_v2  ;;  %3392 = vst.msk [vmem:[#allocation2 + $0x51] sm:$0xff] %vm79_vm0, %v11436_v2  ;;  %v11447_v7 = vadd.f32 %v9306_v14, %v9966_v6  ;;  %v11465_v6 = vld [vmem:[#allocation2 + $0x42] sm:$0xff] }
 0x444   :  { %3395 = vst.msk [vmem:[#allocation2 + $0x81] sm:$0xff] %vm79_vm0, %v11442_v41  ;;  %v11459_v8 = vpack.c.bf16 %v11442_v41, %v11432_v63  ;;  %v9631_v14 = vld [vmem:[%s13282_s10 + $0xe0] sm:$0xff]  }
 0x445   :  { %13403 = vst [vmem:[#allocation7_spill] sm:$0xff] %v11447_v7  ;;  %v11453_v5 = vpack.c.bf16 %v11447_v7, %v11436_v2  ;;  %3393 = vst.msk [vmem:[#allocation2 + $0x61] sm:$0xff] %vm79_vm0, %v11447_v7  ;;  %8534 = vmatprep.subr.bf16.mxu0 %v9631_v14  ;;  %v3579_v2 = vld [vmem:[#allocation2 + $0x91] sm:$0xff] }
 0x447   :  { %9069 = vmatprep.mubr.msk.bf16.mxu1 %vm79_vm0, %v11453_v5 }
 0x448   :  { %9070 = vmatmul.mubr.msk.bf16.gmra.mrb[92].mxu1 %vm79_vm0, %v11459_v8 }
 0x449   :  { %v11473_v23 = vld [vmem:[#allocation2 + $0x70] sm:$0xff] }
 0x44a   :  { %v11467_v48 = vld [vmem:[#allocation2 + $0x52] sm:$0xff] }
 0x44b   :  { %v11471_v20 = vpack.c.bf16 %v11467_v48, %v11465_v6  ;;  %v11475_v22 = vld [vmem:[#allocation2 + $0x80] sm:$0xff]  ;;  %v3433_v11 = vld [vmem:[#allocation2 + $0x51] sm:$0xff] }
 0x44c   :  { %v3495_v46 = vpack.c.bf16 %v11475_v22, %v11473_v23  ;;  %v11481_v40 = vld [vmem:[#allocation2 + $0x81] sm:$0xff]  ;;  %v11491_v35 = vpack.c.bf16 %v3433_v11, %v11371_v38  ;;  %v3506_v37 = vld [vmem:[#allocation2 + $0x71] sm:$0xff] }
 0x44d   :  { %3656 = vrot.lane.b32.xlu0 %v11471_v20, %s9747_s27  ;;  %v3519_v60 = vpack.c.bf16 %v11481_v40, %v3506_v37  ;;  %v11494_v42 = vld [vmem:[#allocation2 + $0x62] sm:$0xff]  ;;  %v11515_v36 = vld [vmem:[#allocation2 + $0x72] sm:$0xff] }
 0x44e   :  { %3682 = vrot.lane.b32.xlu1 %v3495_v46, %s9749_s25  ;;  %v11504_v38 = vld [vmem:[#allocation2 + $0x60] sm:$0xff]  ;;  %v11519_v43 = vpack.c.bf16 %v11515_v36, %v11494_v42  ;;  %v11521_v57 = vld [vmem:[#allocation2 + $0x50] sm:$0xff] }
 0x44f   :  { %v3494_v17 = vpack.c.bf16 %v11504_v38, %v11521_v57  ;;  %v3434_v47 = vld [vmem:[#allocation2 + $0x61] sm:$0xff] }
 0x450   :  { %v11532_v26 = vpack.c.bf16 %v3506_v37, %v3434_v47  ;;  %v3518_v33 = vpack.c.bf16 %v3434_v47, %v3433_v11  ;;  %v3460_v37 = vld [vmem:[#allocation2 + $0xa2] sm:$0xff] }
 0x451   :  { %3632 = vrot.lane.b32.xlu0 %v11491_v35, %s9748_s3 }
 0x452   :  { %3706 = vrot.lane.b32.xlu1 %v3519_v60, %s9750_s8  ;;  %v9634_v60 = vld [vmem:[%s13282_s10 + $0xa8] sm:$0xff]  }
 0x455   :  { %3658 = vrot.lane.b32.xlu0 %v11519_v43, %s9747_s27 }
 0x456   :  { %3680 = vrot.lane.b32.xlu1 %v3494_v17, %s9749_s25 }
 0x457   :  { %v9051_v44 = vpop.f32.mrb[80].mxu0 }
 0x458   :  { %v9307_v49 = vadd.f32 %v9051_v44, %v11317_v15  ;;  %v3146_v21 = vpop.f32.mrb[81].mxu0 }
 0x459   :  { %v9308_v28 = vadd.f32 %v11317_v15, %v3146_v21  ;;  %3634 = vrot.lane.b32.xlu0 %v11532_v26, %s9748_s3  ;;  %v9052_v27 = vpop.f32.mrb[82].mxu0  ;;  %v9636_v21 = vld [vmem:[%s13282_s10 + $0xb0] sm:$0xff]  }
 0x45a   :  { %v11545_v29 = vadd.f32 %v9307_v49, %v13384_v58  ;;  %v9309_v34 = vadd.f32 %v9052_v27, %v11317_v15  ;;  %3704 = vrot.lane.b32.xlu1 %v3518_v33, %s9750_s8  ;;  %v3149_v4 = vpop.f32.mrb[83].mxu0  ;;  %v9635_v49 = vld [vmem:[%s13282_s10 + $0xf0] sm:$0xff]   ;;  %v9637_v27 = vld [vmem:[%s13282_s10 + $0xf8] sm:$0xff]  }
 0x45b   :  { %v11553_v46 = vadd.f32 %v9308_v28, %v9987_v9  ;;  %v9310_v11 = vadd.f32 %v11317_v15, %v3149_v4  ;;  %v9632_v9 = vld [vmem:[%s13282_s10 + $0xa0] sm:$0xff]   ;;  %v9638_v4 = vld [vmem:[%s13282_s10 + $0xb8] sm:$0xff]  }
 0x45c   :  { %13404 = vst [vmem:[#allocation8_spill] sm:$0xff] %v11545_v29  ;;  %3398 = vst.msk [vmem:[#allocation2 + $0xd1] sm:$0xff] %vm79_vm0, %v11545_v29  ;;  %v11559_v58 = vadd.f32 %v9309_v34, %v13385_v54  ;;  %v9633_v54 = vld [vmem:[%s13282_s10 + $0xe8] sm:$0xff]   ;;  %8535 = vmatpush3.bf16.msra.mxu0 %v9632_v9 }
 0x45d   :  { %13405 = vst [vmem:[#allocation9_spill] sm:$0xff] %v11553_v46  ;;  %3396 = vst.msk [vmem:[#allocation2 + $0xb1] sm:$0xff] %vm79_vm0, %v11553_v46  ;;  %v11564_v52 = vadd.f32 %v9310_v11, %v9992_v10  ;;  %8536 = vmatprep.subr.bf16.mxu0 %v9633_v54 }
 0x45e   :  { %13406 = vst [vmem:[#allocation13_spill] sm:$0xff] %v11559_v58  ;;  %3399 = vst.msk [vmem:[#allocation2 + $0xe1] sm:$0xff] %vm79_vm0, %v11559_v58  ;;  %v11582_v10 = vpack.c.bf16 %v11559_v58, %v11545_v29 }
 0x45f   :  { %13407 = vst [vmem:[#allocation10_spill] sm:$0xff] %v11564_v52  ;;  %v11576_v24 = vpack.c.bf16 %v11564_v52, %v11553_v46  ;;  %3397 = vst.msk [vmem:[#allocation2 + $0xc1] sm:$0xff] %vm79_vm0, %v11564_v52 }
 0x460   :  { %8537 = vmatpush3.bf16.msra.mxu0 %v9634_v60 }
 0x461   :  { %9073 = vmatprep.mubr.msk.bf16.mxu1 %vm79_vm0, %v11576_v24  ;;  %8538 = vmatprep.subr.bf16.mxu0 %v9635_v49 }
 0x462   :  { %9074 = vmatmul.mubr.msk.bf16.gmra.mrb[96].mxu1 %vm79_vm0, %v11582_v10 }
 0x463   :  { %v11594_v55 = vld [vmem:[#allocation2 + $0xd0] sm:$0xff] }
 0x464   :  { %v11591_v12 = vld [vmem:[#allocation2 + $0xb2] sm:$0xff]  ;;  %8539 = vmatpush3.bf16.msra.mxu0 %v9636_v21 }
 0x465   :  { %v3472_v61 = vpack.c.bf16 %v11591_v12, %v3460_v37  ;;  %v11596_v17 = vld [vmem:[#allocation2 + $0xe0] sm:$0xff]  ;;  %v3437_v44 = vld [vmem:[#allocation2 + $0xb1] sm:$0xff]  ;;  %8540 = vmatprep.subr.bf16.mxu0 %v9637_v27 }
 0x466   :  { %v3497_v47 = vpack.c.bf16 %v11596_v17, %v11594_v55  ;;  %v3511_v25 = vld [vmem:[#allocation2 + $0xe1] sm:$0xff]  ;;  %v3448_v33 = vpack.c.bf16 %v3437_v44, %v3436_v32  ;;  %v3510_v28 = vld [vmem:[#allocation2 + $0xd1] sm:$0xff] }
 0x467   :  { %3660 = vrot.lane.b32.xlu0 %v3472_v61, %s9747_s27  ;;  %v3521_v16 = vpack.c.bf16 %v3511_v25, %v3510_v28  ;;  %v11611_v34 = vld [vmem:[#allocation2 + $0xc2] sm:$0xff]  ;;  %v11620_v11 = vld [vmem:[#allocation2 + $0xd2] sm:$0xff] }
 0x468   :  { %3686 = vrot.lane.b32.xlu1 %v3497_v47, %s9749_s25  ;;  %v11617_v14 = vld [vmem:[#allocation2 + $0xc0] sm:$0xff]  ;;  %v11624_v9 = vpack.c.bf16 %v11620_v11, %v11611_v34  ;;  %v11626_v54 = vld [vmem:[#allocation2 + $0xb0] sm:$0xff]  ;;  %8541 = vmatpush3.bf16.msra.mxu0 %v9638_v4 }
 0x469   :  { %v3496_v37 = vpack.c.bf16 %v11617_v14, %v11626_v54  ;;  %v3438_v60 = vld [vmem:[#allocation2 + $0xc1] sm:$0xff] }
 0x46a   :  { %v11633_v61 = vpack.c.bf16 %v3510_v28, %v3438_v60  ;;  %v3520_v47 = vpack.c.bf16 %v3438_v60, %v3437_v44 }
 0x46b   :  { %3636 = vrot.lane.b32.xlu0 %v3448_v33, %s9748_s3 }
 0x46c   :  { %3710 = vrot.lane.b32.xlu1 %v3521_v16, %s9750_s8 }
 0x46f   :  { %3662 = vrot.lane.b32.xlu0 %v11624_v9, %s9747_s27 }
 0x470   :  { %3684 = vrot.lane.b32.xlu1 %v3496_v37, %s9749_s25 }
 0x473   :  { %3638 = vrot.lane.b32.xlu0 %v11633_v61, %s9748_s3 }
 0x474   :  { %3708 = vrot.lane.b32.xlu1 %v3520_v47, %s9750_s8 }
 0x477   :  { %v9055_v32 = vpop.f32.mrb[84].mxu0 }
 0x478   :  { %v9311_v49 = vadd.f32 %v9055_v32, %v11317_v15  ;;  %3796 = vrot.lane.b32.xlu1 %v11389_v59, %s13408_s28  ;;  %v3162_v21 = vpop.f32.mrb[85].mxu0 }
 0x479   :  { %v9312_v33 = vadd.f32 %v11317_v15, %v3162_v21  ;;  %v9056_v27 = vpop.f32.mrb[86].mxu0 }
 0x47a   :  { %v11643_v16 = vadd.f32 %v9311_v49, %v13389_v19  ;;  %v9313_v44 = vadd.f32 %v9056_v27, %v11317_v15  ;;  %v3165_v28 = vpop.f32.mrb[87].mxu0 }
 0x47b   :  { %v11647_v4 = vadd.f32 %v9312_v33, %v13386_v1  ;;  %v9314_v37 = vadd.f32 %v11317_v15, %v3165_v28 }
 0x47c   :  { %13409 = vst [vmem:[#allocation11_spill] sm:$0xff] %v11643_v16  ;;  %3402 = vst.msk [vmem:[#allocation2 + $0x111] sm:$0xff] %vm79_vm0, %v11643_v16  ;;  %v11653_v59 = vadd.f32 %v9313_v44, %v13390_v18 }
 0x47d   :  { %13410 = vst [vmem:[#allocation12_spill] sm:$0xff] %v11647_v4  ;;  %3400 = vst.msk [vmem:[#allocation2 + $0xf1] sm:$0xff] %vm79_vm0, %v11647_v4  ;;  %v11658_v19 = vadd.f32 %v9314_v37, %v13387_v31  ;;  %v11676_v31 = vld [vmem:[#allocation2 + $0xe2] sm:$0xff] }
 0x47e   :  { %13411 = vst [vmem:[#allocation14_spill] sm:$0xff] %v11653_v59  ;;  %3403 = vst.msk [vmem:[#allocation2 + $0x121] sm:$0xff] %vm79_vm0, %v11653_v59  ;;  %v11670_v18 = vpack.c.bf16 %v11653_v59, %v11643_v16 }
 0x47f   :  { %13412 = vst [vmem:[#allocation15_spill] sm:$0xff] %v11658_v19  ;;  %v11664_v1 = vpack.c.bf16 %v11658_v19, %v11647_v4  ;;  %3401 = vst.msk [vmem:[#allocation2 + $0x101] sm:$0xff] %vm79_vm0, %v11658_v19  ;;  %v11706_v19 = vpack.c.bf16 %v11521_v57, %v11364_v51 }
 0x481   :  { %9077 = vmatprep.mubr.msk.bf16.mxu1 %vm79_vm0, %v11664_v1 }
 0x482   :  { %9078 = vmatmul.mubr.msk.bf16.gmra.mrb[100].mxu1 %vm79_vm0, %v11670_v18 }
 0x483   :  { %v11684_v47 = vld [vmem:[#allocation2 + $0x110] sm:$0xff] }
 0x484   :  { %v11678_v15 = vld [vmem:[#allocation2 + $0xf2] sm:$0xff] }
 0x485   :  { %v11682_v60 = vpack.c.bf16 %v11678_v15, %v11676_v31  ;;  %v11686_v32 = vld [vmem:[#allocation2 + $0x120] sm:$0xff]  ;;  %v3441_v21 = vld [vmem:[#allocation2 + $0xf1] sm:$0xff] }
 0x486   :  { %v3499_v49 = vpack.c.bf16 %v11686_v32, %v11684_v47  ;;  %v11692_v33 = vld [vmem:[#allocation2 + $0x100] sm:$0xff]  ;;  %v11695_v27 = vpack.c.bf16 %v3441_v21, %v3511_v25  ;;  %v11697_v44 = vld [vmem:[#allocation2 + $0xf0] sm:$0xff] }
 0x487   :  { %3664 = vrot.lane.b32.xlu0 %v11682_v60, %s9747_s27  ;;  %v3498_v28 = vpack.c.bf16 %v11692_v33, %v11697_v44  ;;  %v3513_v37 = vld [vmem:[#allocation2 + $0x101] sm:$0xff] }
 0x488   :  { %3690 = vrot.lane.b32.xlu1 %v3499_v49, %s9749_s25  ;;  %v3522_v4 = vpack.c.bf16 %v3513_v37, %v3441_v21  ;;  %v11708_v59 = vld [vmem:[#allocation2 + $0x102] sm:$0xff]  ;;  %v11715_v49 = vld [vmem:[#allocation2 + $0x112] sm:$0xff]  ;;  %v3541_v21 = vpack.c.bf16 %v11465_v6, %v11383_v53  ;;  %v3542_v53 = vpack.c.bf16 %v11494_v42, %v11467_v48 }
 0x489   :  { %v11712_v25 = vld [vmem:[#allocation2 + $0x121] sm:$0xff]  ;;  %v11719_v16 = vpack.c.bf16 %v11715_v49, %v11708_v59 }
 0x48b   :  { %3640 = vrot.lane.b32.xlu0 %v11695_v27, %s9748_s3 }
 0x48c   :  { %3688 = vrot.lane.b32.xlu1 %v3498_v28, %s9749_s25  ;;  %v3514_v28 = vld [vmem:[#allocation2 + $0x111] sm:$0xff] }
 0x48d   :  { %v3523_v51 = vpack.c.bf16 %v11712_v25, %v3514_v28  ;;  %v11725_v57 = vpack.c.bf16 %v3514_v28, %v3513_v37  ;;  %v11738_v37 = vpack.c.bf16 %v11473_v23, %v11504_v38  ;;  %v3555_v23 = vld [vmem:[#allocation2 + $0x90] sm:$0xff] }
 0x48e   :  { %v3567_v42 = vpack.c.bf16 %v3555_v23, %v11475_v22 }
 0x48f   :  { %3750 = vrot.lane.b32.xlu0 %v11706_v19, %s9751_s4 }
 0x490   :  { %3712 = vrot.lane.b32.xlu1 %v3522_v4, %s9750_s8 }
 0x493   :  { %3666 = vrot.lane.b32.xlu0 %v11719_v16, %s9747_s27 }
 0x494   :  { %3714 = vrot.lane.b32.xlu1 %v3523_v51, %s9750_s8  ;;  %v3602_v51 = vld [vmem:[#allocation2 + $0x82] sm:$0xff] }
 0x497   :  { %3642 = vrot.lane.b32.xlu0 %v11725_v57, %s9748_s3 }
 0x498   :  { %3774 = vrot.lane.b32.xlu1 %v11491_v35, %s9752_s1  ;;  %v3404_v35 = vld [vmem:[#allocation2] sm:$0xff] }
 0x499   :  { %v3653_v4 = vpop.permute.xlu0 %3652 }
 0x49a   :  { %v3679_v52 = vpop.permute.xlu1 %3678 }
 0x49b   :  { %3726 = vrot.lane.b32.xlu0 %v3541_v21, %s13401_s0  ;;  %v3420_v21 = vpack.c.bf16 %v11391_v62, %v3404_v35 }
 0x49c   :  { %3798 = vrot.lane.b32.xlu1 %v11471_v20, %s13408_s28  ;;  %v3603_v20 = vld [vmem:[#allocation2 + $0x92] sm:$0xff] }
 0x49d   :  { %v3629_v46 = vpop.permute.xlu0 %3628  ;;  %v3615_v29 = vpack.c.bf16 %v3603_v20, %v3602_v51 }
 0x49e   :  { %v11740_v28 = vpop.permute.xlu1 %3702  ;;  %v3814_v38 = vsel %vm79_vm0, %v3420_v21, %v3629_v46 }
 0x49f   :  { %3752 = vrot.lane.b32.xlu0 %v11738_v37, %s9751_s4  ;;  %v11767_v46 = vsel %vm13354_vm4, %v3814_v38, %v3653_v4 }
 0x4a0   :  { %3776 = vrot.lane.b32.xlu1 %v11532_v26, %s9752_s1 }
 0x4a1   :  { %v3655_v58 = vpop.permute.xlu0 %3654 }
 0x4a2   :  { %v3677_v6 = vpop.permute.xlu1 %3676  ;;  %v3863_v26 = vsel %vm619_vm2, %v3655_v58, %v3679_v52 }
 0x4a3   :  { %3728 = vrot.lane.b32.xlu0 %v3542_v53, %s13401_s0  ;;  %v3861_v7 = vsel %vm619_vm2, %v3653_v4, %v3677_v6  ;;  %v11774_v22 = vsel %vm13355_vm3, %v3863_v26, %v11740_v28  ;;  %v3543_v4 = vpack.c.bf16 %v3602_v51, %v11515_v36  ;;  %v11794_v36 = vpack.c.bf16 %v11594_v55, %v11617_v14  ;;  %v3587_v6 = vld [vmem:[#allocation2 + $0x131] sm:$0xff] }
 0x4a4   :  { %3800 = vrot.lane.b32.xlu1 %v11519_v43, %s13408_s28  ;;  %v9639_v43 = vld [vmem:[%s13282_s10 + $0x108] sm:$0x3f]   ;;  %v11813_v14 = vpack.c.bf16 %v11697_v44, %v11596_v17  ;;  %v11826_v17 = vpack.c.bf16 %v11684_v47, %v11692_v33 }
 0x4a5   :  { %v3631_v52 = vpop.permute.xlu0 %3630  ;;  %v4275_v35 = vsel %vm1048_vm5, %v9639_v43, 0 }
 0x4a6   :  { %v11755_v48 = vpop.permute.xlu1 %3700 }
 0x4a7   :  { %3802 = vrot.lane.b32.xlu0 %v3615_v29, %s13408_s28  ;;  %v11761_v62 = vsel %vm13355_vm3, %v3861_v7, %v11755_v48  ;;  %v3591_v7 = vpack.c.bf16 %v3579_v2, %v11481_v40  ;;  %v9644_v29 = vld [vmem:[%s13284_s12 + $0x40] sm:$0xff]   ;;  %v3817_v40 = vsel %vm79_vm0, %v11411_v45, %v3631_v52  ;;  %v3544_v45 = vpack.c.bf16 %v11611_v34, %v11591_v12 }
 0x4a8   :  { %3754 = vrot.lane.b32.xlu1 %v3567_v42, %s9751_s4  ;;  %4309 = vmatprep.mubr.bf16.mxu1 %v11761_v62  ;;  %v9640_v2 = vld [vmem:[%s13284_s12 + $0xc0] sm:$0xff]  }
 0x4a9   :  { %4310 = vmatmul.mubr.bf16.vlgmr.msra.gmra.mrb[104].mxu1 %v11767_v46  ;;  %8600 = vmatprep.subr.bf16.mxu0 %v9644_v29  ;;  %v11809_v55 = vpop.permute.xlu0 %3748  ;;  %v3412_v52 = vld [vmem:[#allocation2 + $0xa0] sm:$0xff] }
 0x4aa   :  { %4317 = vmatprep.mubr.bf16.mxu1 %v11774_v22  ;;  %9082 = vmatpush3.bf16.msra.mxu1 %v11512_v56  ;;  %v11801_v56 = vsel %vm13354_vm4, %v3817_v40, %v3655_v58  ;;  %v3545_v58 = vpack.c.bf16 %v11676_v31, %v11620_v11  ;;  %v3773_v34 = vpop.permute.xlu1 %3772  ;;  %v3546_v11 = vpack.c.bf16 %v11708_v59, %v11678_v15  ;;  %v3610_v31 = vld [vmem:[#allocation2 + $0x122] sm:$0xff] }
 0x4ab   :  { %3778 = vrot.lane.b32.xlu0 %v3591_v7, %s9752_s1  ;;  %9498 = vmatprep.subr.msk.bf16.mxu1 %vm1048_vm5, %v9639_v43  ;;  %v3595_v15 = vpack.c.bf16 %v3587_v6, %v11712_v25  ;;  %v3547_v51 = vpack.c.bf16 %v3610_v31, %v11715_v49  ;;  %v9652_v6 = vld [vmem:[%s13284_s12 + $0x50] sm:$0xff]  }
 0x4ac   :  { %3730 = vrot.lane.b32.xlu1 %v3543_v4, %s13401_s0 }
 0x4ad   :  { %v3725_v12 = vpop.permute.xlu0 %3724 }
 0x4ae   :  { %9084 = vmatpush3.bf16.msra.mxu1 %v4275_v35  ;;  %v3424_v35 = vpack.c.bf16 %v11626_v54, %v3412_v52  ;;  %v3901_v54 = vsel %vm13356_vm7, %v11755_v48, %v3725_v12  ;;  %v9648_v12 = vld [vmem:[%s13284_s12 + $0x48] sm:$0xff]  }
 0x4af   :  { %3756 = vrot.lane.b32.xlu0 %v11794_v36, %s9751_s4  ;;  %8664 = vmatprep.subr.bf16.mxu1 %v9640_v2 }
 0x4b0   :  { %3780 = vrot.lane.b32.xlu1 %v11633_v61, %s9752_s1 }
 0x4b1   :  { %4318 = vmatmul.mubr.bf16.gmra.mrb[108].mxu1 %v11801_v56 }
 0x4b3   :  { %3732 = vrot.lane.b32.xlu0 %v3544_v45, %s13401_s0 }
 0x4b4   :  { %3804 = vrot.lane.b32.xlu1 %v11624_v9, %s13408_s28 }
 0x4b7   :  { %3758 = vrot.lane.b32.xlu0 %v11813_v14, %s9751_s4 }
 0x4b8   :  { %3782 = vrot.lane.b32.xlu1 %v11695_v27, %s9752_s1  ;;  %v3611_v27 = vld [vmem:[#allocation2 + $0x132] sm:$0xff] }
 0x4b9   :  { %v3619_v47 = vpack.c.bf16 %v3611_v27, %v3610_v31  ;;  %v3941_v31 = vsel %vm13413_vm6, %v11809_v55, %v3773_v34  ;;  %v11912_v34 = vsel %vm13415_vm9, %v3901_v54, %v11809_v55  ;;  %vm13417_vm9 = vcmask 785408  }
 0x4bb   :  { %3734 = vrot.lane.b32.xlu0 %v3545_v58, %s13401_s0 }
 0x4bc   :  { %3806 = vrot.lane.b32.xlu1 %v11682_v60, %s13408_s28  ;;  %v3563_v60 = vld [vmem:[#allocation2 + $0x130] sm:$0xff] }
 0x4bd   :  { %v3571_v33 = vpack.c.bf16 %v3563_v60, %v11686_v32  ;;  %v9645_v60 = vld [vmem:[%s13284_s12] sm:$0xff]  }
 0x4bf   :  { %v3657_v9 = vpop.permute.xlu0 %3656  ;;  %3760 = vrot.lane.b32.xlu0 %v11826_v17, %s9751_s4 }
 0x4c0   :  { %v3683_v61 = vpop.permute.xlu1 %3682  ;;  %3784 = vrot.lane.b32.xlu1 %v11725_v57, %s9752_s1 }
 0x4c3   :  { %v3633_v44 = vpop.permute.xlu0 %3632  ;;  %3736 = vrot.lane.b32.xlu0 %v3546_v11, %s13401_s0 }
 0x4c4   :  { %v11835_v53 = vpop.permute.xlu1 %3706  ;;  %3808 = vrot.lane.b32.xlu1 %v11719_v16, %s13408_s28  ;;  %v3820_v20 = vsel %vm79_vm0, %v11706_v19, %v3633_v44 }
 0x4c5   :  { %v11858_v25 = vsel %vm13354_vm4, %v3820_v20, %v3657_v9 }
 0x4c7   :  { %3810 = vrot.lane.b32.xlu0 %v3619_v47, %s13408_s28  ;;  %v3659_v59 = vpop.permute.xlu0 %3658 }
 0x4c8   :  { %v3681_v57 = vpop.permute.xlu1 %3680  ;;  %3762 = vrot.lane.b32.xlu1 %v3571_v33, %s9751_s4  ;;  %v3867_v16 = vsel %vm619_vm2, %v3659_v59, %v3683_v61  ;;  %v9649_v33 = vld [vmem:[%s13284_s12 + $0x8] sm:$0xff]  }
 0x4c9   :  { %v3865_v32 = vsel %vm619_vm2, %v3657_v9, %v3681_v57  ;;  %v11863_v19 = vsel %vm13355_vm3, %v3867_v16, %v11835_v53  ;;  %v9656_v57 = vld [vmem:[%s13284_s12 + $0x58] sm:$0xff]   ;;  %v9661_v16 = vld [vmem:[%s13284_s12 + $0x20] sm:$0xff]  }
 0x4cb   :  { %3786 = vrot.lane.b32.xlu0 %v3595_v15, %s9752_s1  ;;  %v3635_v49 = vpop.permute.xlu0 %3634  ;;  %v9660_v15 = vld [vmem:[%s13284_s12 + $0x60] sm:$0xff]  }
 0x4cc   :  { %v11849_v21 = vpop.permute.xlu1 %3704  ;;  %3738 = vrot.lane.b32.xlu1 %v3547_v51, %s13401_s0  ;;  %v3823_v38 = vsel %vm79_vm0, %v11738_v37, %v3635_v49 }
 0x4cd   :  { %v11854_v23 = vsel %vm13355_vm3, %v3865_v32, %v11849_v21  ;;  %v11869_v26 = vsel %vm13354_vm4, %v3823_v38, %v3659_v59  ;;  %v9657_v59 = vld [vmem:[%s13284_s12 + $0x18] sm:$0xff]   ;;  %v9664_v32 = vld [vmem:[%s13284_s12 + $0x68] sm:$0xff]  }
 0x4ce   :  { %4325 = vmatprep.mubr.bf16.mxu1 %v11854_v23 }
 0x4cf   :  { %4326 = vmatmul.mubr.bf16.gmra.mrb[112].mxu1 %v11858_v25 }
 0x4d0   :  { %4333 = vmatprep.mubr.bf16.mxu1 %v11863_v19 }
 0x4d7   :  { %4334 = vmatmul.mubr.bf16.gmra.mrb[116].mxu1 %v11869_v26 }
 0x4d9   :  { %v3661_v42 = vpop.permute.xlu0 %3660 }
 0x4da   :  { %v3687_v43 = vpop.permute.xlu1 %3686 }
 0x4dd   :  { %v3637_v7 = vpop.permute.xlu0 %3636 }
 0x4de   :  { %v11872_v29 = vpop.permute.xlu1 %3710  ;;  %v3826_v40 = vsel %vm79_vm0, %v3424_v35, %v3637_v7 }
 0x4df   :  { %v11886_v61 = vsel %vm13354_vm4, %v3826_v40, %v3661_v42 }
 0x4e1   :  { %v3663_v2 = vpop.permute.xlu0 %3662 }
 0x4e2   :  { %v3685_v4 = vpop.permute.xlu1 %3684  ;;  %v3871_v45 = vsel %vm619_vm2, %v3663_v2, %v3687_v43  ;;  %v9668_v43 = vld [vmem:[%s13284_s12 + $0x70] sm:$0xff]  }
 0x4e3   :  { %v3869_v37 = vsel %vm619_vm2, %v3661_v42, %v3685_v4  ;;  %v11893_v11 = vsel %vm13355_vm3, %v3871_v45, %v11872_v29  ;;  %v9665_v42 = vld [vmem:[%s13284_s12 + $0x28] sm:$0xff]   ;;  %v9670_v45 = vld [vmem:[%s13284_s12 + $0x78] sm:$0xff]  }
 0x4e5   :  { %v3639_v27 = vpop.permute.xlu0 %3638 }
 0x4e6   :  { %v11878_v58 = vpop.permute.xlu1 %3708  ;;  %v3829_v47 = vsel %vm79_vm0, %v11794_v36, %v3639_v27  ;;  %v9653_v36 = vld [vmem:[%s13284_s12 + $0x10] sm:$0xff]   ;;  %v9671_v27 = vld [vmem:[%s13284_s12 + $0x38] sm:$0xff]  }
 0x4e7   :  { %v11882_v9 = vsel %vm13355_vm3, %v3869_v37, %v11878_v58  ;;  %v11925_v55 = vsel %vm13354_vm4, %v3829_v47, %v3663_v2  ;;  %v9669_v2 = vld [vmem:[%s13284_s12 + $0x30] sm:$0xff]  }
 0x4e8   :  { %4341 = vmatprep.mubr.bf16.mxu1 %v11882_v9 }
 0x4e9   :  { %4342 = vmatmul.mubr.bf16.gmra.mrb[120].mxu1 %v11886_v61 }
 0x4ea   :  { %v11897_v44 = vpop.permute.xlu1 %3796  ;;  %4349 = vmatprep.mubr.bf16.mxu1 %v11893_v11 }
 0x4eb   :  { %v11905_v48 = vsel %vm13414_vm8, %v3941_v31, %v11897_v44  ;;  %vm13416_vm8 = vcmask 228352  }
 0x4ec   :  { %4406 = vmatprep.mubr.bf16.mxu0 %v11905_v48 }
 0x4ed   :  { %4407 = vmatmul.mubr.bf16.vlgmr.msra.gmra.mrb[88].mxu0 %v11912_v34 }
 0x4ee   :  { %8601 = vmatpush3.bf16.msra.mxu0 %v9645_v60 }
 0x4ef   :  { %8602 = vmatprep.subr.bf16.mxu0 %v9648_v12  ;;  %v11985_v12 = vld [vmem:[%s13284_s12 + $0x100] sm:$0xff]  }
 0x4f1   :  { %4350 = vmatmul.mubr.bf16.gmra.mrb[124].mxu1 %v11925_v55 }
 0x4f2   :  { %8603 = vmatpush3.bf16.msra.mxu0 %v9649_v33 }
 0x4f3   :  { %8604 = vmatprep.subr.bf16.mxu0 %v9652_v6 }
 0x4f6   :  { %8605 = vmatpush3.bf16.msra.mxu0 %v9653_v36 }
 0x4f7   :  { %8606 = vmatprep.subr.bf16.mxu0 %v9656_v57 }
 0x4f9   :  { %v3665_v51 = vpop.permute.xlu0 %3664 }
 0x4fa   :  { %v3691_v20 = vpop.permute.xlu1 %3690  ;;  %8607 = vmatpush3.bf16.msra.mxu0 %v9657_v59 }
 0x4fb   :  { %8608 = vmatprep.subr.bf16.mxu0 %v9660_v15 }
 0x4fd   :  { %v3641_v49 = vpop.permute.xlu0 %3640 }
 0x4fe   :  { %v3689_v38 = vpop.permute.xlu1 %3688  ;;  %8609 = vmatpush3.bf16.msra.mxu0 %v9661_v16  ;;  %v3832_v7 = vsel %vm79_vm0, %v11813_v14, %v3641_v49  ;;  %v9642_v49 = vld [vmem:[%s13284_s12 + $0xc8] sm:$0xff]  }
 0x4ff   :  { %8610 = vmatprep.subr.bf16.mxu0 %v9664_v32  ;;  %v3873_v4 = vsel %vm619_vm2, %v3665_v51, %v3689_v38  ;;  %v11969_v14 = vsel %vm13354_vm4, %v3832_v7, %v3665_v51 }
 0x501   :  { %v3751_v52 = vpop.permute.xlu0 %3750 }
 0x502   :  { %v11955_v35 = vpop.permute.xlu1 %3712  ;;  %8611 = vmatpush3.bf16.msra.mxu0 %v9665_v42 }
 0x503   :  { %v11962_v40 = vsel %vm13355_vm3, %v3873_v4, %v11955_v35  ;;  %8612 = vmatprep.subr.bf16.mxu0 %v9668_v43 }
 0x504   :  { %4357 = vmatprep.mubr.bf16.mxu1 %v11962_v40 }
 0x505   :  { %v3667_v37 = vpop.permute.xlu0 %3666  ;;  %4358 = vmatmul.mubr.bf16.gmra.mrb[128].mxu1 %v11969_v14 }
 0x506   :  { %v3875_v54 = vsel %vm619_vm2, %v3667_v37, %v3691_v20  ;;  %v11973_v31 = vpop.permute.xlu1 %3714  ;;  %8613 = vmatpush3.bf16.msra.mxu0 %v9669_v2 }
 0x507   :  { %v11980_v60 = vsel %vm13355_vm3, %v3875_v54, %v11973_v31  ;;  %8614 = vmatprep.subr.bf16.mxu0 %v9670_v45  ;;  %v9647_v54 = vld [vmem:[%s13284_s12 + $0x90] sm:$0xff]   ;;  %vm13428_vm3 = vcmask 293888  }
 0x508   :  { %4365 = vmatprep.mubr.bf16.mxu1 %v11980_v60 }
 0x509   :  { %v3643_v47 = vpop.permute.xlu0 %3642 }
 0x50a   :  { %v3835_v33 = vsel %vm79_vm0, %v11826_v17, %v3643_v47  ;;  %v3775_v6 = vpop.permute.xlu1 %3774  ;;  %8615 = vmatpush3.bf16.msra.mxu0 %v9671_v27  ;;  %v9650_v27 = vld [vmem:[%s13284_s12 + $0xd8] sm:$0xff]  }
 0x50b   :  { %v11991_v36 = vsel %vm13354_vm4, %v3835_v33, %v3667_v37  ;;  %9101 = vmatprep.subr.bf16.mxu0 %v11985_v12  ;;  %v3943_v59 = vsel %vm13413_vm6, %v3751_v52, %v3775_v6  ;;  %vm13418_vm4 = vcmask 850944   ;;  %vm13419_vm6 = vmmov %vm13416_vm8 }
 0x50d   :  { %v3727_v57 = vpop.permute.xlu0 %3726  ;;  %4366 = vmatmul.mubr.bf16.gmra.mrb[132].mxu1 %v11991_v36 }
 0x50e   :  { %v3903_v15 = vsel %vm13356_vm7, %v11740_v28, %v3727_v57  ;;  %v11998_v51 = vpop.permute.xlu1 %3798  ;;  %9085 = vmatprep.mubr.msk.bf16.mxu1 %vm13416_vm8, %v11897_v44  ;;  %v9641_v28 = vld [vmem:[%s13284_s12 + $0x80] sm:$0xff]   ;;  %vm13421_vm8 = vmmov %vm13419_vm6  ;;  %v9651_v57 = vld [vmem:[%s13284_s12 + $0x98] sm:$0xff]  }
 0x50f   :  { %v12004_v17 = vsel %vm13417_vm9, %v3943_v59, %v11998_v51  ;;  %v12007_v20 = vsel %vm13418_vm4, %v3903_v15, %v3751_v52  ;;  %vm13420_vm4 = vcmask 293888   ;;  %v9643_v52 = vld [vmem:[%s13284_s12 + $0x88] sm:$0xff]  }
 0x510   :  { %4414 = vmatprep.mubr.bf16.mxu0 %v12004_v17 }
 0x511   :  { %4415 = vmatmul.mubr.bf16.gmra.mrb[92].mxu0 %v12007_v20  ;;  %v3753_v16 = vpop.permute.xlu0 %3752 }
 0x512   :  { %v3777_v32 = vpop.permute.xlu1 %3776 }
 0x513   :  { %v3945_v42 = vsel %vm13420_vm4, %v3753_v16, %v3777_v32  ;;  %vm13423_vm4 = vmmov %vm13421_vm8 }
 0x515   :  { %v3729_v38 = vpop.permute.xlu0 %3728  ;;  %9086 = vmatmul.mubr.msk.bf16.vlgmr.msra.gmra.mrb[136].mxu1 %vm13419_vm6, %v11998_v51  ;;  %vm13422_vm6 = vcmask 850944  }
 0x516   :  { %v3905_v43 = vsel %vm13356_vm7, %v11849_v21, %v3729_v38  ;;  %v12022_v7 = vpop.permute.xlu1 %3800  ;;  %8665 = vmatpush3.bf16.msra.mxu1 %v9641_v28  ;;  %v9646_v21 = vld [vmem:[%s13284_s12 + $0xd0] sm:$0xff]   ;;  %v9658_v38 = vld [vmem:[%s13284_s12 + $0xe8] sm:$0xff]  }
 0x517   :  { %9089 = vmatprep.mubr.msk.bf16.mxu1 %vm13421_vm8, %v12022_v7  ;;  %v12031_v4 = vsel %vm13417_vm9, %v3945_v42, %v12022_v7  ;;  %v12034_v2 = vsel %vm13422_vm6, %v3905_v43, %v3753_v16  ;;  %8666 = vmatprep.subr.bf16.mxu1 %v9642_v49  ;;  %vm13424_vm8 = vcmask 293888   ;;  %v9654_v16 = vld [vmem:[%s13284_s12 + $0xe0] sm:$0xff]  }
 0x518   :  { %4422 = vmatprep.mubr.bf16.mxu0 %v12031_v4 }
 0x519   :  { %4423 = vmatmul.mubr.bf16.gmra.mrb[96].mxu0 %v12034_v2  ;;  %v12041_v45 = vpop.permute.xlu0 %3802 }
 0x51a   :  { %v3755_v37 = vpop.permute.xlu1 %3754  ;;  %8667 = vmatpush3.bf16.msra.mxu1 %v9643_v52 }
 0x51b   :  { %8668 = vmatprep.subr.bf16.mxu1 %v9646_v21 }
 0x51d   :  { %v3779_v47 = vpop.permute.xlu0 %3778  ;;  %9090 = vmatmul.mubr.msk.bf16.gmra.mrb[140].mxu1 %vm13423_vm4, %v12041_v45  ;;  %vm13425_vm4 = vmmov %vm13424_vm8 }
 0x51e   :  { %v3947_v33 = vsel %vm13424_vm8, %v3755_v37, %v3779_v47  ;;  %v3731_v6 = vpop.permute.xlu1 %3730  ;;  %8669 = vmatpush3.bf16.msra.mxu1 %v9647_v54  ;;  %vm13426_vm8 = vcmask 228352  }
 0x51f   :  { %v3907_v59 = vsel %vm13356_vm7, %v11835_v53, %v3731_v6  ;;  %v12059_v15 = vsel %vm13417_vm9, %v3947_v33, %v12041_v45  ;;  %8670 = vmatprep.subr.bf16.mxu1 %v9650_v27  ;;  %v9655_v53 = vld [vmem:[%s13284_s12 + $0xa0] sm:$0xff]   ;;  %v9663_v6 = vld [vmem:[%s13284_s12 + $0xb0] sm:$0xff]  }
 0x520   :  { %4430 = vmatprep.mubr.bf16.mxu0 %v12059_v15  ;;  %v12066_v32 = vsel %vm13422_vm6, %v3907_v59, %v3755_v37  ;;  %v9659_v37 = vld [vmem:[%s13284_s12 + $0xa8] sm:$0xff]  }
 0x521   :  { %4431 = vmatmul.mubr.bf16.gmra.mrb[100].mxu0 %v12066_v32  ;;  %v3757_v28 = vpop.permute.xlu0 %3756 }
 0x522   :  { %v3781_v49 = vpop.permute.xlu1 %3780  ;;  %8671 = vmatpush3.bf16.msra.mxu1 %v9651_v57  ;;  %v9666_v57 = vld [vmem:[%s13284_s12 + $0xf8] sm:$0xff]  }
 0x523   :  { %8672 = vmatprep.subr.bf16.mxu1 %v9654_v16  ;;  %v3949_v43 = vsel %vm13425_vm4, %v3757_v28, %v3781_v49 }
 0x525   :  { %v3733_v42 = vpop.permute.xlu0 %3732 }
 0x526   :  { %v3909_v52 = vsel %vm13356_vm7, %v11878_v58, %v3733_v42  ;;  %v12078_v21 = vpop.permute.xlu1 %3804  ;;  %8673 = vmatpush3.bf16.msra.mxu1 %v9655_v53  ;;  %v9662_v58 = vld [vmem:[%s13284_s12 + $0xf0] sm:$0xff]   ;;  %v9667_v53 = vld [vmem:[%s13284_s12 + $0xb8] sm:$0xff]  }
 0x527   :  { %9093 = vmatprep.mubr.msk.bf16.mxu1 %vm13426_vm8, %v12078_v21  ;;  %v12087_v54 = vsel %vm13417_vm9, %v3949_v43, %v12078_v21  ;;  %v12090_v27 = vsel %vm13422_vm6, %v3909_v52, %v3757_v28  ;;  %8674 = vmatprep.subr.bf16.mxu1 %v9658_v38 }
 0x528   :  { %4438 = vmatprep.mubr.bf16.mxu0 %v12087_v54 }
 0x529   :  { %4439 = vmatmul.mubr.bf16.gmra.mrb[104].mxu0 %v12090_v27  ;;  %v3759_v47 = vpop.permute.xlu0 %3758 }
 0x52a   :  { %v3783_v33 = vpop.permute.xlu1 %3782  ;;  %8675 = vmatpush3.bf16.msra.mxu1 %v9659_v37 }
 0x52b   :  { %8676 = vmatprep.subr.bf16.mxu1 %v9662_v58  ;;  %v3951_v16 = vsel %vm13425_vm4, %v3759_v47, %v3783_v33 }
 0x52d   :  { %v3735_v59 = vpop.permute.xlu0 %3734 }
 0x52e   :  { %v3911_v28 = vsel %vm13356_vm7, %v11872_v29, %v3735_v59  ;;  %v12106_v49 = vpop.permute.xlu1 %3806  ;;  %8677 = vmatpush3.bf16.msra.mxu1 %v9663_v6  ;;  %v9672_v29 = vld [vmem:[%s13287_s15] sm:$0xff]  }
 0x52f   :  { %9094 = vmatmul.mubr.msk.bf16.gmra.mrb[144].mxu1 %vm13426_vm8, %v12106_v49  ;;  %v12115_v38 = vsel %vm13417_vm9, %v3951_v16, %v12106_v49  ;;  %v12118_v42 = vsel %vm13422_vm6, %v3911_v28, %v3759_v47  ;;  %8678 = vmatprep.subr.bf16.mxu1 %v9666_v57 }
 0x530   :  { %4446 = vmatprep.mubr.bf16.mxu0 %v12115_v38 }
 0x531   :  { %4447 = vmatmul.mubr.bf16.gmra.mrb[108].mxu0 %v12118_v42  ;;  %v3761_v43 = vpop.permute.xlu0 %3760 }
 0x532   :  { %v3785_v52 = vpop.permute.xlu1 %3784  ;;  %8679 = vmatpush3.bf16.msra.mxu1 %v9667_v53 }
 0x533   :  { %9147 = vmatprep.subr.bf16.mxu1 %v9672_v29  ;;  %v3953_v58 = vsel %vm13425_vm4, %v3761_v43, %v3785_v52  ;;  %vm13427_vm4 = vmmov %vm13426_vm8 }
 0x535   :  { %v3737_v37 = vpop.permute.xlu0 %3736 }
 0x536   :  { %v3913_v47 = vsel %vm13356_vm7, %v11955_v35, %v3737_v37  ;;  %v12128_v33 = vpop.permute.xlu1 %3808 }
 0x537   :  { %9097 = vmatprep.mubr.msk.bf16.mxu1 %vm13426_vm8, %v12128_v33  ;;  %v3975_v6 = vsel %vm13417_vm9, %v3953_v58, %v12128_v33  ;;  %v3935_v57 = vsel %vm13422_vm6, %v3913_v47, %v3761_v43  ;;  %vm13429_vm8 = vmmov %vm13417_vm9  ;;  %v9673_v58 = vld [vmem:[%s13287_s15 + $0x8] sm:$0xff]  }
 0x538   :  { %4454 = vmatprep.mubr.bf16.mxu0 %v3975_v6  ;;  %vm13430_vm9 = vmmov %vm13422_vm6 }
 0x539   :  { %4455 = vmatmul.mubr.bf16.gmra.mrb[112].mxu0 %v3935_v57  ;;  %v12135_v59 = vpop.permute.xlu0 %3810 }
 0x53a   :  { %v3763_v16 = vpop.permute.xlu1 %3762  ;;  %9098 = vmatmul.mubr.msk.bf16.gmra.mrb[148].mxu1 %vm13427_vm4, %v12135_v59 }
 0x53b   :  { %5578 = vmatprep.mubr.bf16.mxu1 %v11905_v48  ;;  %v9674_v48 = vld [vmem:[%s13287_s15 + $0x10] sm:$0xff]  }
 0x53d   :  { %v3787_v35 = vpop.permute.xlu0 %3786 }
 0x53e   :  { %v3955_v28 = vsel %vm13428_vm3, %v3763_v16, %v3787_v35  ;;  %v3739_v53 = vpop.permute.xlu1 %3738  ;;  %vm13431_vm3 = vmmov %vm13427_vm4 }
 0x53f   :  { %v3915_v52 = vsel %vm13356_vm7, %v11973_v31, %v3739_v53  ;;  %v3978_v43 = vsel %vm13429_vm8, %v3955_v28, %v12135_v59  ;;  %v9675_v31 = vld [vmem:[%s13287_s15 + $0x18] sm:$0x3f]   ;;  %vm13432_vm6 = vmmov %vm13431_vm3 }
 0x540   :  { %4462 = vmatprep.mubr.bf16.mxu0 %v3978_v43  ;;  %v3938_v37 = vsel %vm13430_vm9, %v3915_v52, %v3763_v16  ;;  %vm13433_vm4 = vmmov %vm13431_vm3 }
 0x541   :  { %4463 = vmatmul.mubr.bf16.gmra.mrb[116].mxu0 %v3938_v37  ;;  %vm13434_vm8 = vmmov %vm13431_vm3 }
 0x542   :  { %5481 = vmatprep.mubr.bf16.mxu0 %v11761_v62  ;;  %5579 = vmatmul.mubr.bf16.vlgmr.msra.gmra.mrb[152].mxu1 %v11912_v34  ;;  %v9677_v62 = vld [vmem:[%s13284_s12 + $0x108] sm:$0x3f]   ;;  %v5987_v34 = vsel %vm1048_vm5, %v9675_v31, 0  ;;  %vm13435_vm9 = vmmov %vm13431_vm3 }
 0x543   :  { %5586 = vmatprep.mubr.bf16.mxu1 %v12004_v17  ;;  %9148 = vmatpush3.bf16.msra.mxu1 %v9672_v29 }
 0x544   :  { %9149 = vmatprep.subr.bf16.mxu1 %v9673_v58 }
 0x547   :  { %9150 = vmatpush3.bf16.msra.mxu1 %v9673_v58 }
 0x548   :  { %9151 = vmatprep.subr.bf16.mxu1 %v9674_v48 }
 0x549   :  { %5482 = vmatmul.mubr.bf16.vlgmr.msra.gmra.mrb[120].mxu0 %v11767_v46  ;;  %v5447_v46 = vsel %vm1048_vm5, %v9677_v62, 0 }
 0x54a   :  { %5489 = vmatprep.mubr.bf16.mxu0 %v11774_v22  ;;  %5587 = vmatmul.mubr.bf16.gmra.mrb[156].mxu1 %v12007_v20  ;;  %v6102_v22 = vld [vmem:[%s13288_s16] sm:$0xf]  ;;  %s13440_s16 = smov 40  }
 0x54b   :  { %5594 = vmatprep.mubr.bf16.mxu1 %v12031_v4  ;;  %9152 = vmatpush3.bf16.msra.mxu1 %v9674_v48 }
 0x54c   :  { %9501 = vmatprep.subr.msk.bf16.mxu1 %vm1048_vm5, %v9675_v31  ;;  %9102 = vmatpush3.bf16.msra.mxu0 %v11985_v12 }
 0x54d   :  { %9499 = vmatprep.subr.msk.bf16.mxu0 %vm1048_vm5, %v9677_v62 }
 0x54f   :  { %9154 = vmatpush3.bf16.msra.mxu1 %v5987_v34 }
 0x550   :  { %9104 = vmatpush3.bf16.msra.mxu0 %v5447_v46  ;;  %9502 = vmatprep.subr.msk.bf16.mxu1 %vm2592_vm11, %v6102_v22 }
 0x551   :  { %5490 = vmatmul.mubr.bf16.gmra.mrb[124].mxu0 %v11801_v56 }
 0x552   :  { %5497 = vmatprep.mubr.bf16.mxu0 %v11854_v23  ;;  %5595 = vmatmul.mubr.bf16.gmra.mrb[160].mxu1 %v12034_v2 }
 0x553   :  { %5602 = vmatprep.mubr.bf16.mxu1 %v12059_v15 }
 0x559   :  { %5498 = vmatmul.mubr.bf16.gmra.mrb[128].mxu0 %v11858_v25 }
 0x55a   :  { %5505 = vmatprep.mubr.bf16.mxu0 %v11863_v19  ;;  %5603 = vmatmul.mubr.bf16.gmra.mrb[164].mxu1 %v12066_v32 }
 0x55b   :  { %5610 = vmatprep.mubr.bf16.mxu1 %v12087_v54 }
 0x561   :  { %5506 = vmatmul.mubr.bf16.gmra.mrb[132].mxu0 %v11869_v26 }
 0x562   :  { %5513 = vmatprep.mubr.bf16.mxu0 %v11882_v9  ;;  %5611 = vmatmul.mubr.bf16.gmra.mrb[168].mxu1 %v12090_v27 }
 0x563   :  { %5618 = vmatprep.mubr.bf16.mxu1 %v12115_v38 }
 0x569   :  { %5514 = vmatmul.mubr.bf16.gmra.mrb[136].mxu0 %v11886_v61  ;;  %v6128_v61 = vsel %vm2592_vm11, %v6102_v22, 0 }
 0x56a   :  { %5521 = vmatprep.mubr.bf16.mxu0 %v11893_v11  ;;  %5619 = vmatmul.mubr.bf16.gmra.mrb[172].mxu1 %v12118_v42 }
 0x56b   :  { %5626 = vmatprep.mubr.bf16.mxu1 %v3975_v6 }
 0x571   :  { %5522 = vmatmul.mubr.bf16.gmra.mrb[140].mxu0 %v11925_v55 }
 0x572   :  { %5529 = vmatprep.mubr.bf16.mxu0 %v11962_v40  ;;  %5627 = vmatmul.mubr.bf16.gmra.mrb[176].mxu1 %v3935_v57 }
 0x573   :  { %5634 = vmatprep.mubr.bf16.mxu1 %v3978_v43 }
 0x579   :  { %5530 = vmatmul.mubr.bf16.gmra.mrb[144].mxu0 %v11969_v14 }
 0x57a   :  { %5537 = vmatprep.mubr.bf16.mxu0 %v11980_v60  ;;  %5635 = vmatmul.mubr.bf16.gmra.mrb[180].mxu1 %v3938_v37 }
 0x57b   :  { %9155 = vmatprep.mubr.msk.bf16.mxu1 %vm79_vm0, %v11343_v0 }
 0x57c   :  { %v8478_v56 = vpop.f32.mrb[104].mxu1 }
 0x57d   :  { %v8479_v23 = vpop.f32.mrb[105].mxu1 }
 0x57e   :  { %v8480_v25 = vadd.f32 %v8479_v23, %v8478_v56  ;;  %v8481_v19 = vpop.f32.mrb[106].mxu1 }
 0x57f   :  { %v8482_v26 = vpop.f32.mrb[107].mxu1 }
 0x580   :  { %v8483_v9 = vadd.f32 %v8482_v26, %v8481_v19 }
 0x581   :  { %5538 = vmatmul.mubr.bf16.gmra.mrb[148].mxu0 %v11991_v36 }
 0x582   :  { %9105 = vmatprep.mubr.msk.bf16.mxu0 %vm13431_vm3, %v11897_v44  ;;  %9156 = vmatmul.mubr.msk.bf16.vlgmr.msra.gmra.mrb[184].mxu1 %vm79_vm0, %v11352_v39 }
 0x583   :  { %9159 = vmatprep.mubr.msk.bf16.mxu1 %vm79_vm0, %v11453_v5  ;;  %9172 = vmatpush3.bf16.msra.mxu1 %v6128_v61 }
 0x584   :  { %v8484_v0 = vpop.f32.mrb[108].mxu1 }
 0x585   :  { %v8485_v11 = vpop.f32.mrb[109].mxu1 }
 0x586   :  { %v12203_v55 = vadd.f32 %v8485_v11, %v8484_v0  ;;  %v8487_v40 = vpop.f32.mrb[110].mxu1  ;;  %v12259_v0 = vld [vmem:[%s13283_s11] ss:$0 sm:$0xff] }
 0x587   :  { %v8488_v14 = vpop.f32.mrb[111].mxu1 }
 0x588   :  { %v12205_v60 = vadd.f32 %v8488_v14, %v8487_v40 }
 0x589   :  { %9106 = vmatmul.mubr.msk.bf16.vlgmr.msra.gmra.mrb[152].mxu0 %vm13432_vm6, %v11998_v51  ;;  %vm13436_vm6 = vmmov %vm13431_vm3 }
 0x58a   :  { %9109 = vmatprep.mubr.msk.bf16.mxu0 %vm13433_vm4, %v12022_v7  ;;  %9160 = vmatmul.mubr.msk.bf16.gmra.mrb[188].mxu1 %vm79_vm0, %v11459_v8  ;;  %vm13437_vm4 = vmmov %vm13431_vm3 }
 0x58b   :  { %9163 = vmatprep.mubr.msk.bf16.mxu1 %vm79_vm0, %v11576_v24 }
 0x591   :  { %9110 = vmatmul.mubr.msk.bf16.gmra.mrb[156].mxu0 %vm13434_vm8, %v12041_v45  ;;  %vm13444_vm8 = vcmask 457728  }
 0x592   :  { %9113 = vmatprep.mubr.msk.bf16.mxu0 %vm13435_vm9, %v12078_v21  ;;  %9164 = vmatmul.mubr.msk.bf16.gmra.mrb[192].mxu1 %vm79_vm0, %v11582_v10  ;;  %vm13445_vm9 = vcmask 523264  }
 0x593   :  { %9167 = vmatprep.mubr.msk.bf16.mxu1 %vm79_vm0, %v11664_v1 }
 0x599   :  { %9114 = vmatmul.mubr.msk.bf16.gmra.mrb[160].mxu0 %vm13431_vm3, %v12106_v49  ;;  %vm13446_vm3 = vmmov %vm13444_vm8 }
 0x59a   :  { %9117 = vmatprep.mubr.msk.bf16.mxu0 %vm13436_vm6, %v12128_v33  ;;  %9168 = vmatmul.mubr.msk.bf16.gmra.mrb[196].mxu1 %vm79_vm0, %v11670_v18  ;;  %vm13447_vm6 = vcmask 588800  }
 0x59b   :  { %vm13449_vm7 = vmmov %vm13447_vm6 }
 0x5a1   :  { %9118 = vmatmul.mubr.msk.bf16.gmra.mrb[164].mxu0 %vm13437_vm4, %v12135_v59  ;;  %vm13448_vm4 = vmmov %vm13445_vm9 }
 0x5a2   :  { %v8490_v39 = vpop.f32.mrb[112].mxu1 }
 0x5a3   :  { %v8491_v5 = vpop.f32.mrb[113].mxu1 }
 0x5a4   :  { %v12231_v8 = vadd.f32 %v8491_v5, %v8490_v39  ;;  %v8493_v24 = vpop.f32.mrb[114].mxu1 }
 0x5a5   :  { %v8494_v10 = vpop.f32.mrb[115].mxu1 }
 0x5a6   :  { %v12233_v44 = vadd.f32 %v8494_v10, %v8493_v24 }
 0x5aa   :  { %v8496_v1 = vpop.f32.mrb[116].mxu1 }
 0x5ab   :  { %v8497_v12 = vpop.f32.mrb[117].mxu1 }
 0x5ac   :  { %v12235_v36 = vadd.f32 %v8497_v12, %v8496_v1  ;;  %v8499_v51 = vpop.f32.mrb[118].mxu1 }
 0x5ad   :  { %v8500_v17 = vpop.f32.mrb[119].mxu1 }
 0x5ae   :  { %v12237_v20 = vadd.f32 %v8500_v17, %v8499_v51 }
 0x5bc   :  { %v8502_v18 = vpop.f32.mrb[120].mxu1 }
 0x5bd   :  { %v8503_v7 = vpop.f32.mrb[121].mxu1 }
 0x5be   :  { %v12239_v4 = vadd.f32 %v8503_v7, %v8502_v18  ;;  %v8505_v2 = vpop.f32.mrb[122].mxu1 }
 0x5bf   :  { %v8506_v45 = vpop.f32.mrb[123].mxu1 }
 0x5c0   :  { %v12241_v15 = vadd.f32 %v8506_v45, %v8505_v2  ;;  %v8542_v32 = vpop.f32.mrb[88].mxu0 }
 0x5c1   :  { %v8543_v21 = vpop.f32.mrb[89].mxu0 }
 0x5c2   :  { %v8544_v54 = vadd.f32 %v8543_v21, %v8542_v32  ;;  %v8545_v27 = vpop.f32.mrb[90].mxu0 }
 0x5c3   :  { %v8546_v49 = vpop.f32.mrb[91].mxu0 }
 0x5c4   :  { %v8547_v38 = vadd.f32 %v8546_v49, %v8545_v27  ;;  %v8508_v42 = vpop.f32.mrb[124].mxu1  ;;  %v4409_v29 = vadd.f32 %v8544_v54, %v8480_v25 }
 0x5c5   :  { %v8509_v47 = vpop.f32.mrb[125].mxu1 }
 0x5c6   :  { %v12243_v33 = vadd.f32 %v8509_v47, %v8508_v42  ;;  %v8511_v6 = vpop.f32.mrb[126].mxu1  ;;  %v4412_v57 = vadd.f32 %v8547_v38, %v8483_v9 }
 0x5c7   :  { %v8512_v59 = vpop.f32.mrb[127].mxu1 }
 0x5c8   :  { %v12245_v16 = vadd.f32 %v8512_v59, %v8511_v6 }
 0x5d8   :  { %v8514_v35 = vpop.f32.mrb[128].mxu1 }
 0x5d9   :  { %v8515_v28 = vpop.f32.mrb[129].mxu1 }
 0x5da   :  { %v12247_v53 = vadd.f32 %v8515_v28, %v8514_v35  ;;  %v8517_v52 = vpop.f32.mrb[130].mxu1 }
 0x5db   :  { %v8518_v43 = vpop.f32.mrb[131].mxu1 }
 0x5dc   :  { %v12249_v37 = vadd.f32 %v8518_v43, %v8517_v52 }
 0x5e0   :  { %v8520_v58 = vpop.f32.mrb[132].mxu1 }
 0x5e1   :  { %v8521_v48 = vpop.f32.mrb[133].mxu1 }
 0x5e2   :  { %v12251_v31 = vadd.f32 %v8521_v48, %v8520_v58  ;;  %v8523_v62 = vpop.f32.mrb[134].mxu1 }
 0x5e3   :  { %v8524_v34 = vpop.f32.mrb[135].mxu1 }
 0x5e4   :  { %v12253_v46 = vadd.f32 %v8524_v34, %v8523_v62  ;;  %v8548_v22 = vpop.f32.mrb[92].mxu0 }
 0x5e5   :  { %v8549_v56 = vpop.f32.mrb[93].mxu0 }
 0x5e6   :  { %v8550_v23 = vadd.f32 %v8549_v56, %v8548_v22  ;;  %v8551_v25 = vpop.f32.mrb[94].mxu0 }
 0x5e7   :  { %v8552_v19 = vpop.f32.mrb[95].mxu0 }
 0x5e8   :  { %v8553_v26 = vadd.f32 %v8552_v19, %v8551_v25  ;;  %v4417_v9 = vadd.f32 %v8550_v23, %v12203_v55  ;;  %v9087_v61 = vpop.f32.mrb[136].mxu1 }
 0x5e9   :  { %v4505_v11 = vpop.f32.mrb[137].mxu1 }
 0x5ea   :  { %v4514_v40 = vadd.f32 %v9087_v61, %v4417_v9  ;;  %v4506_v14 = vadd.f32 %v4505_v11, %v4409_v29  ;;  %v4420_v39 = vadd.f32 %v8553_v26, %v12205_v60  ;;  %v9088_v5 = vpop.f32.mrb[138].mxu1  ;;  %v4672_v11 = vld [vmem:[#allocation2 + $0x2] sm:$0xff] }
 0x5eb   :  { %v4508_v24 = vpop.f32.mrb[139].mxu1 }
 0x5ec   :  { %v4570_v10 = vadd.f32 %v12259_v0, %v4514_v40  ;;  %v4568_v1 = vadd.f32 %v12259_v0, %v4506_v14  ;;  %v4517_v12 = vadd.f32 %v9088_v5, %v4420_v39  ;;  %v4509_v51 = vadd.f32 %v4508_v24, %v4412_v57  ;;  %v8554_v55 = vpop.f32.mrb[96].mxu0 }
 0x5ed   :  { %v8555_v17 = vpop.f32.mrb[97].mxu0 }
 0x5ee   :  { %v4586_v18 = vmax.f32 %v4570_v10, 0.0  ;;  %v4584_v7 = vmax.f32 %v4568_v1, 0.0  ;;  %v4571_v2 = vadd.f32 %v12259_v0, %v4517_v12  ;;  %v4569_v45 = vadd.f32 %v12259_v0, %v4509_v51  ;;  %v8557_v32 = vpop.f32.mrb[98].mxu0  ;;  %v9679_v12 = vld [vmem:[%s13285_s13 + $0x8] sm:$0xff]  }
 0x5ef   :  { %v8556_v21 = vadd.f32 %v8555_v17, %v8554_v55  ;;  %v8558_v54 = vpop.f32.mrb[99].mxu0 }
 0x5f0   :  { %4610 = vst.msk [vmem:[#allocation2 + $0x31] sm:$0xff] %vm1383_vm12, %v4586_v18  ;;  %4608 = vst.msk [vmem:[#allocation2 + $0x11] sm:$0xff] %vm1383_vm12, %v4584_v7  ;;  %v4587_v60 = vmax.f32 %v4571_v2, 0.0  ;;  %v4585_v27 = vmax.f32 %v4569_v45, 0.0  ;;  %v8559_v49 = vadd.f32 %v8558_v54, %v8557_v32  ;;  %v9091_v38 = vpop.f32.mrb[140].mxu1 }
 0x5f1   :  { %v4425_v42 = vadd.f32 %v8556_v21, %v12231_v8  ;;  %v4521_v29 = vpop.f32.mrb[141].mxu1  ;;  %v4648_v8 = vld [vmem:[#allocation2 + $0x1] sm:$0xff] }
 0x5f2   :  { %v4601_v47 = vpack.c.bf16 %v4587_v60, %v4586_v18  ;;  %4611 = vst.msk [vmem:[#allocation2 + $0x41] sm:$0xff] %vm1383_vm12, %v4587_v60  ;;  %v4600_v6 = vpack.c.bf16 %v4585_v27, %v4584_v7  ;;  %4609 = vst.msk [vmem:[#allocation2 + $0x21] sm:$0xff] %vm1383_vm12, %v4585_v27  ;;  %v9092_v57 = vpop.f32.mrb[142].mxu1  ;;  %v4428_v59 = vadd.f32 %v8559_v49, %v12233_v44  ;;  %v9678_v44 = vld [vmem:[%s13285_s13] sm:$0xff]  }
 0x5f3   :  { %v4522_v35 = vadd.f32 %v4521_v29, %v4425_v42  ;;  %v4524_v28 = vpop.f32.mrb[143].mxu1  ;;  %9121 = vmatprep.subr.bf16.mxu0 %v9678_v44 }
 0x5f4   :  { %v4525_v52 = vadd.f32 %v4524_v28, %v4428_v59  ;;  %v8560_v43 = vpop.f32.mrb[100].mxu0  ;;  %9173 = vmatprep.mubr.msk.bf16.mxu1 %vm1383_vm12, %v4600_v6  ;;  %9122 = vmatpush3.bf16.msra.mxu0 %v9678_v44 }
 0x5f5   :  { %v4572_v58 = vadd.f32 %v12259_v0, %v4522_v35  ;;  %v8561_v48 = vpop.f32.mrb[101].mxu0  ;;  %9174 = vmatmul.mubr.msk.bf16.vlgmr.msra.gmra.mrb[184].mxu1 %vm1383_vm12, %v4601_v47  ;;  %9123 = vmatprep.subr.bf16.mxu0 %v9679_v12 }
 0x5f6   :  { %v4573_v62 = vadd.f32 %v12259_v0, %v4525_v52  ;;  %v8562_v34 = vadd.f32 %v8561_v48, %v8560_v43  ;;  %v8563_v22 = vpop.f32.mrb[102].mxu0 }
 0x5f7   :  { %v4588_v56 = vmax.f32 %v4572_v58, 0.0  ;;  %v8564_v23 = vpop.f32.mrb[103].mxu0  ;;  %v12279_v25 = vld [vmem:[#allocation2 + $0x11] sm:$0xff] }
 0x5f8   :  { %v4589_v19 = vmax.f32 %v4573_v62, 0.0  ;;  %v4433_v26 = vadd.f32 %v8562_v34, %v12235_v36  ;;  %v8565_v9 = vadd.f32 %v8564_v23, %v8563_v22  ;;  %v4664_v61 = vpack.c.bf16 %v12279_v25, %v4648_v8  ;;  %v12284_v40 = vld [vmem:[#allocation2 + $0x30] sm:$0xff]  ;;  %9124 = vmatpush3.bf16.msra.mxu0 %v9679_v12  ;;  %v9682_v12 = vld [vmem:[%s13285_s13 + $0x20] ss:$0 sps:$4 sm:$0xff]  }
 0x5f9   :  { %4612 = vst.msk [vmem:[#allocation2 + $0x51] sm:$0xff] %vm1383_vm12, %v4588_v56  ;;  %v12286_v14 = vld [vmem:[#allocation2 + $0x40] sm:$0xff]  ;;  %v12288_v39 = vld [vmem:[#allocation2 + $0x12] sm:$0xff] }
 0x5fa   :  { %v4602_v5 = vpack.c.bf16 %v4589_v19, %v4588_v56  ;;  %4613 = vst.msk [vmem:[#allocation2 + $0x61] sm:$0xff] %vm1383_vm12, %v4589_v19  ;;  %v4530_v24 = vadd.f32 %v9091_v38, %v4433_v26  ;;  %v4436_v36 = vadd.f32 %v8565_v9, %v12237_v20  ;;  %4848 = vrot.lane.b32.xlu0 %v4664_v61, %s9755_s30  ;;  %v12295_v1 = vld [vmem:[#allocation2 + $0x41] sm:$0xff]  ;;  %v4722_v7 = vld [vmem:[#allocation2 + $0x31] sm:$0xff] }
 0x5fb   :  { %v4713_v10 = vpack.c.bf16 %v12286_v14, %v12284_v40  ;;  %v4688_v20 = vpack.c.bf16 %v12288_v39, %v4672_v11  ;;  %v12304_v2 = vld [vmem:[#allocation2 + $0x20] sm:$0xff]  ;;  %v4737_v60 = vpack.c.bf16 %v12295_v1, %v4722_v7  ;;  %v12309_v49 = vld [vmem:[#allocation2 + $0x10] sm:$0xff] }
 0x5fc   :  { %v4574_v51 = vadd.f32 %v12259_v0, %v4530_v24  ;;  %v4533_v55 = vadd.f32 %v9092_v57, %v4436_v36  ;;  %v8566_v17 = vpop.f32.mrb[104].mxu0  ;;  %9177 = vmatprep.mubr.msk.bf16.mxu1 %vm1383_vm12, %v4602_v5  ;;  %v12311_v38 = vld [vmem:[#allocation2 + $0x42] sm:$0xff]  ;;  %v4712_v47 = vpack.c.bf16 %v12304_v2, %v12309_v49  ;;  %v4746_v57 = vld [vmem:[#allocation2 + $0x32] sm:$0xff] }
 0x5fd   :  { %4898 = vrot.lane.b32.xlu1 %v4713_v10, %s9757_s2  ;;  %v8567_v18 = vpop.f32.mrb[105].mxu0  ;;  %v4721_v59 = vld [vmem:[#allocation2 + $0x21] sm:$0xff]  ;;  %v4761_v28 = vpack.c.bf16 %v12311_v38, %v4746_v57  ;;  %v9680_v58 = vld [vmem:[%s13285_s13 + $0x10] sm:$0xff]  }
 0x5fe   :  { %v4590_v45 = vmax.f32 %v4574_v51, 0.0  ;;  %v4575_v32 = vadd.f32 %v12259_v0, %v4533_v55  ;;  %v8568_v21 = vadd.f32 %v8567_v18, %v8566_v17  ;;  %v8569_v54 = vpop.f32.mrb[106].mxu0  ;;  %4872 = vrot.lane.b32.xlu0 %v4688_v20, %s13438_s9  ;;  %v4736_v22 = vpack.c.bf16 %v4721_v59, %v12279_v25  ;;  %v4745_v44 = vld [vmem:[#allocation2 + $0x22] sm:$0xff]  ;;  %9125 = vmatprep.subr.bf16.mxu0 %v9680_v58 }
 0x5ff   :  { %v8570_v27 = vpop.f32.mrb[107].mxu0  ;;  %v4665_v23 = vpack.c.bf16 %v4722_v7, %v4721_v59  ;;  %9126 = vmatpush3.bf16.msra.mxu0 %v9680_v58  ;;  %v4760_v5 = vpack.c.bf16 %v4745_v44, %v12288_v39  ;;  %v4689_v39 = vpack.c.bf16 %v4746_v57, %v4745_v44 }
 0x600   :  { %4614 = vst.msk [vmem:[#allocation2 + $0x71] sm:$0xff] %vm1383_vm12, %v4590_v45  ;;  %v4591_v42 = vmax.f32 %v4575_v32, 0.0  ;;  %v8571_v29 = vadd.f32 %v8570_v27, %v8569_v54  ;;  %v4441_v6 = vadd.f32 %v8568_v21, %v12239_v4  ;;  %v9681_v4 = vld [vmem:[%s13285_s13 + $0x18] sm:$0xff]   ;;  %v5809_v54 = vsel %vm2592_vm11, %v9682_v12, 0  ;;  %s13441_s13 = smov 48  }
 0x601   :  { %4922 = vrot.lane.b32.xlu1 %v4737_v60, %s13439_s29  ;;  %9127 = vmatprep.subr.bf16.mxu0 %v9681_v4  ;;  %v12362_v57 = vld [vmem:[#allocation2 + $0x51] sm:$0xff] }
 0x602   :  { %4615 = vst.msk [vmem:[#allocation2 + $0x81] sm:$0xff] %vm1383_vm12, %v4591_v42  ;;  %v9095_v35 = vpop.f32.mrb[144].mxu1  ;;  %4896 = vrot.lane.b32.xlu0 %v4712_v47, %s9757_s2  ;;  %v4603_v52 = vpack.c.bf16 %v4591_v42, %v4590_v45  ;;  %v4444_v43 = vadd.f32 %v8571_v29, %v12241_v15  ;;  %v4809_v58 = vpack.c.bf16 %v12362_v57, %v12295_v1 }
 0x603   :  { %v4537_v48 = vpop.f32.mrb[145].mxu1  ;;  %9128 = vmatpush3.bf16.msra.mxu0 %v9681_v4  ;;  %v12373_v4 = vld [vmem:[#allocation2 + $0x52] sm:$0xff] }
 0x604   :  { %v4538_v8 = vadd.f32 %v4537_v48, %v4441_v6  ;;  %v8572_v62 = vpop.f32.mrb[108].mxu0  ;;  %v9096_v34 = vpop.f32.mrb[146].mxu1  ;;  %9178 = vmatmul.mubr.msk.bf16.gmra.mrb[188].mxu1 %vm1383_vm12, %v4603_v52  ;;  %9500 = vmatprep.subr.msk.bf16.mxu0 %vm2592_vm11, %v9682_v12  ;;  %v4833_v1 = vpack.c.bf16 %v12373_v4, %v12311_v38 }
 0x605   :  { %4946 = vrot.lane.b32.xlu1 %v4761_v28, %s13440_s16  ;;  %v8573_v15 = vpop.f32.mrb[109].mxu0  ;;  %v4540_v56 = vpop.f32.mrb[147].mxu1 }
 0x606   :  { %v4576_v19 = vadd.f32 %v12259_v0, %v4538_v8  ;;  %v8574_v26 = vadd.f32 %v8573_v15, %v8572_v62  ;;  %v4541_v9 = vadd.f32 %v4540_v56, %v4444_v43  ;;  %v8575_v61 = vpop.f32.mrb[110].mxu0  ;;  %4920 = vrot.lane.b32.xlu0 %v4736_v22, %s13439_s29 }
 0x607   :  { %v8576_v11 = vpop.f32.mrb[111].mxu0  ;;  %9130 = vmatpush3.bf16.msra.mxu0 %v5809_v54 }
 0x608   :  { %v4592_v24 = vmax.f32 %v4576_v19, 0.0  ;;  %v4449_v25 = vadd.f32 %v8574_v26, %v12243_v33  ;;  %v4577_v36 = vadd.f32 %v12259_v0, %v4541_v9  ;;  %v8577_v10 = vadd.f32 %v8576_v11, %v8575_v61  ;;  %v12343_v33 = vld [vmem:[#allocation2 + $0x50] sm:$0xff] }
 0x609   :  { %4850 = vrot.lane.b32.xlu1 %v4665_v23, %s9755_s30  ;;  %v12360_v6 = vpack.c.bf16 %v12343_v33, %v12286_v14  ;;  %v12382_v61 = vld [vmem:[#allocation2 + $0x80] sm:$0xff] }
 0x60a   :  { %4616 = vst.msk [vmem:[#allocation2 + $0xb1] sm:$0xff] %vm1383_vm12, %v4592_v24  ;;  %v4546_v51 = vadd.f32 %v9095_v35, %v4449_v25  ;;  %v4593_v55 = vmax.f32 %v4577_v36, 0.0  ;;  %v4452_v17 = vadd.f32 %v8577_v10, %v12245_v16  ;;  %4944 = vrot.lane.b32.xlu0 %v4760_v5, %s13440_s16  ;;  %v12351_v16 = vpack.c.bf16 %v12284_v40, %v12304_v2  ;;  %v12387_v10 = vld [vmem:[#allocation2 + $0x70] sm:$0xff] }
 0x60c   :  { %v4578_v20 = vadd.f32 %v12259_v0, %v4546_v51  ;;  %v4604_v18 = vpack.c.bf16 %v4593_v55, %v4592_v24  ;;  %4617 = vst.msk [vmem:[#allocation2 + $0xc1] sm:$0xff] %vm1383_vm12, %v4593_v55  ;;  %v4549_v7 = vadd.f32 %v9096_v34, %v4452_v17  ;;  %v8578_v45 = vpop.f32.mrb[112].mxu0  ;;  %v4715_v55 = vpack.c.bf16 %v12382_v61, %v12387_v10  ;;  %v12394_v17 = vld [vmem:[#allocation2 + $0x81] sm:$0xff] }
 0x60d   :  { %4874 = vrot.lane.b32.xlu1 %v4689_v39, %s13438_s9  ;;  %v8579_v32 = vpop.f32.mrb[113].mxu0  ;;  %v9099_v21 = vpop.f32.mrb[148].mxu1 }
 0x60e   :  { %v4594_v60 = vmax.f32 %v4578_v20, 0.0  ;;  %v4579_v27 = vadd.f32 %v12259_v0, %v4549_v7  ;;  %v8580_v42 = vadd.f32 %v8579_v32, %v8578_v45  ;;  %v8581_v29 = vpop.f32.mrb[114].mxu0  ;;  %v4553_v47 = vpop.f32.mrb[149].mxu1  ;;  %4968 = vrot.lane.b32.xlu0 %v12351_v16, %s13441_s13  ;;  %9181 = vmatprep.mubr.msk.bf16.mxu1 %vm1383_vm12, %v4604_v18  ;;  %v12399_v45 = vld [vmem:[#allocation2 + $0x71] sm:$0xff] }
 0x60f   :  { %v8582_v40 = vpop.f32.mrb[115].mxu0  ;;  %v9100_v2 = vpop.f32.mrb[150].mxu1 }
 0x610   :  { %4618 = vst.msk [vmem:[#allocation2 + $0xd1] sm:$0xff] %vm1383_vm12, %v4594_v60  ;;  %v4595_v59 = vmax.f32 %v4579_v27, 0.0  ;;  %v4457_v35 = vadd.f32 %v8580_v42, %v12247_v53  ;;  %v8583_v28 = vadd.f32 %v8582_v40, %v8581_v29  ;;  %v4556_v52 = vpop.f32.mrb[151].mxu1  ;;  %v4739_v42 = vpack.c.bf16 %v12394_v17, %v12399_v45 }
 0x611   :  { %4970 = vrot.lane.b32.xlu1 %v12360_v6, %s13441_s13 }
 0x612   :  { %4619 = vst.msk [vmem:[#allocation2 + $0xe1] sm:$0xff] %vm1383_vm12, %v4595_v59  ;;  %v4554_v43 = vadd.f32 %v4553_v47, %v4457_v35  ;;  %v4460_v14 = vadd.f32 %v8583_v28, %v12249_v37  ;;  %4992 = vrot.lane.b32.xlu0 %v4665_v23, %s13442_s6  ;;  %v4605_v48 = vpack.c.bf16 %v4595_v59, %v4594_v60 }
 0x614   :  { %v4580_v53 = vadd.f32 %v12259_v0, %v4554_v43  ;;  %v4557_v8 = vadd.f32 %v4556_v52, %v4460_v14  ;;  %v8584_v62 = vpop.f32.mrb[116].mxu0  ;;  %9182 = vmatmul.mubr.msk.bf16.gmra.mrb[192].mxu1 %vm1383_vm12, %v4605_v48  ;;  %v4750_v14 = vld [vmem:[#allocation2 + $0x72] sm:$0xff] }
 0x615   :  { %4994 = vrot.lane.b32.xlu1 %v4809_v58, %s13442_s6  ;;  %v8585_v34 = vpop.f32.mrb[117].mxu0  ;;  %v8680_v22 = vpop.f32.mrb[152].mxu1 }
 0x616   :  { %v4596_v44 = vmax.f32 %v4580_v53, 0.0  ;;  %v4581_v37 = vadd.f32 %v12259_v0, %v4557_v8  ;;  %v8586_v15 = vadd.f32 %v8585_v34, %v8584_v62  ;;  %v8587_v56 = vpop.f32.mrb[118].mxu0  ;;  %v8681_v23 = vpop.f32.mrb[153].mxu1  ;;  %5016 = vrot.lane.b32.xlu0 %v4689_v39, %s13443_s26  ;;  %v4775_v62 = vld [vmem:[#allocation2 + $0x90] sm:$0xff] }
 0x617   :  { %v8682_v19 = vadd.f32 %v8681_v23, %v8680_v22  ;;  %v8588_v26 = vpop.f32.mrb[119].mxu0  ;;  %v8683_v9 = vpop.f32.mrb[154].mxu1 }
 0x618   :  { %4620 = vst.msk [vmem:[#allocation2 + $0xf1] sm:$0xff] %vm1383_vm12, %v4596_v44  ;;  %v4597_v11 = vmax.f32 %v4581_v37, 0.0  ;;  %v4465_v5 = vadd.f32 %v8586_v15, %v12251_v31  ;;  %v8589_v24 = vadd.f32 %v8588_v26, %v8587_v56  ;;  %v8684_v25 = vpop.f32.mrb[155].mxu1  ;;  %v4749_v37 = vld [vmem:[#allocation2 + $0x62] sm:$0xff] }
 0x619   :  { %5018 = vrot.lane.b32.xlu1 %v4833_v1, %s13443_s26  ;;  %v8685_v36 = vadd.f32 %v8684_v25, %v8683_v9 }
 0x61a   :  { %v4606_v12 = vpack.c.bf16 %v4597_v11, %v4596_v44  ;;  %4621 = vst.msk [vmem:[#allocation2 + $0x101] sm:$0xff] %vm1383_vm12, %v4597_v11  ;;  %v4562_v38 = vadd.f32 %v9099_v21, %v4465_v5  ;;  %v4468_v51 = vadd.f32 %v8589_v24, %v12253_v46  ;;  %4852 = vrot.lane.b32.xlu0 %v4809_v58, %s9755_s30  ;;  %v4701_v46 = vld [vmem:[#allocation2 + $0x60] sm:$0xff]  ;;  %v4799_v11 = vld [vmem:[#allocation2 + $0x91] sm:$0xff] }
 0x61b   :  { %v4725_v58 = vld [vmem:[#allocation2 + $0x61] sm:$0xff] }
 0x61c   :  { %v4582_v31 = vadd.f32 %v12259_v0, %v4562_v38  ;;  %v4565_v39 = vadd.f32 %v9100_v2, %v4468_v51  ;;  %v8616_v20 = vpop.f32.mrb[120].mxu0  ;;  %9185 = vmatprep.mubr.msk.bf16.mxu1 %vm1383_vm12, %v4606_v12  ;;  %v4751_v2 = vld [vmem:[#allocation2 + $0x82] sm:$0xff]  ;;  %v4738_v22 = vpack.c.bf16 %v4725_v58, %v12362_v57  ;;  %v4762_v57 = vpack.c.bf16 %v4749_v37, %v12373_v4 }
 0x61d   :  { %4902 = vrot.lane.b32.xlu1 %v4715_v55, %s9757_s2  ;;  %v8617_v18 = vpop.f32.mrb[121].mxu0  ;;  %v8686_v7 = vpop.f32.mrb[156].mxu1  ;;  %v4763_v53 = vpack.c.bf16 %v4751_v2, %v4750_v14  ;;  %v4811_v38 = vpack.c.bf16 %v4799_v11, %v12394_v17  ;;  %v12429_v55 = vpack.c.bf16 %v12387_v10, %v4701_v46  ;;  %v4810_v10 = vpack.c.bf16 %v12399_v45, %v4725_v58 }
 0x61e   :  { %v4598_v32 = vmax.f32 %v4582_v31, 0.0  ;;  %v4583_v21 = vadd.f32 %v12259_v0, %v4565_v39  ;;  %v8618_v54 = vadd.f32 %v8617_v18, %v8616_v20  ;;  %v8619_v60 = vpop.f32.mrb[122].mxu0  ;;  %v8687_v27 = vpop.f32.mrb[157].mxu1  ;;  %4876 = vrot.lane.b32.xlu0 %v4833_v1, %s13438_s9  ;;  %v4714_v0 = vpack.c.bf16 %v4701_v46, %v12343_v33 }
 0x61f   :  { %v8688_v29 = vadd.f32 %v8687_v27, %v8686_v7  ;;  %v8620_v47 = vpop.f32.mrb[123].mxu0  ;;  %v8689_v40 = vpop.f32.mrb[158].mxu1  ;;  %v4787_v1 = vpack.c.bf16 %v4775_v62, %v12382_v61  ;;  %v4823_v61 = vld [vmem:[#allocation2 + $0x92] sm:$0xff] }
 0x620   :  { %4622 = vst.msk [vmem:[#allocation2 + $0x111] sm:$0xff] %vm1383_vm12, %v4598_v32  ;;  %v4599_v59 = vmax.f32 %v4583_v21, 0.0  ;;  %v12406_v35 = vadd.f32 %v8682_v19, %v8618_v54  ;;  %v8621_v28 = vadd.f32 %v8620_v47, %v8619_v60  ;;  %v8690_v52 = vpop.f32.mrb[159].mxu1  ;;  %v4835_v4 = vpack.c.bf16 %v4823_v61, %v4751_v2 }
 0x621   :  { %4926 = vrot.lane.b32.xlu1 %v4739_v42, %s13439_s29  ;;  %v8691_v43 = vadd.f32 %v8690_v52, %v8689_v40  ;;  %v4834_v47 = vpack.c.bf16 %v4750_v14, %v4749_v37  ;;  %v4680_v37 = vld [vmem:[#allocation2 + $0xa2] sm:$0xff] }
 0x622   :  { %4623 = vst.msk [vmem:[#allocation2 + $0x121] sm:$0xff] %vm1383_vm12, %v4599_v59  ;;  %v12411_v48 = vadd.f32 %v8685_v36, %v8621_v28  ;;  %4900 = vrot.lane.b32.xlu0 %v4714_v0, %s9757_s2  ;;  %v4607_v8 = vpack.c.bf16 %v4599_v59, %v4598_v32  ;;  %v4656_v59 = vld [vmem:[#allocation2 + $0xa1] sm:$0xff]  ;;  %v4657_v28 = vld [vmem:[#allocation2 + $0xb1] sm:$0xff] }
 0x623   :  { %v4668_v14 = vpack.c.bf16 %v4657_v28, %v4656_v59 }
 0x624   :  { %v8622_v34 = vpop.f32.mrb[124].mxu0  ;;  %9186 = vmatmul.mubr.msk.bf16.gmra.mrb[196].mxu1 %vm1383_vm12, %v4607_v8  ;;  %v12442_v8 = vld [vmem:[#allocation2 + $0xe0] sm:$0xff] }
 0x625   :  { %4950 = vrot.lane.b32.xlu1 %v4763_v53, %s13440_s16  ;;  %v8623_v33 = vpop.f32.mrb[125].mxu0  ;;  %v8692_v44 = vpop.f32.mrb[160].mxu1 }
 0x626   :  { %v8624_v15 = vadd.f32 %v8623_v33, %v8622_v34  ;;  %v8625_v56 = vpop.f32.mrb[126].mxu0  ;;  %v8693_v23 = vpop.f32.mrb[161].mxu1  ;;  %4924 = vrot.lane.b32.xlu0 %v4738_v22, %s13439_s29 }
 0x627   :  { %v8694_v19 = vadd.f32 %v8693_v23, %v8692_v44  ;;  %v8626_v26 = vpop.f32.mrb[127].mxu0  ;;  %v8695_v9 = vpop.f32.mrb[162].mxu1  ;;  %v12447_v44 = vld [vmem:[#allocation2 + $0xd0] sm:$0xff] }
 0x628   :  { %v12419_v5 = vadd.f32 %v8688_v29, %v8624_v15  ;;  %v8627_v24 = vadd.f32 %v8626_v26, %v8625_v56  ;;  %v8696_v25 = vpop.f32.mrb[163].mxu1  ;;  %v4681_v15 = vld [vmem:[#allocation2 + $0xb2] sm:$0xff]  ;;  %v4717_v23 = vpack.c.bf16 %v12442_v8, %v12447_v44 }
 0x629   :  { %4974 = vrot.lane.b32.xlu1 %v4787_v1, %s13441_s13  ;;  %v8697_v36 = vadd.f32 %v8696_v25, %v8695_v9  ;;  %v12454_v1 = vld [vmem:[#allocation2 + $0xe1] sm:$0xff]  ;;  %v4692_v26 = vpack.c.bf16 %v4681_v15, %v4680_v37 }
 0x62a   :  { %v12423_v12 = vadd.f32 %v8691_v43, %v8627_v24  ;;  %4948 = vrot.lane.b32.xlu0 %v4762_v57, %s13440_s16  ;;  %v4730_v24 = vld [vmem:[#allocation2 + $0xd1] sm:$0xff]  ;;  %v4705_v25 = vld [vmem:[#allocation2 + $0xc0] sm:$0xff] }
 0x62b   :  { %v4741_v61 = vpack.c.bf16 %v12454_v1, %v4730_v24 }
 0x62c   :  { %v8628_v51 = vpop.f32.mrb[128].mxu0 }
 0x62d   :  { %4998 = vrot.lane.b32.xlu1 %v4811_v38, %s13442_s6  ;;  %v8629_v31 = vpop.f32.mrb[129].mxu0  ;;  %v8698_v39 = vpop.f32.mrb[164].mxu1 }
 0x62e   :  { %v8630_v20 = vadd.f32 %v8629_v31, %v8628_v51  ;;  %v8631_v18 = vpop.f32.mrb[130].mxu0  ;;  %v8699_v7 = vpop.f32.mrb[165].mxu1  ;;  %4972 = vrot.lane.b32.xlu0 %v12429_v55, %s13441_s13 }
 0x62f   :  { %v8700_v32 = vadd.f32 %v8699_v7, %v8698_v39  ;;  %v8632_v21 = vpop.f32.mrb[131].mxu0  ;;  %v8701_v54 = vpop.f32.mrb[166].mxu1 }
 0x630   :  { %v12433_v17 = vadd.f32 %v8694_v19, %v8630_v20  ;;  %v8633_v60 = vadd.f32 %v8632_v21, %v8631_v18  ;;  %v8702_v27 = vpop.f32.mrb[167].mxu1  ;;  %v12459_v20 = vld [vmem:[#allocation2 + $0xb0] sm:$0xff]  ;;  %v12461_v18 = vld [vmem:[#allocation2 + $0xe2] sm:$0xff] }
 0x631   :  { %5022 = vrot.lane.b32.xlu1 %v4835_v4, %s13443_s26  ;;  %v8703_v46 = vadd.f32 %v8702_v27, %v8701_v54  ;;  %v4716_v21 = vpack.c.bf16 %v4705_v25, %v12459_v20  ;;  %v4729_v27 = vld [vmem:[#allocation2 + $0xc1] sm:$0xff] }
 0x632   :  { %v12437_v42 = vadd.f32 %v8697_v36, %v8633_v60  ;;  %4996 = vrot.lane.b32.xlu0 %v4810_v10, %s13442_s6  ;;  %v4754_v60 = vld [vmem:[#allocation2 + $0xd2] sm:$0xff] }
 0x634   :  { %v8634_v29 = vpop.f32.mrb[132].mxu0 }
 0x635   :  { %4854 = vrot.lane.b32.xlu1 %v4810_v10, %s9755_s30  ;;  %v8635_v40 = vpop.f32.mrb[133].mxu0  ;;  %v8704_v2 = vpop.f32.mrb[168].mxu1  ;;  %v12468_v10 = vld [vmem:[%s13286_s14] ss:$0 sm:$0xff] }
 0x636   :  { %v8636_v52 = vadd.f32 %v8635_v40, %v8634_v29  ;;  %v8637_v0 = vpop.f32.mrb[134].mxu0  ;;  %v8705_v43 = vpop.f32.mrb[169].mxu1  ;;  %5020 = vrot.lane.b32.xlu0 %v4834_v47, %s13443_s26  ;;  %v4765_v29 = vpack.c.bf16 %v12461_v18, %v4754_v60 }
 0x637   :  { %v8706_v53 = vadd.f32 %v8705_v43, %v8704_v2  ;;  %v8638_v45 = vpop.f32.mrb[135].mxu0  ;;  %v8707_v58 = vpop.f32.mrb[170].mxu1  ;;  %v4740_v2 = vpack.c.bf16 %v4729_v27, %v4657_v28  ;;  %v4753_v43 = vld [vmem:[#allocation2 + $0xc2] sm:$0xff] }
 0x638   :  { %v12444_v62 = vadd.f32 %v8700_v32, %v8636_v52  ;;  %v8639_v34 = vadd.f32 %v8638_v45, %v8637_v0  ;;  %v8708_v22 = vpop.f32.mrb[171].mxu1  ;;  %v4764_v28 = vpack.c.bf16 %v4753_v43, %v4681_v15 }
 0x639   :  { %4878 = vrot.lane.b32.xlu1 %v4834_v47, %s13438_s9  ;;  %v8709_v33 = vadd.f32 %v8708_v22, %v8707_v58 }
 0x63a   :  { %v12449_v56 = vadd.f32 %v8703_v46, %v8639_v34  ;;  %4856 = vrot.lane.b32.xlu0 %v4668_v14, %s9755_s30  ;;  %v4669_v34 = vpack.c.bf16 %v4730_v24, %v4729_v27  ;;  %v12487_v24 = vpack.c.bf16 %v12447_v44, %v4705_v25 }
 0x63c   :  { %v8640_v19 = vpop.f32.mrb[136].mxu0 }
 0x63d   :  { %4906 = vrot.lane.b32.xlu1 %v4717_v23, %s9757_s2  ;;  %v8641_v9 = vpop.f32.mrb[137].mxu0  ;;  %v8710_v11 = vpop.f32.mrb[172].mxu1 }
 0x63e   :  { %v8642_v57 = vadd.f32 %v8641_v9, %v8640_v19  ;;  %v8643_v36 = vpop.f32.mrb[138].mxu0  ;;  %v8711_v38 = vpop.f32.mrb[173].mxu1  ;;  %4880 = vrot.lane.b32.xlu0 %v4692_v26, %s13438_s9 }
 0x63f   :  { %v8712_v51 = vadd.f32 %v8711_v38, %v8710_v11  ;;  %v8644_v31 = vpop.f32.mrb[139].mxu0  ;;  %v8713_v39 = vpop.f32.mrb[174].mxu1  ;;  %v4693_v11 = vpack.c.bf16 %v4754_v60, %v4753_v43  ;;  %v4803_v60 = vld [vmem:[#allocation2 + $0xf1] sm:$0xff] }
 0x640   :  { %v5613_v7 = vadd.f32 %v8706_v53, %v8642_v57  ;;  %v8645_v4 = vadd.f32 %v8644_v31, %v8643_v36  ;;  %v8714_v32 = vpop.f32.mrb[175].mxu1  ;;  %v4779_v36 = vld [vmem:[#allocation2 + $0xf0] sm:$0xff] }
 0x641   :  { %4930 = vrot.lane.b32.xlu1 %v4741_v61, %s13439_s29  ;;  %v8715_v54 = vadd.f32 %v8714_v32, %v8713_v39 }
 0x642   :  { %v5616_v46 = vadd.f32 %v8709_v33, %v8645_v4  ;;  %4904 = vrot.lane.b32.xlu0 %v4716_v21, %s9757_s2  ;;  %v12473_v47 = vadd.f32 %v12468_v10, %v5613_v7  ;;  %v12495_v4 = vpack.c.bf16 %v4779_v36, %v12442_v8  ;;  %v4827_v8 = vld [vmem:[#allocation2 + $0xf2] sm:$0xff] }
 0x644   :  { %v8646_v40 = vpop.f32.mrb[140].mxu0  ;;  %v12477_v59 = vadd.f32 %v12468_v10, %v5616_v46 }
 0x645   :  { %4954 = vrot.lane.b32.xlu1 %v4765_v29, %s13440_s16  ;;  %v8647_v52 = vpop.f32.mrb[141].mxu0  ;;  %v8716_v0 = vpop.f32.mrb[176].mxu1 }
 0x646   :  { %v8648_v53 = vadd.f32 %v8647_v52, %v8646_v40  ;;  %v8649_v45 = vpop.f32.mrb[142].mxu0  ;;  %v8717_v58 = vpop.f32.mrb[177].mxu1  ;;  %4928 = vrot.lane.b32.xlu0 %v4740_v2, %s13439_s29  ;;  %v4813_v40 = vpack.c.bf16 %v4803_v60, %v12454_v1 }
 0x647   :  { %v8718_v22 = vadd.f32 %v8717_v58, %v8716_v0  ;;  %v8650_v14 = vpop.f32.mrb[143].mxu0  ;;  %v8719_v33 = vpop.f32.mrb[178].mxu1  ;;  %v4837_v58 = vpack.c.bf16 %v4827_v8, %v12461_v18  ;;  %v4734_v18 = vld [vmem:[#allocation2 + $0x111] sm:$0xff] }
 0x648   :  { %v5621_v37 = vadd.f32 %v8712_v51, %v8648_v53  ;;  %v8651_v23 = vadd.f32 %v8650_v14, %v8649_v45  ;;  %v8720_v19 = vpop.f32.mrb[179].mxu1 }
 0x649   :  { %4858 = vrot.lane.b32.xlu1 %v4669_v34, %s9755_s30  ;;  %v8721_v26 = vadd.f32 %v8720_v19, %v8719_v33  ;;  %v4710_v33 = vld [vmem:[#allocation2 + $0x110] sm:$0xff] }
 0x64a   :  { %v5624_v9 = vadd.f32 %v8715_v54, %v8651_v23  ;;  %4952 = vrot.lane.b32.xlu0 %v4764_v28, %s13440_s16  ;;  %v12483_v57 = vadd.f32 %v12468_v10, %v5621_v37  ;;  %v4735_v28 = vld [vmem:[#allocation2 + $0x121] sm:$0xff] }
 0x64c   :  { %v8652_v38 = vpop.f32.mrb[144].mxu0  ;;  %v12490_v61 = vadd.f32 %v12468_v10, %v5624_v9  ;;  %v4709_v9 = vld [vmem:[#allocation2 + $0x100] sm:$0xff] }
 0x64d   :  { %4882 = vrot.lane.b32.xlu1 %v4693_v11, %s13438_s9  ;;  %v8653_v51 = vpop.f32.mrb[145].mxu0  ;;  %v8722_v15 = vpop.f32.mrb[180].mxu1 }
 0x64e   :  { %v8654_v31 = vadd.f32 %v8653_v51, %v8652_v38  ;;  %v8655_v39 = vpop.f32.mrb[146].mxu0  ;;  %v8723_v7 = vpop.f32.mrb[181].mxu1  ;;  %4976 = vrot.lane.b32.xlu0 %v12487_v24, %s13441_s13  ;;  %v4759_v38 = vld [vmem:[#allocation2 + $0x122] sm:$0xff]  ;;  %v4718_v51 = vpack.c.bf16 %v4709_v9, %v4779_v36 }
 0x64f   :  { %v8724_v32 = vadd.f32 %v8723_v7, %v8722_v15  ;;  %v8656_v21 = vpop.f32.mrb[147].mxu0  ;;  %v8725_v54 = vpop.f32.mrb[182].mxu1  ;;  %v4758_v15 = vld [vmem:[#allocation2 + $0x112] sm:$0xff] }
 0x650   :  { %v5629_v44 = vadd.f32 %v8718_v22, %v8654_v31  ;;  %v8657_v25 = vadd.f32 %v8656_v21, %v8655_v39  ;;  %v8726_v27 = vpop.f32.mrb[183].mxu1  ;;  %v4711_v22 = vld [vmem:[#allocation2 + $0x120] sm:$0xff]  ;;  %v4767_v39 = vpack.c.bf16 %v4759_v38, %v4758_v15  ;;  %v4783_v7 = vld [vmem:[#allocation2 + $0x130] sm:$0xff] }
 0x651   :  { %4978 = vrot.lane.b32.xlu1 %v12495_v4, %s13441_s13  ;;  %v8727_v46 = vadd.f32 %v8726_v27, %v8725_v54  ;;  %v4719_v23 = vpack.c.bf16 %v4711_v22, %v4710_v33  ;;  %v4733_v31 = vld [vmem:[#allocation2 + $0x101] sm:$0xff]  ;;  %v4791_v54 = vpack.c.bf16 %v4783_v7, %v4711_v22  ;;  %v12527_v27 = vpack.c.bf16 %v4710_v33, %v4709_v9 }
 0x652   :  { %v5632_v29 = vadd.f32 %v8721_v26, %v8657_v25  ;;  %5000 = vrot.lane.b32.xlu0 %v4669_v34, %s13442_s6  ;;  %v12502_v2 = vadd.f32 %v12468_v10, %v5629_v44  ;;  %v4757_v21 = vld [vmem:[#allocation2 + $0x102] sm:$0xff]  ;;  %v4671_v25 = vpack.c.bf16 %v4734_v18, %v4733_v31 }
 0x653   :  { %v4766_v44 = vpack.c.bf16 %v4757_v21, %v4827_v8 }
 0x654   :  { %v8658_v52 = vpop.f32.mrb[148].mxu0  ;;  %v12506_v0 = vadd.f32 %v12468_v10, %v5632_v29  ;;  %v4807_v29 = vld [vmem:[#allocation2 + $0x131] sm:$0xff] }
 0x655   :  { %5002 = vrot.lane.b32.xlu1 %v4813_v40, %s13442_s6  ;;  %v8659_v43 = vpop.f32.mrb[149].mxu0  ;;  %v4815_v8 = vpack.c.bf16 %v4807_v29, %v4735_v28 }
 0x656   :  { %v8660_v53 = vadd.f32 %v8659_v43, %v8658_v52  ;;  %v8661_v45 = vpop.f32.mrb[150].mxu0  ;;  %5024 = vrot.lane.b32.xlu0 %v4693_v11, %s13443_s26  ;;  %v4743_v11 = vpack.c.bf16 %v4735_v28, %v4734_v18  ;;  %v4831_v43 = vld [vmem:[#allocation2 + $0x132] sm:$0xff] }
 0x657   :  { %v8662_v34 = vpop.f32.mrb[151].mxu0 }
 0x658   :  { %v5637_v1 = vadd.f32 %v8724_v32, %v8660_v53  ;;  %v8663_v14 = vadd.f32 %v8662_v34, %v8661_v45  ;;  %v4742_v32 = vpack.c.bf16 %v4733_v31, %v4803_v60  ;;  %v4695_v60 = vpack.c.bf16 %v4758_v15, %v4757_v21 }
 0x659   :  { %5026 = vrot.lane.b32.xlu1 %v4837_v58, %s13443_s26 }
 0x65a   :  { %v5640_v37 = vadd.f32 %v8727_v46, %v8663_v14  ;;  %4860 = vrot.lane.b32.xlu0 %v4813_v40, %s9755_s30  ;;  %v12513_v19 = vadd.f32 %v12468_v10, %v5637_v1  ;;  %v4624_v14 = vld [vmem:[#allocation2] sm:$0xff] }
 0x65b   :  { %v4640_v28 = vpack.c.bf16 %v12309_v49, %v4624_v14 }
 0x65c   :  { %v12517_v26 = vadd.f32 %v12468_v10, %v5640_v37 }
 0x65d   :  { %4910 = vrot.lane.b32.xlu1 %v4719_v23, %s9757_s2 }
 0x65e   :  { %4884 = vrot.lane.b32.xlu0 %v4837_v58, %s13438_s9  ;;  %v4839_v58 = vpack.c.bf16 %v4831_v43, %v4759_v38 }
 0x661   :  { %4934 = vrot.lane.b32.xlu1 %v4743_v11, %s13439_s29 }
 0x662   :  { %4908 = vrot.lane.b32.xlu0 %v4718_v51, %s9757_s2 }
 0x665   :  { %4958 = vrot.lane.b32.xlu1 %v4767_v39, %s13440_s16 }
 0x666   :  { %4932 = vrot.lane.b32.xlu0 %v4742_v32, %s13439_s29 }
 0x669   :  { %4982 = vrot.lane.b32.xlu1 %v4791_v54, %s13441_s13 }
 0x66a   :  { %4956 = vrot.lane.b32.xlu0 %v4766_v44, %s13440_s16 }
 0x66c   :  { %v4849_v36 = vpop.permute.xlu0 %4848 }
 0x66d   :  { %4862 = vrot.lane.b32.xlu1 %v4671_v25, %s9755_s30  ;;  %v5034_v11 = vsel %vm1383_vm12, %v4640_v28, %v4849_v36 }
 0x66e   :  { %4980 = vrot.lane.b32.xlu0 %v12527_v27, %s13441_s13 }
 0x66f   :  { %v4899_v46 = vpop.permute.xlu1 %4898 }
 0x670   :  { %v4873_v40 = vpop.permute.xlu0 %4872 }
 0x671   :  { %4886 = vrot.lane.b32.xlu1 %v4695_v60, %s13438_s9  ;;  %v5057_v51 = vsel %vm1832_vm13, %v5034_v11, %v4873_v40 }
 0x672   :  { %5004 = vrot.lane.b32.xlu0 %v4671_v25, %s13442_s6 }
 0x673   :  { %v4923_v52 = vpop.permute.xlu1 %4922 }
 0x674   :  { %v4897_v53 = vpop.permute.xlu0 %4896 }
 0x675   :  { %5006 = vrot.lane.b32.xlu1 %v4815_v8, %s13442_s6  ;;  %v5073_v31 = vsel %vm1849_vm14, %v5057_v51, %v4897_v53 }
 0x676   :  { %5028 = vrot.lane.b32.xlu0 %v4695_v60, %s13443_s26 }
 0x677   :  { %v4947_v45 = vpop.permute.xlu1 %4946 }
 0x678   :  { %v4921_v34 = vpop.permute.xlu0 %4920 }
 0x679   :  { %5030 = vrot.lane.b32.xlu1 %v4839_v58, %s13443_s26 }
 0x67b   :  { %v4851_v22 = vpop.permute.xlu1 %4850 }
 0x67c   :  { %v4945_v1 = vpop.permute.xlu0 %4944  ;;  %v5037_v33 = vsel %vm1383_vm12, %v12351_v16, %v4851_v22  ;;  %v5089_v16 = vsel %vm1866_vm15, %v5073_v31, %v4921_v34 }
 0x67d   :  { %v5105_v7 = vsel %vm1883_vm1, %v5089_v16, %v4945_v1 }
 0x67f   :  { %v4875_v37 = vpop.permute.xlu1 %4874 }
 0x680   :  { %v5059_v23 = vsel %vm1832_vm13, %v5037_v33, %v4875_v37  ;;  %v4969_v9 = vpop.permute.xlu0 %4968 }
 0x681   :  { %v5075_v18 = vsel %vm1849_vm14, %v5059_v23, %v4899_v46  ;;  %v5121_v21 = vsel %vm1900_vm10, %v5105_v7, %v4969_v9 }
 0x682   :  { %v5091_v15 = vsel %vm1866_vm15, %v5075_v18, %v4923_v52 }
 0x683   :  { %v4971_v38 = vpop.permute.xlu1 %4970  ;;  %v5107_v32 = vsel %vm1883_vm1, %v5091_v15, %v4947_v45 }
 0x684   :  { %v4993_v39 = vpop.permute.xlu0 %4992  ;;  %v5123_v25 = vsel %vm1900_vm10, %v5107_v32, %v4971_v38 }
 0x685   :  { %v5137_v54 = vsel %vm13444_vm8, %v5121_v21, %v4993_v39  ;;  %vm13451_vm8 = vmmov %vm13448_vm4 }
 0x687   :  { %v4995_v49 = vpop.permute.xlu1 %4994 }
 0x688   :  { %v5017_v44 = vpop.permute.xlu0 %5016  ;;  %v5139_v46 = vsel %vm13446_vm3, %v5123_v25, %v4995_v49 }
 0x689   :  { %v5153_v36 = vsel %vm13445_vm9, %v5137_v54, %v5017_v44  ;;  %vm13452_vm9 = vmmov %vm13447_vm6 }
 0x68a   :  { %9131 = vmatprep.mubr.msk.bf16.mxu0 %vm13447_vm6, %v5153_v36  ;;  %vm13453_vm6 = vmmov %vm13448_vm4 }
 0x68b   :  { %v5019_v60 = vpop.permute.xlu1 %5018 }
 0x68c   :  { %v5155_v29 = vsel %vm13448_vm4, %v5139_v46, %v5019_v60  ;;  %v4853_v40 = vpop.permute.xlu0 %4852  ;;  %vm13454_vm4 = vmmov %vm13452_vm9 }
 0x68d   :  { %9132 = vmatmul.mubr.msk.bf16.vlgmr.msra.gmra.mrb[152].mxu0 %vm13449_vm7, %v5155_v29  ;;  %v5040_v33 = vsel %vm1383_vm12, %v12360_v6, %v4853_v40  ;;  %vm13450_vm7 = vmmov %vm13446_vm3 }
 0x68f   :  { %v4903_v52 = vpop.permute.xlu1 %4902 }
 0x690   :  { %v4877_v8 = vpop.permute.xlu0 %4876 }
 0x691   :  { %v5061_v23 = vsel %vm1832_vm13, %v5040_v33, %v4877_v8 }
 0x693   :  { %v4927_v43 = vpop.permute.xlu1 %4926 }
 0x694   :  { %v4901_v53 = vpop.permute.xlu0 %4900 }
 0x695   :  { %v5077_v28 = vsel %vm1849_vm14, %v5061_v23, %v4901_v53 }
 0x697   :  { %v4951_v45 = vpop.permute.xlu1 %4950 }
 0x698   :  { %v4925_v58 = vpop.permute.xlu0 %4924 }
 0x699   :  { %v5093_v9 = vsel %vm1866_vm15, %v5077_v28, %v4925_v58  ;;  %v4632_v58 = vld [vmem:[#allocation2 + $0xa0] sm:$0xff] }
 0x69b   :  { %v4975_v34 = vpop.permute.xlu1 %4974 }
 0x69c   :  { %v4949_v22 = vpop.permute.xlu0 %4948 }
 0x69d   :  { %v5109_v11 = vsel %vm1883_vm1, %v5093_v9, %v4949_v22  ;;  %v4644_v22 = vpack.c.bf16 %v12459_v20, %v4632_v58 }
 0x69f   :  { %v4999_v1 = vpop.permute.xlu1 %4998 }
 0x6a0   :  { %v4973_v14 = vpop.permute.xlu0 %4972 }
 0x6a1   :  { %v5125_v51 = vsel %vm1900_vm10, %v5109_v11, %v4973_v14 }
 0x6a3   :  { %v5023_v37 = vpop.permute.xlu1 %5022 }
 0x6a4   :  { %v4997_v18 = vpop.permute.xlu0 %4996 }
 0x6a5   :  { %v5141_v15 = vsel %vm13450_vm7, %v5125_v51, %v4997_v18  ;;  %vm13455_vm7 = vmmov %vm13446_vm3 }
 0x6a7   :  { %v4855_v38 = vpop.permute.xlu1 %4854 }
 0x6a8   :  { %v5021_v31 = vpop.permute.xlu0 %5020  ;;  %v5043_v6 = vsel %vm1383_vm12, %v12429_v55, %v4855_v38 }
 0x6a9   :  { %v5157_v39 = vsel %vm13451_vm8, %v5141_v15, %v5021_v31  ;;  %vm13456_vm8 = vmmov %vm13453_vm6 }
 0x6aa   :  { %9135 = vmatprep.mubr.msk.bf16.mxu0 %vm13452_vm9, %v5157_v39  ;;  %vm13457_vm9 = vmmov %vm13446_vm3 }
 0x6ab   :  { %v4879_v16 = vpop.permute.xlu1 %4878 }
 0x6ac   :  { %v5063_v7 = vsel %vm1832_vm13, %v5043_v6, %v4879_v16  ;;  %v4857_v49 = vpop.permute.xlu0 %4856 }
 0x6ad   :  { %v5079_v32 = vsel %vm1849_vm14, %v5063_v7, %v4903_v52  ;;  %v5046_v33 = vsel %vm1383_vm12, %v4644_v22, %v4857_v49 }
 0x6ae   :  { %v5095_v21 = vsel %vm1866_vm15, %v5079_v32, %v4927_v43 }
 0x6af   :  { %v5111_v54 = vsel %vm1883_vm1, %v5095_v21, %v4951_v45  ;;  %v4907_v44 = vpop.permute.xlu1 %4906 }
 0x6b0   :  { %v5127_v25 = vsel %vm1900_vm10, %v5111_v54, %v4975_v34  ;;  %v4881_v36 = vpop.permute.xlu0 %4880 }
 0x6b1   :  { %v5143_v46 = vsel %vm13446_vm3, %v5127_v25, %v4999_v1  ;;  %v5065_v23 = vsel %vm1832_vm13, %v5046_v33, %v4881_v36  ;;  %vm13458_vm3 = vmmov %vm13454_vm4 }
 0x6b2   :  { %v5159_v55 = vsel %vm13453_vm6, %v5143_v46, %v5023_v37 }
 0x6b3   :  { %v4931_v60 = vpop.permute.xlu1 %4930  ;;  %9136 = vmatmul.mubr.msk.bf16.gmra.mrb[156].mxu0 %vm13454_vm4, %v5159_v55  ;;  %vm13459_vm4 = vmmov %vm13458_vm3 }
 0x6b4   :  { %v4905_v29 = vpop.permute.xlu0 %4904 }
 0x6b5   :  { %v5081_v18 = vsel %vm1849_vm14, %v5065_v23, %v4905_v29 }
 0x6b7   :  { %v4955_v40 = vpop.permute.xlu1 %4954 }
 0x6b8   :  { %v4929_v8 = vpop.permute.xlu0 %4928 }
 0x6bb   :  { %v4859_v52 = vpop.permute.xlu1 %4858 }
 0x6bc   :  { %v4953_v53 = vpop.permute.xlu0 %4952  ;;  %v5049_v43 = vsel %vm1383_vm12, %v12487_v24, %v4859_v52  ;;  %v5097_v24 = vsel %vm1866_vm15, %v5081_v18, %v4929_v8 }
 0x6bd   :  { %v5113_v11 = vsel %vm1883_vm1, %v5097_v24, %v4953_v53 }
 0x6bf   :  { %v4883_v45 = vpop.permute.xlu1 %4882 }
 0x6c0   :  { %v5067_v34 = vsel %vm1832_vm13, %v5049_v43, %v4883_v45  ;;  %v4977_v14 = vpop.permute.xlu0 %4976 }
 0x6c1   :  { %v5083_v1 = vsel %vm1849_vm14, %v5067_v34, %v4907_v44  ;;  %v5129_v51 = vsel %vm1900_vm10, %v5113_v11, %v4977_v14 }
 0x6c2   :  { %v5099_v28 = vsel %vm1866_vm15, %v5083_v1, %v4931_v60 }
 0x6c3   :  { %v4979_v37 = vpop.permute.xlu1 %4978  ;;  %v5115_v38 = vsel %vm1883_vm1, %v5099_v28, %v4955_v40  ;;  %v6243_v28 = vld [vmem:[%s13289_s17] sm:$0xf] }
 0x6c4   :  { %v5001_v9 = vpop.permute.xlu0 %5000  ;;  %v5131_v39 = vsel %vm1900_vm10, %v5115_v38, %v4979_v37  ;;  %9503 = vmatprep.subr.msk.bf16.mxu1 %vm2592_vm11, %v6243_v28  ;;  %v6269_v24 = vsel %vm2592_vm11, %v6243_v28, 0  ;;  %vm13477_vm11 = vcmask 982016  }
 0x6c5   :  { %v5145_v15 = vsel %vm13455_vm7, %v5129_v51, %v5001_v9  ;;  %9190 = vmatpush3.bf16.msra.mxu1 %v6269_v24 }
 0x6c7   :  { %v5003_v20 = vpop.permute.xlu1 %5002 }
 0x6c8   :  { %v5025_v31 = vpop.permute.xlu0 %5024  ;;  %v5147_v16 = vsel %vm13457_vm9, %v5131_v39, %v5003_v20 }
 0x6c9   :  { %v5161_v6 = vsel %vm13456_vm8, %v5145_v15, %v5025_v31  ;;  %v9683_v15 = vld [vmem:[%s13292_s20] sm:$0xff]   ;;  %v9331_v31 = vadd.f32 %v12468_v10, %v12419_v5  ;;  %vm13479_vm8 = vmmov %vm13477_vm11 }
 0x6ca   :  { %9139 = vmatprep.mubr.msk.bf16.mxu0 %vm13458_vm3, %v5161_v6  ;;  %9207 = vmatprep.subr.bf16.mxu1 %v9683_v15  ;;  %v9333_v6 = vadd.f32 %v12468_v10, %v12406_v35  ;;  %v9684_v35 = vld [vmem:[%s13292_s20 + $0x8] sm:$0xff]  }
 0x6cb   :  { %v5027_v7 = vpop.permute.xlu1 %5026 }
 0x6cc   :  { %v5163_v32 = vsel %vm13453_vm6, %v5147_v16, %v5027_v7  ;;  %v4861_v49 = vpop.permute.xlu0 %4860 }
 0x6cd   :  { %9140 = vmatmul.mubr.msk.bf16.gmra.mrb[160].mxu0 %vm13459_vm4, %v5163_v32  ;;  %v5052_v8 = vsel %vm1383_vm12, %v12495_v4, %v4861_v49  ;;  %v9335_v32 = vadd.f32 %v12468_v10, %v12423_v12 }
 0x6cf   :  { %v4911_v21 = vpop.permute.xlu1 %4910 }
 0x6d0   :  { %v4885_v54 = vpop.permute.xlu0 %4884 }
 0x6d1   :  { %v5069_v58 = vsel %vm1832_vm13, %v5052_v8, %v4885_v54  ;;  %v9337_v54 = vadd.f32 %v12468_v10, %v12411_v48  ;;  %v9339_v48 = vadd.f32 %v12468_v10, %v12444_v62  ;;  %v9341_v8 = vadd.f32 %v12468_v10, %v12433_v17 }
 0x6d3   :  { %v4935_v44 = vpop.permute.xlu1 %4934 }
 0x6d4   :  { %v4909_v25 = vpop.permute.xlu0 %4908 }
 0x6d5   :  { %v5085_v45 = vsel %vm1849_vm14, %v5069_v58, %v4909_v25  ;;  %v9343_v58 = vadd.f32 %v12468_v10, %v12449_v56 }
 0x6d7   :  { %v4959_v36 = vpop.permute.xlu1 %4958 }
 0x6d8   :  { %v4933_v46 = vpop.permute.xlu0 %4932 }
 0x6d9   :  { %v5101_v1 = vsel %vm1866_vm15, %v5085_v45, %v4933_v46 }
 0x6db   :  { %v4983_v55 = vpop.permute.xlu1 %4982 }
 0x6dc   :  { %v4957_v60 = vpop.permute.xlu0 %4956 }
 0x6dd   :  { %v5117_v33 = vsel %vm1883_vm1, %v5101_v1, %v4957_v60 }
 0x6df   :  { %v4863_v29 = vpop.permute.xlu1 %4862 }
 0x6e0   :  { %v4981_v40 = vpop.permute.xlu0 %4980  ;;  %v5055_v52 = vsel %vm1383_vm12, %v12527_v27, %v4863_v29 }
 0x6e1   :  { %v5133_v27 = vsel %vm1900_vm10, %v5117_v33, %v4981_v40 }
 0x6e3   :  { %v4887_v53 = vpop.permute.xlu1 %4886 }
 0x6e4   :  { %v5071_v43 = vsel %vm1832_vm13, %v5055_v52, %v4887_v53  ;;  %v5005_v22 = vpop.permute.xlu0 %5004  ;;  %vm13460_vm13 = vmmov %vm13455_vm7 }
 0x6e5   :  { %v5087_v34 = vsel %vm1849_vm14, %v5071_v43, %v4911_v21  ;;  %v5149_v18 = vsel %vm13460_vm13, %v5133_v27, %v5005_v22  ;;  %vm13461_vm14 = vmmov %vm13453_vm6 }
 0x6e6   :  { %v5103_v14 = vsel %vm1866_vm15, %v5087_v34, %v4935_v44  ;;  %vm13462_vm15 = vmmov %vm13455_vm7  ;;  %v9345_v34 = vadd.f32 %v12468_v10, %v12437_v42 }
 0x6e7   :  { %v5119_v4 = vsel %vm1883_vm1, %v5103_v14, %v4959_v36  ;;  %v5007_v37 = vpop.permute.xlu1 %5006  ;;  %vm13463_vm1 = vmmov %vm13458_vm3 }
 0x6e8   :  { %v5135_v23 = vsel %vm1900_vm10, %v5119_v4, %v4983_v55  ;;  %v5029_v9 = vpop.permute.xlu0 %5028  ;;  %vm13464_vm10 = vmmov %vm13453_vm6 }
 0x6e9   :  { %v5165_v11 = vsel %vm13461_vm14, %v5149_v18, %v5029_v9  ;;  %v5151_v38 = vsel %vm13462_vm15, %v5135_v23, %v5007_v37  ;;  %vm13465_vm7 = vmmov %vm13463_vm1 }
 0x6ea   :  { %9143 = vmatprep.mubr.msk.bf16.mxu0 %vm13463_vm1, %v5165_v11  ;;  %vm13481_vm3 = vmmov %vm13479_vm8 }
 0x6eb   :  { %v5031_v20 = vpop.permute.xlu1 %5030  ;;  %vm13483_vm4 = vmmov %vm13481_vm3 }
 0x6ec   :  { %v5167_v51 = vsel %vm13464_vm10, %v5151_v38, %v5031_v20  ;;  %vm13485_vm14 = vmmov %vm13481_vm3 }
 0x6ed   :  { %9144 = vmatmul.mubr.msk.bf16.gmra.mrb[164].mxu0 %vm13465_vm7, %v5167_v51  ;;  %vm13487_vm1 = vmmov %vm13481_vm3 }
 0x6ee   :  { %vm13489_vm7 = vmmov %vm13487_vm1 }
 0x760   :  { %v9133_v39 = vpop.f32.mrb[152].mxu0 }
 0x761   :  { %v9332_v16 = vadd.f32 %v9331_v31, %v9133_v39  ;;  %v5845_v7 = vpop.f32.mrb[153].mxu0 }
 0x762   :  { %v9334_v49 = vadd.f32 %v9333_v6, %v5845_v7  ;;  %v9134_v21 = vpop.f32.mrb[154].mxu0 }
 0x763   :  { %v9336_v44 = vadd.f32 %v9335_v32, %v9134_v21  ;;  %v5848_v25 = vpop.f32.mrb[155].mxu0  ;;  %v5926_v46 = vmax.f32 %v9332_v16, 0.0 }
 0x764   :  { %v9338_v36 = vadd.f32 %v9337_v54, %v5848_v25  ;;  %v5924_v5 = vmax.f32 %v9334_v49, 0.0 }
 0x765   :  { %v5927_v55 = vmax.f32 %v9336_v44, 0.0 }
 0x766   :  { %v5925_v60 = vmax.f32 %v9338_v36, 0.0 }
 0x767   :  { %v5941_v29 = vpack.c.bf16 %v5927_v55, %v5926_v46 }
 0x768   :  { %v5940_v40 = vpack.c.bf16 %v5925_v60, %v5924_v5 }
 0x76a   :  { %9191 = vmatprep.mubr.msk.bf16.mxu1 %vm1383_vm12, %v5940_v40 }
 0x76b   :  { %9192 = vmatmul.mubr.msk.bf16.vlgmr.msra.gmra.mrb[184].mxu1 %vm1383_vm12, %v5941_v29 }
 0x76c   :  { %9208 = vmatpush3.bf16.msra.mxu1 %v9683_v15 }
 0x76d   :  { %9209 = vmatprep.subr.bf16.mxu1 %v9684_v35 }
 0x770   :  { %9210 = vmatpush3.bf16.msra.mxu1 %v9684_v35 }
 0x786   :  { %v9137_v12 = vpop.f32.mrb[156].mxu0 }
 0x787   :  { %v9340_v52 = vadd.f32 %v9339_v48, %v9137_v12  ;;  %v5861_v53 = vpop.f32.mrb[157].mxu0 }
 0x788   :  { %v9342_v43 = vadd.f32 %v9341_v8, %v5861_v53  ;;  %v9138_v45 = vpop.f32.mrb[158].mxu0 }
 0x789   :  { %v9344_v22 = vadd.f32 %v9343_v58, %v9138_v45  ;;  %v5864_v1 = vpop.f32.mrb[159].mxu0  ;;  %v5930_v33 = vmax.f32 %v9340_v52, 0.0 }
 0x78a   :  { %v9346_v14 = vadd.f32 %v9345_v34, %v5864_v1  ;;  %v5928_v62 = vmax.f32 %v9342_v43, 0.0 }
 0x78b   :  { %v5931_v4 = vmax.f32 %v9344_v22, 0.0 }
 0x78c   :  { %v5929_v37 = vmax.f32 %v9346_v14, 0.0 }
 0x78d   :  { %v5943_v27 = vpack.c.bf16 %v5931_v4, %v5930_v33  ;;  %v13466_v4 = vld [vmem:[#allocation6_spill] sm:$0xff] }
 0x78e   :  { %v5942_v23 = vpack.c.bf16 %v5929_v37, %v5928_v62  ;;  %v13467_v62 = vld [vmem:[#allocation7_spill] sm:$0xff] }
 0x790   :  { %9195 = vmatprep.mubr.msk.bf16.mxu1 %vm1383_vm12, %v5942_v23 }
 0x791   :  { %9196 = vmatmul.mubr.msk.bf16.gmra.mrb[188].mxu1 %vm1383_vm12, %v5943_v27 }
 0x7a0   :  { %v9141_v17 = vpop.f32.mrb[160].mxu0 }
 0x7a1   :  { %v9348_v56 = vadd.f32 %v12483_v57, %v9141_v17  ;;  %v5877_v28 = vpop.f32.mrb[161].mxu0 }
 0x7a2   :  { %v9350_v18 = vadd.f32 %v12473_v47, %v5877_v28  ;;  %v9142_v42 = vpop.f32.mrb[162].mxu0 }
 0x7a3   :  { %v9352_v10 = vadd.f32 %v12490_v61, %v9142_v42  ;;  %v5880_v9 = vpop.f32.mrb[163].mxu0  ;;  %v5934_v11 = vmax.f32 %v9348_v56, 0.0 }
 0x7a4   :  { %v9354_v24 = vadd.f32 %v12477_v59, %v5880_v9  ;;  %v5932_v20 = vmax.f32 %v9350_v18, 0.0  ;;  %v9685_v59 = vld [vmem:[%s13292_s20 + $0x10] sm:$0xff]  }
 0x7a5   :  { %v5935_v38 = vmax.f32 %v9352_v10, 0.0  ;;  %9211 = vmatprep.subr.bf16.mxu1 %v9685_v59 }
 0x7a6   :  { %v5933_v51 = vmax.f32 %v9354_v24, 0.0  ;;  %9212 = vmatpush3.bf16.msra.mxu1 %v9685_v59  ;;  %v13468_v24 = vld [vmem:[#allocation8_spill] sm:$0xff] }
 0x7a7   :  { %v5945_v15 = vpack.c.bf16 %v5935_v38, %v5934_v11  ;;  %v13469_v11 = vld [vmem:[#allocation13_spill] sm:$0xff] }
 0x7a8   :  { %v5944_v31 = vpack.c.bf16 %v5933_v51, %v5932_v20  ;;  %v13470_v20 = vld [vmem:[#allocation9_spill] sm:$0xff] }
 0x7aa   :  { %9199 = vmatprep.mubr.msk.bf16.mxu1 %vm1383_vm12, %v5944_v31 }
 0x7ab   :  { %9200 = vmatmul.mubr.msk.bf16.gmra.mrb[192].mxu1 %vm1383_vm12, %v5945_v15  ;;  %v13471_v15 = vld [vmem:[#allocation10_spill] sm:$0xff] }
 0x7c0   :  { %v9145_v57 = vpop.f32.mrb[164].mxu0 }
 0x7c1   :  { %v9356_v39 = vadd.f32 %v12513_v19, %v9145_v57  ;;  %v5893_v47 = vpop.f32.mrb[165].mxu0 }
 0x7c2   :  { %v9358_v6 = vadd.f32 %v12502_v2, %v5893_v47  ;;  %v9146_v61 = vpop.f32.mrb[166].mxu0  ;;  %v9686_v2 = vld [vmem:[%s13292_s20 + $0x18] sm:$0x3f]  }
 0x7c3   :  { %v9360_v16 = vadd.f32 %v12517_v26, %v9146_v61  ;;  %v5896_v7 = vpop.f32.mrb[167].mxu0  ;;  %v5938_v49 = vmax.f32 %v9356_v39, 0.0  ;;  %9504 = vmatprep.subr.msk.bf16.mxu1 %vm1048_vm5, %v9686_v2  ;;  %v6464_v36 = vsel %vm1048_vm5, %v9686_v2, 0 }
 0x7c4   :  { %v9362_v32 = vadd.f32 %v12506_v0, %v5896_v7  ;;  %v5936_v54 = vmax.f32 %v9358_v6, 0.0  ;;  %9214 = vmatpush3.bf16.msra.mxu1 %v6464_v36  ;;  %v8047_v0 = vld [vmem:[%s13290_s18] ss:$0 sm:$0xff]  ;;  %v13475_v36 = vld [vmem:[#allocation15_spill] sm:$0xff] }
 0x7c5   :  { %v5939_v21 = vmax.f32 %v9360_v16, 0.0 }
 0x7c6   :  { %v5937_v44 = vmax.f32 %v9362_v32, 0.0 }
 0x7c7   :  { %v5947_v19 = vpack.c.bf16 %v5939_v21, %v5938_v49  ;;  %v13472_v21 = vld [vmem:[#allocation11_spill] sm:$0xff] }
 0x7c8   :  { %v5946_v25 = vpack.c.bf16 %v5937_v44, %v5936_v54  ;;  %v13473_v44 = vld [vmem:[#allocation14_spill] sm:$0xff] }
 0x7ca   :  { %9203 = vmatprep.mubr.msk.bf16.mxu1 %vm1383_vm12, %v5946_v25 }
 0x7cb   :  { %9204 = vmatmul.mubr.msk.bf16.gmra.mrb[196].mxu1 %vm1383_vm12, %v5947_v19  ;;  %v13474_v19 = vld [vmem:[#allocation12_spill] sm:$0xff] }
 0x83e   :  { %v9193_v26 = vpop.f32.mrb[184].mxu1 }
 0x83f   :  { %v9363_v46 = vadd.f32 %v9193_v26, %v8047_v0  ;;  %v6305_v55 = vpop.f32.mrb[185].mxu1 }
 0x840   :  { %v9364_v5 = vadd.f32 %v8047_v0, %v6305_v55  ;;  %v9194_v60 = vpop.f32.mrb[186].mxu1 }
 0x841   :  { %v9365_v29 = vadd.f32 %v9194_v60, %v8047_v0  ;;  %v6308_v40 = vpop.f32.mrb[187].mxu1  ;;  %v6386_v48 = vadd.f32 %v9363_v46, %v11322_v13  ;;  %v9689_v60 = vld [vmem:[%s13294_s22 + $0x48] sm:$0xff]  }
 0x842   :  { %v9366_v35 = vadd.f32 %v8047_v0, %v6308_v40  ;;  %v6384_v8 = vadd.f32 %v9364_v5, %v11326_v30  ;;  %v9687_v5 = vld [vmem:[%s13294_s22 + $0x40] sm:$0xff]   ;;  %v9691_v40 = vld [vmem:[%s13294_s22 + $0x50] sm:$0xff]  }
 0x843   :  { %v6387_v12 = vadd.f32 %v9365_v29, %v11332_v50  ;;  %8793 = vmatprep.subr.bf16.mxu0 %v9687_v5  ;;  %v9690_v29 = vld [vmem:[%s13294_s22 + $0x8] sm:$0xff]  }
 0x844   :  { %v6385_v52 = vadd.f32 %v9366_v35, %v11337_v3  ;;  %v9692_v35 = vld [vmem:[%s13294_s22 + $0x10] sm:$0xff]  }
 0x845   :  { %v6401_v53 = vpack.c.bf16 %v6387_v12, %v6386_v48  ;;  %v9693_v48 = vld [vmem:[%s13294_s22 + $0x58] sm:$0xff]  }
 0x846   :  { %v6400_v58 = vpack.c.bf16 %v6385_v52, %v6384_v8  ;;  %v9694_v12 = vld [vmem:[%s13294_s22 + $0x18] sm:$0xff]   ;;  %v9695_v8 = vld [vmem:[%s13294_s22 + $0x60] sm:$0xff]  }
 0x847   :  { %v9696_v52 = vld [vmem:[%s13294_s22 + $0x20] sm:$0xff]  }
 0x848   :  { %9215 = vmatprep.mubr.msk.bf16.mxu1 %vm79_vm0, %v6400_v58  ;;  %v9698_v58 = vld [vmem:[%s13294_s22 + $0x28] sm:$0xff]  }
 0x849   :  { %9216 = vmatmul.mubr.msk.bf16.vlgmr.msra.gmra.mrb[88].mxu1 %vm79_vm0, %v6401_v53  ;;  %v9697_v53 = vld [vmem:[%s13294_s22 + $0x68] sm:$0xff]  }
 0x864   :  { %v9197_v43 = vpop.f32.mrb[188].mxu1 }
 0x865   :  { %v9367_v45 = vadd.f32 %v9197_v43, %v8047_v0  ;;  %v6321_v34 = vpop.f32.mrb[189].mxu1  ;;  %v12733_v43 = vld [vmem:[%s13293_s21] ss:$0 sm:$0xff] }
 0x866   :  { %v9368_v22 = vadd.f32 %v8047_v0, %v6321_v34  ;;  %v9198_v1 = vpop.f32.mrb[190].mxu1  ;;  %v9699_v34 = vld [vmem:[%s13294_s22 + $0x70] sm:$0xff]  }
 0x867   :  { %v9369_v14 = vadd.f32 %v9198_v1, %v8047_v0  ;;  %v6324_v33 = vpop.f32.mrb[191].mxu1  ;;  %v6390_v50 = vadd.f32 %v9367_v45, %v11432_v63 }
 0x868   :  { %v9370_v13 = vadd.f32 %v8047_v0, %v6324_v33  ;;  %v6388_v3 = vadd.f32 %v9368_v22, %v13466_v4  ;;  %v9700_v22 = vld [vmem:[%s13294_s22 + $0x30] sm:$0xff]  }
 0x869   :  { %v6391_v30 = vadd.f32 %v9369_v14, %v11442_v41 }
 0x86a   :  { %v6389_v37 = vadd.f32 %v9370_v13, %v13467_v62  ;;  %v9702_v62 = vld [vmem:[%s13294_s22 + $0x38] sm:$0xff]  }
 0x86b   :  { %v6403_v27 = vpack.c.bf16 %v6391_v30, %v6390_v50 }
 0x86c   :  { %v6402_v23 = vpack.c.bf16 %v6389_v37, %v6388_v3  ;;  %v9701_v3 = vld [vmem:[%s13294_s22 + $0x78] sm:$0xff]   ;;  %v6643_v37 = vld [vmem:[#allocation2 + $0x2] sm:$0xff] }
 0x86e   :  { %9219 = vmatprep.mubr.msk.bf16.mxu1 %vm79_vm0, %v6402_v23  ;;  %v6619_v23 = vld [vmem:[#allocation2 + $0x1] sm:$0xff] }
 0x86f   :  { %9220 = vmatmul.mubr.msk.bf16.gmra.mrb[92].mxu1 %vm79_vm0, %v6403_v27 }
 0x87e   :  { %v9201_v17 = vpop.f32.mrb[192].mxu1 }
 0x87f   :  { %v9371_v56 = vadd.f32 %v9201_v17, %v8047_v0  ;;  %v6337_v28 = vpop.f32.mrb[193].mxu1 }
 0x880   :  { %v9372_v18 = vadd.f32 %v8047_v0, %v6337_v28  ;;  %v9202_v42 = vpop.f32.mrb[194].mxu1 }
 0x881   :  { %v9373_v10 = vadd.f32 %v9202_v42, %v8047_v0  ;;  %v6340_v9 = vpop.f32.mrb[195].mxu1  ;;  %v6394_v41 = vadd.f32 %v9371_v56, %v13468_v24 }
 0x882   :  { %v9374_v63 = vadd.f32 %v8047_v0, %v6340_v9  ;;  %v6392_v51 = vadd.f32 %v9372_v18, %v13470_v20 }
 0x883   :  { %v6395_v38 = vadd.f32 %v9373_v10, %v13469_v11 }
 0x884   :  { %v6393_v31 = vadd.f32 %v9374_v63, %v13471_v15 }
 0x885   :  { %v6405_v57 = vpack.c.bf16 %v6395_v38, %v6394_v41 }
 0x886   :  { %v6404_v39 = vpack.c.bf16 %v6393_v31, %v6392_v51 }
 0x888   :  { %9223 = vmatprep.mubr.msk.bf16.mxu1 %vm79_vm0, %v6404_v39 }
 0x889   :  { %9224 = vmatmul.mubr.msk.bf16.gmra.mrb[96].mxu1 %vm79_vm0, %v6405_v57 }
 0x89e   :  { %v9205_v47 = vpop.f32.mrb[196].mxu1 }
 0x89f   :  { %v9375_v6 = vadd.f32 %v9205_v47, %v8047_v0  ;;  %v6353_v61 = vpop.f32.mrb[197].mxu1 }
 0x8a0   :  { %v9376_v59 = vadd.f32 %v8047_v0, %v6353_v61  ;;  %v9206_v16 = vpop.f32.mrb[198].mxu1 }
 0x8a1   :  { %v9377_v7 = vadd.f32 %v9206_v16, %v8047_v0  ;;  %v6356_v32 = vpop.f32.mrb[199].mxu1  ;;  %v6398_v54 = vadd.f32 %v9375_v6, %v13472_v21 }
 0x8a2   :  { %v9378_v49 = vadd.f32 %v8047_v0, %v6356_v32  ;;  %v6396_v25 = vadd.f32 %v9376_v59, %v13474_v19  ;;  %v9688_v0 = vld [vmem:[%s13294_s22] sm:$0xff]  }
 0x8a3   :  { %v6399_v2 = vadd.f32 %v9377_v7, %v13473_v44  ;;  %8794 = vmatpush3.bf16.msra.mxu0 %v9688_v0 }
 0x8a4   :  { %v6397_v26 = vadd.f32 %v9378_v49, %v13475_v36  ;;  %8795 = vmatprep.subr.bf16.mxu0 %v9689_v60 }
 0x8a5   :  { %v6407_v46 = vpack.c.bf16 %v6399_v2, %v6398_v54 }
 0x8a6   :  { %v6406_v55 = vpack.c.bf16 %v6397_v26, %v6396_v25 }
 0x8a7   :  { %8796 = vmatpush3.bf16.msra.mxu0 %v9690_v29 }
 0x8a8   :  { %9227 = vmatprep.mubr.msk.bf16.mxu1 %vm79_vm0, %v6406_v55  ;;  %8797 = vmatprep.subr.bf16.mxu0 %v9691_v40 }
 0x8a9   :  { %9228 = vmatmul.mubr.msk.bf16.gmra.mrb[100].mxu1 %vm79_vm0, %v6407_v46 }
 0x8ab   :  { %8798 = vmatpush3.bf16.msra.mxu0 %v9692_v35 }
 0x8ac   :  { %8799 = vmatprep.subr.bf16.mxu0 %v9693_v48 }
 0x8af   :  { %8800 = vmatpush3.bf16.msra.mxu0 %v9694_v12  ;;  %v9703_v12 = vld [vmem:[%s13294_s22 + $0xc0] sm:$0xff]  }
 0x8b0   :  { %8801 = vmatprep.subr.bf16.mxu0 %v9695_v8 }
 0x8b3   :  { %8802 = vmatpush3.bf16.msra.mxu0 %v9696_v52 }
 0x8b4   :  { %8803 = vmatprep.subr.bf16.mxu0 %v9697_v53 }
 0x8b7   :  { %8804 = vmatpush3.bf16.msra.mxu0 %v9698_v58 }
 0x8b8   :  { %8805 = vmatprep.subr.bf16.mxu0 %v9699_v34 }
 0x8bb   :  { %8806 = vmatpush3.bf16.msra.mxu0 %v9700_v22 }
 0x8bc   :  { %8807 = vmatprep.subr.bf16.mxu0 %v9701_v3 }
 0x8bf   :  { %8808 = vmatpush3.bf16.msra.mxu0 %v9702_v62 }
 0x8c0   :  { %8857 = vmatprep.subr.bf16.mxu0 %v9703_v12 }
 0x91c   :  { %v9217_v45 = vpop.f32.mrb[88].mxu1 }
 0x91d   :  { %v9315_v1 = vadd.f32 %v9217_v45, %v12733_v43  ;;  %v6500_v14 = vpop.f32.mrb[89].mxu1 }
 0x91e   :  { %v9316_v33 = vadd.f32 %v12733_v43, %v6500_v14  ;;  %v9218_v13 = vpop.f32.mrb[90].mxu1 }
 0x91f   :  { %6581 = vst.msk [vmem:[#allocation2 + $0x31] sm:$0xff] %vm79_vm0, %v9315_v1  ;;  %v9317_v50 = vadd.f32 %v9218_v13, %v12733_v43  ;;  %v6503_v30 = vpop.f32.mrb[91].mxu1 }
 0x920   :  { %6579 = vst.msk [vmem:[#allocation2 + $0x11] sm:$0xff] %vm79_vm0, %v9316_v33  ;;  %v9318_v4 = vadd.f32 %v12733_v43, %v6503_v30 }
 0x921   :  { %6582 = vst.msk [vmem:[#allocation2 + $0x41] sm:$0xff] %vm79_vm0, %v9317_v50 }
 0x922   :  { %6580 = vst.msk [vmem:[#allocation2 + $0x21] sm:$0xff] %vm79_vm0, %v9318_v4 }
 0x926   :  { %v12760_v28 = vld [vmem:[#allocation2 + $0x32] sm:$0xff] }
 0x927   :  { %v12755_v27 = vld [vmem:[#allocation2 + $0x12] sm:$0xff] }
 0x928   :  { %v6659_v17 = vpack.c.bf16 %v12755_v27, %v6643_v37  ;;  %v12758_v56 = vld [vmem:[#allocation2 + $0x10] sm:$0xff]  ;;  %v12762_v18 = vld [vmem:[#allocation2 + $0x42] sm:$0xff] }
 0x929   :  { %v6668_v42 = vld [vmem:[#allocation2 + $0x20] sm:$0xff]  ;;  %v6620_v10 = vld [vmem:[#allocation2 + $0x11] sm:$0xff]  ;;  %v6732_v63 = vpack.c.bf16 %v12762_v18, %v12760_v28 }
 0x92a   :  { %v12764_v9 = vld [vmem:[#allocation2 + $0x22] sm:$0xff]  ;;  %6843 = vrot.lane.b32.xlu0 %v6659_v17, %s9747_s27  ;;  %v6683_v24 = vpack.c.bf16 %v6668_v42, %v12758_v56  ;;  %v6669_v41 = vld [vmem:[#allocation2 + $0x30] sm:$0xff]  ;;  %v6635_v51 = vpack.c.bf16 %v6620_v10, %v6619_v23 }
 0x92b   :  { %v6692_v11 = vld [vmem:[#allocation2 + $0x21] sm:$0xff]  ;;  %v12770_v38 = vpack.c.bf16 %v6669_v41, %v6668_v42  ;;  %v6731_v20 = vpack.c.bf16 %v12764_v9, %v12755_v27  ;;  %v12779_v57 = vpack.c.bf16 %v12760_v28, %v12764_v9  ;;  %v6622_v47 = vld [vmem:[#allocation2 + $0x31] sm:$0xff] }
 0x92c   :  { %6867 = vrot.lane.b32.xlu1 %v6683_v24, %s9749_s25  ;;  %v6707_v15 = vpack.c.bf16 %v6692_v11, %v6620_v10  ;;  %v6670_v31 = vld [vmem:[#allocation2 + $0x40] sm:$0xff]  ;;  %v12784_v61 = vpack.c.bf16 %v6622_v47, %v6692_v11  ;;  %v9705_v9 = vld [vmem:[%s13294_s22 + $0xc8] sm:$0xff]  }
 0x92d   :  { %v6684_v39 = vpack.c.bf16 %v6670_v31, %v6669_v41  ;;  %v6694_v6 = vld [vmem:[#allocation2 + $0x41] sm:$0xff] }
 0x92e   :  { %6819 = vrot.lane.b32.xlu0 %v6635_v51, %s9748_s3  ;;  %v6708_v59 = vpack.c.bf16 %v6694_v6, %v6622_v47  ;;  %v6651_v23 = vld [vmem:[#allocation2 + $0xa2] sm:$0xff] }
 0x92f   :  { %v6627_v24 = vld [vmem:[#allocation2 + $0xa1] sm:$0xff] }
 0x930   :  { %6891 = vrot.lane.b32.xlu1 %v6707_v15, %s9750_s8  ;;  %v9704_v27 = vld [vmem:[%s13294_s22 + $0x80] sm:$0xff]  }
 0x932   :  { %6845 = vrot.lane.b32.xlu0 %v12779_v57, %s9747_s27 }
 0x934   :  { %6869 = vrot.lane.b32.xlu1 %v6684_v39, %s9749_s25 }
 0x936   :  { %6821 = vrot.lane.b32.xlu0 %v12784_v61, %s9748_s3 }
 0x938   :  { %6893 = vrot.lane.b32.xlu1 %v6708_v59, %s9750_s8 }
 0x942   :  { %v9221_v16 = vpop.f32.mrb[92].mxu1 }
 0x943   :  { %v9319_v7 = vadd.f32 %v9221_v16, %v12733_v43  ;;  %v6516_v32 = vpop.f32.mrb[93].mxu1 }
 0x944   :  { %v9320_v49 = vadd.f32 %v12733_v43, %v6516_v32  ;;  %v9222_v21 = vpop.f32.mrb[94].mxu1 }
 0x945   :  { %6585 = vst.msk [vmem:[#allocation2 + $0x71] sm:$0xff] %vm79_vm0, %v9319_v7  ;;  %v9321_v54 = vadd.f32 %v9222_v21, %v12733_v43  ;;  %v6519_v44 = vpop.f32.mrb[95].mxu1 }
 0x946   :  { %6583 = vst.msk [vmem:[#allocation2 + $0x51] sm:$0xff] %vm79_vm0, %v9320_v49  ;;  %v9322_v2 = vadd.f32 %v12733_v43, %v6519_v44 }
 0x947   :  { %6586 = vst.msk [vmem:[#allocation2 + $0x81] sm:$0xff] %vm79_vm0, %v9321_v54 }
 0x948   :  { %6584 = vst.msk [vmem:[#allocation2 + $0x61] sm:$0xff] %vm79_vm0, %v9322_v2 }
 0x94c   :  { %v6673_v60 = vld [vmem:[#allocation2 + $0x70] sm:$0xff] }
 0x94d   :  { %v12797_v19 = vld [vmem:[#allocation2 + $0x52] sm:$0xff] }
 0x94e   :  { %v6671_v25 = vld [vmem:[#allocation2 + $0x50] sm:$0xff]  ;;  %v12801_v36 = vpack.c.bf16 %v12797_v19, %v12762_v18  ;;  %v12823_v53 = vld [vmem:[#allocation2 + $0x80] sm:$0xff] }
 0x94f   :  { %v12803_v26 = vpack.c.bf16 %v6671_v25, %v6670_v31  ;;  %v6672_v46 = vld [vmem:[#allocation2 + $0x60] sm:$0xff]  ;;  %v6624_v55 = vld [vmem:[#allocation2 + $0x51] sm:$0xff]  ;;  %v6686_v45 = vpack.c.bf16 %v12823_v53, %v6673_v60 }
 0x950   :  { %v12805_v5 = vld [vmem:[#allocation2 + $0x62] sm:$0xff]  ;;  %6847 = vrot.lane.b32.xlu0 %v12801_v36, %s9747_s27  ;;  %v6685_v0 = vpack.c.bf16 %v6672_v46, %v6671_v25  ;;  %v12809_v40 = vpack.c.bf16 %v6673_v60, %v6672_v46  ;;  %v12814_v48 = vpack.c.bf16 %v6624_v55, %v6694_v6  ;;  %v12821_v52 = vld [vmem:[#allocation2 + $0x72] sm:$0xff] }
 0x951   :  { %v6696_v29 = vld [vmem:[#allocation2 + $0x61] sm:$0xff]  ;;  %v6733_v35 = vpack.c.bf16 %v12805_v5, %v12797_v19  ;;  %v12828_v58 = vpack.c.bf16 %v12821_v52, %v12805_v5  ;;  %v6626_v34 = vld [vmem:[#allocation2 + $0x71] sm:$0xff] }
 0x952   :  { %6871 = vrot.lane.b32.xlu1 %v6685_v0, %s9749_s25  ;;  %v6709_v8 = vpack.c.bf16 %v6696_v29, %v6624_v55  ;;  %v12833_v22 = vld [vmem:[#allocation2 + $0x81] sm:$0xff]  ;;  %v12836_v1 = vpack.c.bf16 %v6626_v34, %v6696_v29 }
 0x953   :  { %v6710_v33 = vpack.c.bf16 %v12833_v22, %v6626_v34  ;;  %v9712_v5 = vld [vmem:[%s13294_s22 + $0xa0] sm:$0xff]  }
 0x954   :  { %6823 = vrot.lane.b32.xlu0 %v12814_v48, %s9748_s3 }
 0x956   :  { %6895 = vrot.lane.b32.xlu1 %v6709_v8, %s9750_s8 }
 0x958   :  { %6849 = vrot.lane.b32.xlu0 %v12828_v58, %s9747_s27 }
 0x95a   :  { %6873 = vrot.lane.b32.xlu1 %v6686_v45, %s9749_s25 }
 0x95c   :  { %6825 = vrot.lane.b32.xlu0 %v12836_v1, %s9748_s3  ;;  %v9225_v14 = vpop.f32.mrb[96].mxu1 }
 0x95d   :  { %v9323_v13 = vadd.f32 %v9225_v14, %v12733_v43  ;;  %v6532_v50 = vpop.f32.mrb[97].mxu1 }
 0x95e   :  { %v9324_v30 = vadd.f32 %v12733_v43, %v6532_v50  ;;  %6897 = vrot.lane.b32.xlu1 %v6710_v33, %s9750_s8  ;;  %v9226_v4 = vpop.f32.mrb[98].mxu1 }
 0x95f   :  { %6589 = vst.msk [vmem:[#allocation2 + $0xd1] sm:$0xff] %vm79_vm0, %v9323_v13  ;;  %v9325_v3 = vadd.f32 %v9226_v4, %v12733_v43  ;;  %v6535_v62 = vpop.f32.mrb[99].mxu1 }
 0x960   :  { %6587 = vst.msk [vmem:[#allocation2 + $0xb1] sm:$0xff] %vm79_vm0, %v9324_v30  ;;  %v9326_v37 = vadd.f32 %v12733_v43, %v6535_v62 }
 0x961   :  { %6590 = vst.msk [vmem:[#allocation2 + $0xe1] sm:$0xff] %vm79_vm0, %v9325_v3 }
 0x962   :  { %6588 = vst.msk [vmem:[#allocation2 + $0xc1] sm:$0xff] %vm79_vm0, %v9326_v37 }
 0x966   :  { %v6677_v31 = vld [vmem:[#allocation2 + $0xd0] sm:$0xff] }
 0x967   :  { %v12850_v17 = vld [vmem:[#allocation2 + $0xb2] sm:$0xff] }
 0x968   :  { %v6663_v42 = vpack.c.bf16 %v12850_v17, %v6651_v23  ;;  %v12853_v10 = vld [vmem:[#allocation2 + $0xb0] sm:$0xff]  ;;  %v12867_v32 = vld [vmem:[#allocation2 + $0xe0] sm:$0xff] }
 0x969   :  { %v6676_v41 = vld [vmem:[#allocation2 + $0xc0] sm:$0xff]  ;;  %v6628_v11 = vld [vmem:[#allocation2 + $0xb1] sm:$0xff]  ;;  %v6688_v21 = vpack.c.bf16 %v12867_v32, %v6677_v31 }
 0x96a   :  { %v12855_v51 = vld [vmem:[#allocation2 + $0xc2] sm:$0xff]  ;;  %6851 = vrot.lane.b32.xlu0 %v6663_v42, %s9747_s27  ;;  %v6687_v15 = vpack.c.bf16 %v6676_v41, %v12853_v10  ;;  %v12859_v47 = vpack.c.bf16 %v6677_v31, %v6676_v41  ;;  %v6639_v59 = vpack.c.bf16 %v6628_v11, %v6627_v24  ;;  %v12865_v7 = vld [vmem:[#allocation2 + $0xd2] sm:$0xff] }
 0x96b   :  { %v6700_v39 = vld [vmem:[#allocation2 + $0xc1] sm:$0xff]  ;;  %v6735_v6 = vpack.c.bf16 %v12855_v51, %v12850_v17  ;;  %v12872_v49 = vpack.c.bf16 %v12865_v7, %v12855_v51  ;;  %v6630_v54 = vld [vmem:[#allocation2 + $0xd1] sm:$0xff] }
 0x96c   :  { %6875 = vrot.lane.b32.xlu1 %v6687_v15, %s9749_s25  ;;  %v6711_v16 = vpack.c.bf16 %v6700_v39, %v6628_v11  ;;  %v6702_v44 = vld [vmem:[#allocation2 + $0xe1] sm:$0xff]  ;;  %v12878_v2 = vpack.c.bf16 %v6630_v54, %v6700_v39 }
 0x96d   :  { %v6712_v25 = vpack.c.bf16 %v6702_v44, %v6630_v54  ;;  %v12891_v34 = vld [vmem:[#allocation2 + $0xe2] sm:$0xff] }
 0x96e   :  { %6827 = vrot.lane.b32.xlu0 %v6639_v59, %s9748_s3  ;;  %v9719_v15 = vld [vmem:[%s13294_s22 + $0x100] sm:$0xff]   ;;  %v6736_v51 = vpack.c.bf16 %v12891_v34, %v12865_v7 }
 0x96f   :  { %9231 = vmatprep.subr.bf16.mxu1 %v9719_v15 }
 0x970   :  { %6899 = vrot.lane.b32.xlu1 %v6711_v16, %s9750_s8  ;;  %9232 = vmatpush3.bf16.msra.mxu1 %v9719_v15 }
 0x972   :  { %6853 = vrot.lane.b32.xlu0 %v12872_v49, %s9747_s27 }
 0x974   :  { %6877 = vrot.lane.b32.xlu1 %v6688_v21, %s9749_s25  ;;  %v9720_v21 = vld [vmem:[%s13294_s22 + $0x108] sm:$0x3f]  }
 0x975   :  { %9505 = vmatprep.subr.msk.bf16.mxu1 %vm1048_vm5, %v9720_v21  ;;  %v7466_v54 = vsel %vm1048_vm5, %v9720_v21, 0  ;;  %vm13476_vm5 = vcmask 916480   ;;  %v9715_v21 = vld [vmem:[%s13294_s22 + $0xf0] sm:$0xff]  }
 0x976   :  { %6829 = vrot.lane.b32.xlu0 %v12878_v2, %s9748_s3  ;;  %9234 = vmatpush3.bf16.msra.mxu1 %v7466_v54  ;;  %vm13478_vm12 = vmmov %vm13476_vm5  ;;  %v9717_v54 = vld [vmem:[%s13294_s22 + $0xf8] sm:$0xff]  }
 0x977   :  { %vm13480_vm9 = vmmov %vm13476_vm5 }
 0x978   :  { %6901 = vrot.lane.b32.xlu1 %v6712_v25, %s9750_s8  ;;  %v6595_v25 = vld [vmem:[#allocation2] sm:$0xff]  ;;  %vm13482_vm6 = vmmov %vm13476_vm5 }
 0x979   :  { %vm13484_vm13 = vmmov %vm13476_vm5 }
 0x97a   :  { %vm13486_vm15 = vmmov %vm13476_vm5 }
 0x97b   :  { %vm13488_vm10 = vmmov %vm13476_vm5 }
 0x97c   :  { %v9229_v46 = vpop.f32.mrb[100].mxu1 }
 0x97d   :  { %v9327_v55 = vadd.f32 %v9229_v46, %v12733_v43  ;;  %v6548_v0 = vpop.f32.mrb[101].mxu1 }
 0x97e   :  { %v9328_v60 = vadd.f32 %v12733_v43, %v6548_v0  ;;  %v9230_v29 = vpop.f32.mrb[102].mxu1 }
 0x97f   :  { %6593 = vst.msk [vmem:[#allocation2 + $0x111] sm:$0xff] %vm79_vm0, %v9327_v55  ;;  %v9329_v12 = vadd.f32 %v9230_v29, %v12733_v43  ;;  %v6551_v8 = vpop.f32.mrb[103].mxu1  ;;  %v6611_v55 = vpack.c.bf16 %v12758_v56, %v6595_v25 }
 0x980   :  { %6591 = vst.msk [vmem:[#allocation2 + $0xf1] sm:$0xff] %vm79_vm0, %v9328_v60  ;;  %v9330_v45 = vadd.f32 %v12733_v43, %v6551_v8  ;;  %v9706_v8 = vld [vmem:[%s13294_s22 + $0x88] sm:$0xff]  }
 0x981   :  { %6594 = vst.msk [vmem:[#allocation2 + $0x121] sm:$0xff] %vm79_vm0, %v9329_v12 }
 0x982   :  { %6592 = vst.msk [vmem:[#allocation2 + $0x101] sm:$0xff] %vm79_vm0, %v9330_v45  ;;  %v9707_v45 = vld [vmem:[%s13294_s22 + $0xd0] sm:$0xff]  }
 0x986   :  { %v12914_v23 = vld [vmem:[#allocation2 + $0x112] sm:$0xff] }
 0x987   :  { %v12893_v14 = vld [vmem:[#allocation2 + $0xf2] sm:$0xff] }
 0x988   :  { %v12897_v33 = vpack.c.bf16 %v12893_v14, %v12891_v34  ;;  %v12899_v13 = vld [vmem:[#allocation2 + $0xf0] sm:$0xff]  ;;  %v12916_v42 = vld [vmem:[#allocation2 + $0x120] sm:$0xff] }
 0x989   :  { %v12901_v50 = vld [vmem:[#allocation2 + $0x100] sm:$0xff]  ;;  %v6632_v30 = vld [vmem:[#allocation2 + $0xf1] sm:$0xff]  ;;  %v13056_v25 = vpack.c.bf16 %v12899_v13, %v12867_v32 }
 0x98a   :  { %6855 = vrot.lane.b32.xlu0 %v12897_v33, %s9747_s27  ;;  %v6689_v43 = vpack.c.bf16 %v12901_v50, %v12899_v13  ;;  %v6704_v4 = vld [vmem:[#allocation2 + $0x101] sm:$0xff]  ;;  %v12908_v3 = vpack.c.bf16 %v6632_v30, %v6702_v44  ;;  %v12923_v41 = vld [vmem:[#allocation2 + $0x110] sm:$0xff] }
 0x98b   :  { %v12910_v62 = vld [vmem:[#allocation2 + $0x102] sm:$0xff]  ;;  %v6713_v37 = vpack.c.bf16 %v6704_v4, %v6632_v30  ;;  %v6690_v11 = vpack.c.bf16 %v12916_v42, %v12923_v41  ;;  %v6634_v31 = vld [vmem:[#allocation2 + $0x111] sm:$0xff]  ;;  %v13074_v13 = vpack.c.bf16 %v12923_v41, %v12901_v50 }
 0x98c   :  { %6879 = vrot.lane.b32.xlu1 %v6689_v43, %s9749_s25  ;;  %v12921_v24 = vpack.c.bf16 %v12914_v23, %v12910_v62  ;;  %v12932_v39 = vld [vmem:[#allocation2 + $0x121] sm:$0xff]  ;;  %v12935_v59 = vpack.c.bf16 %v6634_v31, %v6704_v4  ;;  %v6746_v4 = vld [vmem:[#allocation2 + $0x90] sm:$0xff] }
 0x98d   :  { %v6714_v16 = vpack.c.bf16 %v12932_v39, %v6634_v31  ;;  %v6758_v15 = vpack.c.bf16 %v6746_v4, %v12823_v53  ;;  %v6722_v31 = vld [vmem:[#allocation2 + $0x82] sm:$0xff]  ;;  %v6754_v50 = vld [vmem:[#allocation2 + $0x130] sm:$0xff] }
 0x98e   :  { %6831 = vrot.lane.b32.xlu0 %v12908_v3, %s9748_s3  ;;  %v6734_v53 = vpack.c.bf16 %v6722_v31, %v12821_v52  ;;  %v9716_v52 = vld [vmem:[%s13294_s22 + $0xb0] sm:$0xff]  }
 0x990   :  { %6903 = vrot.lane.b32.xlu1 %v6713_v37, %s9750_s8  ;;  %v9710_v37 = vld [vmem:[%s13294_s22 + $0x98] sm:$0xff]  }
 0x992   :  { %6857 = vrot.lane.b32.xlu0 %v12921_v24, %s9747_s27 }
 0x994   :  { %6881 = vrot.lane.b32.xlu1 %v6690_v11, %s9749_s25  ;;  %v6770_v11 = vld [vmem:[#allocation2 + $0x91] sm:$0xff] }
 0x995   :  { %v6782_v19 = vpack.c.bf16 %v6770_v11, %v12833_v22  ;;  %v9714_v22 = vld [vmem:[%s13294_s22 + $0xa8] sm:$0xff]  }
 0x996   :  { %6833 = vrot.lane.b32.xlu0 %v12935_v59, %s9748_s3 }
 0x998   :  { %6905 = vrot.lane.b32.xlu1 %v6714_v16, %s9750_s8  ;;  %v9713_v16 = vld [vmem:[%s13294_s22 + $0xe8] sm:$0xff]  }
 0x99a   :  { %6939 = vrot.lane.b32.xlu0 %v12770_v38, %s9751_s4 }
 0x99c   :  { %v6844_v44 = vpop.permute.xlu0 %6843  ;;  %6963 = vrot.lane.b32.xlu1 %v12784_v61, %s9752_s1 }
 0x99e   :  { %v6868_v46 = vpop.permute.xlu1 %6867  ;;  %6915 = vrot.lane.b32.xlu0 %v6731_v20, %s13401_s0 }
 0x99f   :  { %v7052_v29 = vsel %vm619_vm2, %v6844_v44, %v6868_v46 }
 0x9a0   :  { %v6820_v0 = vpop.permute.xlu0 %6819  ;;  %6987 = vrot.lane.b32.xlu1 %v12779_v57, %s13408_s28 }
 0x9a1   :  { %v7005_v60 = vsel %vm79_vm0, %v6611_v55, %v6820_v0  ;;  %v6778_v0 = vld [vmem:[#allocation2 + $0x131] sm:$0xff] }
 0x9a2   :  { %v12959_v12 = vpop.permute.xlu1 %6891  ;;  %6941 = vrot.lane.b32.xlu0 %v12803_v26, %s9751_s4  ;;  %v7028_v20 = vsel %vm13477_vm11, %v7005_v60, %v6844_v44  ;;  %v9718_v44 = vld [vmem:[%s13294_s22 + $0xb8] sm:$0xff]   ;;  %vm13490_vm11 = vmmov %vm13487_vm1 }
 0x9a3   :  { %v7068_v56 = vsel %vm13476_vm5, %v7052_v29, %v12959_v12 }
 0x9a4   :  { %7500 = vmatprep.mubr.bf16.mxu0 %v7068_v56  ;;  %v6846_v57 = vpop.permute.xlu0 %6845  ;;  %6965 = vrot.lane.b32.xlu1 %v12814_v48, %s9752_s1  ;;  %v6802_v56 = vld [vmem:[#allocation2 + $0x132] sm:$0xff] }
 0x9a5   :  { %7501 = vmatmul.mubr.bf16.vlgmr.msra.gmra.mrb[168].mxu0 %v7028_v20  ;;  %v6603_v20 = vld [vmem:[#allocation2 + $0xa0] sm:$0xff] }
 0x9a6   :  { %v6870_v61 = vpop.permute.xlu1 %6869  ;;  %6917 = vrot.lane.b32.xlu0 %v6732_v63, %s13401_s0  ;;  %8858 = vmatpush3.bf16.msra.mxu0 %v9704_v27  ;;  %v9708_v63 = vld [vmem:[%s13294_s22 + $0x90] sm:$0xff]  }
 0x9a7   :  { %8859 = vmatprep.subr.bf16.mxu0 %v9705_v9  ;;  %v7054_v28 = vsel %vm619_vm2, %v6846_v57, %v6870_v61  ;;  %v6615_v61 = vpack.c.bf16 %v12853_v10, %v6603_v20 }
 0x9a8   :  { %v6822_v30 = vpop.permute.xlu0 %6821  ;;  %6989 = vrot.lane.b32.xlu1 %v12801_v36, %s13408_s28 }
 0x9a9   :  { %v7008_v48 = vsel %vm79_vm0, %v12770_v38, %v6822_v30  ;;  %v9709_v38 = vld [vmem:[%s13294_s22 + $0xd8] sm:$0xff]  }
 0x9aa   :  { %v12989_v18 = vpop.permute.xlu1 %6893  ;;  %6943 = vrot.lane.b32.xlu0 %v12809_v40, %s9751_s4  ;;  %8860 = vmatpush3.bf16.msra.mxu0 %v9706_v8  ;;  %v7031_v36 = vsel %vm13479_vm8, %v7008_v48, %v6846_v57  ;;  %vm13492_vm8 = vcmask 293888  }
 0x9ab   :  { %v7071_v43 = vsel %vm13478_vm12, %v7054_v28, %v12989_v18  ;;  %8861 = vmatprep.subr.bf16.mxu0 %v9707_v45  ;;  %vm13491_vm12 = vcmask 359424  }
 0x9ac   :  { %7508 = vmatprep.mubr.bf16.mxu0 %v7071_v43  ;;  %6967 = vrot.lane.b32.xlu1 %v12836_v1, %s9752_s1  ;;  %v9711_v1 = vld [vmem:[%s13294_s22 + $0xe0] sm:$0xff]  }
 0x9ad   :  { %7509 = vmatmul.mubr.bf16.gmra.mrb[172].mxu0 %v7031_v36 }
 0x9ae   :  { %6919 = vrot.lane.b32.xlu0 %v6733_v35, %s13401_s0  ;;  %8862 = vmatpush3.bf16.msra.mxu0 %v9708_v63  ;;  %v6794_v35 = vld [vmem:[#allocation2 + $0x92] sm:$0xff] }
 0x9af   :  { %8863 = vmatprep.subr.bf16.mxu0 %v9709_v38 }
 0x9b0   :  { %6991 = vrot.lane.b32.xlu1 %v12828_v58, %s13408_s28  ;;  %v6806_v58 = vpack.c.bf16 %v6794_v35, %v6722_v31 }
 0x9b2   :  { %6945 = vrot.lane.b32.xlu0 %v6758_v15, %s9751_s4  ;;  %8864 = vmatpush3.bf16.msra.mxu0 %v9710_v37 }
 0x9b3   :  { %8865 = vmatprep.subr.bf16.mxu0 %v9711_v1 }
 0x9b4   :  { %6969 = vrot.lane.b32.xlu1 %v6782_v19, %s9752_s1 }
 0x9b6   :  { %6921 = vrot.lane.b32.xlu0 %v6734_v53, %s13401_s0  ;;  %8866 = vmatpush3.bf16.msra.mxu0 %v9712_v5 }
 0x9b7   :  { %8867 = vmatprep.subr.bf16.mxu0 %v9713_v16 }
 0x9b8   :  { %6993 = vrot.lane.b32.xlu1 %v6806_v58, %s13408_s28 }
 0x9ba   :  { %6947 = vrot.lane.b32.xlu0 %v12859_v47, %s9751_s4  ;;  %8868 = vmatpush3.bf16.msra.mxu0 %v9714_v22 }
 0x9bb   :  { %8869 = vmatprep.subr.bf16.mxu0 %v9715_v21 }
 0x9bc   :  { %6971 = vrot.lane.b32.xlu1 %v12878_v2, %s9752_s1 }
 0x9be   :  { %6923 = vrot.lane.b32.xlu0 %v6735_v6, %s13401_s0  ;;  %8870 = vmatpush3.bf16.msra.mxu0 %v9716_v52 }
 0x9bf   :  { %8871 = vmatprep.subr.bf16.mxu0 %v9717_v54 }
 0x9c0   :  { %6995 = vrot.lane.b32.xlu1 %v12872_v49, %s13408_s28 }
 0x9c2   :  { %v6848_v46 = vpop.permute.xlu0 %6847  ;;  %6949 = vrot.lane.b32.xlu0 %v13056_v25, %s9751_s4  ;;  %8872 = vmatpush3.bf16.msra.mxu0 %v9718_v44 }
 0x9c4   :  { %v6872_v17 = vpop.permute.xlu1 %6871  ;;  %6973 = vrot.lane.b32.xlu1 %v12908_v3, %s9752_s1 }
 0x9c5   :  { %v7056_v32 = vsel %vm619_vm2, %v6848_v46, %v6872_v17 }
 0x9c6   :  { %v6824_v6 = vpop.permute.xlu0 %6823  ;;  %6925 = vrot.lane.b32.xlu0 %v6736_v51, %s13401_s0 }
 0x9c7   :  { %v7011_v49 = vsel %vm79_vm0, %v12803_v26, %v6824_v6 }
 0x9c8   :  { %v13068_v2 = vpop.permute.xlu1 %6895  ;;  %6997 = vrot.lane.b32.xlu1 %v12897_v33, %s13408_s28  ;;  %v7034_v26 = vsel %vm13481_vm3, %v7011_v49, %v6848_v46  ;;  %v6737_v33 = vpack.c.bf16 %v12910_v62, %v12893_v14  ;;  %v6730_v62 = vld [vmem:[#allocation2 + $0x122] sm:$0xff]  ;;  %vm13495_vm3 = vcmask 850944  }
 0x9c9   :  { %v7074_v7 = vsel %vm13480_vm9, %v7056_v32, %v13068_v2  ;;  %v6738_v9 = vpack.c.bf16 %v6730_v62, %v12914_v23  ;;  %vm13493_vm9 = vcmask 228352  }
 0x9ca   :  { %7516 = vmatprep.mubr.bf16.mxu0 %v7074_v7  ;;  %v6850_v34 = vpop.permute.xlu0 %6849  ;;  %6951 = vrot.lane.b32.xlu0 %v13074_v13, %s9751_s4 }
 0x9cb   :  { %7517 = vmatmul.mubr.bf16.gmra.mrb[176].mxu0 %v7034_v26 }
 0x9cc   :  { %v6874_v3 = vpop.permute.xlu1 %6873  ;;  %6975 = vrot.lane.b32.xlu1 %v12935_v59, %s9752_s1  ;;  %v6762_v59 = vpack.c.bf16 %v6754_v50, %v12916_v42  ;;  %v6810_v42 = vpack.c.bf16 %v6802_v56, %v6730_v62 }
 0x9cd   :  { %v7058_v60 = vsel %vm619_vm2, %v6850_v34, %v6874_v3 }
 0x9ce   :  { %v6826_v41 = vpop.permute.xlu0 %6825  ;;  %6927 = vrot.lane.b32.xlu0 %v6737_v33, %s13401_s0 }
 0x9cf   :  { %v7014_v55 = vsel %vm79_vm0, %v12809_v40, %v6826_v41  ;;  %v6786_v40 = vpack.c.bf16 %v6778_v0, %v12932_v39 }
 0x9d0   :  { %v13089_v29 = vpop.permute.xlu1 %6897  ;;  %6999 = vrot.lane.b32.xlu1 %v12921_v24, %s13408_s28  ;;  %v7037_v27 = vsel %vm13483_vm4, %v7014_v55, %v6850_v34  ;;  %vm13497_vm4 = vmmov %vm13492_vm8 }
 0x9d1   :  { %v7077_v14 = vsel %vm13482_vm6, %v7058_v60, %v13089_v29  ;;  %vm13496_vm6 = vmmov %vm13491_vm12 }
 0x9d2   :  { %7524 = vmatprep.mubr.bf16.mxu0 %v7077_v14  ;;  %6953 = vrot.lane.b32.xlu0 %v6762_v59, %s9751_s4 }
 0x9d3   :  { %7525 = vmatmul.mubr.bf16.gmra.mrb[180].mxu0 %v7037_v27 }
 0x9d4   :  { %6977 = vrot.lane.b32.xlu1 %v6786_v40, %s9752_s1 }
 0x9d6   :  { %6929 = vrot.lane.b32.xlu0 %v6738_v9, %s13401_s0 }
 0x9d8   :  { %7001 = vrot.lane.b32.xlu1 %v6810_v42, %s13408_s28 }
 0x9dc   :  { %v6852_v24 = vpop.permute.xlu0 %6851 }
 0x9de   :  { %v6876_v57 = vpop.permute.xlu1 %6875 }
 0x9df   :  { %v7060_v39 = vsel %vm619_vm2, %v6852_v24, %v6876_v57 }
 0x9e0   :  { %v6828_v8 = vpop.permute.xlu0 %6827 }
 0x9e1   :  { %v7017_v45 = vsel %vm79_vm0, %v6615_v61, %v6828_v8 }
 0x9e2   :  { %v13106_v30 = vpop.permute.xlu1 %6899  ;;  %v7040_v28 = vsel %vm13485_vm14, %v7017_v45, %v6852_v24 }
 0x9e3   :  { %v7080_v23 = vsel %vm13484_vm13, %v7060_v39, %v13106_v30  ;;  %vm13498_vm13 = vmmov %vm13493_vm9 }
 0x9e4   :  { %7532 = vmatprep.mubr.bf16.mxu0 %v7080_v23  ;;  %v6854_v48 = vpop.permute.xlu0 %6853 }
 0x9e5   :  { %7533 = vmatmul.mubr.bf16.gmra.mrb[184].mxu0 %v7040_v28 }
 0x9e6   :  { %v6878_v63 = vpop.permute.xlu1 %6877 }
 0x9e7   :  { %v7062_v38 = vsel %vm619_vm2, %v6854_v48, %v6878_v63 }
 0x9e8   :  { %v6830_v43 = vpop.permute.xlu0 %6829 }
 0x9e9   :  { %v7020_v10 = vsel %vm79_vm0, %v12859_v47, %v6830_v43 }
 0x9ea   :  { %v13114_v36 = vpop.permute.xlu1 %6901  ;;  %v7043_v37 = vsel %vm13487_vm1, %v7020_v10, %v6854_v48  ;;  %vm13501_vm1 = vmmov %vm13496_vm6 }
 0x9eb   :  { %v7083_v4 = vsel %vm13486_vm15, %v7062_v38, %v13114_v36  ;;  %vm13500_vm15 = vmmov %vm13495_vm3 }
 0x9ec   :  { %7540 = vmatprep.mubr.bf16.mxu0 %v7083_v4 }
 0x9ed   :  { %7541 = vmatmul.mubr.bf16.gmra.mrb[188].mxu0 %v7043_v37 }
 0x9fc   :  { %v6856_v11 = vpop.permute.xlu0 %6855 }
 0x9fe   :  { %v6880_v1 = vpop.permute.xlu1 %6879 }
 0x9ff   :  { %v7064_v19 = vsel %vm619_vm2, %v6856_v11, %v6880_v1 }
 0xa00   :  { %v6832_v15 = vpop.permute.xlu0 %6831 }
 0xa01   :  { %v7023_v31 = vsel %vm79_vm0, %v13056_v25, %v6832_v15 }
 0xa02   :  { %v13122_v47 = vpop.permute.xlu1 %6903  ;;  %v7046_v16 = vsel %vm13489_vm7, %v7023_v31, %v6856_v11  ;;  %vm13503_vm7 = vmmov %vm13493_vm9 }
 0xa03   :  { %v7086_v5 = vsel %vm13488_vm10, %v7064_v19, %v13122_v47  ;;  %vm13502_vm10 = vmmov %vm13497_vm4 }
 0xa04   :  { %7548 = vmatprep.mubr.bf16.mxu0 %v7086_v5  ;;  %v6858_v35 = vpop.permute.xlu0 %6857 }
 0xa05   :  { %7549 = vmatmul.mubr.bf16.gmra.mrb[192].mxu0 %v7046_v16 }
 0xa06   :  { %v6882_v53 = vpop.permute.xlu1 %6881 }
 0xa07   :  { %v7066_v21 = vsel %vm619_vm2, %v6858_v35, %v6882_v53  ;;  %vm13494_vm2 = vcmask 785408  }
 0xa08   :  { %v6834_v58 = vpop.permute.xlu0 %6833  ;;  %vm13499_vm14 = vmmov %vm13494_vm2 }
 0xa09   :  { %v7026_v22 = vsel %vm79_vm0, %v13074_v13, %v6834_v58 }
 0xa0a   :  { %v13130_v52 = vpop.permute.xlu1 %6905  ;;  %v7049_v25 = vsel %vm13490_vm11, %v7026_v22, %v6858_v35  ;;  %vm13505_vm11 = vmmov %vm13495_vm3 }
 0xa0b   :  { %v7089_v54 = vsel %vm13476_vm5, %v7066_v21, %v13130_v52  ;;  %vm13504_vm5 = vmmov %vm13494_vm2 }
 0xa0c   :  { %7556 = vmatprep.mubr.bf16.mxu0 %v7089_v54  ;;  %v6940_v44 = vpop.permute.xlu0 %6939 }
 0xa0d   :  { %7557 = vmatmul.mubr.bf16.gmra.mrb[196].mxu0 %v7049_v25 }
 0xa0e   :  { %v6964_v46 = vpop.permute.xlu1 %6963 }
 0xa0f   :  { %v7132_v6 = vsel %vm13492_vm8, %v6940_v44, %v6964_v46  ;;  %vm13507_vm8 = vmmov %vm13497_vm4 }
 0xa10   :  { %v6916_v17 = vpop.permute.xlu0 %6915 }
 0xa11   :  { %v7092_v51 = vsel %vm13491_vm12, %v12959_v12, %v6916_v17  ;;  %vm13506_vm12 = vmmov %vm13501_vm1 }
 0xa12   :  { %v6988_v49 = vpop.permute.xlu1 %6987  ;;  %v7108_v13 = vsel %vm13495_vm3, %v7092_v51, %v6940_v44 }
 0xa13   :  { %9235 = vmatprep.mubr.msk.bf16.mxu1 %vm13493_vm9, %v6988_v49  ;;  %v7148_v32 = vsel %vm13494_vm2, %v7132_v6, %v6988_v49  ;;  %vm13508_vm9 = vmmov %vm13503_vm7 }
 0xa14   :  { %v6942_v7 = vpop.permute.xlu0 %6941  ;;  %7597 = vmatprep.mubr.bf16.mxu0 %v7148_v32 }
 0xa15   :  { %7598 = vmatmul.mubr.bf16.vlgmr.msra.gmra.mrb[200].mxu0 %v7108_v13 }
 0xa16   :  { %v6966_v34 = vpop.permute.xlu1 %6965 }
 0xa17   :  { %v7134_v33 = vsel %vm13497_vm4, %v6942_v7, %v6966_v34 }
 0xa18   :  { %v6918_v26 = vpop.permute.xlu0 %6917 }
 0xa19   :  { %v7094_v3 = vsel %vm13496_vm6, %v12989_v18, %v6918_v26  ;;  %vm13509_vm6 = vmmov %vm13501_vm1 }
 0xa1a   :  { %v6990_v12 = vpop.permute.xlu1 %6989  ;;  %v7111_v55 = vsel %vm13500_vm15, %v7094_v3, %v6942_v7  ;;  %vm13512_vm15 = vmmov %vm13495_vm3 }
 0xa1b   :  { %9236 = vmatmul.mubr.msk.bf16.vlgmr.msra.gmra.mrb[200].mxu1 %vm13498_vm13, %v6990_v12  ;;  %v7151_v50 = vsel %vm13499_vm14, %v7134_v33, %v6990_v12  ;;  %vm13510_vm13 = vmmov %vm13503_vm7 }
 0xa1c   :  { %v6944_v41 = vpop.permute.xlu0 %6943  ;;  %7605 = vmatprep.mubr.bf16.mxu0 %v7151_v50  ;;  %vm13511_vm14 = vmmov %vm13494_vm2 }
 0xa1d   :  { %7606 = vmatmul.mubr.bf16.gmra.mrb[204].mxu0 %v7111_v55 }
 0xa1e   :  { %v6968_v0 = vpop.permute.xlu1 %6967 }
 0xa1f   :  { %v7136_v14 = vsel %vm13502_vm10, %v6944_v41, %v6968_v0  ;;  %vm13513_vm10 = vmmov %vm13497_vm4 }
 0xa20   :  { %v6920_v60 = vpop.permute.xlu0 %6919 }
 0xa21   :  { %v7096_v59 = vsel %vm13501_vm1, %v13068_v2, %v6920_v60 }
 0xa22   :  { %v6992_v18 = vpop.permute.xlu1 %6991  ;;  %v7114_v40 = vsel %vm13505_vm11, %v7096_v59, %v6944_v41  ;;  %vm13515_vm11 = vmmov %vm13495_vm3 }
 0xa23   :  { %9239 = vmatprep.mubr.msk.bf16.mxu1 %vm13503_vm7, %v6992_v18  ;;  %v7154_v62 = vsel %vm13504_vm5, %v7136_v14, %v6992_v18  ;;  %vm13514_vm5 = vmmov %vm13494_vm2 }
 0xa24   :  { %v6946_v27 = vpop.permute.xlu0 %6945  ;;  %7613 = vmatprep.mubr.bf16.mxu0 %v7154_v62 }
 0xa25   :  { %7614 = vmatmul.mubr.bf16.gmra.mrb[208].mxu0 %v7114_v40 }
 0xa26   :  { %v6970_v56 = vpop.permute.xlu1 %6969 }
 0xa27   :  { %v7138_v24 = vsel %vm13507_vm8, %v6946_v27, %v6970_v56  ;;  %vm13517_vm8 = vmmov %vm13497_vm4 }
 0xa28   :  { %v6922_v9 = vpop.permute.xlu0 %6921 }
 0xa29   :  { %v7098_v42 = vsel %vm13506_vm12, %v13089_v29, %v6922_v9  ;;  %vm13516_vm12 = vmmov %vm13501_vm1 }
 0xa2a   :  { %v6994_v2 = vpop.permute.xlu1 %6993  ;;  %v7117_v61 = vsel %vm13495_vm3, %v7098_v42, %v6946_v27 }
 0xa2b   :  { %9240 = vmatmul.mubr.msk.bf16.gmra.mrb[204].mxu1 %vm13508_vm9, %v6994_v2  ;;  %v7157_v20 = vsel %vm13494_vm2, %v7138_v24, %v6994_v2  ;;  %vm13518_vm9 = vmmov %vm13503_vm7 }
 0xa2c   :  { %v6948_v57 = vpop.permute.xlu0 %6947  ;;  %7621 = vmatprep.mubr.bf16.mxu0 %v7157_v20 }
 0xa2d   :  { %7622 = vmatmul.mubr.bf16.gmra.mrb[212].mxu0 %v7117_v61 }
 0xa2e   :  { %v6972_v8 = vpop.permute.xlu1 %6971 }
 0xa2f   :  { %v7140_v23 = vsel %vm13497_vm4, %v6948_v57, %v6972_v8 }
 0xa30   :  { %v6924_v45 = vpop.permute.xlu0 %6923 }
 0xa31   :  { %v7100_v39 = vsel %vm13509_vm6, %v13106_v30, %v6924_v45  ;;  %vm13519_vm6 = vmmov %vm13501_vm1 }
 0xa32   :  { %v6996_v29 = vpop.permute.xlu1 %6995  ;;  %v7120_v63 = vsel %vm13512_vm15, %v7100_v39, %v6948_v57  ;;  %vm13522_vm15 = vmmov %vm13495_vm3 }
 0xa33   :  { %9243 = vmatprep.mubr.msk.bf16.mxu1 %vm13510_vm13, %v6996_v29  ;;  %v7160_v48 = vsel %vm13511_vm14, %v7140_v23, %v6996_v29  ;;  %vm13520_vm13 = vmmov %vm13503_vm7 }
 0xa34   :  { %v6950_v28 = vpop.permute.xlu0 %6949  ;;  %7629 = vmatprep.mubr.bf16.mxu0 %v7160_v48  ;;  %vm13521_vm14 = vmmov %vm13494_vm2 }
 0xa35   :  { %7630 = vmatmul.mubr.bf16.gmra.mrb[216].mxu0 %v7120_v63 }
 0xa36   :  { %v6974_v43 = vpop.permute.xlu1 %6973 }
 0xa37   :  { %v7142_v4 = vsel %vm13513_vm10, %v6950_v28, %v6974_v43 }
 0xa38   :  { %v6926_v10 = vpop.permute.xlu0 %6925 }
 0xa39   :  { %v7102_v38 = vsel %vm13501_vm1, %v13114_v36, %v6926_v10 }
 0xa3a   :  { %v6998_v30 = vpop.permute.xlu1 %6997  ;;  %v7123_v1 = vsel %vm13515_vm11, %v7102_v38, %v6950_v28 }
 0xa3b   :  { %9244 = vmatmul.mubr.msk.bf16.gmra.mrb[208].mxu1 %vm13503_vm7, %v6998_v30  ;;  %v7163_v37 = vsel %vm13514_vm5, %v7142_v4, %v6998_v30 }
 0xa3c   :  { %v6952_v11 = vpop.permute.xlu0 %6951  ;;  %7637 = vmatprep.mubr.bf16.mxu0 %v7163_v37 }
 0xa3d   :  { %7638 = vmatmul.mubr.bf16.gmra.mrb[220].mxu0 %v7123_v1 }
 0xa3e   :  { %v6976_v15 = vpop.permute.xlu1 %6975 }
 0xa3f   :  { %v7144_v5 = vsel %vm13517_vm8, %v6952_v11, %v6976_v15 }
 0xa40   :  { %v6928_v31 = vpop.permute.xlu0 %6927 }
 0xa41   :  { %v7104_v19 = vsel %vm13516_vm12, %v13122_v47, %v6928_v31 }
 0xa42   :  { %v7000_v36 = vpop.permute.xlu1 %6999  ;;  %v7126_v53 = vsel %vm13495_vm3, %v7104_v19, %v6952_v11 }
 0xa43   :  { %9247 = vmatprep.mubr.msk.bf16.mxu1 %vm13518_vm9, %v7000_v36  ;;  %v7166_v35 = vsel %vm13494_vm2, %v7144_v5, %v7000_v36 }
 0xa44   :  { %v6954_v16 = vpop.permute.xlu0 %6953  ;;  %7645 = vmatprep.mubr.bf16.mxu0 %v7166_v35 }
 0xa45   :  { %7646 = vmatmul.mubr.bf16.gmra.mrb[224].mxu0 %v7126_v53 }
 0xa46   :  { %v6978_v58 = vpop.permute.xlu1 %6977 }
 0xa47   :  { %v7146_v54 = vsel %vm13497_vm4, %v6954_v16, %v6978_v58  ;;  %v13212_v58 = vld [vmem:[%s13295_s23] ss:$0 sm:$0xff]  ;;  %s9763_s23 = smov [#allocation3]  }
 0xa48   :  { %v6930_v22 = vpop.permute.xlu0 %6929  ;;  %s7796_s1 = sshll.u32 %s9763_s23, 4  ;;  %s7797_s1 = int_to_ptr.vmem [resolvable:$true] %s7796_s1 }
 0xa49   :  { %v7106_v21 = vsel %vm13519_vm6, %v13130_v52, %v6930_v22  ;;  %s9722_s0 = scalar_lea.vmem %s7797_s1, 2048  ;;  %p9727_p1 = scmp.lt.s32.totalorder %s7797_s1, %s7797_s1 }
 0xa4a   :  { %v7002_v47 = vpop.permute.xlu1 %7001  ;;  %v7129_v25 = vsel %vm13522_vm15, %v7106_v21, %v6954_v16  ;;  %p9723_p0 = scmp.ne.s32.totalorder %s7797_s1, %s9722_s0  ;;  %p9728_p2 = scmp.lt.s32.totalorder %s9722_s0, %s9722_s0 }
 0xa4b   :  { %9248 = vmatmul.mubr.msk.bf16.gmra.mrb[212].mxu1 %vm13520_vm13, %v7002_v47  ;;  %v7169_v44 = vsel %vm13521_vm14, %v7146_v54, %v7002_v47 }
 0xa4c   :  { %7653 = vmatprep.mubr.bf16.mxu0 %v7169_v44  ;;  %p9729_p3 = por %p9728_p2, %p9727_p1 }
 0xa4d   :  { %7654 = vmatmul.mubr.bf16.gmra.mrb[228].mxu0 %v7129_v25 }
 0xa4e   :  { %p9730_p4 = pnand %p9729_p3, %p9723_p0 }
 0xa78   :  { %v8809_v46 = vpop.f32.mrb[168].mxu0 }
 0xa79   :  { %v8810_v17 = vpop.f32.mrb[169].mxu0 }
 0xa7a   :  { %v8811_v51 = vadd.f32 %v8810_v17, %v8809_v46  ;;  %v8812_v6 = vpop.f32.mrb[170].mxu0 }
 0xa7b   :  { %v8813_v49 = vpop.f32.mrb[171].mxu0 }
 0xa7c   :  { %v8814_v32 = vadd.f32 %v8813_v49, %v8812_v6 }
 0xa80   :  { %v8815_v13 = vpop.f32.mrb[172].mxu0 }
 0xa81   :  { %v8816_v7 = vpop.f32.mrb[173].mxu0 }
 0xa82   :  { %v8817_v52 = vadd.f32 %v8816_v7, %v8815_v13  ;;  %v8818_v34 = vpop.f32.mrb[174].mxu0 }
 0xa83   :  { %v8819_v26 = vpop.f32.mrb[175].mxu0 }
 0xa84   :  { %v13183_v3 = vadd.f32 %v8819_v26, %v8818_v34 }
 0xa9e   :  { %v8821_v33 = vpop.f32.mrb[176].mxu0 }
 0xa9f   :  { %v8822_v12 = vpop.f32.mrb[177].mxu0 }
 0xaa0   :  { %v13185_v50 = vadd.f32 %v8822_v12, %v8821_v33  ;;  %v8824_v41 = vpop.f32.mrb[178].mxu0 }
 0xaa1   :  { %v8825_v55 = vpop.f32.mrb[179].mxu0 }
 0xaa2   :  { %v13187_v0 = vadd.f32 %v8825_v55, %v8824_v41 }
 0xaa6   :  { %v8827_v60 = vpop.f32.mrb[180].mxu0 }
 0xaa7   :  { %v8828_v59 = vpop.f32.mrb[181].mxu0 }
 0xaa8   :  { %v13189_v14 = vadd.f32 %v8828_v59, %v8827_v60  ;;  %v8830_v18 = vpop.f32.mrb[182].mxu0 }
 0xaa9   :  { %v8831_v62 = vpop.f32.mrb[183].mxu0 }
 0xaaa   :  { %v13191_v27 = vadd.f32 %v8831_v62, %v8830_v18 }
 0xab8   :  { %v8833_v40 = vpop.f32.mrb[184].mxu0 }
 0xab9   :  { %v8834_v56 = vpop.f32.mrb[185].mxu0 }
 0xaba   :  { %v13193_v9 = vadd.f32 %v8834_v56, %v8833_v40  ;;  %v8836_v42 = vpop.f32.mrb[186].mxu0 }
 0xabb   :  { %v8837_v24 = vpop.f32.mrb[187].mxu0 }
 0xabc   :  { %v13195_v2 = vadd.f32 %v8837_v24, %v8836_v42 }
 0xac0   :  { %v8839_v20 = vpop.f32.mrb[188].mxu0 }
 0xac1   :  { %v8840_v57 = vpop.f32.mrb[189].mxu0 }
 0xac2   :  { %v13197_v61 = vadd.f32 %v8840_v57, %v8839_v20  ;;  %v8842_v8 = vpop.f32.mrb[190].mxu0 }
 0xac3   :  { %v8843_v45 = vpop.f32.mrb[191].mxu0 }
 0xac4   :  { %v13199_v39 = vadd.f32 %v8843_v45, %v8842_v8 }
 0xad8   :  { %v8845_v23 = vpop.f32.mrb[192].mxu0 }
 0xad9   :  { %v8846_v29 = vpop.f32.mrb[193].mxu0 }
 0xada   :  { %v13201_v48 = vadd.f32 %v8846_v29, %v8845_v23  ;;  %v8848_v28 = vpop.f32.mrb[194].mxu0 }
 0xadb   :  { %v8849_v63 = vpop.f32.mrb[195].mxu0 }
 0xadc   :  { %v13203_v43 = vadd.f32 %v8849_v63, %v8848_v28 }
 0xae0   :  { %v8851_v10 = vpop.f32.mrb[196].mxu0 }
 0xae1   :  { %v8852_v38 = vpop.f32.mrb[197].mxu0 }
 0xae2   :  { %v13205_v4 = vadd.f32 %v8852_v38, %v8851_v10  ;;  %v8854_v30 = vpop.f32.mrb[198].mxu0 }
 0xae3   :  { %v8855_v37 = vpop.f32.mrb[199].mxu0 }
 0xae4   :  { %v13207_v11 = vadd.f32 %v8855_v37, %v8854_v30 }
 0xae8   :  { %v8873_v1 = vpop.f32.mrb[200].mxu0 }
 0xae9   :  { %v8874_v15 = vpop.f32.mrb[201].mxu0 }
 0xaea   :  { %v8875_v31 = vadd.f32 %v8874_v15, %v8873_v1  ;;  %v8876_v19 = vpop.f32.mrb[202].mxu0 }
 0xaeb   :  { %v8877_v5 = vpop.f32.mrb[203].mxu0 }
 0xaec   :  { %v8878_v36 = vadd.f32 %v8877_v5, %v8876_v19  ;;  %v7600_v35 = vadd.f32 %v8875_v31, %v8811_v51 }
 0xaee   :  { %v9237_v16 = vpop.f32.mrb[200].mxu1  ;;  %v7603_v53 = vadd.f32 %v8878_v36, %v8814_v32 }
 0xaef   :  { %v7696_v22 = vpop.f32.mrb[201].mxu1 }
 0xaf0   :  { %v7697_v21 = vadd.f32 %v7696_v22, %v7600_v35  ;;  %v8879_v54 = vpop.f32.mrb[204].mxu0  ;;  %v9238_v47 = vpop.f32.mrb[202].mxu1 }
 0xaf1   :  { %v8880_v44 = vpop.f32.mrb[205].mxu0  ;;  %v7699_v25 = vpop.f32.mrb[203].mxu1 }
 0xaf2   :  { %v7759_v46 = vadd.f32 %v13212_v58, %v7697_v21  ;;  %v8881_v17 = vadd.f32 %v8880_v44, %v8879_v54  ;;  %v7700_v6 = vadd.f32 %v7699_v25, %v7603_v53  ;;  %v8882_v49 = vpop.f32.mrb[206].mxu0 }
 0xaf3   :  { %v8883_v13 = vpop.f32.mrb[207].mxu0 }
 0xaf4   :  { %7775 = vst.msk [vmem:[#allocation3] sm:$0xff] %vm79_vm0, %v7759_v46  ;;  %v7608_v51 = vadd.f32 %v8881_v17, %v8817_v52  ;;  %v7760_v32 = vadd.f32 %v13212_v58, %v7700_v6  ;;  %v8884_v7 = vadd.f32 %v8883_v13, %v8882_v49 }
 0xaf6   :  { %v7705_v34 = vadd.f32 %v9237_v16, %v7608_v51  ;;  %7776 = vst.msk [vmem:[#allocation3 + $0x8] sm:$0xff] %vm79_vm0, %v7760_v32  ;;  %v7611_v26 = vadd.f32 %v8884_v7, %v13183_v3 }
 0xaf8   :  { %v7761_v33 = vadd.f32 %v13212_v58, %v7705_v34  ;;  %v7708_v12 = vadd.f32 %v9238_v47, %v7611_v26  ;;  %v8885_v41 = vpop.f32.mrb[208].mxu0 }
 0xaf9   :  { %v8886_v55 = vpop.f32.mrb[209].mxu0 }
 0xafa   :  { %7777 = vst.msk [vmem:[#allocation3 + $0x10] sm:$0xff] %vm79_vm0, %v7761_v33  ;;  %v7762_v60 = vadd.f32 %v13212_v58, %v7708_v12  ;;  %v8887_v59 = vadd.f32 %v8886_v55, %v8885_v41  ;;  %v8888_v18 = vpop.f32.mrb[210].mxu0 }
 0xafb   :  { %v8889_v52 = vpop.f32.mrb[211].mxu0 }
 0xafc   :  { %7778 = vst.msk [vmem:[#allocation3 + $0x18] sm:$0xff] %vm79_vm0, %v7762_v60  ;;  %v8890_v62 = vadd.f32 %v8889_v52, %v8888_v18  ;;  %v7616_v40 = vadd.f32 %v8887_v59, %v13185_v50 }
 0xafe   :  { %v9241_v56 = vpop.f32.mrb[204].mxu1  ;;  %v7619_v3 = vadd.f32 %v8890_v62, %v13187_v0 }
 0xaff   :  { %v7712_v42 = vpop.f32.mrb[205].mxu1 }
 0xb00   :  { %v7713_v24 = vadd.f32 %v7712_v42, %v7616_v40  ;;  %v8891_v20 = vpop.f32.mrb[212].mxu0  ;;  %v9242_v57 = vpop.f32.mrb[206].mxu1 }
 0xb01   :  { %v8892_v8 = vpop.f32.mrb[213].mxu0  ;;  %v7715_v45 = vpop.f32.mrb[207].mxu1 }
 0xb02   :  { %v7763_v23 = vadd.f32 %v13212_v58, %v7713_v24  ;;  %v8893_v29 = vadd.f32 %v8892_v8, %v8891_v20  ;;  %v7716_v28 = vadd.f32 %v7715_v45, %v7619_v3  ;;  %v8894_v63 = vpop.f32.mrb[214].mxu0 }
 0xb03   :  { %v8895_v10 = vpop.f32.mrb[215].mxu0 }
 0xb04   :  { %7779 = vst.msk [vmem:[#allocation3 + $0x20] sm:$0xff] %vm79_vm0, %v7763_v23  ;;  %v7624_v38 = vadd.f32 %v8893_v29, %v13189_v14  ;;  %v7764_v50 = vadd.f32 %v13212_v58, %v7716_v28  ;;  %v8896_v30 = vadd.f32 %v8895_v10, %v8894_v63 }
 0xb06   :  { %v7721_v0 = vadd.f32 %v9241_v56, %v7624_v38  ;;  %7780 = vst.msk [vmem:[#allocation3 + $0x28] sm:$0xff] %vm79_vm0, %v7764_v50  ;;  %v7627_v37 = vadd.f32 %v8896_v30, %v13191_v27 }
 0xb08   :  { %v7765_v1 = vadd.f32 %v13212_v58, %v7721_v0  ;;  %v7724_v15 = vadd.f32 %v9242_v57, %v7627_v37  ;;  %v8897_v31 = vpop.f32.mrb[216].mxu0 }
 0xb09   :  { %v8898_v19 = vpop.f32.mrb[217].mxu0 }
 0xb0a   :  { %7781 = vst.msk [vmem:[#allocation3 + $0x30] sm:$0xff] %vm79_vm0, %v7765_v1  ;;  %v7766_v5 = vadd.f32 %v13212_v58, %v7724_v15  ;;  %v8899_v36 = vadd.f32 %v8898_v19, %v8897_v31  ;;  %v8900_v35 = vpop.f32.mrb[218].mxu0 }
 0xb0b   :  { %v8901_v14 = vpop.f32.mrb[219].mxu0 }
 0xb0c   :  { %7782 = vst.msk [vmem:[#allocation3 + $0x38] sm:$0xff] %vm79_vm0, %v7766_v5  ;;  %v8902_v16 = vadd.f32 %v8901_v14, %v8900_v35  ;;  %v7632_v53 = vadd.f32 %v8899_v36, %v13193_v9 }
 0xb0e   :  { %v9245_v22 = vpop.f32.mrb[208].mxu1  ;;  %v7635_v27 = vadd.f32 %v8902_v16, %v13195_v2 }
 0xb0f   :  { %v7728_v21 = vpop.f32.mrb[209].mxu1 }
 0xb10   :  { %v7729_v54 = vadd.f32 %v7728_v21, %v7632_v53  ;;  %v8903_v47 = vpop.f32.mrb[220].mxu0  ;;  %v9246_v44 = vpop.f32.mrb[210].mxu1 }
 0xb11   :  { %v8904_v25 = vpop.f32.mrb[221].mxu0  ;;  %v7731_v46 = vpop.f32.mrb[211].mxu1 }
 0xb12   :  { %v7767_v17 = vadd.f32 %v13212_v58, %v7729_v54  ;;  %v8905_v6 = vadd.f32 %v8904_v25, %v8903_v47  ;;  %v7732_v49 = vadd.f32 %v7731_v46, %v7635_v27  ;;  %v8906_v13 = vpop.f32.mrb[222].mxu0 }
 0xb13   :  { %v8907_v51 = vpop.f32.mrb[223].mxu0 }
 0xb14   :  { %7783 = vst.msk [vmem:[#allocation3 + $0x40] sm:$0xff] %vm79_vm0, %v7767_v17  ;;  %v7640_v32 = vadd.f32 %v8905_v6, %v13197_v61  ;;  %v7768_v9 = vadd.f32 %v13212_v58, %v7732_v49  ;;  %v8908_v7 = vadd.f32 %v8907_v51, %v8906_v13 }
 0xb16   :  { %v7737_v2 = vadd.f32 %v9245_v22, %v7640_v32  ;;  %7784 = vst.msk [vmem:[#allocation3 + $0x48] sm:$0xff] %vm79_vm0, %v7768_v9  ;;  %v7643_v34 = vadd.f32 %v8908_v7, %v13199_v39 }
 0xb18   :  { %v7769_v26 = vadd.f32 %v13212_v58, %v7737_v2  ;;  %v7740_v33 = vadd.f32 %v9246_v44, %v7643_v34  ;;  %v8909_v12 = vpop.f32.mrb[224].mxu0 }
 0xb19   :  { %v8910_v41 = vpop.f32.mrb[225].mxu0 }
 0xb1a   :  { %7785 = vst.msk [vmem:[#allocation3 + $0x50] sm:$0xff] %vm79_vm0, %v7769_v26  ;;  %v7770_v55 = vadd.f32 %v13212_v58, %v7740_v33  ;;  %v8911_v60 = vadd.f32 %v8910_v41, %v8909_v12  ;;  %v8912_v59 = vpop.f32.mrb[226].mxu0 }
 0xb1b   :  { %v8913_v61 = vpop.f32.mrb[227].mxu0 }
 0xb1c   :  { %7786 = vst.msk [vmem:[#allocation3 + $0x58] sm:$0xff] %vm79_vm0, %v7770_v55  ;;  %v8914_v18 = vadd.f32 %v8913_v61, %v8912_v59  ;;  %v7648_v52 = vadd.f32 %v8911_v60, %v13201_v48 }
 0xb1e   :  { %v9249_v62 = vpop.f32.mrb[212].mxu1  ;;  %v7651_v39 = vadd.f32 %v8914_v18, %v13203_v43 }
 0xb1f   :  { %v7744_v40 = vpop.f32.mrb[213].mxu1 }
 0xb20   :  { %v7745_v56 = vadd.f32 %v7744_v40, %v7648_v52  ;;  %v8915_v3 = vpop.f32.mrb[228].mxu0  ;;  %v9250_v42 = vpop.f32.mrb[214].mxu1 }
 0xb21   :  { %v8916_v24 = vpop.f32.mrb[229].mxu0  ;;  %v7747_v20 = vpop.f32.mrb[215].mxu1 }
 0xb22   :  { %v7771_v57 = vadd.f32 %v13212_v58, %v7745_v56  ;;  %v8917_v8 = vadd.f32 %v8916_v24, %v8915_v3  ;;  %v7748_v45 = vadd.f32 %v7747_v20, %v7651_v39  ;;  %v8918_v23 = vpop.f32.mrb[230].mxu0 }
 0xb23   :  { %v8919_v29 = vpop.f32.mrb[231].mxu0 }
 0xb24   :  { %7787 = vst.msk [vmem:[#allocation3 + $0x60] sm:$0xff] %vm79_vm0, %v7771_v57  ;;  %v7656_v28 = vadd.f32 %v8917_v8, %v13205_v4  ;;  %v7772_v48 = vadd.f32 %v13212_v58, %v7748_v45  ;;  %v8920_v63 = vadd.f32 %v8919_v29, %v8918_v23 }
 0xb26   :  { %v7753_v43 = vadd.f32 %v9249_v62, %v7656_v28  ;;  %7788 = vst.msk [vmem:[#allocation3 + $0x68] sm:$0xff] %vm79_vm0, %v7772_v48  ;;  %v7659_v10 = vadd.f32 %v8920_v63, %v13207_v11 }
 0xb28   :  { %v7773_v38 = vadd.f32 %v13212_v58, %v7753_v43  ;;  %v7756_v50 = vadd.f32 %v9250_v42, %v7659_v10 }
 0xb2a   :  { %7789 = vst.msk [vmem:[#allocation3 + $0x70] sm:$0xff] %vm79_vm0, %v7773_v38  ;;  %v7774_v30 = vadd.f32 %v13212_v58, %v7756_v50 }
 0xb2c   :  { %7790 = vst.msk [vmem:[#allocation3 + $0x78] sm:$0xff] %vm79_vm0, %v7774_v30 }
 0xb2d   :  { %9733 = shalt.err (!%p9730_p4)
}
 0xb2e   :  { %s9734_s2 = scalar_lea.hbm %s13296_s24, 2048 }
 0xb2f   :  { %p9735_p5 = scmp.ne.s32.totalorder %s13296_s24, %s9734_s2  ;;  %p9738_p6 = scmp.lt.u32.totalorder %s9734_s2, %s13296_s24 }
 0xb31   :  { %p9740_p7 = pnand %p9738_p6, %p9735_p5 }
 0xb33   :  { %9743 = shalt.err (!%p9740_p7)
}
 0xb34   :  { %s9764_s21 = smov 128  }
 0xb35   :  { %7802 = dma.vmem_to_hbm [thread:$0]  %s7797_s1, 2048, %s13296_s24, [#allocation4], %s9764_s21, %s9764_s21, %s9755_s30  }
 0xb36   :  { %9744 = dma.done.wait [#allocation4], 2048  }
 0xb37   :  { %9745 = vsyncadd [#allocation4], 4294965248 }
 0xb38   :  { %7806 = vsyncpa [#allocation4], 1 }

</bundles_post_ra>
